<compile_context>
chip_gen: v7x
topology: tpu7x:2x2x1
jax: 0.10.0
libtpu: 0.0.40
codegen_flags: <defaults>
</compile_context>

<pallas_src>
import functools

import numpy as np

import jax
import jax.numpy as jnp
from jax import lax
from jax.experimental import pallas as pl
from jax.experimental.pallas import tpu as pltpu

_LN_EPS = 1e-5  # PyTorch nn.LayerNorm / nn.Transformer default


# ----------------------------- in-kernel helpers -----------------------------

def _layer_norm(x, w, b):
    # Independent reductions (sum(x), sum(x*x)) pipeline through the XLU.
    mu = jnp.mean(x, axis=-1, keepdims=True)
    ms = jnp.mean(x * x, axis=-1, keepdims=True)
    var = jnp.maximum(ms - mu * mu, 0.0)
    return (x - mu) * lax.rsqrt(var + _LN_EPS) * w + b


def _matw(x, w):
    """x (f32 activations) @ w (bf16 weight, (in,out)); bf16 MXU inputs, f32 accumulate."""
    return jnp.dot(x.astype(w.dtype), w, preferred_element_type=jnp.float32)


def _matw_nt(x, wt):
    """x (L,K) f32 @ wt.T where wt is (N,K) bf16 (lane-friendly 'NT' contraction)."""
    return lax.dot_general(x.astype(wt.dtype), wt, (((1,), (1,)), ((), ())),
                           preferred_element_type=jnp.float32)


def _attn(q, k, v, wo, bo, mask, nhead):
    """Stacked-head attention. q already carries the folded 1/sqrt(head_dim) scale.

    mask is (nhead*Lq, D): row block h keeps only head-h columns, so one score matmul,
    one softmax pass and one p@v contraction cover all heads; the head reduction is a
    cheap sublane slice-and-add (no emat/rmat matmuls).
    """
    lq = q.shape[0]
    if lq == 1:
        q_st = q * mask                                   # broadcast to (nhead, D)
    else:
        q_st = jnp.concatenate([q] * nhead, axis=0) * mask  # (nhead*Lq, D)
    s = lax.dot_general(q_st, k, (((1,), (1,)), ((), ())),
                        preferred_element_type=jnp.float32)  # (nhead*Lq, Lk)
    s = s - jnp.max(s, axis=-1, keepdims=True)
    p = jnp.exp(s)
    p = p * pl.reciprocal(jnp.sum(p, axis=-1, keepdims=True), approx=True)
    ctx = jnp.dot(p, v, preferred_element_type=jnp.float32) * mask  # (nhead*Lq, D)
    if lq == 1:
        attn = jnp.sum(ctx, axis=0, keepdims=True)        # (1, D)
    else:
        attn = ctx[0:lq]
        for h in range(1, nhead):                         # static, aligned sublane slices
            attn = attn + ctx[h * lq:(h + 1) * lq]
    return _matw(attn, wo) + bo


def _ffn(x, w1, b1, w2t, b2):
    h = jnp.maximum(_matw(x, w1) + b1, 0.0)               # (Lq, F), ReLU in f32
    return _matw_nt(h, w2t) + b2                          # (Lq, D)


# ------------------------------- fused kernel --------------------------------

def _spoter_kernel(h_ref, poscq_ref, mask_e_ref, mask_d_ref,
                   enc_wqkv_ref, enc_wo_ref, enc_bqkv_ref, enc_sm_ref,
                   dec_wq_ref, dec_wkv_ref, dec_wo_ref, dec_bkv_ref, dec_sm_ref,
                   ffn_b1_ref, fin_ref, wc_ref, bc_ref,
                   ffn_w1_hbm, ffn_w2t_hbm,
                   out_ref,
                   w1_buf, w2t_buf, dma_sem, *, nhead):
    n_enc = enc_wqkv_ref.shape[0]
    n_dec = dec_wq_ref.shape[0]
    n_ffn = n_enc + n_dec
    T, D = h_ref.shape

    # --- manual double-buffered prefetch of the big FFN weights (HBM -> VMEM) ---
    def _ffn_copy(idx, which):
        slot = idx & 1
        hbm = ffn_w1_hbm if which == 0 else ffn_w2t_hbm
        buf = w1_buf if which == 0 else w2t_buf
        return pltpu.make_async_copy(hbm.at[idx], buf.at[slot], dma_sem.at[which, slot])

    def ffn_start(idx):
        _ffn_copy(idx, 0).start()
        _ffn_copy(idx, 1).start()

    def ffn_wait(idx):
        _ffn_copy(idx, 0).wait()
        _ffn_copy(idx, 1).wait()

    ffn_start(0)                              # overlaps encoder layer-0 attention

    mask_e = mask_e_ref[...]                  # (nhead*T, D) precomputed host constant
    mask_d = mask_d_ref[...]                  # (nhead,   D)
    pq = poscq_ref[...]                       # (2, D): row0 = pos, row1 = class_query
    x = h_ref[...] + pq[0:1]                  # src = pos + flatten(inputs)

    # ---------------- encoder: 3x post-norm TransformerEncoderLayer ----------------
    for l in range(n_enc):                    # static unroll; layers are sequential
        sm = enc_sm_ref[l]                    # (6, D): bo, n1w, n1b, n2w, n2b, b2
        qkv = _matw(x, enc_wqkv_ref[l]) + enc_bqkv_ref[l]          # fused QKV (T, 3D)
        q = qkv[:, :D]
        k = qkv[:, D:2 * D]
        v = qkv[:, 2 * D:]
        a = _attn(q, k, v, enc_wo_ref[l], sm[0:1], mask_e, nhead)
        x = _layer_norm(x + a, sm[1:2], sm[2:3])

        fi = l
        if fi + 1 < n_ffn:
            ffn_start(fi + 1)                 # prefetch next layer's FFN weights
        ffn_wait(fi)
        slot = fi & 1
        f = _ffn(x, w1_buf[slot], ffn_b1_ref[fi], w2t_buf[slot], sm[5:6])
        x = _layer_norm(x + f, sm[3:4], sm[4:5])

    fin = fin_ref[...]                        # (4, D): enc_norm w/b, dec_norm w/b
    memory = _layer_norm(x, fin[0:1], fin[1:2])

    # ---------------- decoder: 3x SPOTERTransformerDecoderLayer --------------------
    t = pq[1:2]                               # class query, (1, D)
    for l in range(n_dec):
        sm = dec_sm_ref[l]                    # (9, D): bq, bo, n1, n2, n3, b2
        # TODO(synk): dropout layers (p=0.1) are eval-mode identities, so the SPOTER
        # quirk `tgt = tgt + dropout1(tgt)` reduces to `t + t` (no stochastic masking).
        t = _layer_norm(t + t, sm[2:3], sm[3:4])
        q = _matw(t, dec_wq_ref[l]) + sm[0:1]
        kv = _matw(memory, dec_wkv_ref[l]) + dec_bkv_ref[l]        # fused K/V (T, 2D)
        k = kv[:, :D]
        v = kv[:, D:]
        a = _attn(q, k, v, dec_wo_ref[l], sm[1:2], mask_d, nhead)
        t = _layer_norm(t + a, sm[4:5], sm[5:6])

        fi = n_enc + l
        if fi + 1 < n_ffn:
            ffn_start(fi + 1)
        ffn_wait(fi)
        slot = fi & 1
        f = _ffn(t, w1_buf[slot], ffn_b1_ref[fi], w2t_buf[slot], sm[8:9])
        t = _layer_norm(t + f, sm[6:7], sm[7:8])

    t = _layer_norm(t, fin[2:3], fin[3:4])

    # classification head
    out_ref[...] = (jnp.dot(t, wc_ref[...], preferred_element_type=jnp.float32)
                    + bc_ref[...])


# ------------------------------ parameter setup -------------------------------

def init_spoter_params(key, *, num_classes, hidden_dim, nhead,
                       num_enc_layers=3, num_dec_layers=3, dim_feedforward=2048):
    D, F, C = hidden_dim, dim_feedforward, num_classes
    hd = D // nhead
    scale = 1.0 / (hd ** 0.5)                 # folded into wq / bq
    kit = iter(jax.random.split(key, 512))

    def unif(shape, lo=-0.1, hi=0.1):
        return jax.random.uniform(next(kit), shape, jnp.float32, lo, hi)

    def normal(shape, s=0.02):
        return jax.random.normal(next(kit), shape, jnp.float32) * s

    def attn_weights():
        in_w = normal((3 * D, D))             # torch in_proj_weight (3D, D)
        in_b = unif((3 * D,))
        wq = in_w[:D].T * scale
        wk = in_w[D:2 * D].T
        wv = in_w[2 * D:].T
        bq, bk, bv = in_b[:D] * scale, in_b[D:2 * D], in_b[2 * D:]
        wo = normal((D, D)).T                 # out_proj, pre-transposed (in,out)
        bo = unif((D,))
        return wq, wk, wv, bq, bk, bv, wo, bo

    def ffn_weights():
        w1 = normal((F, D)).T                 # linear1 (D, F), lane dim = F
        b1 = unif((1, F))
        w2t = normal((D, F))                  # linear2 stored in torch layout (D, F)
        b2 = unif((D,))
        return w1, b1, w2t, b2

    def ln():
        return jnp.ones((D,), jnp.float32), jnp.zeros((D,), jnp.float32)

    enc_wqkv, enc_wo, enc_bqkv, enc_sm = [], [], [], []
    dec_wq, dec_wkv, dec_wo, dec_bkv, dec_sm = [], [], [], [], []
    ffn_w1, ffn_w2t, ffn_b1 = [], [], []

    for _ in range(num_enc_layers):
        wq, wk, wv, bq, bk, bv, wo, bo = attn_weights()
        w1, b1, w2t, b2 = ffn_weights()
        n1w, n1b = ln()
        n2w, n2b = ln()
        enc_wqkv.append(jnp.concatenate([wq, wk, wv], axis=1).astype(jnp.bfloat16))
        enc_bqkv.append(jnp.concatenate([bq, bk, bv])[None, :])
        enc_wo.append(wo.astype(jnp.bfloat16))
        enc_sm.append(jnp.stack([bo, n1w, n1b, n2w, n2b, b2]))
        ffn_w1.append(w1.astype(jnp.bfloat16))
        ffn_w2t.append(w2t.astype(jnp.bfloat16))
        ffn_b1.append(b1)

    for _ in range(num_dec_layers):
        wq, wk, wv, bq, bk, bv, wo, bo = attn_weights()
        w1, b1, w2t, b2 = ffn_weights()
        n1w, n1b = ln()
        n2w, n2b = ln()
        n3w, n3b = ln()
        dec_wq.append(wq.astype(jnp.bfloat16))
        dec_wkv.append(jnp.concatenate([wk, wv], axis=1).astype(jnp.bfloat16))
        dec_bkv.append(jnp.concatenate([bk, bv])[None, :])
        dec_wo.append(wo.astype(jnp.bfloat16))
        dec_sm.append(jnp.stack([bq, bo, n1w, n1b, n2w, n2b, n3w, n3b, b2]))
        ffn_w1.append(w1.astype(jnp.bfloat16))
        ffn_w2t.append(w2t.astype(jnp.bfloat16))
        ffn_b1.append(b1)

    row_embed = jax.random.uniform(next(kit), (100, D), jnp.float32)   # torch.rand(100, D)
    class_query = jax.random.uniform(next(kit), (1, D), jnp.float32)   # torch.rand(1, D)
    # pos parameter collapses to row_embed[0] with a size-1 batch dim (squeezed here).
    poscq = jnp.concatenate([row_embed[0:1], class_query], axis=0)     # (2, D)

    fin = jnp.stack([jnp.ones((D,), jnp.float32), jnp.zeros((D,), jnp.float32),
                     jnp.ones((D,), jnp.float32), jnp.zeros((D,), jnp.float32)])  # (4, D)

    wc = normal((C, D)).T                     # (D, C)
    bc = unif((1, C))

    return {
        "poscq": poscq,
        "enc_wqkv": jnp.stack(enc_wqkv), "enc_wo": jnp.stack(enc_wo),
        "enc_bqkv": jnp.stack(enc_bqkv), "enc_sm": jnp.stack(enc_sm),
        "dec_wq": jnp.stack(dec_wq), "dec_wkv": jnp.stack(dec_wkv),
        "dec_wo": jnp.stack(dec_wo), "dec_bkv": jnp.stack(dec_bkv),
        "dec_sm": jnp.stack(dec_sm),
        "ffn_w1": jnp.stack(ffn_w1), "ffn_w2t": jnp.stack(ffn_w2t),
        "ffn_b1": jnp.stack(ffn_b1),
        "fin": fin, "wc": wc, "bc": bc,
    }


def _build_head_mask(nhead, lq, d):
    """Host-side constant: (nhead*lq, d) mask keeping head-h columns in row block h."""
    hd = d // nhead
    m = np.zeros((nhead * lq, d), np.float32)
    for h in range(nhead):
        m[h * lq:(h + 1) * lq, h * hd:(h + 1) * hd] = 1.0
    return jnp.asarray(m)


# ---------------------------------- forward -----------------------------------

def spoter_forward(params, inputs, *, nhead):
    """inputs: (frames, joints, 2) — single sample, as the PyTorch call site passes."""
    T = inputs.shape[0]
    D = params["poscq"].shape[-1]
    C = params["wc"].shape[-1]
    F = params["ffn_w1"].shape[-1]
    h = inputs.reshape(T, -1).astype(jnp.float32)      # (T, D); pos is added in-kernel

    # Head-stacking masks are trace-time constants (hoisted out of the kernel body).
    mask_e = _build_head_mask(nhead, T, D)
    mask_d = _build_head_mask(nhead, 1, D)

    kernel = functools.partial(_spoter_kernel, nhead=nhead)
    vmem = pl.BlockSpec(memory_space=pltpu.MemorySpace.VMEM)
    hbm = pl.BlockSpec(memory_space=pl.ANY)             # FFN weights stay in HBM

    args = (h, params["poscq"], mask_e, mask_d,
            params["enc_wqkv"], params["enc_wo"], params["enc_bqkv"], params["enc_sm"],
            params["dec_wq"], params["dec_wkv"], params["dec_wo"], params["dec_bkv"],
            params["dec_sm"],
            params["ffn_b1"], params["fin"], params["wc"], params["bc"],
            params["ffn_w1"], params["ffn_w2t"])

    logits = pl.pallas_call(
        kernel,
        out_shape=jax.ShapeDtypeStruct((1, C), jnp.float32),
        in_specs=[vmem] * 17 + [hbm, hbm],
        out_specs=vmem,
        scratch_shapes=[
            pltpu.VMEM((2, D, F), jnp.bfloat16),         # double-buffered linear1 weight
            pltpu.VMEM((2, D, F), jnp.bfloat16),         # double-buffered linear2 weight
            pltpu.SemaphoreType.DMA((2, 2)),
        ],
    )(*args)
    # transformer output (tgt_len=1, batch=1, D).transpose(0,1) -> (1,1,D); linear -> (1,1,C)
    return logits.reshape(1, 1, C)


if __name__ == "__main__":
    FRAMES, JOINTS = 8, 12
    HIDDEN_DIM = JOINTS * 2       # 24 (d_model == flattened per-frame feature size)
    NHEAD = 6                     # head_dim = 4
    NUM_CLASSES = 10
    DIM_FF = 2048                 # nn.Transformer / custom decoder layer default

    key = jax.random.PRNGKey(0)
    pkey, xkey = jax.random.split(key)
    params = init_spoter_params(pkey, num_classes=NUM_CLASSES, hidden_dim=HIDDEN_DIM,
                                nhead=NHEAD, num_enc_layers=3, num_dec_layers=3,
                                dim_feedforward=DIM_FF)
    inputs = jax.random.uniform(xkey, (FRAMES, JOINTS, 2), jnp.float32)

    fwd = jax.jit(functools.partial(spoter_forward, nhead=NHEAD))
    out = jax.block_until_ready(fwd(params, inputs))
    assert out.shape == (1, 1, NUM_CLASSES)
    assert bool(jnp.all(jnp.isfinite(out)))
    print("KERNEL_OK")
</pallas_src>

<mosaic_0001>
module attributes {stable_mosaic.version = 11 : i64} {
  func.func @_spoter_kernel(%arg0: memref<8x24xf32, #tpu.memory_space<vmem>>, %arg1: memref<2x24xf32, #tpu.memory_space<vmem>>, %arg2: memref<48x24xf32, #tpu.memory_space<vmem>>, %arg3: memref<6x24xf32, #tpu.memory_space<vmem>>, %arg4: memref<3x24x72xbf16, #tpu.memory_space<vmem>>, %arg5: memref<3x24x24xbf16, #tpu.memory_space<vmem>>, %arg6: memref<3x1x72xf32, #tpu.memory_space<vmem>>, %arg7: memref<3x6x24xf32, #tpu.memory_space<vmem>>, %arg8: memref<3x24x24xbf16, #tpu.memory_space<vmem>>, %arg9: memref<3x24x48xbf16, #tpu.memory_space<vmem>>, %arg10: memref<3x24x24xbf16, #tpu.memory_space<vmem>>, %arg11: memref<3x1x48xf32, #tpu.memory_space<vmem>>, %arg12: memref<3x9x24xf32, #tpu.memory_space<vmem>>, %arg13: memref<6x1x2048xf32, #tpu.memory_space<vmem>>, %arg14: memref<4x24xf32, #tpu.memory_space<vmem>>, %arg15: memref<24x10xf32, #tpu.memory_space<vmem>>, %arg16: memref<1x10xf32, #tpu.memory_space<vmem>>, %arg17: memref<6x24x2048xbf16, #tpu.memory_space<any>>, %arg18: memref<6x24x2048xbf16, #tpu.memory_space<any>>, %arg19: memref<1x10xf32, #tpu.memory_space<vmem>>, %arg20: memref<2x24x2048xbf16, #tpu.memory_space<vmem>>, %arg21: memref<2x24x2048xbf16, #tpu.memory_space<vmem>>, %arg22: memref<2x2x!tpu.dma_semaphore, #tpu.memory_space<semaphore_mem>>) attributes {dimension_semantics = [], scalar_prefetch = 0 : i64, scratch_operands = 3 : i64, tpu.core_type = #tpu.core_type<tc>} {
    %c0_i32 = arith.constant 0 : i32
    %c0_i32_0 = arith.constant 0 : i32
    %c0_i32_1 = arith.constant 0 : i32
    %c0_i32_2 = arith.constant 0 : i32
    %c0_i32_3 = arith.constant 0 : i32
    %c0_i32_4 = arith.constant 0 : i32
    %0 = tpu.memref_slice %arg17[%c0_i32, %c0_i32_3, %c0_i32_4] : memref<6x24x2048xbf16, #tpu.memory_space<any>> -> memref<1x24x2048xbf16, #tpu.memory_space<any>>
    %1 = tpu.memref_squeeze %0 : memref<1x24x2048xbf16, #tpu.memory_space<any>> -> memref<24x2048xbf16, #tpu.memory_space<any>>
    %c0_i32_5 = arith.constant 0 : i32
    %c0_i32_6 = arith.constant 0 : i32
    %2 = tpu.memref_slice %arg20[%c0_i32_0, %c0_i32_5, %c0_i32_6] : memref<2x24x2048xbf16, #tpu.memory_space<vmem>> -> memref<1x24x2048xbf16, #tpu.memory_space<vmem>>
    %3 = tpu.memref_squeeze %2 : memref<1x24x2048xbf16, #tpu.memory_space<vmem>> -> memref<24x2048xbf16, #tpu.memory_space<vmem>>
    %4 = tpu.memref_slice %arg22[%c0_i32_1, %c0_i32_2] : memref<2x2x!tpu.dma_semaphore, #tpu.memory_space<semaphore_mem>> -> memref<1x1x!tpu.dma_semaphore, #tpu.memory_space<semaphore_mem>>
    %5 = tpu.memref_squeeze %4 : memref<1x1x!tpu.dma_semaphore, #tpu.memory_space<semaphore_mem>> -> memref<!tpu.dma_semaphore, #tpu.memory_space<semaphore_mem>>
    tpu.enqueue_dma source(%1 : memref<24x2048xbf16, #tpu.memory_space<any>>) target(%3 : memref<24x2048xbf16, #tpu.memory_space<vmem>>) target_semaphore(%5 : memref<!tpu.dma_semaphore, #tpu.memory_space<semaphore_mem>>)
    %c0_i32_7 = arith.constant 0 : i32
    %c0_i32_8 = arith.constant 0 : i32
    %c1_i32 = arith.constant 1 : i32
    %c0_i32_9 = arith.constant 0 : i32
    %c0_i32_10 = arith.constant 0 : i32
    %c0_i32_11 = arith.constant 0 : i32
    %6 = tpu.memref_slice %arg18[%c0_i32_7, %c0_i32_10, %c0_i32_11] : memref<6x24x2048xbf16, #tpu.memory_space<any>> -> memref<1x24x2048xbf16, #tpu.memory_space<any>>
    %7 = tpu.memref_squeeze %6 : memref<1x24x2048xbf16, #tpu.memory_space<any>> -> memref<24x2048xbf16, #tpu.memory_space<any>>
    %c0_i32_12 = arith.constant 0 : i32
    %c0_i32_13 = arith.constant 0 : i32
    %8 = tpu.memref_slice %arg21[%c0_i32_8, %c0_i32_12, %c0_i32_13] : memref<2x24x2048xbf16, #tpu.memory_space<vmem>> -> memref<1x24x2048xbf16, #tpu.memory_space<vmem>>
    %9 = tpu.memref_squeeze %8 : memref<1x24x2048xbf16, #tpu.memory_space<vmem>> -> memref<24x2048xbf16, #tpu.memory_space<vmem>>
    %10 = tpu.memref_slice %arg22[%c1_i32, %c0_i32_9] : memref<2x2x!tpu.dma_semaphore, #tpu.memory_space<semaphore_mem>> -> memref<1x1x!tpu.dma_semaphore, #tpu.memory_space<semaphore_mem>>
    %11 = tpu.memref_squeeze %10 : memref<1x1x!tpu.dma_semaphore, #tpu.memory_space<semaphore_mem>> -> memref<!tpu.dma_semaphore, #tpu.memory_space<semaphore_mem>>
    tpu.enqueue_dma source(%7 : memref<24x2048xbf16, #tpu.memory_space<any>>) target(%9 : memref<24x2048xbf16, #tpu.memory_space<vmem>>) target_semaphore(%11 : memref<!tpu.dma_semaphore, #tpu.memory_space<semaphore_mem>>)
    %c0 = arith.constant 0 : index
    %c0_14 = arith.constant 0 : index
    %12 = vector.load %arg2[%c0, %c0_14] : memref<48x24xf32, #tpu.memory_space<vmem>>, vector<48x24xf32>
    %c0_15 = arith.constant 0 : index
    %c0_16 = arith.constant 0 : index
    %13 = vector.load %arg3[%c0_15, %c0_16] : memref<6x24xf32, #tpu.memory_space<vmem>>, vector<6x24xf32>
    %c0_17 = arith.constant 0 : index
    %c0_18 = arith.constant 0 : index
    %14 = vector.load %arg1[%c0_17, %c0_18] : memref<2x24xf32, #tpu.memory_space<vmem>>, vector<2x24xf32>
    %c0_19 = arith.constant 0 : index
    %c0_20 = arith.constant 0 : index
    %15 = vector.load %arg0[%c0_19, %c0_20] : memref<8x24xf32, #tpu.memory_space<vmem>>, vector<8x24xf32>
    %16 = vector.extract_strided_slice %14 {offsets = [0, 0], sizes = [1, 24], strides = [1, 1]} : vector<2x24xf32> to vector<1x24xf32>
    %17 = vector.broadcast %16 : vector<1x24xf32> to vector<8x24xf32>
    %18 = arith.addf %15, %17 : vector<8x24xf32>
    %c0_21 = arith.constant 0 : index
    %c0_22 = arith.constant 0 : index
    %c0_23 = arith.constant 0 : index
    %19 = vector.load %arg7[%c0_21, %c0_22, %c0_23] : memref<3x6x24xf32, #tpu.memory_space<vmem>>, vector<1x6x24xf32>
    %20 = vector.shape_cast %19 : vector<1x6x24xf32> to vector<6x24xf32>
    %c0_24 = arith.constant 0 : index
    %c0_25 = arith.constant 0 : index
    %c0_26 = arith.constant 0 : index
    %21 = vector.load %arg4[%c0_24, %c0_25, %c0_26] : memref<3x24x72xbf16, #tpu.memory_space<vmem>>, vector<1x24x72xbf16>
    %22 = vector.shape_cast %21 : vector<1x24x72xbf16> to vector<24x72xbf16>
    %23 = arith.truncf %18 : vector<8x24xf32> to vector<8x24xbf16>
    %cst = arith.constant dense<0.000000e+00> : vector<8x72xf32>
    %24 = tpu.matmul %23, %22, %cst {dimension_numbers = #tpu.dot_dimension_numbers<[1], [0], [0], [1], [0, 0, 1, 1], [], []>} : vector<8x24xbf16>, vector<24x72xbf16>, vector<8x72xf32> -> vector<8x72xf32>
    %c0_27 = arith.constant 0 : index
    %c0_28 = arith.constant 0 : index
    %c0_29 = arith.constant 0 : index
    %25 = vector.load %arg6[%c0_27, %c0_28, %c0_29] : memref<3x1x72xf32, #tpu.memory_space<vmem>>, vector<1x1x72xf32>
    %26 = vector.shape_cast %25 : vector<1x1x72xf32> to vector<1x72xf32>
    %27 = vector.broadcast %26 : vector<1x72xf32> to vector<8x72xf32>
    %28 = arith.addf %24, %27 : vector<8x72xf32>
    %29 = vector.extract_strided_slice %28 {offsets = [0, 0], sizes = [8, 24], strides = [1, 1]} : vector<8x72xf32> to vector<8x24xf32>
    %30 = vector.extract_strided_slice %28 {offsets = [0, 24], sizes = [8, 24], strides = [1, 1]} : vector<8x72xf32> to vector<8x24xf32>
    %31 = vector.extract_strided_slice %28 {offsets = [0, 48], sizes = [8, 24], strides = [1, 1]} : vector<8x72xf32> to vector<8x24xf32>
    %c0_30 = arith.constant 0 : index
    %c0_31 = arith.constant 0 : index
    %c0_32 = arith.constant 0 : index
    %32 = vector.load %arg5[%c0_30, %c0_31, %c0_32] : memref<3x24x24xbf16, #tpu.memory_space<vmem>>, vector<1x24x24xbf16>
    %33 = vector.shape_cast %32 : vector<1x24x24xbf16> to vector<24x24xbf16>
    %34 = vector.extract_strided_slice %20 {offsets = [0, 0], sizes = [1, 24], strides = [1, 1]} : vector<6x24xf32> to vector<1x24xf32>
    %35 = tpu.concatenate %29, %29, %29, %29, %29, %29 in 0 : vector<8x24xf32>, vector<8x24xf32>, vector<8x24xf32>, vector<8x24xf32>, vector<8x24xf32>, vector<8x24xf32> -> vector<48x24xf32>
    %36 = arith.mulf %35, %12 : vector<48x24xf32>
    %cst_33 = arith.constant dense<0.000000e+00> : vector<48x8xf32>
    %37 = tpu.matmul %36, %30, %cst_33 {dimension_numbers = #tpu.dot_dimension_numbers<[1], [1], [0], [0], [0, 0, 1, 0], [], []>} : vector<48x24xf32>, vector<8x24xf32>, vector<48x8xf32> -> vector<48x8xf32>
    %cst_34 = arith.constant dense<0xFF800000> : vector<48xf32>
    %38 = vector.multi_reduction <maximumf>, %37, %cst_34 [1] : vector<48x8xf32> to vector<48xf32>
    %39 = vector.shape_cast %38 : vector<48xf32> to vector<48x1xf32>
    %40 = vector.broadcast %39 : vector<48x1xf32> to vector<48x8xf32>
    %41 = arith.subf %37, %40 : vector<48x8xf32>
    %42 = math.exp %41 : vector<48x8xf32>
    %cst_35 = arith.constant dense<0.000000e+00> : vector<48xf32>
    %43 = vector.multi_reduction <add>, %42, %cst_35 [1] : vector<48x8xf32> to vector<48xf32>
    %44 = vector.shape_cast %43 : vector<48xf32> to vector<48x1xf32>
    %45 = tpu.reciprocal %44 {approx = true} : vector<48x1xf32> -> vector<48x1xf32>
    %46 = vector.broadcast %45 : vector<48x1xf32> to vector<48x8xf32>
    %47 = arith.mulf %42, %46 : vector<48x8xf32>
    %cst_36 = arith.constant dense<0.000000e+00> : vector<48x24xf32>
    %48 = tpu.matmul %47, %31, %cst_36 {dimension_numbers = #tpu.dot_dimension_numbers<[1], [0], [0], [1], [0, 0, 1, 1], [], []>} : vector<48x8xf32>, vector<8x24xf32>, vector<48x24xf32> -> vector<48x24xf32>
    %49 = arith.mulf %48, %12 : vector<48x24xf32>
    %50 = vector.extract_strided_slice %49 {offsets = [0, 0], sizes = [8, 24], strides = [1, 1]} : vector<48x24xf32> to vector<8x24xf32>
    %51 = vector.extract_strided_slice %49 {offsets = [8, 0], sizes = [8, 24], strides = [1, 1]} : vector<48x24xf32> to vector<8x24xf32>
    %52 = arith.addf %50, %51 : vector<8x24xf32>
    %53 = vector.extract_strided_slice %49 {offsets = [16, 0], sizes = [8, 24], strides = [1, 1]} : vector<48x24xf32> to vector<8x24xf32>
    %54 = arith.addf %52, %53 : vector<8x24xf32>
    %55 = vector.extract_strided_slice %49 {offsets = [24, 0], sizes = [8, 24], strides = [1, 1]} : vector<48x24xf32> to vector<8x24xf32>
    %56 = arith.addf %54, %55 : vector<8x24xf32>
    %57 = vector.extract_strided_slice %49 {offsets = [32, 0], sizes = [8, 24], strides = [1, 1]} : vector<48x24xf32> to vector<8x24xf32>
    %58 = arith.addf %56, %57 : vector<8x24xf32>
    %59 = vector.extract_strided_slice %49 {offsets = [40, 0], sizes = [8, 24], strides = [1, 1]} : vector<48x24xf32> to vector<8x24xf32>
    %60 = arith.addf %58, %59 : vector<8x24xf32>
    %61 = arith.truncf %60 : vector<8x24xf32> to vector<8x24xbf16>
    %cst_37 = arith.constant dense<0.000000e+00> : vector<8x24xf32>
    %62 = tpu.matmul %61, %33, %cst_37 {dimension_numbers = #tpu.dot_dimension_numbers<[1], [0], [0], [1], [0, 0, 1, 1], [], []>} : vector<8x24xbf16>, vector<24x24xbf16>, vector<8x24xf32> -> vector<8x24xf32>
    %63 = vector.broadcast %34 : vector<1x24xf32> to vector<8x24xf32>
    %64 = arith.addf %62, %63 : vector<8x24xf32>
    %65 = arith.addf %18, %64 : vector<8x24xf32>
    %66 = vector.extract_strided_slice %20 {offsets = [1, 0], sizes = [1, 24], strides = [1, 1]} : vector<6x24xf32> to vector<1x24xf32>
    %67 = vector.extract_strided_slice %20 {offsets = [2, 0], sizes = [1, 24], strides = [1, 1]} : vector<6x24xf32> to vector<1x24xf32>
    %cst_38 = arith.constant dense<0.000000e+00> : vector<8xf32>
    %68 = vector.multi_reduction <add>, %65, %cst_38 [1] : vector<8x24xf32> to vector<8xf32>
    %69 = vector.shape_cast %68 : vector<8xf32> to vector<8x1xf32>
    %cst_39 = arith.constant 2.400000e+01 : f32
    %70 = vector.broadcast %cst_39 : f32 to vector<8x1xf32>
    %71 = arith.divf %69, %70 : vector<8x1xf32>
    %72 = arith.mulf %65, %65 : vector<8x24xf32>
    %cst_40 = arith.constant dense<0.000000e+00> : vector<8xf32>
    %73 = vector.multi_reduction <add>, %72, %cst_40 [1] : vector<8x24xf32> to vector<8xf32>
    %74 = vector.shape_cast %73 : vector<8xf32> to vector<8x1xf32>
    %cst_41 = arith.constant 2.400000e+01 : f32
    %75 = vector.broadcast %cst_41 : f32 to vector<8x1xf32>
    %76 = arith.divf %74, %75 : vector<8x1xf32>
    %77 = arith.mulf %71, %71 : vector<8x1xf32>
    %78 = arith.subf %76, %77 : vector<8x1xf32>
    %cst_42 = arith.constant 0.000000e+00 : f32
    %79 = vector.broadcast %cst_42 : f32 to vector<8x1xf32>
    %80 = arith.maximumf %78, %79 : vector<8x1xf32>
    %81 = vector.broadcast %71 : vector<8x1xf32> to vector<8x24xf32>
    %82 = arith.subf %65, %81 : vector<8x24xf32>
    %cst_43 = arith.constant 9.99999974E-6 : f32
    %83 = vector.broadcast %cst_43 : f32 to vector<8x1xf32>
    %84 = arith.addf %80, %83 : vector<8x1xf32>
    %85 = math.rsqrt %84 : vector<8x1xf32>
    %86 = vector.broadcast %85 : vector<8x1xf32> to vector<8x24xf32>
    %87 = arith.mulf %82, %86 : vector<8x24xf32>
    %88 = vector.broadcast %66 : vector<1x24xf32> to vector<8x24xf32>
    %89 = arith.mulf %87, %88 : vector<8x24xf32>
    %90 = vector.broadcast %67 : vector<1x24xf32> to vector<8x24xf32>
    %91 = arith.addf %89, %90 : vector<8x24xf32>
    %c1_i32_44 = arith.constant 1 : i32
    %c1_i32_45 = arith.constant 1 : i32
    %c0_i32_46 = arith.constant 0 : i32
    %c1_i32_47 = arith.constant 1 : i32
    %c0_i32_48 = arith.constant 0 : i32
    %c0_i32_49 = arith.constant 0 : i32
    %92 = tpu.memref_slice %arg17[%c1_i32_44, %c0_i32_48, %c0_i32_49] : memref<6x24x2048xbf16, #tpu.memory_space<any>> -> memref<1x24x2048xbf16, #tpu.memory_space<any>>
    %93 = tpu.memref_squeeze %92 : memref<1x24x2048xbf16, #tpu.memory_space<any>> -> memref<24x2048xbf16, #tpu.memory_space<any>>
    %c0_i32_50 = arith.constant 0 : i32
    %c0_i32_51 = arith.constant 0 : i32
    %94 = tpu.memref_slice %arg20[%c1_i32_45, %c0_i32_50, %c0_i32_51] : memref<2x24x2048xbf16, #tpu.memory_space<vmem>> -> memref<1x24x2048xbf16, #tpu.memory_space<vmem>>
    %95 = tpu.memref_squeeze %94 : memref<1x24x2048xbf16, #tpu.memory_space<vmem>> -> memref<24x2048xbf16, #tpu.memory_space<vmem>>
    %96 = tpu.memref_slice %arg22[%c0_i32_46, %c1_i32_47] : memref<2x2x!tpu.dma_semaphore, #tpu.memory_space<semaphore_mem>> -> memref<1x1x!tpu.dma_semaphore, #tpu.memory_space<semaphore_mem>>
    %97 = tpu.memref_squeeze %96 : memref<1x1x!tpu.dma_semaphore, #tpu.memory_space<semaphore_mem>> -> memref<!tpu.dma_semaphore, #tpu.memory_space<semaphore_mem>>
    tpu.enqueue_dma source(%93 : memref<24x2048xbf16, #tpu.memory_space<any>>) target(%95 : memref<24x2048xbf16, #tpu.memory_space<vmem>>) target_semaphore(%97 : memref<!tpu.dma_semaphore, #tpu.memory_space<semaphore_mem>>)
    %c1_i32_52 = arith.constant 1 : i32
    %c1_i32_53 = arith.constant 1 : i32
    %c1_i32_54 = arith.constant 1 : i32
    %c1_i32_55 = arith.constant 1 : i32
    %c0_i32_56 = arith.constant 0 : i32
    %c0_i32_57 = arith.constant 0 : i32
    %98 = tpu.memref_slice %arg18[%c1_i32_52, %c0_i32_56, %c0_i32_57] : memref<6x24x2048xbf16, #tpu.memory_space<any>> -> memref<1x24x2048xbf16, #tpu.memory_space<any>>
    %99 = tpu.memref_squeeze %98 : memref<1x24x2048xbf16, #tpu.memory_space<any>> -> memref<24x2048xbf16, #tpu.memory_space<any>>
    %c0_i32_58 = arith.constant 0 : i32
    %c0_i32_59 = arith.constant 0 : i32
    %100 = tpu.memref_slice %arg21[%c1_i32_53, %c0_i32_58, %c0_i32_59] : memref<2x24x2048xbf16, #tpu.memory_space<vmem>> -> memref<1x24x2048xbf16, #tpu.memory_space<vmem>>
    %101 = tpu.memref_squeeze %100 : memref<1x24x2048xbf16, #tpu.memory_space<vmem>> -> memref<24x2048xbf16, #tpu.memory_space<vmem>>
    %102 = tpu.memref_slice %arg22[%c1_i32_54, %c1_i32_55] : memref<2x2x!tpu.dma_semaphore, #tpu.memory_space<semaphore_mem>> -> memref<1x1x!tpu.dma_semaphore, #tpu.memory_space<semaphore_mem>>
    %103 = tpu.memref_squeeze %102 : memref<1x1x!tpu.dma_semaphore, #tpu.memory_space<semaphore_mem>> -> memref<!tpu.dma_semaphore, #tpu.memory_space<semaphore_mem>>
    tpu.enqueue_dma source(%99 : memref<24x2048xbf16, #tpu.memory_space<any>>) target(%101 : memref<24x2048xbf16, #tpu.memory_space<vmem>>) target_semaphore(%103 : memref<!tpu.dma_semaphore, #tpu.memory_space<semaphore_mem>>)
    %c0_i32_60 = arith.constant 0 : i32
    %c0_i32_61 = arith.constant 0 : i32
    %c0_i32_62 = arith.constant 0 : i32
    %c0_i32_63 = arith.constant 0 : i32
    %c0_i32_64 = arith.constant 0 : i32
    %c0_i32_65 = arith.constant 0 : i32
    %104 = tpu.memref_slice %arg17[%c0_i32_60, %c0_i32_64, %c0_i32_65] : memref<6x24x2048xbf16, #tpu.memory_space<any>> -> memref<1x24x2048xbf16, #tpu.memory_space<any>>
    %105 = tpu.memref_squeeze %104 : memref<1x24x2048xbf16, #tpu.memory_space<any>> -> memref<24x2048xbf16, #tpu.memory_space<any>>
    %c0_i32_66 = arith.constant 0 : i32
    %c0_i32_67 = arith.constant 0 : i32
    %106 = tpu.memref_slice %arg20[%c0_i32_61, %c0_i32_66, %c0_i32_67] : memref<2x24x2048xbf16, #tpu.memory_space<vmem>> -> memref<1x24x2048xbf16, #tpu.memory_space<vmem>>
    %107 = tpu.memref_squeeze %106 : memref<1x24x2048xbf16, #tpu.memory_space<vmem>> -> memref<24x2048xbf16, #tpu.memory_space<vmem>>
    %108 = tpu.memref_slice %arg22[%c0_i32_62, %c0_i32_63] : memref<2x2x!tpu.dma_semaphore, #tpu.memory_space<semaphore_mem>> -> memref<1x1x!tpu.dma_semaphore, #tpu.memory_space<semaphore_mem>>
    %109 = tpu.memref_squeeze %108 : memref<1x1x!tpu.dma_semaphore, #tpu.memory_space<semaphore_mem>> -> memref<!tpu.dma_semaphore, #tpu.memory_space<semaphore_mem>>
    tpu.wait_dma2 semaphore(%109 : memref<!tpu.dma_semaphore, #tpu.memory_space<semaphore_mem>>) src(%105 : memref<24x2048xbf16, #tpu.memory_space<any>>) dst(%107 : memref<24x2048xbf16, #tpu.memory_space<vmem>>)
    %c0_i32_68 = arith.constant 0 : i32
    %c0_i32_69 = arith.constant 0 : i32
    %c1_i32_70 = arith.constant 1 : i32
    %c0_i32_71 = arith.constant 0 : i32
    %c0_i32_72 = arith.constant 0 : i32
    %c0_i32_73 = arith.constant 0 : i32
    %110 = tpu.memref_slice %arg18[%c0_i32_68, %c0_i32_72, %c0_i32_73] : memref<6x24x2048xbf16, #tpu.memory_space<any>> -> memref<1x24x2048xbf16, #tpu.memory_space<any>>
    %111 = tpu.memref_squeeze %110 : memref<1x24x2048xbf16, #tpu.memory_space<any>> -> memref<24x2048xbf16, #tpu.memory_space<any>>
    %c0_i32_74 = arith.constant 0 : i32
    %c0_i32_75 = arith.constant 0 : i32
    %112 = tpu.memref_slice %arg21[%c0_i32_69, %c0_i32_74, %c0_i32_75] : memref<2x24x2048xbf16, #tpu.memory_space<vmem>> -> memref<1x24x2048xbf16, #tpu.memory_space<vmem>>
    %113 = tpu.memref_squeeze %112 : memref<1x24x2048xbf16, #tpu.memory_space<vmem>> -> memref<24x2048xbf16, #tpu.memory_space<vmem>>
    %114 = tpu.memref_slice %arg22[%c1_i32_70, %c0_i32_71] : memref<2x2x!tpu.dma_semaphore, #tpu.memory_space<semaphore_mem>> -> memref<1x1x!tpu.dma_semaphore, #tpu.memory_space<semaphore_mem>>
    %115 = tpu.memref_squeeze %114 : memref<1x1x!tpu.dma_semaphore, #tpu.memory_space<semaphore_mem>> -> memref<!tpu.dma_semaphore, #tpu.memory_space<semaphore_mem>>
    tpu.wait_dma2 semaphore(%115 : memref<!tpu.dma_semaphore, #tpu.memory_space<semaphore_mem>>) src(%111 : memref<24x2048xbf16, #tpu.memory_space<any>>) dst(%113 : memref<24x2048xbf16, #tpu.memory_space<vmem>>)
    %c0_76 = arith.constant 0 : index
    %c0_77 = arith.constant 0 : index
    %c0_78 = arith.constant 0 : index
    %116 = vector.load %arg20[%c0_76, %c0_77, %c0_78] : memref<2x24x2048xbf16, #tpu.memory_space<vmem>>, vector<1x24x2048xbf16>
    %117 = vector.shape_cast %116 : vector<1x24x2048xbf16> to vector<24x2048xbf16>
    %c0_79 = arith.constant 0 : index
    %c0_80 = arith.constant 0 : index
    %c0_81 = arith.constant 0 : index
    %118 = vector.load %arg13[%c0_79, %c0_80, %c0_81] : memref<6x1x2048xf32, #tpu.memory_space<vmem>>, vector<1x1x2048xf32>
    %119 = vector.shape_cast %118 : vector<1x1x2048xf32> to vector<1x2048xf32>
    %c0_82 = arith.constant 0 : index
    %c0_83 = arith.constant 0 : index
    %c0_84 = arith.constant 0 : index
    %120 = vector.load %arg21[%c0_82, %c0_83, %c0_84] : memref<2x24x2048xbf16, #tpu.memory_space<vmem>>, vector<1x24x2048xbf16>
    %121 = vector.shape_cast %120 : vector<1x24x2048xbf16> to vector<24x2048xbf16>
    %122 = vector.extract_strided_slice %20 {offsets = [5, 0], sizes = [1, 24], strides = [1, 1]} : vector<6x24xf32> to vector<1x24xf32>
    %123 = arith.truncf %91 : vector<8x24xf32> to vector<8x24xbf16>
    %cst_85 = arith.constant dense<0.000000e+00> : vector<8x2048xf32>
    %124 = tpu.matmul %123, %117, %cst_85 {dimension_numbers = #tpu.dot_dimension_numbers<[1], [0], [0], [1], [0, 0, 1, 1], [], []>} : vector<8x24xbf16>, vector<24x2048xbf16>, vector<8x2048xf32> -> vector<8x2048xf32>
    %125 = vector.broadcast %119 : vector<1x2048xf32> to vector<8x2048xf32>
    %126 = arith.addf %124, %125 : vector<8x2048xf32>
    %cst_86 = arith.constant 0.000000e+00 : f32
    %127 = vector.broadcast %cst_86 : f32 to vector<8x2048xf32>
    %128 = arith.maximumf %126, %127 : vector<8x2048xf32>
    %129 = arith.truncf %128 : vector<8x2048xf32> to vector<8x2048xbf16>
    %cst_87 = arith.constant dense<0.000000e+00> : vector<8x24xf32>
    %130 = tpu.matmul %129, %121, %cst_87 {dimension_numbers = #tpu.dot_dimension_numbers<[1], [1], [0], [0], [0, 0, 1, 0], [], []>} : vector<8x2048xbf16>, vector<24x2048xbf16>, vector<8x24xf32> -> vector<8x24xf32>
    %131 = vector.broadcast %122 : vector<1x24xf32> to vector<8x24xf32>
    %132 = arith.addf %130, %131 : vector<8x24xf32>
    %133 = arith.addf %91, %132 : vector<8x24xf32>
    %134 = vector.extract_strided_slice %20 {offsets = [3, 0], sizes = [1, 24], strides = [1, 1]} : vector<6x24xf32> to vector<1x24xf32>
    %135 = vector.extract_strided_slice %20 {offsets = [4, 0], sizes = [1, 24], strides = [1, 1]} : vector<6x24xf32> to vector<1x24xf32>
    %cst_88 = arith.constant dense<0.000000e+00> : vector<8xf32>
    %136 = vector.multi_reduction <add>, %133, %cst_88 [1] : vector<8x24xf32> to vector<8xf32>
    %137 = vector.shape_cast %136 : vector<8xf32> to vector<8x1xf32>
    %cst_89 = arith.constant 2.400000e+01 : f32
    %138 = vector.broadcast %cst_89 : f32 to vector<8x1xf32>
    %139 = arith.divf %137, %138 : vector<8x1xf32>
    %140 = arith.mulf %133, %133 : vector<8x24xf32>
    %cst_90 = arith.constant dense<0.000000e+00> : vector<8xf32>
    %141 = vector.multi_reduction <add>, %140, %cst_90 [1] : vector<8x24xf32> to vector<8xf32>
    %142 = vector.shape_cast %141 : vector<8xf32> to vector<8x1xf32>
    %cst_91 = arith.constant 2.400000e+01 : f32
    %143 = vector.broadcast %cst_91 : f32 to vector<8x1xf32>
    %144 = arith.divf %142, %143 : vector<8x1xf32>
    %145 = arith.mulf %139, %139 : vector<8x1xf32>
    %146 = arith.subf %144, %145 : vector<8x1xf32>
    %cst_92 = arith.constant 0.000000e+00 : f32
    %147 = vector.broadcast %cst_92 : f32 to vector<8x1xf32>
    %148 = arith.maximumf %146, %147 : vector<8x1xf32>
    %149 = vector.broadcast %139 : vector<8x1xf32> to vector<8x24xf32>
    %150 = arith.subf %133, %149 : vector<8x24xf32>
    %cst_93 = arith.constant 9.99999974E-6 : f32
    %151 = vector.broadcast %cst_93 : f32 to vector<8x1xf32>
    %152 = arith.addf %148, %151 : vector<8x1xf32>
    %153 = math.rsqrt %152 : vector<8x1xf32>
    %154 = vector.broadcast %153 : vector<8x1xf32> to vector<8x24xf32>
    %155 = arith.mulf %150, %154 : vector<8x24xf32>
    %156 = vector.broadcast %134 : vector<1x24xf32> to vector<8x24xf32>
    %157 = arith.mulf %155, %156 : vector<8x24xf32>
    %158 = vector.broadcast %135 : vector<1x24xf32> to vector<8x24xf32>
    %159 = arith.addf %157, %158 : vector<8x24xf32>
    %c1 = arith.constant 1 : index
    %c0_94 = arith.constant 0 : index
    %c0_95 = arith.constant 0 : index
    %160 = vector.load %arg7[%c1, %c0_94, %c0_95] : memref<3x6x24xf32, #tpu.memory_space<vmem>>, vector<1x6x24xf32>
    %161 = vector.shape_cast %160 : vector<1x6x24xf32> to vector<6x24xf32>
    %c1_96 = arith.constant 1 : index
    %c0_97 = arith.constant 0 : index
    %c0_98 = arith.constant 0 : index
    %162 = vector.load %arg4[%c1_96, %c0_97, %c0_98] : memref<3x24x72xbf16, #tpu.memory_space<vmem>>, vector<1x24x72xbf16>
    %163 = vector.shape_cast %162 : vector<1x24x72xbf16> to vector<24x72xbf16>
    %164 = arith.truncf %159 : vector<8x24xf32> to vector<8x24xbf16>
    %cst_99 = arith.constant dense<0.000000e+00> : vector<8x72xf32>
    %165 = tpu.matmul %164, %163, %cst_99 {dimension_numbers = #tpu.dot_dimension_numbers<[1], [0], [0], [1], [0, 0, 1, 1], [], []>} : vector<8x24xbf16>, vector<24x72xbf16>, vector<8x72xf32> -> vector<8x72xf32>
    %c1_100 = arith.constant 1 : index
    %c0_101 = arith.constant 0 : index
    %c0_102 = arith.constant 0 : index
    %166 = vector.load %arg6[%c1_100, %c0_101, %c0_102] : memref<3x1x72xf32, #tpu.memory_space<vmem>>, vector<1x1x72xf32>
    %167 = vector.shape_cast %166 : vector<1x1x72xf32> to vector<1x72xf32>
    %168 = vector.broadcast %167 : vector<1x72xf32> to vector<8x72xf32>
    %169 = arith.addf %165, %168 : vector<8x72xf32>
    %170 = vector.extract_strided_slice %169 {offsets = [0, 0], sizes = [8, 24], strides = [1, 1]} : vector<8x72xf32> to vector<8x24xf32>
    %171 = vector.extract_strided_slice %169 {offsets = [0, 24], sizes = [8, 24], strides = [1, 1]} : vector<8x72xf32> to vector<8x24xf32>
    %172 = vector.extract_strided_slice %169 {offsets = [0, 48], sizes = [8, 24], strides = [1, 1]} : vector<8x72xf32> to vector<8x24xf32>
    %c1_103 = arith.constant 1 : index
    %c0_104 = arith.constant 0 : index
    %c0_105 = arith.constant 0 : index
    %173 = vector.load %arg5[%c1_103, %c0_104, %c0_105] : memref<3x24x24xbf16, #tpu.memory_space<vmem>>, vector<1x24x24xbf16>
    %174 = vector.shape_cast %173 : vector<1x24x24xbf16> to vector<24x24xbf16>
    %175 = vector.extract_strided_slice %161 {offsets = [0, 0], sizes = [1, 24], strides = [1, 1]} : vector<6x24xf32> to vector<1x24xf32>
    %176 = tpu.concatenate %170, %170, %170, %170, %170, %170 in 0 : vector<8x24xf32>, vector<8x24xf32>, vector<8x24xf32>, vector<8x24xf32>, vector<8x24xf32>, vector<8x24xf32> -> vector<48x24xf32>
    %177 = arith.mulf %176, %12 : vector<48x24xf32>
    %cst_106 = arith.constant dense<0.000000e+00> : vector<48x8xf32>
    %178 = tpu.matmul %177, %171, %cst_106 {dimension_numbers = #tpu.dot_dimension_numbers<[1], [1], [0], [0], [0, 0, 1, 0], [], []>} : vector<48x24xf32>, vector<8x24xf32>, vector<48x8xf32> -> vector<48x8xf32>
    %cst_107 = arith.constant dense<0xFF800000> : vector<48xf32>
    %179 = vector.multi_reduction <maximumf>, %178, %cst_107 [1] : vector<48x8xf32> to vector<48xf32>
    %180 = vector.shape_cast %179 : vector<48xf32> to vector<48x1xf32>
    %181 = vector.broadcast %180 : vector<48x1xf32> to vector<48x8xf32>
    %182 = arith.subf %178, %181 : vector<48x8xf32>
    %183 = math.exp %182 : vector<48x8xf32>
    %cst_108 = arith.constant dense<0.000000e+00> : vector<48xf32>
    %184 = vector.multi_reduction <add>, %183, %cst_108 [1] : vector<48x8xf32> to vector<48xf32>
    %185 = vector.shape_cast %184 : vector<48xf32> to vector<48x1xf32>
    %186 = tpu.reciprocal %185 {approx = true} : vector<48x1xf32> -> vector<48x1xf32>
    %187 = vector.broadcast %186 : vector<48x1xf32> to vector<48x8xf32>
    %188 = arith.mulf %183, %187 : vector<48x8xf32>
    %cst_109 = arith.constant dense<0.000000e+00> : vector<48x24xf32>
    %189 = tpu.matmul %188, %172, %cst_109 {dimension_numbers = #tpu.dot_dimension_numbers<[1], [0], [0], [1], [0, 0, 1, 1], [], []>} : vector<48x8xf32>, vector<8x24xf32>, vector<48x24xf32> -> vector<48x24xf32>
    %190 = arith.mulf %189, %12 : vector<48x24xf32>
    %191 = vector.extract_strided_slice %190 {offsets = [0, 0], sizes = [8, 24], strides = [1, 1]} : vector<48x24xf32> to vector<8x24xf32>
    %192 = vector.extract_strided_slice %190 {offsets = [8, 0], sizes = [8, 24], strides = [1, 1]} : vector<48x24xf32> to vector<8x24xf32>
    %193 = arith.addf %191, %192 : vector<8x24xf32>
    %194 = vector.extract_strided_slice %190 {offsets = [16, 0], sizes = [8, 24], strides = [1, 1]} : vector<48x24xf32> to vector<8x24xf32>
    %195 = arith.addf %193, %194 : vector<8x24xf32>
    %196 = vector.extract_strided_slice %190 {offsets = [24, 0], sizes = [8, 24], strides = [1, 1]} : vector<48x24xf32> to vector<8x24xf32>
    %197 = arith.addf %195, %196 : vector<8x24xf32>
    %198 = vector.extract_strided_slice %190 {offsets = [32, 0], sizes = [8, 24], strides = [1, 1]} : vector<48x24xf32> to vector<8x24xf32>
    %199 = arith.addf %197, %198 : vector<8x24xf32>
    %200 = vector.extract_strided_slice %190 {offsets = [40, 0], sizes = [8, 24], strides = [1, 1]} : vector<48x24xf32> to vector<8x24xf32>
    %201 = arith.addf %199, %200 : vector<8x24xf32>
    %202 = arith.truncf %201 : vector<8x24xf32> to vector<8x24xbf16>
    %cst_110 = arith.constant dense<0.000000e+00> : vector<8x24xf32>
    %203 = tpu.matmul %202, %174, %cst_110 {dimension_numbers = #tpu.dot_dimension_numbers<[1], [0], [0], [1], [0, 0, 1, 1], [], []>} : vector<8x24xbf16>, vector<24x24xbf16>, vector<8x24xf32> -> vector<8x24xf32>
    %204 = vector.broadcast %175 : vector<1x24xf32> to vector<8x24xf32>
    %205 = arith.addf %203, %204 : vector<8x24xf32>
    %206 = arith.addf %159, %205 : vector<8x24xf32>
    %207 = vector.extract_strided_slice %161 {offsets = [1, 0], sizes = [1, 24], strides = [1, 1]} : vector<6x24xf32> to vector<1x24xf32>
    %208 = vector.extract_strided_slice %161 {offsets = [2, 0], sizes = [1, 24], strides = [1, 1]} : vector<6x24xf32> to vector<1x24xf32>
    %cst_111 = arith.constant dense<0.000000e+00> : vector<8xf32>
    %209 = vector.multi_reduction <add>, %206, %cst_111 [1] : vector<8x24xf32> to vector<8xf32>
    %210 = vector.shape_cast %209 : vector<8xf32> to vector<8x1xf32>
    %cst_112 = arith.constant 2.400000e+01 : f32
    %211 = vector.broadcast %cst_112 : f32 to vector<8x1xf32>
    %212 = arith.divf %210, %211 : vector<8x1xf32>
    %213 = arith.mulf %206, %206 : vector<8x24xf32>
    %cst_113 = arith.constant dense<0.000000e+00> : vector<8xf32>
    %214 = vector.multi_reduction <add>, %213, %cst_113 [1] : vector<8x24xf32> to vector<8xf32>
    %215 = vector.shape_cast %214 : vector<8xf32> to vector<8x1xf32>
    %cst_114 = arith.constant 2.400000e+01 : f32
    %216 = vector.broadcast %cst_114 : f32 to vector<8x1xf32>
    %217 = arith.divf %215, %216 : vector<8x1xf32>
    %218 = arith.mulf %212, %212 : vector<8x1xf32>
    %219 = arith.subf %217, %218 : vector<8x1xf32>
    %cst_115 = arith.constant 0.000000e+00 : f32
    %220 = vector.broadcast %cst_115 : f32 to vector<8x1xf32>
    %221 = arith.maximumf %219, %220 : vector<8x1xf32>
    %222 = vector.broadcast %212 : vector<8x1xf32> to vector<8x24xf32>
    %223 = arith.subf %206, %222 : vector<8x24xf32>
    %cst_116 = arith.constant 9.99999974E-6 : f32
    %224 = vector.broadcast %cst_116 : f32 to vector<8x1xf32>
    %225 = arith.addf %221, %224 : vector<8x1xf32>
    %226 = math.rsqrt %225 : vector<8x1xf32>
    %227 = vector.broadcast %226 : vector<8x1xf32> to vector<8x24xf32>
    %228 = arith.mulf %223, %227 : vector<8x24xf32>
    %229 = vector.broadcast %207 : vector<1x24xf32> to vector<8x24xf32>
    %230 = arith.mulf %228, %229 : vector<8x24xf32>
    %231 = vector.broadcast %208 : vector<1x24xf32> to vector<8x24xf32>
    %232 = arith.addf %230, %231 : vector<8x24xf32>
    %c2_i32 = arith.constant 2 : i32
    %c0_i32_117 = arith.constant 0 : i32
    %c0_i32_118 = arith.constant 0 : i32
    %c0_i32_119 = arith.constant 0 : i32
    %c0_i32_120 = arith.constant 0 : i32
    %c0_i32_121 = arith.constant 0 : i32
    %233 = tpu.memref_slice %arg17[%c2_i32, %c0_i32_120, %c0_i32_121] : memref<6x24x2048xbf16, #tpu.memory_space<any>> -> memref<1x24x2048xbf16, #tpu.memory_space<any>>
    %234 = tpu.memref_squeeze %233 : memref<1x24x2048xbf16, #tpu.memory_space<any>> -> memref<24x2048xbf16, #tpu.memory_space<any>>
    %c0_i32_122 = arith.constant 0 : i32
    %c0_i32_123 = arith.constant 0 : i32
    %235 = tpu.memref_slice %arg20[%c0_i32_117, %c0_i32_122, %c0_i32_123] : memref<2x24x2048xbf16, #tpu.memory_space<vmem>> -> memref<1x24x2048xbf16, #tpu.memory_space<vmem>>
    %236 = tpu.memref_squeeze %235 : memref<1x24x2048xbf16, #tpu.memory_space<vmem>> -> memref<24x2048xbf16, #tpu.memory_space<vmem>>
    %237 = tpu.memref_slice %arg22[%c0_i32_118, %c0_i32_119] : memref<2x2x!tpu.dma_semaphore, #tpu.memory_space<semaphore_mem>> -> memref<1x1x!tpu.dma_semaphore, #tpu.memory_space<semaphore_mem>>
    %238 = tpu.memref_squeeze %237 : memref<1x1x!tpu.dma_semaphore, #tpu.memory_space<semaphore_mem>> -> memref<!tpu.dma_semaphore, #tpu.memory_space<semaphore_mem>>
    tpu.enqueue_dma source(%234 : memref<24x2048xbf16, #tpu.memory_space<any>>) target(%236 : memref<24x2048xbf16, #tpu.memory_space<vmem>>) target_semaphore(%238 : memref<!tpu.dma_semaphore, #tpu.memory_space<semaphore_mem>>)
    %c2_i32_124 = arith.constant 2 : i32
    %c0_i32_125 = arith.constant 0 : i32
    %c1_i32_126 = arith.constant 1 : i32
    %c0_i32_127 = arith.constant 0 : i32
    %c0_i32_128 = arith.constant 0 : i32
    %c0_i32_129 = arith.constant 0 : i32
    %239 = tpu.memref_slice %arg18[%c2_i32_124, %c0_i32_128, %c0_i32_129] : memref<6x24x2048xbf16, #tpu.memory_space<any>> -> memref<1x24x2048xbf16, #tpu.memory_space<any>>
    %240 = tpu.memref_squeeze %239 : memref<1x24x2048xbf16, #tpu.memory_space<any>> -> memref<24x2048xbf16, #tpu.memory_space<any>>
    %c0_i32_130 = arith.constant 0 : i32
    %c0_i32_131 = arith.constant 0 : i32
    %241 = tpu.memref_slice %arg21[%c0_i32_125, %c0_i32_130, %c0_i32_131] : memref<2x24x2048xbf16, #tpu.memory_space<vmem>> -> memref<1x24x2048xbf16, #tpu.memory_space<vmem>>
    %242 = tpu.memref_squeeze %241 : memref<1x24x2048xbf16, #tpu.memory_space<vmem>> -> memref<24x2048xbf16, #tpu.memory_space<vmem>>
    %243 = tpu.memref_slice %arg22[%c1_i32_126, %c0_i32_127] : memref<2x2x!tpu.dma_semaphore, #tpu.memory_space<semaphore_mem>> -> memref<1x1x!tpu.dma_semaphore, #tpu.memory_space<semaphore_mem>>
    %244 = tpu.memref_squeeze %243 : memref<1x1x!tpu.dma_semaphore, #tpu.memory_space<semaphore_mem>> -> memref<!tpu.dma_semaphore, #tpu.memory_space<semaphore_mem>>
    tpu.enqueue_dma source(%240 : memref<24x2048xbf16, #tpu.memory_space<any>>) target(%242 : memref<24x2048xbf16, #tpu.memory_space<vmem>>) target_semaphore(%244 : memref<!tpu.dma_semaphore, #tpu.memory_space<semaphore_mem>>)
    %c1_i32_132 = arith.constant 1 : i32
    %c1_i32_133 = arith.constant 1 : i32
    %c0_i32_134 = arith.constant 0 : i32
    %c1_i32_135 = arith.constant 1 : i32
    %c0_i32_136 = arith.constant 0 : i32
    %c0_i32_137 = arith.constant 0 : i32
    %245 = tpu.memref_slice %arg17[%c1_i32_132, %c0_i32_136, %c0_i32_137] : memref<6x24x2048xbf16, #tpu.memory_space<any>> -> memref<1x24x2048xbf16, #tpu.memory_space<any>>
    %246 = tpu.memref_squeeze %245 : memref<1x24x2048xbf16, #tpu.memory_space<any>> -> memref<24x2048xbf16, #tpu.memory_space<any>>
    %c0_i32_138 = arith.constant 0 : i32
    %c0_i32_139 = arith.constant 0 : i32
    %247 = tpu.memref_slice %arg20[%c1_i32_133, %c0_i32_138, %c0_i32_139] : memref<2x24x2048xbf16, #tpu.memory_space<vmem>> -> memref<1x24x2048xbf16, #tpu.memory_space<vmem>>
    %248 = tpu.memref_squeeze %247 : memref<1x24x2048xbf16, #tpu.memory_space<vmem>> -> memref<24x2048xbf16, #tpu.memory_space<vmem>>
    %249 = tpu.memref_slice %arg22[%c0_i32_134, %c1_i32_135] : memref<2x2x!tpu.dma_semaphore, #tpu.memory_space<semaphore_mem>> -> memref<1x1x!tpu.dma_semaphore, #tpu.memory_space<semaphore_mem>>
    %250 = tpu.memref_squeeze %249 : memref<1x1x!tpu.dma_semaphore, #tpu.memory_space<semaphore_mem>> -> memref<!tpu.dma_semaphore, #tpu.memory_space<semaphore_mem>>
    tpu.wait_dma2 semaphore(%250 : memref<!tpu.dma_semaphore, #tpu.memory_space<semaphore_mem>>) src(%246 : memref<24x2048xbf16, #tpu.memory_space<any>>) dst(%248 : memref<24x2048xbf16, #tpu.memory_space<vmem>>)
    %c1_i32_140 = arith.constant 1 : i32
    %c1_i32_141 = arith.constant 1 : i32
    %c1_i32_142 = arith.constant 1 : i32
    %c1_i32_143 = arith.constant 1 : i32
    %c0_i32_144 = arith.constant 0 : i32
    %c0_i32_145 = arith.constant 0 : i32
    %251 = tpu.memref_slice %arg18[%c1_i32_140, %c0_i32_144, %c0_i32_145] : memref<6x24x2048xbf16, #tpu.memory_space<any>> -> memref<1x24x2048xbf16, #tpu.memory_space<any>>
    %252 = tpu.memref_squeeze %251 : memref<1x24x2048xbf16, #tpu.memory_space<any>> -> memref<24x2048xbf16, #tpu.memory_space<any>>
    %c0_i32_146 = arith.constant 0 : i32
    %c0_i32_147 = arith.constant 0 : i32
    %253 = tpu.memref_slice %arg21[%c1_i32_141, %c0_i32_146, %c0_i32_147] : memref<2x24x2048xbf16, #tpu.memory_space<vmem>> -> memref<1x24x2048xbf16, #tpu.memory_space<vmem>>
    %254 = tpu.memref_squeeze %253 : memref<1x24x2048xbf16, #tpu.memory_space<vmem>> -> memref<24x2048xbf16, #tpu.memory_space<vmem>>
    %255 = tpu.memref_slice %arg22[%c1_i32_142, %c1_i32_143] : memref<2x2x!tpu.dma_semaphore, #tpu.memory_space<semaphore_mem>> -> memref<1x1x!tpu.dma_semaphore, #tpu.memory_space<semaphore_mem>>
    %256 = tpu.memref_squeeze %255 : memref<1x1x!tpu.dma_semaphore, #tpu.memory_space<semaphore_mem>> -> memref<!tpu.dma_semaphore, #tpu.memory_space<semaphore_mem>>
    tpu.wait_dma2 semaphore(%256 : memref<!tpu.dma_semaphore, #tpu.memory_space<semaphore_mem>>) src(%252 : memref<24x2048xbf16, #tpu.memory_space<any>>) dst(%254 : memref<24x2048xbf16, #tpu.memory_space<vmem>>)
    %c1_148 = arith.constant 1 : index
    %c0_149 = arith.constant 0 : index
    %c0_150 = arith.constant 0 : index
    %257 = vector.load %arg20[%c1_148, %c0_149, %c0_150] : memref<2x24x2048xbf16, #tpu.memory_space<vmem>>, vector<1x24x2048xbf16>
    %258 = vector.shape_cast %257 : vector<1x24x2048xbf16> to vector<24x2048xbf16>
    %c1_151 = arith.constant 1 : index
    %c0_152 = arith.constant 0 : index
    %c0_153 = arith.constant 0 : index
    %259 = vector.load %arg13[%c1_151, %c0_152, %c0_153] : memref<6x1x2048xf32, #tpu.memory_space<vmem>>, vector<1x1x2048xf32>
    %260 = vector.shape_cast %259 : vector<1x1x2048xf32> to vector<1x2048xf32>
    %c1_154 = arith.constant 1 : index
    %c0_155 = arith.constant 0 : index
    %c0_156 = arith.constant 0 : index
    %261 = vector.load %arg21[%c1_154, %c0_155, %c0_156] : memref<2x24x2048xbf16, #tpu.memory_space<vmem>>, vector<1x24x2048xbf16>
    %262 = vector.shape_cast %261 : vector<1x24x2048xbf16> to vector<24x2048xbf16>
    %263 = vector.extract_strided_slice %161 {offsets = [5, 0], sizes = [1, 24], strides = [1, 1]} : vector<6x24xf32> to vector<1x24xf32>
    %264 = arith.truncf %232 : vector<8x24xf32> to vector<8x24xbf16>
    %cst_157 = arith.constant dense<0.000000e+00> : vector<8x2048xf32>
    %265 = tpu.matmul %264, %258, %cst_157 {dimension_numbers = #tpu.dot_dimension_numbers<[1], [0], [0], [1], [0, 0, 1, 1], [], []>} : vector<8x24xbf16>, vector<24x2048xbf16>, vector<8x2048xf32> -> vector<8x2048xf32>
    %266 = vector.broadcast %260 : vector<1x2048xf32> to vector<8x2048xf32>
    %267 = arith.addf %265, %266 : vector<8x2048xf32>
    %cst_158 = arith.constant 0.000000e+00 : f32
    %268 = vector.broadcast %cst_158 : f32 to vector<8x2048xf32>
    %269 = arith.maximumf %267, %268 : vector<8x2048xf32>
    %270 = arith.truncf %269 : vector<8x2048xf32> to vector<8x2048xbf16>
    %cst_159 = arith.constant dense<0.000000e+00> : vector<8x24xf32>
    %271 = tpu.matmul %270, %262, %cst_159 {dimension_numbers = #tpu.dot_dimension_numbers<[1], [1], [0], [0], [0, 0, 1, 0], [], []>} : vector<8x2048xbf16>, vector<24x2048xbf16>, vector<8x24xf32> -> vector<8x24xf32>
    %272 = vector.broadcast %263 : vector<1x24xf32> to vector<8x24xf32>
    %273 = arith.addf %271, %272 : vector<8x24xf32>
    %274 = arith.addf %232, %273 : vector<8x24xf32>
    %275 = vector.extract_strided_slice %161 {offsets = [3, 0], sizes = [1, 24], strides = [1, 1]} : vector<6x24xf32> to vector<1x24xf32>
    %276 = vector.extract_strided_slice %161 {offsets = [4, 0], sizes = [1, 24], strides = [1, 1]} : vector<6x24xf32> to vector<1x24xf32>
    %cst_160 = arith.constant dense<0.000000e+00> : vector<8xf32>
    %277 = vector.multi_reduction <add>, %274, %cst_160 [1] : vector<8x24xf32> to vector<8xf32>
    %278 = vector.shape_cast %277 : vector<8xf32> to vector<8x1xf32>
    %cst_161 = arith.constant 2.400000e+01 : f32
    %279 = vector.broadcast %cst_161 : f32 to vector<8x1xf32>
    %280 = arith.divf %278, %279 : vector<8x1xf32>
    %281 = arith.mulf %274, %274 : vector<8x24xf32>
    %cst_162 = arith.constant dense<0.000000e+00> : vector<8xf32>
    %282 = vector.multi_reduction <add>, %281, %cst_162 [1] : vector<8x24xf32> to vector<8xf32>
    %283 = vector.shape_cast %282 : vector<8xf32> to vector<8x1xf32>
    %cst_163 = arith.constant 2.400000e+01 : f32
    %284 = vector.broadcast %cst_163 : f32 to vector<8x1xf32>
    %285 = arith.divf %283, %284 : vector<8x1xf32>
    %286 = arith.mulf %280, %280 : vector<8x1xf32>
    %287 = arith.subf %285, %286 : vector<8x1xf32>
    %cst_164 = arith.constant 0.000000e+00 : f32
    %288 = vector.broadcast %cst_164 : f32 to vector<8x1xf32>
    %289 = arith.maximumf %287, %288 : vector<8x1xf32>
    %290 = vector.broadcast %280 : vector<8x1xf32> to vector<8x24xf32>
    %291 = arith.subf %274, %290 : vector<8x24xf32>
    %cst_165 = arith.constant 9.99999974E-6 : f32
    %292 = vector.broadcast %cst_165 : f32 to vector<8x1xf32>
    %293 = arith.addf %289, %292 : vector<8x1xf32>
    %294 = math.rsqrt %293 : vector<8x1xf32>
    %295 = vector.broadcast %294 : vector<8x1xf32> to vector<8x24xf32>
    %296 = arith.mulf %291, %295 : vector<8x24xf32>
    %297 = vector.broadcast %275 : vector<1x24xf32> to vector<8x24xf32>
    %298 = arith.mulf %296, %297 : vector<8x24xf32>
    %299 = vector.broadcast %276 : vector<1x24xf32> to vector<8x24xf32>
    %300 = arith.addf %298, %299 : vector<8x24xf32>
    %c2 = arith.constant 2 : index
    %c0_166 = arith.constant 0 : index
    %c0_167 = arith.constant 0 : index
    %301 = vector.load %arg7[%c2, %c0_166, %c0_167] : memref<3x6x24xf32, #tpu.memory_space<vmem>>, vector<1x6x24xf32>
    %302 = vector.shape_cast %301 : vector<1x6x24xf32> to vector<6x24xf32>
    %c2_168 = arith.constant 2 : index
    %c0_169 = arith.constant 0 : index
    %c0_170 = arith.constant 0 : index
    %303 = vector.load %arg4[%c2_168, %c0_169, %c0_170] : memref<3x24x72xbf16, #tpu.memory_space<vmem>>, vector<1x24x72xbf16>
    %304 = vector.shape_cast %303 : vector<1x24x72xbf16> to vector<24x72xbf16>
    %305 = arith.truncf %300 : vector<8x24xf32> to vector<8x24xbf16>
    %cst_171 = arith.constant dense<0.000000e+00> : vector<8x72xf32>
    %306 = tpu.matmul %305, %304, %cst_171 {dimension_numbers = #tpu.dot_dimension_numbers<[1], [0], [0], [1], [0, 0, 1, 1], [], []>} : vector<8x24xbf16>, vector<24x72xbf16>, vector<8x72xf32> -> vector<8x72xf32>
    %c2_172 = arith.constant 2 : index
    %c0_173 = arith.constant 0 : index
    %c0_174 = arith.constant 0 : index
    %307 = vector.load %arg6[%c2_172, %c0_173, %c0_174] : memref<3x1x72xf32, #tpu.memory_space<vmem>>, vector<1x1x72xf32>
    %308 = vector.shape_cast %307 : vector<1x1x72xf32> to vector<1x72xf32>
    %309 = vector.broadcast %308 : vector<1x72xf32> to vector<8x72xf32>
    %310 = arith.addf %306, %309 : vector<8x72xf32>
    %311 = vector.extract_strided_slice %310 {offsets = [0, 0], sizes = [8, 24], strides = [1, 1]} : vector<8x72xf32> to vector<8x24xf32>
    %312 = vector.extract_strided_slice %310 {offsets = [0, 24], sizes = [8, 24], strides = [1, 1]} : vector<8x72xf32> to vector<8x24xf32>
    %313 = vector.extract_strided_slice %310 {offsets = [0, 48], sizes = [8, 24], strides = [1, 1]} : vector<8x72xf32> to vector<8x24xf32>
    %c2_175 = arith.constant 2 : index
    %c0_176 = arith.constant 0 : index
    %c0_177 = arith.constant 0 : index
    %314 = vector.load %arg5[%c2_175, %c0_176, %c0_177] : memref<3x24x24xbf16, #tpu.memory_space<vmem>>, vector<1x24x24xbf16>
    %315 = vector.shape_cast %314 : vector<1x24x24xbf16> to vector<24x24xbf16>
    %316 = vector.extract_strided_slice %302 {offsets = [0, 0], sizes = [1, 24], strides = [1, 1]} : vector<6x24xf32> to vector<1x24xf32>
    %317 = tpu.concatenate %311, %311, %311, %311, %311, %311 in 0 : vector<8x24xf32>, vector<8x24xf32>, vector<8x24xf32>, vector<8x24xf32>, vector<8x24xf32>, vector<8x24xf32> -> vector<48x24xf32>
    %318 = arith.mulf %317, %12 : vector<48x24xf32>
    %cst_178 = arith.constant dense<0.000000e+00> : vector<48x8xf32>
    %319 = tpu.matmul %318, %312, %cst_178 {dimension_numbers = #tpu.dot_dimension_numbers<[1], [1], [0], [0], [0, 0, 1, 0], [], []>} : vector<48x24xf32>, vector<8x24xf32>, vector<48x8xf32> -> vector<48x8xf32>
    %cst_179 = arith.constant dense<0xFF800000> : vector<48xf32>
    %320 = vector.multi_reduction <maximumf>, %319, %cst_179 [1] : vector<48x8xf32> to vector<48xf32>
    %321 = vector.shape_cast %320 : vector<48xf32> to vector<48x1xf32>
    %322 = vector.broadcast %321 : vector<48x1xf32> to vector<48x8xf32>
    %323 = arith.subf %319, %322 : vector<48x8xf32>
    %324 = math.exp %323 : vector<48x8xf32>
    %cst_180 = arith.constant dense<0.000000e+00> : vector<48xf32>
    %325 = vector.multi_reduction <add>, %324, %cst_180 [1] : vector<48x8xf32> to vector<48xf32>
    %326 = vector.shape_cast %325 : vector<48xf32> to vector<48x1xf32>
    %327 = tpu.reciprocal %326 {approx = true} : vector<48x1xf32> -> vector<48x1xf32>
    %328 = vector.broadcast %327 : vector<48x1xf32> to vector<48x8xf32>
    %329 = arith.mulf %324, %328 : vector<48x8xf32>
    %cst_181 = arith.constant dense<0.000000e+00> : vector<48x24xf32>
    %330 = tpu.matmul %329, %313, %cst_181 {dimension_numbers = #tpu.dot_dimension_numbers<[1], [0], [0], [1], [0, 0, 1, 1], [], []>} : vector<48x8xf32>, vector<8x24xf32>, vector<48x24xf32> -> vector<48x24xf32>
    %331 = arith.mulf %330, %12 : vector<48x24xf32>
    %332 = vector.extract_strided_slice %331 {offsets = [0, 0], sizes = [8, 24], strides = [1, 1]} : vector<48x24xf32> to vector<8x24xf32>
    %333 = vector.extract_strided_slice %331 {offsets = [8, 0], sizes = [8, 24], strides = [1, 1]} : vector<48x24xf32> to vector<8x24xf32>
    %334 = arith.addf %332, %333 : vector<8x24xf32>
    %335 = vector.extract_strided_slice %331 {offsets = [16, 0], sizes = [8, 24], strides = [1, 1]} : vector<48x24xf32> to vector<8x24xf32>
    %336 = arith.addf %334, %335 : vector<8x24xf32>
    %337 = vector.extract_strided_slice %331 {offsets = [24, 0], sizes = [8, 24], strides = [1, 1]} : vector<48x24xf32> to vector<8x24xf32>
    %338 = arith.addf %336, %337 : vector<8x24xf32>
    %339 = vector.extract_strided_slice %331 {offsets = [32, 0], sizes = [8, 24], strides = [1, 1]} : vector<48x24xf32> to vector<8x24xf32>
    %340 = arith.addf %338, %339 : vector<8x24xf32>
    %341 = vector.extract_strided_slice %331 {offsets = [40, 0], sizes = [8, 24], strides = [1, 1]} : vector<48x24xf32> to vector<8x24xf32>
    %342 = arith.addf %340, %341 : vector<8x24xf32>
    %343 = arith.truncf %342 : vector<8x24xf32> to vector<8x24xbf16>
    %cst_182 = arith.constant dense<0.000000e+00> : vector<8x24xf32>
    %344 = tpu.matmul %343, %315, %cst_182 {dimension_numbers = #tpu.dot_dimension_numbers<[1], [0], [0], [1], [0, 0, 1, 1], [], []>} : vector<8x24xbf16>, vector<24x24xbf16>, vector<8x24xf32> -> vector<8x24xf32>
    %345 = vector.broadcast %316 : vector<1x24xf32> to vector<8x24xf32>
    %346 = arith.addf %344, %345 : vector<8x24xf32>
    %347 = arith.addf %300, %346 : vector<8x24xf32>
    %348 = vector.extract_strided_slice %302 {offsets = [1, 0], sizes = [1, 24], strides = [1, 1]} : vector<6x24xf32> to vector<1x24xf32>
    %349 = vector.extract_strided_slice %302 {offsets = [2, 0], sizes = [1, 24], strides = [1, 1]} : vector<6x24xf32> to vector<1x24xf32>
    %cst_183 = arith.constant dense<0.000000e+00> : vector<8xf32>
    %350 = vector.multi_reduction <add>, %347, %cst_183 [1] : vector<8x24xf32> to vector<8xf32>
    %351 = vector.shape_cast %350 : vector<8xf32> to vector<8x1xf32>
    %cst_184 = arith.constant 2.400000e+01 : f32
    %352 = vector.broadcast %cst_184 : f32 to vector<8x1xf32>
    %353 = arith.divf %351, %352 : vector<8x1xf32>
    %354 = arith.mulf %347, %347 : vector<8x24xf32>
    %cst_185 = arith.constant dense<0.000000e+00> : vector<8xf32>
    %355 = vector.multi_reduction <add>, %354, %cst_185 [1] : vector<8x24xf32> to vector<8xf32>
    %356 = vector.shape_cast %355 : vector<8xf32> to vector<8x1xf32>
    %cst_186 = arith.constant 2.400000e+01 : f32
    %357 = vector.broadcast %cst_186 : f32 to vector<8x1xf32>
    %358 = arith.divf %356, %357 : vector<8x1xf32>
    %359 = arith.mulf %353, %353 : vector<8x1xf32>
    %360 = arith.subf %358, %359 : vector<8x1xf32>
    %cst_187 = arith.constant 0.000000e+00 : f32
    %361 = vector.broadcast %cst_187 : f32 to vector<8x1xf32>
    %362 = arith.maximumf %360, %361 : vector<8x1xf32>
    %363 = vector.broadcast %353 : vector<8x1xf32> to vector<8x24xf32>
    %364 = arith.subf %347, %363 : vector<8x24xf32>
    %cst_188 = arith.constant 9.99999974E-6 : f32
    %365 = vector.broadcast %cst_188 : f32 to vector<8x1xf32>
    %366 = arith.addf %362, %365 : vector<8x1xf32>
    %367 = math.rsqrt %366 : vector<8x1xf32>
    %368 = vector.broadcast %367 : vector<8x1xf32> to vector<8x24xf32>
    %369 = arith.mulf %364, %368 : vector<8x24xf32>
    %370 = vector.broadcast %348 : vector<1x24xf32> to vector<8x24xf32>
    %371 = arith.mulf %369, %370 : vector<8x24xf32>
    %372 = vector.broadcast %349 : vector<1x24xf32> to vector<8x24xf32>
    %373 = arith.addf %371, %372 : vector<8x24xf32>
    %c3_i32 = arith.constant 3 : i32
    %c1_i32_189 = arith.constant 1 : i32
    %c0_i32_190 = arith.constant 0 : i32
    %c1_i32_191 = arith.constant 1 : i32
    %c0_i32_192 = arith.constant 0 : i32
    %c0_i32_193 = arith.constant 0 : i32
    %374 = tpu.memref_slice %arg17[%c3_i32, %c0_i32_192, %c0_i32_193] : memref<6x24x2048xbf16, #tpu.memory_space<any>> -> memref<1x24x2048xbf16, #tpu.memory_space<any>>
    %375 = tpu.memref_squeeze %374 : memref<1x24x2048xbf16, #tpu.memory_space<any>> -> memref<24x2048xbf16, #tpu.memory_space<any>>
    %c0_i32_194 = arith.constant 0 : i32
    %c0_i32_195 = arith.constant 0 : i32
    %376 = tpu.memref_slice %arg20[%c1_i32_189, %c0_i32_194, %c0_i32_195] : memref<2x24x2048xbf16, #tpu.memory_space<vmem>> -> memref<1x24x2048xbf16, #tpu.memory_space<vmem>>
    %377 = tpu.memref_squeeze %376 : memref<1x24x2048xbf16, #tpu.memory_space<vmem>> -> memref<24x2048xbf16, #tpu.memory_space<vmem>>
    %378 = tpu.memref_slice %arg22[%c0_i32_190, %c1_i32_191] : memref<2x2x!tpu.dma_semaphore, #tpu.memory_space<semaphore_mem>> -> memref<1x1x!tpu.dma_semaphore, #tpu.memory_space<semaphore_mem>>
    %379 = tpu.memref_squeeze %378 : memref<1x1x!tpu.dma_semaphore, #tpu.memory_space<semaphore_mem>> -> memref<!tpu.dma_semaphore, #tpu.memory_space<semaphore_mem>>
    tpu.enqueue_dma source(%375 : memref<24x2048xbf16, #tpu.memory_space<any>>) target(%377 : memref<24x2048xbf16, #tpu.memory_space<vmem>>) target_semaphore(%379 : memref<!tpu.dma_semaphore, #tpu.memory_space<semaphore_mem>>)
    %c3_i32_196 = arith.constant 3 : i32
    %c1_i32_197 = arith.constant 1 : i32
    %c1_i32_198 = arith.constant 1 : i32
    %c1_i32_199 = arith.constant 1 : i32
    %c0_i32_200 = arith.constant 0 : i32
    %c0_i32_201 = arith.constant 0 : i32
    %380 = tpu.memref_slice %arg18[%c3_i32_196, %c0_i32_200, %c0_i32_201] : memref<6x24x2048xbf16, #tpu.memory_space<any>> -> memref<1x24x2048xbf16, #tpu.memory_space<any>>
    %381 = tpu.memref_squeeze %380 : memref<1x24x2048xbf16, #tpu.memory_space<any>> -> memref<24x2048xbf16, #tpu.memory_space<any>>
    %c0_i32_202 = arith.constant 0 : i32
    %c0_i32_203 = arith.constant 0 : i32
    %382 = tpu.memref_slice %arg21[%c1_i32_197, %c0_i32_202, %c0_i32_203] : memref<2x24x2048xbf16, #tpu.memory_space<vmem>> -> memref<1x24x2048xbf16, #tpu.memory_space<vmem>>
    %383 = tpu.memref_squeeze %382 : memref<1x24x2048xbf16, #tpu.memory_space<vmem>> -> memref<24x2048xbf16, #tpu.memory_space<vmem>>
    %384 = tpu.memref_slice %arg22[%c1_i32_198, %c1_i32_199] : memref<2x2x!tpu.dma_semaphore, #tpu.memory_space<semaphore_mem>> -> memref<1x1x!tpu.dma_semaphore, #tpu.memory_space<semaphore_mem>>
    %385 = tpu.memref_squeeze %384 : memref<1x1x!tpu.dma_semaphore, #tpu.memory_space<semaphore_mem>> -> memref<!tpu.dma_semaphore, #tpu.memory_space<semaphore_mem>>
    tpu.enqueue_dma source(%381 : memref<24x2048xbf16, #tpu.memory_space<any>>) target(%383 : memref<24x2048xbf16, #tpu.memory_space<vmem>>) target_semaphore(%385 : memref<!tpu.dma_semaphore, #tpu.memory_space<semaphore_mem>>)
    %c2_i32_204 = arith.constant 2 : i32
    %c0_i32_205 = arith.constant 0 : i32
    %c0_i32_206 = arith.constant 0 : i32
    %c0_i32_207 = arith.constant 0 : i32
    %c0_i32_208 = arith.constant 0 : i32
    %c0_i32_209 = arith.constant 0 : i32
    %386 = tpu.memref_slice %arg17[%c2_i32_204, %c0_i32_208, %c0_i32_209] : memref<6x24x2048xbf16, #tpu.memory_space<any>> -> memref<1x24x2048xbf16, #tpu.memory_space<any>>
    %387 = tpu.memref_squeeze %386 : memref<1x24x2048xbf16, #tpu.memory_space<any>> -> memref<24x2048xbf16, #tpu.memory_space<any>>
    %c0_i32_210 = arith.constant 0 : i32
    %c0_i32_211 = arith.constant 0 : i32
    %388 = tpu.memref_slice %arg20[%c0_i32_205, %c0_i32_210, %c0_i32_211] : memref<2x24x2048xbf16, #tpu.memory_space<vmem>> -> memref<1x24x2048xbf16, #tpu.memory_space<vmem>>
    %389 = tpu.memref_squeeze %388 : memref<1x24x2048xbf16, #tpu.memory_space<vmem>> -> memref<24x2048xbf16, #tpu.memory_space<vmem>>
    %390 = tpu.memref_slice %arg22[%c0_i32_206, %c0_i32_207] : memref<2x2x!tpu.dma_semaphore, #tpu.memory_space<semaphore_mem>> -> memref<1x1x!tpu.dma_semaphore, #tpu.memory_space<semaphore_mem>>
    %391 = tpu.memref_squeeze %390 : memref<1x1x!tpu.dma_semaphore, #tpu.memory_space<semaphore_mem>> -> memref<!tpu.dma_semaphore, #tpu.memory_space<semaphore_mem>>
    tpu.wait_dma2 semaphore(%391 : memref<!tpu.dma_semaphore, #tpu.memory_space<semaphore_mem>>) src(%387 : memref<24x2048xbf16, #tpu.memory_space<any>>) dst(%389 : memref<24x2048xbf16, #tpu.memory_space<vmem>>)
    %c2_i32_212 = arith.constant 2 : i32
    %c0_i32_213 = arith.constant 0 : i32
    %c1_i32_214 = arith.constant 1 : i32
    %c0_i32_215 = arith.constant 0 : i32
    %c0_i32_216 = arith.constant 0 : i32
    %c0_i32_217 = arith.constant 0 : i32
    %392 = tpu.memref_slice %arg18[%c2_i32_212, %c0_i32_216, %c0_i32_217] : memref<6x24x2048xbf16, #tpu.memory_space<any>> -> memref<1x24x2048xbf16, #tpu.memory_space<any>>
    %393 = tpu.memref_squeeze %392 : memref<1x24x2048xbf16, #tpu.memory_space<any>> -> memref<24x2048xbf16, #tpu.memory_space<any>>
    %c0_i32_218 = arith.constant 0 : i32
    %c0_i32_219 = arith.constant 0 : i32
    %394 = tpu.memref_slice %arg21[%c0_i32_213, %c0_i32_218, %c0_i32_219] : memref<2x24x2048xbf16, #tpu.memory_space<vmem>> -> memref<1x24x2048xbf16, #tpu.memory_space<vmem>>
    %395 = tpu.memref_squeeze %394 : memref<1x24x2048xbf16, #tpu.memory_space<vmem>> -> memref<24x2048xbf16, #tpu.memory_space<vmem>>
    %396 = tpu.memref_slice %arg22[%c1_i32_214, %c0_i32_215] : memref<2x2x!tpu.dma_semaphore, #tpu.memory_space<semaphore_mem>> -> memref<1x1x!tpu.dma_semaphore, #tpu.memory_space<semaphore_mem>>
    %397 = tpu.memref_squeeze %396 : memref<1x1x!tpu.dma_semaphore, #tpu.memory_space<semaphore_mem>> -> memref<!tpu.dma_semaphore, #tpu.memory_space<semaphore_mem>>
    tpu.wait_dma2 semaphore(%397 : memref<!tpu.dma_semaphore, #tpu.memory_space<semaphore_mem>>) src(%393 : memref<24x2048xbf16, #tpu.memory_space<any>>) dst(%395 : memref<24x2048xbf16, #tpu.memory_space<vmem>>)
    %c0_220 = arith.constant 0 : index
    %c0_221 = arith.constant 0 : index
    %c0_222 = arith.constant 0 : index
    %398 = vector.load %arg20[%c0_220, %c0_221, %c0_222] : memref<2x24x2048xbf16, #tpu.memory_space<vmem>>, vector<1x24x2048xbf16>
    %399 = vector.shape_cast %398 : vector<1x24x2048xbf16> to vector<24x2048xbf16>
    %c2_223 = arith.constant 2 : index
    %c0_224 = arith.constant 0 : index
    %c0_225 = arith.constant 0 : index
    %400 = vector.load %arg13[%c2_223, %c0_224, %c0_225] : memref<6x1x2048xf32, #tpu.memory_space<vmem>>, vector<1x1x2048xf32>
    %401 = vector.shape_cast %400 : vector<1x1x2048xf32> to vector<1x2048xf32>
    %c0_226 = arith.constant 0 : index
    %c0_227 = arith.constant 0 : index
    %c0_228 = arith.constant 0 : index
    %402 = vector.load %arg21[%c0_226, %c0_227, %c0_228] : memref<2x24x2048xbf16, #tpu.memory_space<vmem>>, vector<1x24x2048xbf16>
    %403 = vector.shape_cast %402 : vector<1x24x2048xbf16> to vector<24x2048xbf16>
    %404 = vector.extract_strided_slice %302 {offsets = [5, 0], sizes = [1, 24], strides = [1, 1]} : vector<6x24xf32> to vector<1x24xf32>
    %405 = arith.truncf %373 : vector<8x24xf32> to vector<8x24xbf16>
    %cst_229 = arith.constant dense<0.000000e+00> : vector<8x2048xf32>
    %406 = tpu.matmul %405, %399, %cst_229 {dimension_numbers = #tpu.dot_dimension_numbers<[1], [0], [0], [1], [0, 0, 1, 1], [], []>} : vector<8x24xbf16>, vector<24x2048xbf16>, vector<8x2048xf32> -> vector<8x2048xf32>
    %407 = vector.broadcast %401 : vector<1x2048xf32> to vector<8x2048xf32>
    %408 = arith.addf %406, %407 : vector<8x2048xf32>
    %cst_230 = arith.constant 0.000000e+00 : f32
    %409 = vector.broadcast %cst_230 : f32 to vector<8x2048xf32>
    %410 = arith.maximumf %408, %409 : vector<8x2048xf32>
    %411 = arith.truncf %410 : vector<8x2048xf32> to vector<8x2048xbf16>
    %cst_231 = arith.constant dense<0.000000e+00> : vector<8x24xf32>
    %412 = tpu.matmul %411, %403, %cst_231 {dimension_numbers = #tpu.dot_dimension_numbers<[1], [1], [0], [0], [0, 0, 1, 0], [], []>} : vector<8x2048xbf16>, vector<24x2048xbf16>, vector<8x24xf32> -> vector<8x24xf32>
    %413 = vector.broadcast %404 : vector<1x24xf32> to vector<8x24xf32>
    %414 = arith.addf %412, %413 : vector<8x24xf32>
    %415 = arith.addf %373, %414 : vector<8x24xf32>
    %416 = vector.extract_strided_slice %302 {offsets = [3, 0], sizes = [1, 24], strides = [1, 1]} : vector<6x24xf32> to vector<1x24xf32>
    %417 = vector.extract_strided_slice %302 {offsets = [4, 0], sizes = [1, 24], strides = [1, 1]} : vector<6x24xf32> to vector<1x24xf32>
    %cst_232 = arith.constant dense<0.000000e+00> : vector<8xf32>
    %418 = vector.multi_reduction <add>, %415, %cst_232 [1] : vector<8x24xf32> to vector<8xf32>
    %419 = vector.shape_cast %418 : vector<8xf32> to vector<8x1xf32>
    %cst_233 = arith.constant 2.400000e+01 : f32
    %420 = vector.broadcast %cst_233 : f32 to vector<8x1xf32>
    %421 = arith.divf %419, %420 : vector<8x1xf32>
    %422 = arith.mulf %415, %415 : vector<8x24xf32>
    %cst_234 = arith.constant dense<0.000000e+00> : vector<8xf32>
    %423 = vector.multi_reduction <add>, %422, %cst_234 [1] : vector<8x24xf32> to vector<8xf32>
    %424 = vector.shape_cast %423 : vector<8xf32> to vector<8x1xf32>
    %cst_235 = arith.constant 2.400000e+01 : f32
    %425 = vector.broadcast %cst_235 : f32 to vector<8x1xf32>
    %426 = arith.divf %424, %425 : vector<8x1xf32>
    %427 = arith.mulf %421, %421 : vector<8x1xf32>
    %428 = arith.subf %426, %427 : vector<8x1xf32>
    %cst_236 = arith.constant 0.000000e+00 : f32
    %429 = vector.broadcast %cst_236 : f32 to vector<8x1xf32>
    %430 = arith.maximumf %428, %429 : vector<8x1xf32>
    %431 = vector.broadcast %421 : vector<8x1xf32> to vector<8x24xf32>
    %432 = arith.subf %415, %431 : vector<8x24xf32>
    %cst_237 = arith.constant 9.99999974E-6 : f32
    %433 = vector.broadcast %cst_237 : f32 to vector<8x1xf32>
    %434 = arith.addf %430, %433 : vector<8x1xf32>
    %435 = math.rsqrt %434 : vector<8x1xf32>
    %436 = vector.broadcast %435 : vector<8x1xf32> to vector<8x24xf32>
    %437 = arith.mulf %432, %436 : vector<8x24xf32>
    %438 = vector.broadcast %416 : vector<1x24xf32> to vector<8x24xf32>
    %439 = arith.mulf %437, %438 : vector<8x24xf32>
    %440 = vector.broadcast %417 : vector<1x24xf32> to vector<8x24xf32>
    %441 = arith.addf %439, %440 : vector<8x24xf32>
    %c0_238 = arith.constant 0 : index
    %c0_239 = arith.constant 0 : index
    %442 = vector.load %arg14[%c0_238, %c0_239] : memref<4x24xf32, #tpu.memory_space<vmem>>, vector<4x24xf32>
    %443 = vector.extract_strided_slice %442 {offsets = [0, 0], sizes = [1, 24], strides = [1, 1]} : vector<4x24xf32> to vector<1x24xf32>
    %444 = vector.extract_strided_slice %442 {offsets = [1, 0], sizes = [1, 24], strides = [1, 1]} : vector<4x24xf32> to vector<1x24xf32>
    %cst_240 = arith.constant dense<0.000000e+00> : vector<8xf32>
    %445 = vector.multi_reduction <add>, %441, %cst_240 [1] : vector<8x24xf32> to vector<8xf32>
    %446 = vector.shape_cast %445 : vector<8xf32> to vector<8x1xf32>
    %cst_241 = arith.constant 2.400000e+01 : f32
    %447 = vector.broadcast %cst_241 : f32 to vector<8x1xf32>
    %448 = arith.divf %446, %447 : vector<8x1xf32>
    %449 = arith.mulf %441, %441 : vector<8x24xf32>
    %cst_242 = arith.constant dense<0.000000e+00> : vector<8xf32>
    %450 = vector.multi_reduction <add>, %449, %cst_242 [1] : vector<8x24xf32> to vector<8xf32>
    %451 = vector.shape_cast %450 : vector<8xf32> to vector<8x1xf32>
    %cst_243 = arith.constant 2.400000e+01 : f32
    %452 = vector.broadcast %cst_243 : f32 to vector<8x1xf32>
    %453 = arith.divf %451, %452 : vector<8x1xf32>
    %454 = arith.mulf %448, %448 : vector<8x1xf32>
    %455 = arith.subf %453, %454 : vector<8x1xf32>
    %cst_244 = arith.constant 0.000000e+00 : f32
    %456 = vector.broadcast %cst_244 : f32 to vector<8x1xf32>
    %457 = arith.maximumf %455, %456 : vector<8x1xf32>
    %458 = vector.broadcast %448 : vector<8x1xf32> to vector<8x24xf32>
    %459 = arith.subf %441, %458 : vector<8x24xf32>
    %cst_245 = arith.constant 9.99999974E-6 : f32
    %460 = vector.broadcast %cst_245 : f32 to vector<8x1xf32>
    %461 = arith.addf %457, %460 : vector<8x1xf32>
    %462 = math.rsqrt %461 : vector<8x1xf32>
    %463 = vector.broadcast %462 : vector<8x1xf32> to vector<8x24xf32>
    %464 = arith.mulf %459, %463 : vector<8x24xf32>
    %465 = vector.broadcast %443 : vector<1x24xf32> to vector<8x24xf32>
    %466 = arith.mulf %464, %465 : vector<8x24xf32>
    %467 = vector.broadcast %444 : vector<1x24xf32> to vector<8x24xf32>
    %468 = arith.addf %466, %467 : vector<8x24xf32>
    %469 = vector.extract_strided_slice %14 {offsets = [1, 0], sizes = [1, 24], strides = [1, 1]} : vector<2x24xf32> to vector<1x24xf32>
    %c0_246 = arith.constant 0 : index
    %c0_247 = arith.constant 0 : index
    %c0_248 = arith.constant 0 : index
    %470 = vector.load %arg12[%c0_246, %c0_247, %c0_248] : memref<3x9x24xf32, #tpu.memory_space<vmem>>, vector<1x9x24xf32>
    %471 = vector.shape_cast %470 : vector<1x9x24xf32> to vector<9x24xf32>
    %472 = arith.addf %469, %469 : vector<1x24xf32>
    %473 = vector.extract_strided_slice %471 {offsets = [2, 0], sizes = [1, 24], strides = [1, 1]} : vector<9x24xf32> to vector<1x24xf32>
    %474 = vector.extract_strided_slice %471 {offsets = [3, 0], sizes = [1, 24], strides = [1, 1]} : vector<9x24xf32> to vector<1x24xf32>
    %cst_249 = arith.constant dense<0.000000e+00> : vector<1xf32>
    %475 = vector.multi_reduction <add>, %472, %cst_249 [1] : vector<1x24xf32> to vector<1xf32>
    %476 = vector.shape_cast %475 : vector<1xf32> to vector<1x1xf32>
    %cst_250 = arith.constant 2.400000e+01 : f32
    %477 = vector.broadcast %cst_250 : f32 to vector<1x1xf32>
    %478 = arith.divf %476, %477 : vector<1x1xf32>
    %479 = arith.mulf %472, %472 : vector<1x24xf32>
    %cst_251 = arith.constant dense<0.000000e+00> : vector<1xf32>
    %480 = vector.multi_reduction <add>, %479, %cst_251 [1] : vector<1x24xf32> to vector<1xf32>
    %481 = vector.shape_cast %480 : vector<1xf32> to vector<1x1xf32>
    %cst_252 = arith.constant 2.400000e+01 : f32
    %482 = vector.broadcast %cst_252 : f32 to vector<1x1xf32>
    %483 = arith.divf %481, %482 : vector<1x1xf32>
    %484 = arith.mulf %478, %478 : vector<1x1xf32>
    %485 = arith.subf %483, %484 : vector<1x1xf32>
    %cst_253 = arith.constant 0.000000e+00 : f32
    %486 = vector.broadcast %cst_253 : f32 to vector<1x1xf32>
    %487 = arith.maximumf %485, %486 : vector<1x1xf32>
    %488 = vector.broadcast %478 : vector<1x1xf32> to vector<1x24xf32>
    %489 = arith.subf %472, %488 : vector<1x24xf32>
    %cst_254 = arith.constant 9.99999974E-6 : f32
    %490 = vector.broadcast %cst_254 : f32 to vector<1x1xf32>
    %491 = arith.addf %487, %490 : vector<1x1xf32>
    %492 = math.rsqrt %491 : vector<1x1xf32>
    %493 = vector.broadcast %492 : vector<1x1xf32> to vector<1x24xf32>
    %494 = arith.mulf %489, %493 : vector<1x24xf32>
    %495 = arith.mulf %494, %473 : vector<1x24xf32>
    %496 = arith.addf %495, %474 : vector<1x24xf32>
    %c0_255 = arith.constant 0 : index
    %c0_256 = arith.constant 0 : index
    %c0_257 = arith.constant 0 : index
    %497 = vector.load %arg8[%c0_255, %c0_256, %c0_257] : memref<3x24x24xbf16, #tpu.memory_space<vmem>>, vector<1x24x24xbf16>
    %498 = vector.shape_cast %497 : vector<1x24x24xbf16> to vector<24x24xbf16>
    %499 = arith.truncf %496 : vector<1x24xf32> to vector<1x24xbf16>
    %cst_258 = arith.constant dense<0.000000e+00> : vector<1x24xf32>
    %500 = tpu.matmul %499, %498, %cst_258 {dimension_numbers = #tpu.dot_dimension_numbers<[1], [0], [0], [1], [0, 0, 1, 1], [], []>} : vector<1x24xbf16>, vector<24x24xbf16>, vector<1x24xf32> -> vector<1x24xf32>
    %501 = vector.extract_strided_slice %471 {offsets = [0, 0], sizes = [1, 24], strides = [1, 1]} : vector<9x24xf32> to vector<1x24xf32>
    %502 = arith.addf %500, %501 : vector<1x24xf32>
    %c0_259 = arith.constant 0 : index
    %c0_260 = arith.constant 0 : index
    %c0_261 = arith.constant 0 : index
    %503 = vector.load %arg9[%c0_259, %c0_260, %c0_261] : memref<3x24x48xbf16, #tpu.memory_space<vmem>>, vector<1x24x48xbf16>
    %504 = vector.shape_cast %503 : vector<1x24x48xbf16> to vector<24x48xbf16>
    %505 = arith.truncf %468 : vector<8x24xf32> to vector<8x24xbf16>
    %cst_262 = arith.constant dense<0.000000e+00> : vector<8x48xf32>
    %506 = tpu.matmul %505, %504, %cst_262 {dimension_numbers = #tpu.dot_dimension_numbers<[1], [0], [0], [1], [0, 0, 1, 1], [], []>} : vector<8x24xbf16>, vector<24x48xbf16>, vector<8x48xf32> -> vector<8x48xf32>
    %c0_263 = arith.constant 0 : index
    %c0_264 = arith.constant 0 : index
    %c0_265 = arith.constant 0 : index
    %507 = vector.load %arg11[%c0_263, %c0_264, %c0_265] : memref<3x1x48xf32, #tpu.memory_space<vmem>>, vector<1x1x48xf32>
    %508 = vector.shape_cast %507 : vector<1x1x48xf32> to vector<1x48xf32>
    %509 = vector.broadcast %508 : vector<1x48xf32> to vector<8x48xf32>
    %510 = arith.addf %506, %509 : vector<8x48xf32>
    %511 = vector.extract_strided_slice %510 {offsets = [0, 0], sizes = [8, 24], strides = [1, 1]} : vector<8x48xf32> to vector<8x24xf32>
    %512 = vector.extract_strided_slice %510 {offsets = [0, 24], sizes = [8, 24], strides = [1, 1]} : vector<8x48xf32> to vector<8x24xf32>
    %c0_266 = arith.constant 0 : index
    %c0_267 = arith.constant 0 : index
    %c0_268 = arith.constant 0 : index
    %513 = vector.load %arg10[%c0_266, %c0_267, %c0_268] : memref<3x24x24xbf16, #tpu.memory_space<vmem>>, vector<1x24x24xbf16>
    %514 = vector.shape_cast %513 : vector<1x24x24xbf16> to vector<24x24xbf16>
    %515 = vector.extract_strided_slice %471 {offsets = [1, 0], sizes = [1, 24], strides = [1, 1]} : vector<9x24xf32> to vector<1x24xf32>
    %516 = vector.broadcast %502 : vector<1x24xf32> to vector<6x24xf32>
    %517 = arith.mulf %516, %13 : vector<6x24xf32>
    %cst_269 = arith.constant dense<0.000000e+00> : vector<6x8xf32>
    %518 = tpu.matmul %517, %511, %cst_269 {dimension_numbers = #tpu.dot_dimension_numbers<[1], [1], [0], [0], [0, 0, 1, 0], [], []>} : vector<6x24xf32>, vector<8x24xf32>, vector<6x8xf32> -> vector<6x8xf32>
    %cst_270 = arith.constant dense<0xFF800000> : vector<6xf32>
    %519 = vector.multi_reduction <maximumf>, %518, %cst_270 [1] : vector<6x8xf32> to vector<6xf32>
    %520 = vector.shape_cast %519 : vector<6xf32> to vector<6x1xf32>
    %521 = vector.broadcast %520 : vector<6x1xf32> to vector<6x8xf32>
    %522 = arith.subf %518, %521 : vector<6x8xf32>
    %523 = math.exp %522 : vector<6x8xf32>
    %cst_271 = arith.constant dense<0.000000e+00> : vector<6xf32>
    %524 = vector.multi_reduction <add>, %523, %cst_271 [1] : vector<6x8xf32> to vector<6xf32>
    %525 = vector.shape_cast %524 : vector<6xf32> to vector<6x1xf32>
    %526 = tpu.reciprocal %525 {approx = true} : vector<6x1xf32> -> vector<6x1xf32>
    %527 = vector.broadcast %526 : vector<6x1xf32> to vector<6x8xf32>
    %528 = arith.mulf %523, %527 : vector<6x8xf32>
    %cst_272 = arith.constant dense<0.000000e+00> : vector<6x24xf32>
    %529 = tpu.matmul %528, %512, %cst_272 {dimension_numbers = #tpu.dot_dimension_numbers<[1], [0], [0], [1], [0, 0, 1, 1], [], []>} : vector<6x8xf32>, vector<8x24xf32>, vector<6x24xf32> -> vector<6x24xf32>
    %530 = arith.mulf %529, %13 : vector<6x24xf32>
    %cst_273 = arith.constant dense<0.000000e+00> : vector<24xf32>
    %531 = vector.multi_reduction <add>, %530, %cst_273 [0] : vector<6x24xf32> to vector<24xf32>
    %532 = vector.shape_cast %531 : vector<24xf32> to vector<1x24xf32>
    %533 = arith.truncf %532 : vector<1x24xf32> to vector<1x24xbf16>
    %cst_274 = arith.constant dense<0.000000e+00> : vector<1x24xf32>
    %534 = tpu.matmul %533, %514, %cst_274 {dimension_numbers = #tpu.dot_dimension_numbers<[1], [0], [0], [1], [0, 0, 1, 1], [], []>} : vector<1x24xbf16>, vector<24x24xbf16>, vector<1x24xf32> -> vector<1x24xf32>
    %535 = arith.addf %534, %515 : vector<1x24xf32>
    %536 = arith.addf %496, %535 : vector<1x24xf32>
    %537 = vector.extract_strided_slice %471 {offsets = [4, 0], sizes = [1, 24], strides = [1, 1]} : vector<9x24xf32> to vector<1x24xf32>
    %538 = vector.extract_strided_slice %471 {offsets = [5, 0], sizes = [1, 24], strides = [1, 1]} : vector<9x24xf32> to vector<1x24xf32>
    %cst_275 = arith.constant dense<0.000000e+00> : vector<1xf32>
    %539 = vector.multi_reduction <add>, %536, %cst_275 [1] : vector<1x24xf32> to vector<1xf32>
    %540 = vector.shape_cast %539 : vector<1xf32> to vector<1x1xf32>
    %cst_276 = arith.constant 2.400000e+01 : f32
    %541 = vector.broadcast %cst_276 : f32 to vector<1x1xf32>
    %542 = arith.divf %540, %541 : vector<1x1xf32>
    %543 = arith.mulf %536, %536 : vector<1x24xf32>
    %cst_277 = arith.constant dense<0.000000e+00> : vector<1xf32>
    %544 = vector.multi_reduction <add>, %543, %cst_277 [1] : vector<1x24xf32> to vector<1xf32>
    %545 = vector.shape_cast %544 : vector<1xf32> to vector<1x1xf32>
    %cst_278 = arith.constant 2.400000e+01 : f32
    %546 = vector.broadcast %cst_278 : f32 to vector<1x1xf32>
    %547 = arith.divf %545, %546 : vector<1x1xf32>
    %548 = arith.mulf %542, %542 : vector<1x1xf32>
    %549 = arith.subf %547, %548 : vector<1x1xf32>
    %cst_279 = arith.constant 0.000000e+00 : f32
    %550 = vector.broadcast %cst_279 : f32 to vector<1x1xf32>
    %551 = arith.maximumf %549, %550 : vector<1x1xf32>
    %552 = vector.broadcast %542 : vector<1x1xf32> to vector<1x24xf32>
    %553 = arith.subf %536, %552 : vector<1x24xf32>
    %cst_280 = arith.constant 9.99999974E-6 : f32
    %554 = vector.broadcast %cst_280 : f32 to vector<1x1xf32>
    %555 = arith.addf %551, %554 : vector<1x1xf32>
    %556 = math.rsqrt %555 : vector<1x1xf32>
    %557 = vector.broadcast %556 : vector<1x1xf32> to vector<1x24xf32>
    %558 = arith.mulf %553, %557 : vector<1x24xf32>
    %559 = arith.mulf %558, %537 : vector<1x24xf32>
    %560 = arith.addf %559, %538 : vector<1x24xf32>
    %c4_i32 = arith.constant 4 : i32
    %c0_i32_281 = arith.constant 0 : i32
    %c0_i32_282 = arith.constant 0 : i32
    %c0_i32_283 = arith.constant 0 : i32
    %c0_i32_284 = arith.constant 0 : i32
    %c0_i32_285 = arith.constant 0 : i32
    %561 = tpu.memref_slice %arg17[%c4_i32, %c0_i32_284, %c0_i32_285] : memref<6x24x2048xbf16, #tpu.memory_space<any>> -> memref<1x24x2048xbf16, #tpu.memory_space<any>>
    %562 = tpu.memref_squeeze %561 : memref<1x24x2048xbf16, #tpu.memory_space<any>> -> memref<24x2048xbf16, #tpu.memory_space<any>>
    %c0_i32_286 = arith.constant 0 : i32
    %c0_i32_287 = arith.constant 0 : i32
    %563 = tpu.memref_slice %arg20[%c0_i32_281, %c0_i32_286, %c0_i32_287] : memref<2x24x2048xbf16, #tpu.memory_space<vmem>> -> memref<1x24x2048xbf16, #tpu.memory_space<vmem>>
    %564 = tpu.memref_squeeze %563 : memref<1x24x2048xbf16, #tpu.memory_space<vmem>> -> memref<24x2048xbf16, #tpu.memory_space<vmem>>
    %565 = tpu.memref_slice %arg22[%c0_i32_282, %c0_i32_283] : memref<2x2x!tpu.dma_semaphore, #tpu.memory_space<semaphore_mem>> -> memref<1x1x!tpu.dma_semaphore, #tpu.memory_space<semaphore_mem>>
    %566 = tpu.memref_squeeze %565 : memref<1x1x!tpu.dma_semaphore, #tpu.memory_space<semaphore_mem>> -> memref<!tpu.dma_semaphore, #tpu.memory_space<semaphore_mem>>
    tpu.enqueue_dma source(%562 : memref<24x2048xbf16, #tpu.memory_space<any>>) target(%564 : memref<24x2048xbf16, #tpu.memory_space<vmem>>) target_semaphore(%566 : memref<!tpu.dma_semaphore, #tpu.memory_space<semaphore_mem>>)
    %c4_i32_288 = arith.constant 4 : i32
    %c0_i32_289 = arith.constant 0 : i32
    %c1_i32_290 = arith.constant 1 : i32
    %c0_i32_291 = arith.constant 0 : i32
    %c0_i32_292 = arith.constant 0 : i32
    %c0_i32_293 = arith.constant 0 : i32
    %567 = tpu.memref_slice %arg18[%c4_i32_288, %c0_i32_292, %c0_i32_293] : memref<6x24x2048xbf16, #tpu.memory_space<any>> -> memref<1x24x2048xbf16, #tpu.memory_space<any>>
    %568 = tpu.memref_squeeze %567 : memref<1x24x2048xbf16, #tpu.memory_space<any>> -> memref<24x2048xbf16, #tpu.memory_space<any>>
    %c0_i32_294 = arith.constant 0 : i32
    %c0_i32_295 = arith.constant 0 : i32
    %569 = tpu.memref_slice %arg21[%c0_i32_289, %c0_i32_294, %c0_i32_295] : memref<2x24x2048xbf16, #tpu.memory_space<vmem>> -> memref<1x24x2048xbf16, #tpu.memory_space<vmem>>
    %570 = tpu.memref_squeeze %569 : memref<1x24x2048xbf16, #tpu.memory_space<vmem>> -> memref<24x2048xbf16, #tpu.memory_space<vmem>>
    %571 = tpu.memref_slice %arg22[%c1_i32_290, %c0_i32_291] : memref<2x2x!tpu.dma_semaphore, #tpu.memory_space<semaphore_mem>> -> memref<1x1x!tpu.dma_semaphore, #tpu.memory_space<semaphore_mem>>
    %572 = tpu.memref_squeeze %571 : memref<1x1x!tpu.dma_semaphore, #tpu.memory_space<semaphore_mem>> -> memref<!tpu.dma_semaphore, #tpu.memory_space<semaphore_mem>>
    tpu.enqueue_dma source(%568 : memref<24x2048xbf16, #tpu.memory_space<any>>) target(%570 : memref<24x2048xbf16, #tpu.memory_space<vmem>>) target_semaphore(%572 : memref<!tpu.dma_semaphore, #tpu.memory_space<semaphore_mem>>)
    %c3_i32_296 = arith.constant 3 : i32
    %c1_i32_297 = arith.constant 1 : i32
    %c0_i32_298 = arith.constant 0 : i32
    %c1_i32_299 = arith.constant 1 : i32
    %c0_i32_300 = arith.constant 0 : i32
    %c0_i32_301 = arith.constant 0 : i32
    %573 = tpu.memref_slice %arg17[%c3_i32_296, %c0_i32_300, %c0_i32_301] : memref<6x24x2048xbf16, #tpu.memory_space<any>> -> memref<1x24x2048xbf16, #tpu.memory_space<any>>
    %574 = tpu.memref_squeeze %573 : memref<1x24x2048xbf16, #tpu.memory_space<any>> -> memref<24x2048xbf16, #tpu.memory_space<any>>
    %c0_i32_302 = arith.constant 0 : i32
    %c0_i32_303 = arith.constant 0 : i32
    %575 = tpu.memref_slice %arg20[%c1_i32_297, %c0_i32_302, %c0_i32_303] : memref<2x24x2048xbf16, #tpu.memory_space<vmem>> -> memref<1x24x2048xbf16, #tpu.memory_space<vmem>>
    %576 = tpu.memref_squeeze %575 : memref<1x24x2048xbf16, #tpu.memory_space<vmem>> -> memref<24x2048xbf16, #tpu.memory_space<vmem>>
    %577 = tpu.memref_slice %arg22[%c0_i32_298, %c1_i32_299] : memref<2x2x!tpu.dma_semaphore, #tpu.memory_space<semaphore_mem>> -> memref<1x1x!tpu.dma_semaphore, #tpu.memory_space<semaphore_mem>>
    %578 = tpu.memref_squeeze %577 : memref<1x1x!tpu.dma_semaphore, #tpu.memory_space<semaphore_mem>> -> memref<!tpu.dma_semaphore, #tpu.memory_space<semaphore_mem>>
    tpu.wait_dma2 semaphore(%578 : memref<!tpu.dma_semaphore, #tpu.memory_space<semaphore_mem>>) src(%574 : memref<24x2048xbf16, #tpu.memory_space<any>>) dst(%576 : memref<24x2048xbf16, #tpu.memory_space<vmem>>)
    %c3_i32_304 = arith.constant 3 : i32
    %c1_i32_305 = arith.constant 1 : i32
    %c1_i32_306 = arith.constant 1 : i32
    %c1_i32_307 = arith.constant 1 : i32
    %c0_i32_308 = arith.constant 0 : i32
    %c0_i32_309 = arith.constant 0 : i32
    %579 = tpu.memref_slice %arg18[%c3_i32_304, %c0_i32_308, %c0_i32_309] : memref<6x24x2048xbf16, #tpu.memory_space<any>> -> memref<1x24x2048xbf16, #tpu.memory_space<any>>
    %580 = tpu.memref_squeeze %579 : memref<1x24x2048xbf16, #tpu.memory_space<any>> -> memref<24x2048xbf16, #tpu.memory_space<any>>
    %c0_i32_310 = arith.constant 0 : i32
    %c0_i32_311 = arith.constant 0 : i32
    %581 = tpu.memref_slice %arg21[%c1_i32_305, %c0_i32_310, %c0_i32_311] : memref<2x24x2048xbf16, #tpu.memory_space<vmem>> -> memref<1x24x2048xbf16, #tpu.memory_space<vmem>>
    %582 = tpu.memref_squeeze %581 : memref<1x24x2048xbf16, #tpu.memory_space<vmem>> -> memref<24x2048xbf16, #tpu.memory_space<vmem>>
    %583 = tpu.memref_slice %arg22[%c1_i32_306, %c1_i32_307] : memref<2x2x!tpu.dma_semaphore, #tpu.memory_space<semaphore_mem>> -> memref<1x1x!tpu.dma_semaphore, #tpu.memory_space<semaphore_mem>>
    %584 = tpu.memref_squeeze %583 : memref<1x1x!tpu.dma_semaphore, #tpu.memory_space<semaphore_mem>> -> memref<!tpu.dma_semaphore, #tpu.memory_space<semaphore_mem>>
    tpu.wait_dma2 semaphore(%584 : memref<!tpu.dma_semaphore, #tpu.memory_space<semaphore_mem>>) src(%580 : memref<24x2048xbf16, #tpu.memory_space<any>>) dst(%582 : memref<24x2048xbf16, #tpu.memory_space<vmem>>)
    %c1_312 = arith.constant 1 : index
    %c0_313 = arith.constant 0 : index
    %c0_314 = arith.constant 0 : index
    %585 = vector.load %arg20[%c1_312, %c0_313, %c0_314] : memref<2x24x2048xbf16, #tpu.memory_space<vmem>>, vector<1x24x2048xbf16>
    %586 = vector.shape_cast %585 : vector<1x24x2048xbf16> to vector<24x2048xbf16>
    %c3 = arith.constant 3 : index
    %c0_315 = arith.constant 0 : index
    %c0_316 = arith.constant 0 : index
    %587 = vector.load %arg13[%c3, %c0_315, %c0_316] : memref<6x1x2048xf32, #tpu.memory_space<vmem>>, vector<1x1x2048xf32>
    %588 = vector.shape_cast %587 : vector<1x1x2048xf32> to vector<1x2048xf32>
    %c1_317 = arith.constant 1 : index
    %c0_318 = arith.constant 0 : index
    %c0_319 = arith.constant 0 : index
    %589 = vector.load %arg21[%c1_317, %c0_318, %c0_319] : memref<2x24x2048xbf16, #tpu.memory_space<vmem>>, vector<1x24x2048xbf16>
    %590 = vector.shape_cast %589 : vector<1x24x2048xbf16> to vector<24x2048xbf16>
    %591 = vector.extract_strided_slice %471 {offsets = [8, 0], sizes = [1, 24], strides = [1, 1]} : vector<9x24xf32> to vector<1x24xf32>
    %592 = arith.truncf %560 : vector<1x24xf32> to vector<1x24xbf16>
    %cst_320 = arith.constant dense<0.000000e+00> : vector<1x2048xf32>
    %593 = tpu.matmul %592, %586, %cst_320 {dimension_numbers = #tpu.dot_dimension_numbers<[1], [0], [0], [1], [0, 0, 1, 1], [], []>} : vector<1x24xbf16>, vector<24x2048xbf16>, vector<1x2048xf32> -> vector<1x2048xf32>
    %594 = arith.addf %593, %588 : vector<1x2048xf32>
    %cst_321 = arith.constant 0.000000e+00 : f32
    %595 = vector.broadcast %cst_321 : f32 to vector<1x2048xf32>
    %596 = arith.maximumf %594, %595 : vector<1x2048xf32>
    %597 = arith.truncf %596 : vector<1x2048xf32> to vector<1x2048xbf16>
    %cst_322 = arith.constant dense<0.000000e+00> : vector<1x24xf32>
    %598 = tpu.matmul %597, %590, %cst_322 {dimension_numbers = #tpu.dot_dimension_numbers<[1], [1], [0], [0], [0, 0, 1, 0], [], []>} : vector<1x2048xbf16>, vector<24x2048xbf16>, vector<1x24xf32> -> vector<1x24xf32>
    %599 = arith.addf %598, %591 : vector<1x24xf32>
    %600 = arith.addf %560, %599 : vector<1x24xf32>
    %601 = vector.extract_strided_slice %471 {offsets = [6, 0], sizes = [1, 24], strides = [1, 1]} : vector<9x24xf32> to vector<1x24xf32>
    %602 = vector.extract_strided_slice %471 {offsets = [7, 0], sizes = [1, 24], strides = [1, 1]} : vector<9x24xf32> to vector<1x24xf32>
    %cst_323 = arith.constant dense<0.000000e+00> : vector<1xf32>
    %603 = vector.multi_reduction <add>, %600, %cst_323 [1] : vector<1x24xf32> to vector<1xf32>
    %604 = vector.shape_cast %603 : vector<1xf32> to vector<1x1xf32>
    %cst_324 = arith.constant 2.400000e+01 : f32
    %605 = vector.broadcast %cst_324 : f32 to vector<1x1xf32>
    %606 = arith.divf %604, %605 : vector<1x1xf32>
    %607 = arith.mulf %600, %600 : vector<1x24xf32>
    %cst_325 = arith.constant dense<0.000000e+00> : vector<1xf32>
    %608 = vector.multi_reduction <add>, %607, %cst_325 [1] : vector<1x24xf32> to vector<1xf32>
    %609 = vector.shape_cast %608 : vector<1xf32> to vector<1x1xf32>
    %cst_326 = arith.constant 2.400000e+01 : f32
    %610 = vector.broadcast %cst_326 : f32 to vector<1x1xf32>
    %611 = arith.divf %609, %610 : vector<1x1xf32>
    %612 = arith.mulf %606, %606 : vector<1x1xf32>
    %613 = arith.subf %611, %612 : vector<1x1xf32>
    %cst_327 = arith.constant 0.000000e+00 : f32
    %614 = vector.broadcast %cst_327 : f32 to vector<1x1xf32>
    %615 = arith.maximumf %613, %614 : vector<1x1xf32>
    %616 = vector.broadcast %606 : vector<1x1xf32> to vector<1x24xf32>
    %617 = arith.subf %600, %616 : vector<1x24xf32>
    %cst_328 = arith.constant 9.99999974E-6 : f32
    %618 = vector.broadcast %cst_328 : f32 to vector<1x1xf32>
    %619 = arith.addf %615, %618 : vector<1x1xf32>
    %620 = math.rsqrt %619 : vector<1x1xf32>
    %621 = vector.broadcast %620 : vector<1x1xf32> to vector<1x24xf32>
    %622 = arith.mulf %617, %621 : vector<1x24xf32>
    %623 = arith.mulf %622, %601 : vector<1x24xf32>
    %624 = arith.addf %623, %602 : vector<1x24xf32>
    %c1_329 = arith.constant 1 : index
    %c0_330 = arith.constant 0 : index
    %c0_331 = arith.constant 0 : index
    %625 = vector.load %arg12[%c1_329, %c0_330, %c0_331] : memref<3x9x24xf32, #tpu.memory_space<vmem>>, vector<1x9x24xf32>
    %626 = vector.shape_cast %625 : vector<1x9x24xf32> to vector<9x24xf32>
    %627 = arith.addf %624, %624 : vector<1x24xf32>
    %628 = vector.extract_strided_slice %626 {offsets = [2, 0], sizes = [1, 24], strides = [1, 1]} : vector<9x24xf32> to vector<1x24xf32>
    %629 = vector.extract_strided_slice %626 {offsets = [3, 0], sizes = [1, 24], strides = [1, 1]} : vector<9x24xf32> to vector<1x24xf32>
    %cst_332 = arith.constant dense<0.000000e+00> : vector<1xf32>
    %630 = vector.multi_reduction <add>, %627, %cst_332 [1] : vector<1x24xf32> to vector<1xf32>
    %631 = vector.shape_cast %630 : vector<1xf32> to vector<1x1xf32>
    %cst_333 = arith.constant 2.400000e+01 : f32
    %632 = vector.broadcast %cst_333 : f32 to vector<1x1xf32>
    %633 = arith.divf %631, %632 : vector<1x1xf32>
    %634 = arith.mulf %627, %627 : vector<1x24xf32>
    %cst_334 = arith.constant dense<0.000000e+00> : vector<1xf32>
    %635 = vector.multi_reduction <add>, %634, %cst_334 [1] : vector<1x24xf32> to vector<1xf32>
    %636 = vector.shape_cast %635 : vector<1xf32> to vector<1x1xf32>
    %cst_335 = arith.constant 2.400000e+01 : f32
    %637 = vector.broadcast %cst_335 : f32 to vector<1x1xf32>
    %638 = arith.divf %636, %637 : vector<1x1xf32>
    %639 = arith.mulf %633, %633 : vector<1x1xf32>
    %640 = arith.subf %638, %639 : vector<1x1xf32>
    %cst_336 = arith.constant 0.000000e+00 : f32
    %641 = vector.broadcast %cst_336 : f32 to vector<1x1xf32>
    %642 = arith.maximumf %640, %641 : vector<1x1xf32>
    %643 = vector.broadcast %633 : vector<1x1xf32> to vector<1x24xf32>
    %644 = arith.subf %627, %643 : vector<1x24xf32>
    %cst_337 = arith.constant 9.99999974E-6 : f32
    %645 = vector.broadcast %cst_337 : f32 to vector<1x1xf32>
    %646 = arith.addf %642, %645 : vector<1x1xf32>
    %647 = math.rsqrt %646 : vector<1x1xf32>
    %648 = vector.broadcast %647 : vector<1x1xf32> to vector<1x24xf32>
    %649 = arith.mulf %644, %648 : vector<1x24xf32>
    %650 = arith.mulf %649, %628 : vector<1x24xf32>
    %651 = arith.addf %650, %629 : vector<1x24xf32>
    %c1_338 = arith.constant 1 : index
    %c0_339 = arith.constant 0 : index
    %c0_340 = arith.constant 0 : index
    %652 = vector.load %arg8[%c1_338, %c0_339, %c0_340] : memref<3x24x24xbf16, #tpu.memory_space<vmem>>, vector<1x24x24xbf16>
    %653 = vector.shape_cast %652 : vector<1x24x24xbf16> to vector<24x24xbf16>
    %654 = arith.truncf %651 : vector<1x24xf32> to vector<1x24xbf16>
    %cst_341 = arith.constant dense<0.000000e+00> : vector<1x24xf32>
    %655 = tpu.matmul %654, %653, %cst_341 {dimension_numbers = #tpu.dot_dimension_numbers<[1], [0], [0], [1], [0, 0, 1, 1], [], []>} : vector<1x24xbf16>, vector<24x24xbf16>, vector<1x24xf32> -> vector<1x24xf32>
    %656 = vector.extract_strided_slice %626 {offsets = [0, 0], sizes = [1, 24], strides = [1, 1]} : vector<9x24xf32> to vector<1x24xf32>
    %657 = arith.addf %655, %656 : vector<1x24xf32>
    %c1_342 = arith.constant 1 : index
    %c0_343 = arith.constant 0 : index
    %c0_344 = arith.constant 0 : index
    %658 = vector.load %arg9[%c1_342, %c0_343, %c0_344] : memref<3x24x48xbf16, #tpu.memory_space<vmem>>, vector<1x24x48xbf16>
    %659 = vector.shape_cast %658 : vector<1x24x48xbf16> to vector<24x48xbf16>
    %660 = arith.truncf %468 : vector<8x24xf32> to vector<8x24xbf16>
    %cst_345 = arith.constant dense<0.000000e+00> : vector<8x48xf32>
    %661 = tpu.matmul %660, %659, %cst_345 {dimension_numbers = #tpu.dot_dimension_numbers<[1], [0], [0], [1], [0, 0, 1, 1], [], []>} : vector<8x24xbf16>, vector<24x48xbf16>, vector<8x48xf32> -> vector<8x48xf32>
    %c1_346 = arith.constant 1 : index
    %c0_347 = arith.constant 0 : index
    %c0_348 = arith.constant 0 : index
    %662 = vector.load %arg11[%c1_346, %c0_347, %c0_348] : memref<3x1x48xf32, #tpu.memory_space<vmem>>, vector<1x1x48xf32>
    %663 = vector.shape_cast %662 : vector<1x1x48xf32> to vector<1x48xf32>
    %664 = vector.broadcast %663 : vector<1x48xf32> to vector<8x48xf32>
    %665 = arith.addf %661, %664 : vector<8x48xf32>
    %666 = vector.extract_strided_slice %665 {offsets = [0, 0], sizes = [8, 24], strides = [1, 1]} : vector<8x48xf32> to vector<8x24xf32>
    %667 = vector.extract_strided_slice %665 {offsets = [0, 24], sizes = [8, 24], strides = [1, 1]} : vector<8x48xf32> to vector<8x24xf32>
    %c1_349 = arith.constant 1 : index
    %c0_350 = arith.constant 0 : index
    %c0_351 = arith.constant 0 : index
    %668 = vector.load %arg10[%c1_349, %c0_350, %c0_351] : memref<3x24x24xbf16, #tpu.memory_space<vmem>>, vector<1x24x24xbf16>
    %669 = vector.shape_cast %668 : vector<1x24x24xbf16> to vector<24x24xbf16>
    %670 = vector.extract_strided_slice %626 {offsets = [1, 0], sizes = [1, 24], strides = [1, 1]} : vector<9x24xf32> to vector<1x24xf32>
    %671 = vector.broadcast %657 : vector<1x24xf32> to vector<6x24xf32>
    %672 = arith.mulf %671, %13 : vector<6x24xf32>
    %cst_352 = arith.constant dense<0.000000e+00> : vector<6x8xf32>
    %673 = tpu.matmul %672, %666, %cst_352 {dimension_numbers = #tpu.dot_dimension_numbers<[1], [1], [0], [0], [0, 0, 1, 0], [], []>} : vector<6x24xf32>, vector<8x24xf32>, vector<6x8xf32> -> vector<6x8xf32>
    %cst_353 = arith.constant dense<0xFF800000> : vector<6xf32>
    %674 = vector.multi_reduction <maximumf>, %673, %cst_353 [1] : vector<6x8xf32> to vector<6xf32>
    %675 = vector.shape_cast %674 : vector<6xf32> to vector<6x1xf32>
    %676 = vector.broadcast %675 : vector<6x1xf32> to vector<6x8xf32>
    %677 = arith.subf %673, %676 : vector<6x8xf32>
    %678 = math.exp %677 : vector<6x8xf32>
    %cst_354 = arith.constant dense<0.000000e+00> : vector<6xf32>
    %679 = vector.multi_reduction <add>, %678, %cst_354 [1] : vector<6x8xf32> to vector<6xf32>
    %680 = vector.shape_cast %679 : vector<6xf32> to vector<6x1xf32>
    %681 = tpu.reciprocal %680 {approx = true} : vector<6x1xf32> -> vector<6x1xf32>
    %682 = vector.broadcast %681 : vector<6x1xf32> to vector<6x8xf32>
    %683 = arith.mulf %678, %682 : vector<6x8xf32>
    %cst_355 = arith.constant dense<0.000000e+00> : vector<6x24xf32>
    %684 = tpu.matmul %683, %667, %cst_355 {dimension_numbers = #tpu.dot_dimension_numbers<[1], [0], [0], [1], [0, 0, 1, 1], [], []>} : vector<6x8xf32>, vector<8x24xf32>, vector<6x24xf32> -> vector<6x24xf32>
    %685 = arith.mulf %684, %13 : vector<6x24xf32>
    %cst_356 = arith.constant dense<0.000000e+00> : vector<24xf32>
    %686 = vector.multi_reduction <add>, %685, %cst_356 [0] : vector<6x24xf32> to vector<24xf32>
    %687 = vector.shape_cast %686 : vector<24xf32> to vector<1x24xf32>
    %688 = arith.truncf %687 : vector<1x24xf32> to vector<1x24xbf16>
    %cst_357 = arith.constant dense<0.000000e+00> : vector<1x24xf32>
    %689 = tpu.matmul %688, %669, %cst_357 {dimension_numbers = #tpu.dot_dimension_numbers<[1], [0], [0], [1], [0, 0, 1, 1], [], []>} : vector<1x24xbf16>, vector<24x24xbf16>, vector<1x24xf32> -> vector<1x24xf32>
    %690 = arith.addf %689, %670 : vector<1x24xf32>
    %691 = arith.addf %651, %690 : vector<1x24xf32>
    %692 = vector.extract_strided_slice %626 {offsets = [4, 0], sizes = [1, 24], strides = [1, 1]} : vector<9x24xf32> to vector<1x24xf32>
    %693 = vector.extract_strided_slice %626 {offsets = [5, 0], sizes = [1, 24], strides = [1, 1]} : vector<9x24xf32> to vector<1x24xf32>
    %cst_358 = arith.constant dense<0.000000e+00> : vector<1xf32>
    %694 = vector.multi_reduction <add>, %691, %cst_358 [1] : vector<1x24xf32> to vector<1xf32>
    %695 = vector.shape_cast %694 : vector<1xf32> to vector<1x1xf32>
    %cst_359 = arith.constant 2.400000e+01 : f32
    %696 = vector.broadcast %cst_359 : f32 to vector<1x1xf32>
    %697 = arith.divf %695, %696 : vector<1x1xf32>
    %698 = arith.mulf %691, %691 : vector<1x24xf32>
    %cst_360 = arith.constant dense<0.000000e+00> : vector<1xf32>
    %699 = vector.multi_reduction <add>, %698, %cst_360 [1] : vector<1x24xf32> to vector<1xf32>
    %700 = vector.shape_cast %699 : vector<1xf32> to vector<1x1xf32>
    %cst_361 = arith.constant 2.400000e+01 : f32
    %701 = vector.broadcast %cst_361 : f32 to vector<1x1xf32>
    %702 = arith.divf %700, %701 : vector<1x1xf32>
    %703 = arith.mulf %697, %697 : vector<1x1xf32>
    %704 = arith.subf %702, %703 : vector<1x1xf32>
    %cst_362 = arith.constant 0.000000e+00 : f32
    %705 = vector.broadcast %cst_362 : f32 to vector<1x1xf32>
    %706 = arith.maximumf %704, %705 : vector<1x1xf32>
    %707 = vector.broadcast %697 : vector<1x1xf32> to vector<1x24xf32>
    %708 = arith.subf %691, %707 : vector<1x24xf32>
    %cst_363 = arith.constant 9.99999974E-6 : f32
    %709 = vector.broadcast %cst_363 : f32 to vector<1x1xf32>
    %710 = arith.addf %706, %709 : vector<1x1xf32>
    %711 = math.rsqrt %710 : vector<1x1xf32>
    %712 = vector.broadcast %711 : vector<1x1xf32> to vector<1x24xf32>
    %713 = arith.mulf %708, %712 : vector<1x24xf32>
    %714 = arith.mulf %713, %692 : vector<1x24xf32>
    %715 = arith.addf %714, %693 : vector<1x24xf32>
    %c5_i32 = arith.constant 5 : i32
    %c1_i32_364 = arith.constant 1 : i32
    %c0_i32_365 = arith.constant 0 : i32
    %c1_i32_366 = arith.constant 1 : i32
    %c0_i32_367 = arith.constant 0 : i32
    %c0_i32_368 = arith.constant 0 : i32
    %716 = tpu.memref_slice %arg17[%c5_i32, %c0_i32_367, %c0_i32_368] : memref<6x24x2048xbf16, #tpu.memory_space<any>> -> memref<1x24x2048xbf16, #tpu.memory_space<any>>
    %717 = tpu.memref_squeeze %716 : memref<1x24x2048xbf16, #tpu.memory_space<any>> -> memref<24x2048xbf16, #tpu.memory_space<any>>
    %c0_i32_369 = arith.constant 0 : i32
    %c0_i32_370 = arith.constant 0 : i32
    %718 = tpu.memref_slice %arg20[%c1_i32_364, %c0_i32_369, %c0_i32_370] : memref<2x24x2048xbf16, #tpu.memory_space<vmem>> -> memref<1x24x2048xbf16, #tpu.memory_space<vmem>>
    %719 = tpu.memref_squeeze %718 : memref<1x24x2048xbf16, #tpu.memory_space<vmem>> -> memref<24x2048xbf16, #tpu.memory_space<vmem>>
    %720 = tpu.memref_slice %arg22[%c0_i32_365, %c1_i32_366] : memref<2x2x!tpu.dma_semaphore, #tpu.memory_space<semaphore_mem>> -> memref<1x1x!tpu.dma_semaphore, #tpu.memory_space<semaphore_mem>>
    %721 = tpu.memref_squeeze %720 : memref<1x1x!tpu.dma_semaphore, #tpu.memory_space<semaphore_mem>> -> memref<!tpu.dma_semaphore, #tpu.memory_space<semaphore_mem>>
    tpu.enqueue_dma source(%717 : memref<24x2048xbf16, #tpu.memory_space<any>>) target(%719 : memref<24x2048xbf16, #tpu.memory_space<vmem>>) target_semaphore(%721 : memref<!tpu.dma_semaphore, #tpu.memory_space<semaphore_mem>>)
    %c5_i32_371 = arith.constant 5 : i32
    %c1_i32_372 = arith.constant 1 : i32
    %c1_i32_373 = arith.constant 1 : i32
    %c1_i32_374 = arith.constant 1 : i32
    %c0_i32_375 = arith.constant 0 : i32
    %c0_i32_376 = arith.constant 0 : i32
    %722 = tpu.memref_slice %arg18[%c5_i32_371, %c0_i32_375, %c0_i32_376] : memref<6x24x2048xbf16, #tpu.memory_space<any>> -> memref<1x24x2048xbf16, #tpu.memory_space<any>>
    %723 = tpu.memref_squeeze %722 : memref<1x24x2048xbf16, #tpu.memory_space<any>> -> memref<24x2048xbf16, #tpu.memory_space<any>>
    %c0_i32_377 = arith.constant 0 : i32
    %c0_i32_378 = arith.constant 0 : i32
    %724 = tpu.memref_slice %arg21[%c1_i32_372, %c0_i32_377, %c0_i32_378] : memref<2x24x2048xbf16, #tpu.memory_space<vmem>> -> memref<1x24x2048xbf16, #tpu.memory_space<vmem>>
    %725 = tpu.memref_squeeze %724 : memref<1x24x2048xbf16, #tpu.memory_space<vmem>> -> memref<24x2048xbf16, #tpu.memory_space<vmem>>
    %726 = tpu.memref_slice %arg22[%c1_i32_373, %c1_i32_374] : memref<2x2x!tpu.dma_semaphore, #tpu.memory_space<semaphore_mem>> -> memref<1x1x!tpu.dma_semaphore, #tpu.memory_space<semaphore_mem>>
    %727 = tpu.memref_squeeze %726 : memref<1x1x!tpu.dma_semaphore, #tpu.memory_space<semaphore_mem>> -> memref<!tpu.dma_semaphore, #tpu.memory_space<semaphore_mem>>
    tpu.enqueue_dma source(%723 : memref<24x2048xbf16, #tpu.memory_space<any>>) target(%725 : memref<24x2048xbf16, #tpu.memory_space<vmem>>) target_semaphore(%727 : memref<!tpu.dma_semaphore, #tpu.memory_space<semaphore_mem>>)
    %c4_i32_379 = arith.constant 4 : i32
    %c0_i32_380 = arith.constant 0 : i32
    %c0_i32_381 = arith.constant 0 : i32
    %c0_i32_382 = arith.constant 0 : i32
    %c0_i32_383 = arith.constant 0 : i32
    %c0_i32_384 = arith.constant 0 : i32
    %728 = tpu.memref_slice %arg17[%c4_i32_379, %c0_i32_383, %c0_i32_384] : memref<6x24x2048xbf16, #tpu.memory_space<any>> -> memref<1x24x2048xbf16, #tpu.memory_space<any>>
    %729 = tpu.memref_squeeze %728 : memref<1x24x2048xbf16, #tpu.memory_space<any>> -> memref<24x2048xbf16, #tpu.memory_space<any>>
    %c0_i32_385 = arith.constant 0 : i32
    %c0_i32_386 = arith.constant 0 : i32
    %730 = tpu.memref_slice %arg20[%c0_i32_380, %c0_i32_385, %c0_i32_386] : memref<2x24x2048xbf16, #tpu.memory_space<vmem>> -> memref<1x24x2048xbf16, #tpu.memory_space<vmem>>
    %731 = tpu.memref_squeeze %730 : memref<1x24x2048xbf16, #tpu.memory_space<vmem>> -> memref<24x2048xbf16, #tpu.memory_space<vmem>>
    %732 = tpu.memref_slice %arg22[%c0_i32_381, %c0_i32_382] : memref<2x2x!tpu.dma_semaphore, #tpu.memory_space<semaphore_mem>> -> memref<1x1x!tpu.dma_semaphore, #tpu.memory_space<semaphore_mem>>
    %733 = tpu.memref_squeeze %732 : memref<1x1x!tpu.dma_semaphore, #tpu.memory_space<semaphore_mem>> -> memref<!tpu.dma_semaphore, #tpu.memory_space<semaphore_mem>>
    tpu.wait_dma2 semaphore(%733 : memref<!tpu.dma_semaphore, #tpu.memory_space<semaphore_mem>>) src(%729 : memref<24x2048xbf16, #tpu.memory_space<any>>) dst(%731 : memref<24x2048xbf16, #tpu.memory_space<vmem>>)
    %c4_i32_387 = arith.constant 4 : i32
    %c0_i32_388 = arith.constant 0 : i32
    %c1_i32_389 = arith.constant 1 : i32
    %c0_i32_390 = arith.constant 0 : i32
    %c0_i32_391 = arith.constant 0 : i32
    %c0_i32_392 = arith.constant 0 : i32
    %734 = tpu.memref_slice %arg18[%c4_i32_387, %c0_i32_391, %c0_i32_392] : memref<6x24x2048xbf16, #tpu.memory_space<any>> -> memref<1x24x2048xbf16, #tpu.memory_space<any>>
    %735 = tpu.memref_squeeze %734 : memref<1x24x2048xbf16, #tpu.memory_space<any>> -> memref<24x2048xbf16, #tpu.memory_space<any>>
    %c0_i32_393 = arith.constant 0 : i32
    %c0_i32_394 = arith.constant 0 : i32
    %736 = tpu.memref_slice %arg21[%c0_i32_388, %c0_i32_393, %c0_i32_394] : memref<2x24x2048xbf16, #tpu.memory_space<vmem>> -> memref<1x24x2048xbf16, #tpu.memory_space<vmem>>
    %737 = tpu.memref_squeeze %736 : memref<1x24x2048xbf16, #tpu.memory_space<vmem>> -> memref<24x2048xbf16, #tpu.memory_space<vmem>>
    %738 = tpu.memref_slice %arg22[%c1_i32_389, %c0_i32_390] : memref<2x2x!tpu.dma_semaphore, #tpu.memory_space<semaphore_mem>> -> memref<1x1x!tpu.dma_semaphore, #tpu.memory_space<semaphore_mem>>
    %739 = tpu.memref_squeeze %738 : memref<1x1x!tpu.dma_semaphore, #tpu.memory_space<semaphore_mem>> -> memref<!tpu.dma_semaphore, #tpu.memory_space<semaphore_mem>>
    tpu.wait_dma2 semaphore(%739 : memref<!tpu.dma_semaphore, #tpu.memory_space<semaphore_mem>>) src(%735 : memref<24x2048xbf16, #tpu.memory_space<any>>) dst(%737 : memref<24x2048xbf16, #tpu.memory_space<vmem>>)
    %c0_395 = arith.constant 0 : index
    %c0_396 = arith.constant 0 : index
    %c0_397 = arith.constant 0 : index
    %740 = vector.load %arg20[%c0_395, %c0_396, %c0_397] : memref<2x24x2048xbf16, #tpu.memory_space<vmem>>, vector<1x24x2048xbf16>
    %741 = vector.shape_cast %740 : vector<1x24x2048xbf16> to vector<24x2048xbf16>
    %c4 = arith.constant 4 : index
    %c0_398 = arith.constant 0 : index
    %c0_399 = arith.constant 0 : index
    %742 = vector.load %arg13[%c4, %c0_398, %c0_399] : memref<6x1x2048xf32, #tpu.memory_space<vmem>>, vector<1x1x2048xf32>
    %743 = vector.shape_cast %742 : vector<1x1x2048xf32> to vector<1x2048xf32>
    %c0_400 = arith.constant 0 : index
    %c0_401 = arith.constant 0 : index
    %c0_402 = arith.constant 0 : index
    %744 = vector.load %arg21[%c0_400, %c0_401, %c0_402] : memref<2x24x2048xbf16, #tpu.memory_space<vmem>>, vector<1x24x2048xbf16>
    %745 = vector.shape_cast %744 : vector<1x24x2048xbf16> to vector<24x2048xbf16>
    %746 = vector.extract_strided_slice %626 {offsets = [8, 0], sizes = [1, 24], strides = [1, 1]} : vector<9x24xf32> to vector<1x24xf32>
    %747 = arith.truncf %715 : vector<1x24xf32> to vector<1x24xbf16>
    %cst_403 = arith.constant dense<0.000000e+00> : vector<1x2048xf32>
    %748 = tpu.matmul %747, %741, %cst_403 {dimension_numbers = #tpu.dot_dimension_numbers<[1], [0], [0], [1], [0, 0, 1, 1], [], []>} : vector<1x24xbf16>, vector<24x2048xbf16>, vector<1x2048xf32> -> vector<1x2048xf32>
    %749 = arith.addf %748, %743 : vector<1x2048xf32>
    %cst_404 = arith.constant 0.000000e+00 : f32
    %750 = vector.broadcast %cst_404 : f32 to vector<1x2048xf32>
    %751 = arith.maximumf %749, %750 : vector<1x2048xf32>
    %752 = arith.truncf %751 : vector<1x2048xf32> to vector<1x2048xbf16>
    %cst_405 = arith.constant dense<0.000000e+00> : vector<1x24xf32>
    %753 = tpu.matmul %752, %745, %cst_405 {dimension_numbers = #tpu.dot_dimension_numbers<[1], [1], [0], [0], [0, 0, 1, 0], [], []>} : vector<1x2048xbf16>, vector<24x2048xbf16>, vector<1x24xf32> -> vector<1x24xf32>
    %754 = arith.addf %753, %746 : vector<1x24xf32>
    %755 = arith.addf %715, %754 : vector<1x24xf32>
    %756 = vector.extract_strided_slice %626 {offsets = [6, 0], sizes = [1, 24], strides = [1, 1]} : vector<9x24xf32> to vector<1x24xf32>
    %757 = vector.extract_strided_slice %626 {offsets = [7, 0], sizes = [1, 24], strides = [1, 1]} : vector<9x24xf32> to vector<1x24xf32>
    %cst_406 = arith.constant dense<0.000000e+00> : vector<1xf32>
    %758 = vector.multi_reduction <add>, %755, %cst_406 [1] : vector<1x24xf32> to vector<1xf32>
    %759 = vector.shape_cast %758 : vector<1xf32> to vector<1x1xf32>
    %cst_407 = arith.constant 2.400000e+01 : f32
    %760 = vector.broadcast %cst_407 : f32 to vector<1x1xf32>
    %761 = arith.divf %759, %760 : vector<1x1xf32>
    %762 = arith.mulf %755, %755 : vector<1x24xf32>
    %cst_408 = arith.constant dense<0.000000e+00> : vector<1xf32>
    %763 = vector.multi_reduction <add>, %762, %cst_408 [1] : vector<1x24xf32> to vector<1xf32>
    %764 = vector.shape_cast %763 : vector<1xf32> to vector<1x1xf32>
    %cst_409 = arith.constant 2.400000e+01 : f32
    %765 = vector.broadcast %cst_409 : f32 to vector<1x1xf32>
    %766 = arith.divf %764, %765 : vector<1x1xf32>
    %767 = arith.mulf %761, %761 : vector<1x1xf32>
    %768 = arith.subf %766, %767 : vector<1x1xf32>
    %cst_410 = arith.constant 0.000000e+00 : f32
    %769 = vector.broadcast %cst_410 : f32 to vector<1x1xf32>
    %770 = arith.maximumf %768, %769 : vector<1x1xf32>
    %771 = vector.broadcast %761 : vector<1x1xf32> to vector<1x24xf32>
    %772 = arith.subf %755, %771 : vector<1x24xf32>
    %cst_411 = arith.constant 9.99999974E-6 : f32
    %773 = vector.broadcast %cst_411 : f32 to vector<1x1xf32>
    %774 = arith.addf %770, %773 : vector<1x1xf32>
    %775 = math.rsqrt %774 : vector<1x1xf32>
    %776 = vector.broadcast %775 : vector<1x1xf32> to vector<1x24xf32>
    %777 = arith.mulf %772, %776 : vector<1x24xf32>
    %778 = arith.mulf %777, %756 : vector<1x24xf32>
    %779 = arith.addf %778, %757 : vector<1x24xf32>
    %c2_412 = arith.constant 2 : index
    %c0_413 = arith.constant 0 : index
    %c0_414 = arith.constant 0 : index
    %780 = vector.load %arg12[%c2_412, %c0_413, %c0_414] : memref<3x9x24xf32, #tpu.memory_space<vmem>>, vector<1x9x24xf32>
    %781 = vector.shape_cast %780 : vector<1x9x24xf32> to vector<9x24xf32>
    %782 = arith.addf %779, %779 : vector<1x24xf32>
    %783 = vector.extract_strided_slice %781 {offsets = [2, 0], sizes = [1, 24], strides = [1, 1]} : vector<9x24xf32> to vector<1x24xf32>
    %784 = vector.extract_strided_slice %781 {offsets = [3, 0], sizes = [1, 24], strides = [1, 1]} : vector<9x24xf32> to vector<1x24xf32>
    %cst_415 = arith.constant dense<0.000000e+00> : vector<1xf32>
    %785 = vector.multi_reduction <add>, %782, %cst_415 [1] : vector<1x24xf32> to vector<1xf32>
    %786 = vector.shape_cast %785 : vector<1xf32> to vector<1x1xf32>
    %cst_416 = arith.constant 2.400000e+01 : f32
    %787 = vector.broadcast %cst_416 : f32 to vector<1x1xf32>
    %788 = arith.divf %786, %787 : vector<1x1xf32>
    %789 = arith.mulf %782, %782 : vector<1x24xf32>
    %cst_417 = arith.constant dense<0.000000e+00> : vector<1xf32>
    %790 = vector.multi_reduction <add>, %789, %cst_417 [1] : vector<1x24xf32> to vector<1xf32>
    %791 = vector.shape_cast %790 : vector<1xf32> to vector<1x1xf32>
    %cst_418 = arith.constant 2.400000e+01 : f32
    %792 = vector.broadcast %cst_418 : f32 to vector<1x1xf32>
    %793 = arith.divf %791, %792 : vector<1x1xf32>
    %794 = arith.mulf %788, %788 : vector<1x1xf32>
    %795 = arith.subf %793, %794 : vector<1x1xf32>
    %cst_419 = arith.constant 0.000000e+00 : f32
    %796 = vector.broadcast %cst_419 : f32 to vector<1x1xf32>
    %797 = arith.maximumf %795, %796 : vector<1x1xf32>
    %798 = vector.broadcast %788 : vector<1x1xf32> to vector<1x24xf32>
    %799 = arith.subf %782, %798 : vector<1x24xf32>
    %cst_420 = arith.constant 9.99999974E-6 : f32
    %800 = vector.broadcast %cst_420 : f32 to vector<1x1xf32>
    %801 = arith.addf %797, %800 : vector<1x1xf32>
    %802 = math.rsqrt %801 : vector<1x1xf32>
    %803 = vector.broadcast %802 : vector<1x1xf32> to vector<1x24xf32>
    %804 = arith.mulf %799, %803 : vector<1x24xf32>
    %805 = arith.mulf %804, %783 : vector<1x24xf32>
    %806 = arith.addf %805, %784 : vector<1x24xf32>
    %c2_421 = arith.constant 2 : index
    %c0_422 = arith.constant 0 : index
    %c0_423 = arith.constant 0 : index
    %807 = vector.load %arg8[%c2_421, %c0_422, %c0_423] : memref<3x24x24xbf16, #tpu.memory_space<vmem>>, vector<1x24x24xbf16>
    %808 = vector.shape_cast %807 : vector<1x24x24xbf16> to vector<24x24xbf16>
    %809 = arith.truncf %806 : vector<1x24xf32> to vector<1x24xbf16>
    %cst_424 = arith.constant dense<0.000000e+00> : vector<1x24xf32>
    %810 = tpu.matmul %809, %808, %cst_424 {dimension_numbers = #tpu.dot_dimension_numbers<[1], [0], [0], [1], [0, 0, 1, 1], [], []>} : vector<1x24xbf16>, vector<24x24xbf16>, vector<1x24xf32> -> vector<1x24xf32>
    %811 = vector.extract_strided_slice %781 {offsets = [0, 0], sizes = [1, 24], strides = [1, 1]} : vector<9x24xf32> to vector<1x24xf32>
    %812 = arith.addf %810, %811 : vector<1x24xf32>
    %c2_425 = arith.constant 2 : index
    %c0_426 = arith.constant 0 : index
    %c0_427 = arith.constant 0 : index
    %813 = vector.load %arg9[%c2_425, %c0_426, %c0_427] : memref<3x24x48xbf16, #tpu.memory_space<vmem>>, vector<1x24x48xbf16>
    %814 = vector.shape_cast %813 : vector<1x24x48xbf16> to vector<24x48xbf16>
    %815 = arith.truncf %468 : vector<8x24xf32> to vector<8x24xbf16>
    %cst_428 = arith.constant dense<0.000000e+00> : vector<8x48xf32>
    %816 = tpu.matmul %815, %814, %cst_428 {dimension_numbers = #tpu.dot_dimension_numbers<[1], [0], [0], [1], [0, 0, 1, 1], [], []>} : vector<8x24xbf16>, vector<24x48xbf16>, vector<8x48xf32> -> vector<8x48xf32>
    %c2_429 = arith.constant 2 : index
    %c0_430 = arith.constant 0 : index
    %c0_431 = arith.constant 0 : index
    %817 = vector.load %arg11[%c2_429, %c0_430, %c0_431] : memref<3x1x48xf32, #tpu.memory_space<vmem>>, vector<1x1x48xf32>
    %818 = vector.shape_cast %817 : vector<1x1x48xf32> to vector<1x48xf32>
    %819 = vector.broadcast %818 : vector<1x48xf32> to vector<8x48xf32>
    %820 = arith.addf %816, %819 : vector<8x48xf32>
    %821 = vector.extract_strided_slice %820 {offsets = [0, 0], sizes = [8, 24], strides = [1, 1]} : vector<8x48xf32> to vector<8x24xf32>
    %822 = vector.extract_strided_slice %820 {offsets = [0, 24], sizes = [8, 24], strides = [1, 1]} : vector<8x48xf32> to vector<8x24xf32>
    %c2_432 = arith.constant 2 : index
    %c0_433 = arith.constant 0 : index
    %c0_434 = arith.constant 0 : index
    %823 = vector.load %arg10[%c2_432, %c0_433, %c0_434] : memref<3x24x24xbf16, #tpu.memory_space<vmem>>, vector<1x24x24xbf16>
    %824 = vector.shape_cast %823 : vector<1x24x24xbf16> to vector<24x24xbf16>
    %825 = vector.extract_strided_slice %781 {offsets = [1, 0], sizes = [1, 24], strides = [1, 1]} : vector<9x24xf32> to vector<1x24xf32>
    %826 = vector.broadcast %812 : vector<1x24xf32> to vector<6x24xf32>
    %827 = arith.mulf %826, %13 : vector<6x24xf32>
    %cst_435 = arith.constant dense<0.000000e+00> : vector<6x8xf32>
    %828 = tpu.matmul %827, %821, %cst_435 {dimension_numbers = #tpu.dot_dimension_numbers<[1], [1], [0], [0], [0, 0, 1, 0], [], []>} : vector<6x24xf32>, vector<8x24xf32>, vector<6x8xf32> -> vector<6x8xf32>
    %cst_436 = arith.constant dense<0xFF800000> : vector<6xf32>
    %829 = vector.multi_reduction <maximumf>, %828, %cst_436 [1] : vector<6x8xf32> to vector<6xf32>
    %830 = vector.shape_cast %829 : vector<6xf32> to vector<6x1xf32>
    %831 = vector.broadcast %830 : vector<6x1xf32> to vector<6x8xf32>
    %832 = arith.subf %828, %831 : vector<6x8xf32>
    %833 = math.exp %832 : vector<6x8xf32>
    %cst_437 = arith.constant dense<0.000000e+00> : vector<6xf32>
    %834 = vector.multi_reduction <add>, %833, %cst_437 [1] : vector<6x8xf32> to vector<6xf32>
    %835 = vector.shape_cast %834 : vector<6xf32> to vector<6x1xf32>
    %836 = tpu.reciprocal %835 {approx = true} : vector<6x1xf32> -> vector<6x1xf32>
    %837 = vector.broadcast %836 : vector<6x1xf32> to vector<6x8xf32>
    %838 = arith.mulf %833, %837 : vector<6x8xf32>
    %cst_438 = arith.constant dense<0.000000e+00> : vector<6x24xf32>
    %839 = tpu.matmul %838, %822, %cst_438 {dimension_numbers = #tpu.dot_dimension_numbers<[1], [0], [0], [1], [0, 0, 1, 1], [], []>} : vector<6x8xf32>, vector<8x24xf32>, vector<6x24xf32> -> vector<6x24xf32>
    %840 = arith.mulf %839, %13 : vector<6x24xf32>
    %cst_439 = arith.constant dense<0.000000e+00> : vector<24xf32>
    %841 = vector.multi_reduction <add>, %840, %cst_439 [0] : vector<6x24xf32> to vector<24xf32>
    %842 = vector.shape_cast %841 : vector<24xf32> to vector<1x24xf32>
    %843 = arith.truncf %842 : vector<1x24xf32> to vector<1x24xbf16>
    %cst_440 = arith.constant dense<0.000000e+00> : vector<1x24xf32>
    %844 = tpu.matmul %843, %824, %cst_440 {dimension_numbers = #tpu.dot_dimension_numbers<[1], [0], [0], [1], [0, 0, 1, 1], [], []>} : vector<1x24xbf16>, vector<24x24xbf16>, vector<1x24xf32> -> vector<1x24xf32>
    %845 = arith.addf %844, %825 : vector<1x24xf32>
    %846 = arith.addf %806, %845 : vector<1x24xf32>
    %847 = vector.extract_strided_slice %781 {offsets = [4, 0], sizes = [1, 24], strides = [1, 1]} : vector<9x24xf32> to vector<1x24xf32>
    %848 = vector.extract_strided_slice %781 {offsets = [5, 0], sizes = [1, 24], strides = [1, 1]} : vector<9x24xf32> to vector<1x24xf32>
    %cst_441 = arith.constant dense<0.000000e+00> : vector<1xf32>
    %849 = vector.multi_reduction <add>, %846, %cst_441 [1] : vector<1x24xf32> to vector<1xf32>
    %850 = vector.shape_cast %849 : vector<1xf32> to vector<1x1xf32>
    %cst_442 = arith.constant 2.400000e+01 : f32
    %851 = vector.broadcast %cst_442 : f32 to vector<1x1xf32>
    %852 = arith.divf %850, %851 : vector<1x1xf32>
    %853 = arith.mulf %846, %846 : vector<1x24xf32>
    %cst_443 = arith.constant dense<0.000000e+00> : vector<1xf32>
    %854 = vector.multi_reduction <add>, %853, %cst_443 [1] : vector<1x24xf32> to vector<1xf32>
    %855 = vector.shape_cast %854 : vector<1xf32> to vector<1x1xf32>
    %cst_444 = arith.constant 2.400000e+01 : f32
    %856 = vector.broadcast %cst_444 : f32 to vector<1x1xf32>
    %857 = arith.divf %855, %856 : vector<1x1xf32>
    %858 = arith.mulf %852, %852 : vector<1x1xf32>
    %859 = arith.subf %857, %858 : vector<1x1xf32>
    %cst_445 = arith.constant 0.000000e+00 : f32
    %860 = vector.broadcast %cst_445 : f32 to vector<1x1xf32>
    %861 = arith.maximumf %859, %860 : vector<1x1xf32>
    %862 = vector.broadcast %852 : vector<1x1xf32> to vector<1x24xf32>
    %863 = arith.subf %846, %862 : vector<1x24xf32>
    %cst_446 = arith.constant 9.99999974E-6 : f32
    %864 = vector.broadcast %cst_446 : f32 to vector<1x1xf32>
    %865 = arith.addf %861, %864 : vector<1x1xf32>
    %866 = math.rsqrt %865 : vector<1x1xf32>
    %867 = vector.broadcast %866 : vector<1x1xf32> to vector<1x24xf32>
    %868 = arith.mulf %863, %867 : vector<1x24xf32>
    %869 = arith.mulf %868, %847 : vector<1x24xf32>
    %870 = arith.addf %869, %848 : vector<1x24xf32>
    %c5_i32_447 = arith.constant 5 : i32
    %c1_i32_448 = arith.constant 1 : i32
    %c0_i32_449 = arith.constant 0 : i32
    %c1_i32_450 = arith.constant 1 : i32
    %c0_i32_451 = arith.constant 0 : i32
    %c0_i32_452 = arith.constant 0 : i32
    %871 = tpu.memref_slice %arg17[%c5_i32_447, %c0_i32_451, %c0_i32_452] : memref<6x24x2048xbf16, #tpu.memory_space<any>> -> memref<1x24x2048xbf16, #tpu.memory_space<any>>
    %872 = tpu.memref_squeeze %871 : memref<1x24x2048xbf16, #tpu.memory_space<any>> -> memref<24x2048xbf16, #tpu.memory_space<any>>
    %c0_i32_453 = arith.constant 0 : i32
    %c0_i32_454 = arith.constant 0 : i32
    %873 = tpu.memref_slice %arg20[%c1_i32_448, %c0_i32_453, %c0_i32_454] : memref<2x24x2048xbf16, #tpu.memory_space<vmem>> -> memref<1x24x2048xbf16, #tpu.memory_space<vmem>>
    %874 = tpu.memref_squeeze %873 : memref<1x24x2048xbf16, #tpu.memory_space<vmem>> -> memref<24x2048xbf16, #tpu.memory_space<vmem>>
    %875 = tpu.memref_slice %arg22[%c0_i32_449, %c1_i32_450] : memref<2x2x!tpu.dma_semaphore, #tpu.memory_space<semaphore_mem>> -> memref<1x1x!tpu.dma_semaphore, #tpu.memory_space<semaphore_mem>>
    %876 = tpu.memref_squeeze %875 : memref<1x1x!tpu.dma_semaphore, #tpu.memory_space<semaphore_mem>> -> memref<!tpu.dma_semaphore, #tpu.memory_space<semaphore_mem>>
    tpu.wait_dma2 semaphore(%876 : memref<!tpu.dma_semaphore, #tpu.memory_space<semaphore_mem>>) src(%872 : memref<24x2048xbf16, #tpu.memory_space<any>>) dst(%874 : memref<24x2048xbf16, #tpu.memory_space<vmem>>)
    %c5_i32_455 = arith.constant 5 : i32
    %c1_i32_456 = arith.constant 1 : i32
    %c1_i32_457 = arith.constant 1 : i32
    %c1_i32_458 = arith.constant 1 : i32
    %c0_i32_459 = arith.constant 0 : i32
    %c0_i32_460 = arith.constant 0 : i32
    %877 = tpu.memref_slice %arg18[%c5_i32_455, %c0_i32_459, %c0_i32_460] : memref<6x24x2048xbf16, #tpu.memory_space<any>> -> memref<1x24x2048xbf16, #tpu.memory_space<any>>
    %878 = tpu.memref_squeeze %877 : memref<1x24x2048xbf16, #tpu.memory_space<any>> -> memref<24x2048xbf16, #tpu.memory_space<any>>
    %c0_i32_461 = arith.constant 0 : i32
    %c0_i32_462 = arith.constant 0 : i32
    %879 = tpu.memref_slice %arg21[%c1_i32_456, %c0_i32_461, %c0_i32_462] : memref<2x24x2048xbf16, #tpu.memory_space<vmem>> -> memref<1x24x2048xbf16, #tpu.memory_space<vmem>>
    %880 = tpu.memref_squeeze %879 : memref<1x24x2048xbf16, #tpu.memory_space<vmem>> -> memref<24x2048xbf16, #tpu.memory_space<vmem>>
    %881 = tpu.memref_slice %arg22[%c1_i32_457, %c1_i32_458] : memref<2x2x!tpu.dma_semaphore, #tpu.memory_space<semaphore_mem>> -> memref<1x1x!tpu.dma_semaphore, #tpu.memory_space<semaphore_mem>>
    %882 = tpu.memref_squeeze %881 : memref<1x1x!tpu.dma_semaphore, #tpu.memory_space<semaphore_mem>> -> memref<!tpu.dma_semaphore, #tpu.memory_space<semaphore_mem>>
    tpu.wait_dma2 semaphore(%882 : memref<!tpu.dma_semaphore, #tpu.memory_space<semaphore_mem>>) src(%878 : memref<24x2048xbf16, #tpu.memory_space<any>>) dst(%880 : memref<24x2048xbf16, #tpu.memory_space<vmem>>)
    %c1_463 = arith.constant 1 : index
    %c0_464 = arith.constant 0 : index
    %c0_465 = arith.constant 0 : index
    %883 = vector.load %arg20[%c1_463, %c0_464, %c0_465] : memref<2x24x2048xbf16, #tpu.memory_space<vmem>>, vector<1x24x2048xbf16>
    %884 = vector.shape_cast %883 : vector<1x24x2048xbf16> to vector<24x2048xbf16>
    %c5 = arith.constant 5 : index
    %c0_466 = arith.constant 0 : index
    %c0_467 = arith.constant 0 : index
    %885 = vector.load %arg13[%c5, %c0_466, %c0_467] : memref<6x1x2048xf32, #tpu.memory_space<vmem>>, vector<1x1x2048xf32>
    %886 = vector.shape_cast %885 : vector<1x1x2048xf32> to vector<1x2048xf32>
    %c1_468 = arith.constant 1 : index
    %c0_469 = arith.constant 0 : index
    %c0_470 = arith.constant 0 : index
    %887 = vector.load %arg21[%c1_468, %c0_469, %c0_470] : memref<2x24x2048xbf16, #tpu.memory_space<vmem>>, vector<1x24x2048xbf16>
    %888 = vector.shape_cast %887 : vector<1x24x2048xbf16> to vector<24x2048xbf16>
    %889 = vector.extract_strided_slice %781 {offsets = [8, 0], sizes = [1, 24], strides = [1, 1]} : vector<9x24xf32> to vector<1x24xf32>
    %890 = arith.truncf %870 : vector<1x24xf32> to vector<1x24xbf16>
    %cst_471 = arith.constant dense<0.000000e+00> : vector<1x2048xf32>
    %891 = tpu.matmul %890, %884, %cst_471 {dimension_numbers = #tpu.dot_dimension_numbers<[1], [0], [0], [1], [0, 0, 1, 1], [], []>} : vector<1x24xbf16>, vector<24x2048xbf16>, vector<1x2048xf32> -> vector<1x2048xf32>
    %892 = arith.addf %891, %886 : vector<1x2048xf32>
    %cst_472 = arith.constant 0.000000e+00 : f32
    %893 = vector.broadcast %cst_472 : f32 to vector<1x2048xf32>
    %894 = arith.maximumf %892, %893 : vector<1x2048xf32>
    %895 = arith.truncf %894 : vector<1x2048xf32> to vector<1x2048xbf16>
    %cst_473 = arith.constant dense<0.000000e+00> : vector<1x24xf32>
    %896 = tpu.matmul %895, %888, %cst_473 {dimension_numbers = #tpu.dot_dimension_numbers<[1], [1], [0], [0], [0, 0, 1, 0], [], []>} : vector<1x2048xbf16>, vector<24x2048xbf16>, vector<1x24xf32> -> vector<1x24xf32>
    %897 = arith.addf %896, %889 : vector<1x24xf32>
    %898 = arith.addf %870, %897 : vector<1x24xf32>
    %899 = vector.extract_strided_slice %781 {offsets = [6, 0], sizes = [1, 24], strides = [1, 1]} : vector<9x24xf32> to vector<1x24xf32>
    %900 = vector.extract_strided_slice %781 {offsets = [7, 0], sizes = [1, 24], strides = [1, 1]} : vector<9x24xf32> to vector<1x24xf32>
    %cst_474 = arith.constant dense<0.000000e+00> : vector<1xf32>
    %901 = vector.multi_reduction <add>, %898, %cst_474 [1] : vector<1x24xf32> to vector<1xf32>
    %902 = vector.shape_cast %901 : vector<1xf32> to vector<1x1xf32>
    %cst_475 = arith.constant 2.400000e+01 : f32
    %903 = vector.broadcast %cst_475 : f32 to vector<1x1xf32>
    %904 = arith.divf %902, %903 : vector<1x1xf32>
    %905 = arith.mulf %898, %898 : vector<1x24xf32>
    %cst_476 = arith.constant dense<0.000000e+00> : vector<1xf32>
    %906 = vector.multi_reduction <add>, %905, %cst_476 [1] : vector<1x24xf32> to vector<1xf32>
    %907 = vector.shape_cast %906 : vector<1xf32> to vector<1x1xf32>
    %cst_477 = arith.constant 2.400000e+01 : f32
    %908 = vector.broadcast %cst_477 : f32 to vector<1x1xf32>
    %909 = arith.divf %907, %908 : vector<1x1xf32>
    %910 = arith.mulf %904, %904 : vector<1x1xf32>
    %911 = arith.subf %909, %910 : vector<1x1xf32>
    %cst_478 = arith.constant 0.000000e+00 : f32
    %912 = vector.broadcast %cst_478 : f32 to vector<1x1xf32>
    %913 = arith.maximumf %911, %912 : vector<1x1xf32>
    %914 = vector.broadcast %904 : vector<1x1xf32> to vector<1x24xf32>
    %915 = arith.subf %898, %914 : vector<1x24xf32>
    %cst_479 = arith.constant 9.99999974E-6 : f32
    %916 = vector.broadcast %cst_479 : f32 to vector<1x1xf32>
    %917 = arith.addf %913, %916 : vector<1x1xf32>
    %918 = math.rsqrt %917 : vector<1x1xf32>
    %919 = vector.broadcast %918 : vector<1x1xf32> to vector<1x24xf32>
    %920 = arith.mulf %915, %919 : vector<1x24xf32>
    %921 = arith.mulf %920, %899 : vector<1x24xf32>
    %922 = arith.addf %921, %900 : vector<1x24xf32>
    %923 = vector.extract_strided_slice %442 {offsets = [2, 0], sizes = [1, 24], strides = [1, 1]} : vector<4x24xf32> to vector<1x24xf32>
    %924 = vector.extract_strided_slice %442 {offsets = [3, 0], sizes = [1, 24], strides = [1, 1]} : vector<4x24xf32> to vector<1x24xf32>
    %cst_480 = arith.constant dense<0.000000e+00> : vector<1xf32>
    %925 = vector.multi_reduction <add>, %922, %cst_480 [1] : vector<1x24xf32> to vector<1xf32>
    %926 = vector.shape_cast %925 : vector<1xf32> to vector<1x1xf32>
    %cst_481 = arith.constant 2.400000e+01 : f32
    %927 = vector.broadcast %cst_481 : f32 to vector<1x1xf32>
    %928 = arith.divf %926, %927 : vector<1x1xf32>
    %929 = arith.mulf %922, %922 : vector<1x24xf32>
    %cst_482 = arith.constant dense<0.000000e+00> : vector<1xf32>
    %930 = vector.multi_reduction <add>, %929, %cst_482 [1] : vector<1x24xf32> to vector<1xf32>
    %931 = vector.shape_cast %930 : vector<1xf32> to vector<1x1xf32>
    %cst_483 = arith.constant 2.400000e+01 : f32
    %932 = vector.broadcast %cst_483 : f32 to vector<1x1xf32>
    %933 = arith.divf %931, %932 : vector<1x1xf32>
    %934 = arith.mulf %928, %928 : vector<1x1xf32>
    %935 = arith.subf %933, %934 : vector<1x1xf32>
    %cst_484 = arith.constant 0.000000e+00 : f32
    %936 = vector.broadcast %cst_484 : f32 to vector<1x1xf32>
    %937 = arith.maximumf %935, %936 : vector<1x1xf32>
    %938 = vector.broadcast %928 : vector<1x1xf32> to vector<1x24xf32>
    %939 = arith.subf %922, %938 : vector<1x24xf32>
    %cst_485 = arith.constant 9.99999974E-6 : f32
    %940 = vector.broadcast %cst_485 : f32 to vector<1x1xf32>
    %941 = arith.addf %937, %940 : vector<1x1xf32>
    %942 = math.rsqrt %941 : vector<1x1xf32>
    %943 = vector.broadcast %942 : vector<1x1xf32> to vector<1x24xf32>
    %944 = arith.mulf %939, %943 : vector<1x24xf32>
    %945 = arith.mulf %944, %923 : vector<1x24xf32>
    %946 = arith.addf %945, %924 : vector<1x24xf32>
    %c0_486 = arith.constant 0 : index
    %c0_487 = arith.constant 0 : index
    %947 = vector.load %arg15[%c0_486, %c0_487] : memref<24x10xf32, #tpu.memory_space<vmem>>, vector<24x10xf32>
    %cst_488 = arith.constant dense<0.000000e+00> : vector<1x10xf32>
    %948 = tpu.matmul %946, %947, %cst_488 {dimension_numbers = #tpu.dot_dimension_numbers<[1], [0], [0], [1], [0, 0, 1, 1], [], []>} : vector<1x24xf32>, vector<24x10xf32>, vector<1x10xf32> -> vector<1x10xf32>
    %c0_489 = arith.constant 0 : index
    %c0_490 = arith.constant 0 : index
    %949 = vector.load %arg16[%c0_489, %c0_490] : memref<1x10xf32, #tpu.memory_space<vmem>>, vector<1x10xf32>
    %950 = arith.addf %948, %949 : vector<1x10xf32>
    %c0_491 = arith.constant 0 : index
    %c0_492 = arith.constant 0 : index
    %951 = vector.load %arg19[%c0_491, %c0_492] : memref<1x10xf32, #tpu.memory_space<vmem>>, vector<1x10xf32>
    tpu.vector_store %arg19[%c0_491, %c0_492], %950 {strides = array<i32>} : memref<1x10xf32, #tpu.memory_space<vmem>>, vector<1x10xf32>,
    return
  }
}

</mosaic_0001>

<bundles_post_ra>
// kernel: spoter_forward.1
= control target key start
LH: loop header
LB: loop body
LE: loop exit
PB: predicated region body
PF: predicated region fallthrough
CT: control target
= control target key end

     0   :  { %s13865_s0 = inlined_call_operand.vmem [shape: f32[8,24], index: 0, kind: input, shape index: {}]   ;;  %s13866_s1 = inlined_call_operand.hbm [shape: f32[2,24], index: 1, kind: input, shape index: {}]   ;;  %s13867_s2 = inlined_call_operand.vmem [shape: f32[48,24], index: 2, kind: input, shape index: {}]   ;;  %s13868_s3 = inlined_call_operand.vmem [shape: f32[6,24], index: 3, kind: input, shape index: {}]   ;;  %s13869_s4 = inlined_call_operand.vmem [shape: bf16[3,24,72], index: 4, kind: input, shape index: {}]   ;;  %s13870_s5 = inlined_call_operand.hbm [shape: bf16[3,24,24], index: 5, kind: input, shape index: {}]   ;;  %s13871_s6 = inlined_call_operand.hbm [shape: f32[3,1,72], index: 6, kind: input, shape index: {}]   ;;  %s13872_s7 = inlined_call_operand.hbm [shape: f32[3,6,24], index: 7, kind: input, shape index: {}]   ;;  %s13873_s8 = inlined_call_operand.hbm [shape: bf16[3,24,24], index: 8, kind: input, shape index: {}]   ;;  %s13874_s9 = inlined_call_operand.hbm [shape: bf16[3,24,48], index: 9, kind: input, shape index: {}]   ;;  %s13875_s10 = inlined_call_operand.hbm [shape: bf16[3,24,24], index: 10, kind: input, shape index: {}]   ;;  %s13876_s11 = inlined_call_operand.hbm [shape: f32[3,1,48], index: 11, kind: input, shape index: {}]   ;;  %s13877_s12 = inlined_call_operand.vmem [shape: f32[3,9,24], index: 12, kind: input, shape index: {}]   ;;  %s13878_s13 = inlined_call_operand.vmem [shape: f32[6,1,2048], index: 13, kind: input, shape index: {}]   ;;  %s13879_s14 = inlined_call_operand.hbm [shape: f32[4,24], index: 14, kind: input, shape index: {}]   ;;  %s13880_s15 = inlined_call_operand.vmem [shape: f32[24,10], index: 15, kind: input, shape index: {}]   ;;  %s13881_s16 = inlined_call_operand.hbm [shape: f32[1,10], index: 16, kind: input, shape index: {}]   ;;  %s13882_s17 = inlined_call_operand.hbm [shape: bf16[6,24,2048], index: 17, kind: input, shape index: {}]   ;;  %s13883_s18 = inlined_call_operand.hbm [shape: bf16[6,24,2048], index: 18, kind: input, shape index: {}]   ;;  %s13884_s19 = inlined_call_operand.hbm [shape: f32[1,10], index: 19, kind: output, shape index: {}]  }
   0x1   :  { %13892 = sst [smem:[#allocation68_spill]] %s13865_s0 }
   0x2   :  { %13893 = sst [smem:[#allocation69_spill]] %s13866_s1 }
   0x3   :  { %13894 = sst [smem:[#allocation70_spill]] %s13867_s2 }
   0x4   :  { %13895 = sst [smem:[#allocation71_spill]] %s13868_s3 }
   0x5   :  { %24 = vsyncpa [#allocation6], 0 }
   0x6   :  { %25 = vsyncpa [#allocation9], 0 }
   0x7   :  { %26 = vsyncpa [#allocation12], 0 }
   0x8   :  { %27 = vsyncpa [#allocation15], 0 }
   0x9   :  { %28 = vsyncpa [#allocation18], 0 }
   0xa   :  { %29 = vsyncpa [#allocation21], 0 }
   0xb   :  { %30 = vsyncpa [#allocation7], 0  ;;  %s12106_s0 = smov [#allocation8]   ;;  %s11532_s1 = scalar_lea.hbm %s13870_s5, 576 }
   0xc   :  { %s54_s30 = sshll.u32 %s12106_s0, 4  ;;  %p11533_p0 = scmp.ne.s32.totalorder %s13870_s5, %s11532_s1  ;;  %s55_s30 = int_to_ptr.vmem [resolvable:$true] %s54_s30 }
   0xd   :  { %p11536_p1 = scmp.lt.u32.totalorder %s11532_s1, %s13870_s5 }
   0xf   :  { %p11538_p2 = pnand %p11536_p1, %p11533_p0 }
  0x11   :  { %11541 = shalt.err (!%p11538_p2)
}
  0x12   :  { %s11542_s25 = scalar_lea.vmem %s55_s30, 576  ;;  %p11547_p4 = scmp.lt.s32.totalorder %s55_s30, %s55_s30 }
  0x13   :  { %p11543_p3 = scmp.ne.s32.totalorder %s55_s30, %s11542_s25  ;;  %p11548_p5 = scmp.lt.s32.totalorder %s11542_s25, %s11542_s25 }
  0x15   :  { %p11549_p6 = por %p11548_p5, %p11547_p4 }
  0x17   :  { %p11550_p7 = pnand %p11549_p6, %p11543_p3 }
  0x19   :  { %11553 = shalt.err (!%p11550_p7)
}
  0x1a   :  { %s13887_s3 = smov 64   ;;  %s12108_s26 = smov 4  }
  0x1b   :  { %60 = dma.hbm_to_vmem [thread:$0]  %s13870_s5, 576, %s55_s30, [#allocation9], %s13887_s3, %s13887_s3, %s12108_s26  }
  0x1c   :  { %s12109_s29 = smov [#allocation11]   ;;  %s11554_s1 = scalar_lea.hbm %s13872_s7, 384 }
  0x1d   :  { %s78_s0 = sshll.u32 %s12109_s29, 4  ;;  %p11555_p8 = scmp.ne.s32.totalorder %s13872_s7, %s11554_s1  ;;  %s79_s0 = int_to_ptr.vmem [resolvable:$true] %s78_s0 }
  0x1e   :  { %p11558_p9 = scmp.lt.u32.totalorder %s11554_s1, %s13872_s7 }
  0x20   :  { %p11560_p10 = pnand %p11558_p9, %p11555_p8 }
  0x22   :  { %11563 = shalt.err (!%p11560_p10)
}
  0x23   :  { %s11564_s25 = scalar_lea.vmem %s79_s0, 384  ;;  %p11569_p12 = scmp.lt.s32.totalorder %s79_s0, %s79_s0 }
  0x24   :  { %p11565_p11 = scmp.ne.s32.totalorder %s79_s0, %s11564_s25  ;;  %p11570_p13 = scmp.lt.s32.totalorder %s11564_s25, %s11564_s25 }
  0x26   :  { %p11571_p0 = por %p11570_p13, %p11569_p12 }
  0x28   :  { %p11572_p1 = pnand %p11571_p0, %p11565_p11 }
  0x2a   :  { %11575 = shalt.err (!%p11572_p1)
}
  0x2b   :  { %s12110_s5 = smov 128   ;;  %s12111_s30 = smov 8  }
  0x2c   :  { %84 = dma.hbm_to_vmem [thread:$0]  %s13872_s7, 384, %s79_s0, [#allocation12], %s12110_s5, %s12110_s5, %s12111_s30  }
  0x2d   :  { %s12112_s29 = smov [#allocation14]   ;;  %s11576_s22 = scalar_lea.hbm %s13874_s9, 576 }
  0x2e   :  { %s102_s20 = sshll.u32 %s12112_s29, 4  ;;  %p11577_p2 = scmp.ne.s32.totalorder %s13874_s9, %s11576_s22  ;;  %s103_s20 = int_to_ptr.vmem [resolvable:$true] %s102_s20 }
  0x2f   :  { %p11580_p3 = scmp.lt.u32.totalorder %s11576_s22, %s13874_s9 }
  0x31   :  { %p11582_p4 = pnand %p11580_p3, %p11577_p2 }
  0x33   :  { %11585 = shalt.err (!%p11582_p4)
}
  0x34   :  { %s11586_s3 = scalar_lea.vmem %s103_s20, 576  ;;  %p11591_p6 = scmp.lt.s32.totalorder %s103_s20, %s103_s20 }
  0x35   :  { %p11587_p5 = scmp.ne.s32.totalorder %s103_s20, %s11586_s3  ;;  %p11592_p7 = scmp.lt.s32.totalorder %s11586_s3, %s11586_s3 }
  0x37   :  { %p11593_p8 = por %p11592_p7, %p11591_p6 }
  0x39   :  { %p11594_p9 = pnand %p11593_p8, %p11587_p5 }
  0x3b   :  { %11597 = shalt.err (!%p11594_p9)
}
  0x3c   :  { %s13896_s7 = smov 64   ;;  %s12113_s30 = smov [#allocation17]  }
  0x3d   :  { %108 = dma.hbm_to_vmem [thread:$0]  %s13874_s9, 576, %s103_s20, [#allocation15], %s13896_s7, %s13896_s7, %s12108_s26  }
  0x3e   :  { %s126_s27 = sshll.u32 %s12113_s30, 4  ;;  %s12114_s28 = smov [#allocation5]   ;;  %s127_s27 = int_to_ptr.vmem [resolvable:$true] %s126_s27 }
  0x3f   :  { %s39_s29 = sshll.u32 %s12114_s28, 4  ;;  %s11598_s22 = scalar_lea.hbm %s13876_s11, 48  ;;  %s40_s29 = int_to_ptr.vmem [resolvable:$true] %s39_s29 }
  0x40   :  { %p11599_p10 = scmp.ne.s32.totalorder %s13876_s11, %s11598_s22  ;;  %p11602_p11 = scmp.lt.u32.totalorder %s11598_s22, %s13876_s11 }
  0x42   :  { %p11604_p12 = pnand %p11602_p11, %p11599_p10 }
  0x44   :  { %11607 = shalt.err (!%p11604_p12)
}
  0x45   :  { %s11608_s9 = scalar_lea.vmem %s127_s27, 48  ;;  %s11612_s20 = scalar_lea.vmem %s127_s27, 64 }
  0x46   :  { %p11609_p13 = scmp.ne.s32.totalorder %s127_s27, %s11608_s9  ;;  %p11613_p0 = scmp.lt.s32.totalorder %s127_s27, %s127_s27 }
  0x47   :  { %p11614_p1 = scmp.lt.s32.totalorder %s11612_s20, %s11608_s9 }
  0x49   :  { %p11615_p2 = por %p11614_p1, %p11613_p0 }
  0x4b   :  { %p11616_p3 = pnand %p11615_p2, %p11609_p13 }
  0x4d   :  { %11619 = shalt.err (!%p11616_p3)
}
  0x4e   :  { %s12115_s25 = smov 16   ;;  %s12116_s0 = smov 1  }
  0x4f   :  { %132 = dma.hbm_to_vmem [thread:$0]  %s13876_s11, 48, %s127_s27, [#allocation18], %s12115_s25, %s12115_s25, %s12116_s0  }
  0x50   :  { %s13897_s1 = sld [smem:[#allocation69_spill]] }
  0x56   :  { %s11620_s22 = scalar_lea.hbm %s13897_s1, 32 }
  0x57   :  { %p11621_p4 = scmp.ne.s32.totalorder %s13897_s1, %s11620_s22  ;;  %p11624_p5 = scmp.lt.u32.totalorder %s11620_s22, %s13897_s1 }
  0x59   :  { %p11626_p6 = pnand %p11624_p5, %p11621_p4 }
  0x5b   :  { %11629 = shalt.err (!%p11626_p6)
}
  0x5c   :  { %s11630_s9 = scalar_lea.vmem %s40_s29, 32  ;;  %p11635_p8 = scmp.lt.s32.totalorder %s40_s29, %s40_s29 }
  0x5d   :  { %p11631_p7 = scmp.ne.s32.totalorder %s40_s29, %s11630_s9  ;;  %p11636_p9 = scmp.lt.s32.totalorder %s11630_s9, %s11630_s9 }
  0x5f   :  { %p11637_p10 = por %p11636_p9, %p11635_p8 }
  0x61   :  { %p11638_p11 = pnand %p11637_p10, %p11631_p7 }
  0x63   :  { %11641 = shalt.err (!%p11638_p11)
}
  0x64   :  { %42 = dma.hbm_to_vmem [thread:$0]  %s13897_s1, 32, %s40_s29, [#allocation6]  }
  0x65   :  { %s12117_s20 = smov [#allocation10]   ;;  %s12118_s30 = smov [#allocation13]  }
  0x66   :  { %s66_s5 = sshll.u32 %s12117_s20, 4  ;;  %s90_s28 = sshll.u32 %s12118_s30, 4  ;;  %s67_s5 = int_to_ptr.vmem [resolvable:$true] %s66_s5  ;;  %s91_s28 = int_to_ptr.vmem [resolvable:$true] %s90_s28 }
  0x67   :  { %s11642_s3 = scalar_lea.hbm %s13871_s6, 48 }
  0x68   :  { %p11643_p12 = scmp.ne.s32.totalorder %s13871_s6, %s11642_s3  ;;  %p11646_p13 = scmp.lt.u32.totalorder %s11642_s3, %s13871_s6 }
  0x6a   :  { %p11648_p0 = pnand %p11646_p13, %p11643_p12 }
  0x6c   :  { %11651 = shalt.err (!%p11648_p0)
}
  0x6d   :  { %s11652_s29 = scalar_lea.vmem %s67_s5, 48  ;;  %s11656_s1 = scalar_lea.vmem %s67_s5, 64 }
  0x6e   :  { %p11653_p1 = scmp.ne.s32.totalorder %s67_s5, %s11652_s29  ;;  %p11657_p2 = scmp.lt.s32.totalorder %s67_s5, %s67_s5 }
  0x6f   :  { %p11658_p3 = scmp.lt.s32.totalorder %s11656_s1, %s11652_s29 }
  0x71   :  { %p11659_p4 = por %p11658_p3, %p11657_p2 }
  0x73   :  { %p11660_p5 = pnand %p11659_p4, %p11653_p1 }
  0x75   :  { %11663 = shalt.err (!%p11660_p5)
}
  0x76   :  { %72 = dma.hbm_to_vmem [thread:$0]  %s13871_s6, 48, %s67_s5, [#allocation9], %s12115_s25, %s12115_s25, %s12116_s0  }
  0x77   :  { %s11664_s21 = scalar_lea.hbm %s13873_s8, 576 }
  0x78   :  { %p11665_p6 = scmp.ne.s32.totalorder %s13873_s8, %s11664_s21  ;;  %p11668_p7 = scmp.lt.u32.totalorder %s11664_s21, %s13873_s8 }
  0x7a   :  { %p11670_p8 = pnand %p11668_p7, %p11665_p6 }
  0x7c   :  { %11673 = shalt.err (!%p11670_p8)
}
  0x7d   :  { %s11674_s24 = scalar_lea.vmem %s91_s28, 576  ;;  %p11679_p10 = scmp.lt.s32.totalorder %s91_s28, %s91_s28 }
  0x7e   :  { %p11675_p9 = scmp.ne.s32.totalorder %s91_s28, %s11674_s24  ;;  %p11680_p11 = scmp.lt.s32.totalorder %s11674_s24, %s11674_s24 }
  0x80   :  { %p11681_p12 = por %p11680_p11, %p11679_p10 }
  0x82   :  { %p11682_p13 = pnand %p11681_p12, %p11675_p9 }
  0x84   :  { %11685 = shalt.err (!%p11682_p13)
}
  0x85   :  { %96 = dma.hbm_to_vmem [thread:$0]  %s13873_s8, 576, %s91_s28, [#allocation12], %s13896_s7, %s13896_s7, %s12108_s26  }
  0x86   :  { %s12119_s0 = smov [#allocation16]   ;;  %s12120_s9 = smov [#allocation19]  }
  0x87   :  { %s114_s5 = sshll.u32 %s12119_s0, 4  ;;  %s143_s29 = sshll.u32 %s12120_s9, 4  ;;  %s115_s5 = int_to_ptr.vmem [resolvable:$true] %s114_s5  ;;  %s144_s29 = int_to_ptr.vmem [resolvable:$true] %s143_s29 }
  0x88   :  { %s11686_s27 = scalar_lea.hbm %s13875_s10, 576 }
  0x89   :  { %p11687_p0 = scmp.ne.s32.totalorder %s13875_s10, %s11686_s27  ;;  %p11690_p1 = scmp.lt.u32.totalorder %s11686_s27, %s13875_s10 }
  0x8b   :  { %p11692_p2 = pnand %p11690_p1, %p11687_p0 }
  0x8d   :  { %11695 = shalt.err (!%p11692_p2)
}
  0x8e   :  { %s11696_s8 = scalar_lea.vmem %s115_s5, 576  ;;  %p11701_p4 = scmp.lt.s32.totalorder %s115_s5, %s115_s5 }
  0x8f   :  { %p11697_p3 = scmp.ne.s32.totalorder %s115_s5, %s11696_s8  ;;  %p11702_p5 = scmp.lt.s32.totalorder %s11696_s8, %s11696_s8 }
  0x91   :  { %p11703_p6 = por %p11702_p5, %p11701_p4 }
  0x93   :  { %p11704_p7 = pnand %p11703_p6, %p11697_p3 }
  0x95   :  { %11707 = shalt.err (!%p11704_p7)
}
  0x96   :  { %120 = dma.hbm_to_vmem [thread:$0]  %s13875_s10, 576, %s115_s5, [#allocation15], %s13896_s7, %s13896_s7, %s12108_s26  }
  0x97   :  { %s11708_s24 = scalar_lea.hbm %s13879_s14, 64 }
  0x98   :  { %p11709_p8 = scmp.ne.s32.totalorder %s13879_s14, %s11708_s24  ;;  %p11712_p9 = scmp.lt.u32.totalorder %s11708_s24, %s13879_s14 }
  0x9a   :  { %p11714_p10 = pnand %p11712_p9, %p11709_p8 }
  0x9c   :  { %11717 = shalt.err (!%p11714_p10)
}
  0x9d   :  { %s11718_s1 = scalar_lea.vmem %s144_s29, 64  ;;  %p11723_p12 = scmp.lt.s32.totalorder %s144_s29, %s144_s29 }
  0x9e   :  { %p11719_p11 = scmp.ne.s32.totalorder %s144_s29, %s11718_s1  ;;  %p11724_p13 = scmp.lt.s32.totalorder %s11718_s1, %s11718_s1 }
  0xa0   :  { %p11725_p0 = por %p11724_p13, %p11723_p12 }
  0xa2   :  { %p11726_p1 = pnand %p11725_p0, %p11719_p11 }
  0xa4   :  { %11729 = shalt.err (!%p11726_p1)
}
  0xa5   :  { %146 = dma.hbm_to_vmem [thread:$0]  %s13879_s14, 64, %s144_s29, [#allocation18]  }
  0xa6   :  { %s12121_s7 = smov [#allocation20]   ;;  %s11730_s20 = scalar_lea.hbm %s13881_s16, 16 }
  0xa7   :  { %s155_s5 = sshll.u32 %s12121_s7, 4  ;;  %p11731_p2 = scmp.ne.s32.totalorder %s13881_s16, %s11730_s20  ;;  %s156_s5 = int_to_ptr.vmem [resolvable:$true] %s155_s5 }
  0xa8   :  { %p11734_p3 = scmp.lt.u32.totalorder %s11730_s20, %s13881_s16 }
  0xaa   :  { %p11736_p4 = pnand %p11734_p3, %p11731_p2 }
  0xac   :  { %11739 = shalt.err (!%p11736_p4)
}
  0xad   :  { %s11740_s28 = scalar_lea.vmem %s156_s5, 16  ;;  %s11744_s14 = scalar_lea.vmem %s156_s5, 32 }
  0xae   :  { %p11741_p5 = scmp.ne.s32.totalorder %s156_s5, %s11740_s28  ;;  %p11745_p6 = scmp.lt.s32.totalorder %s156_s5, %s156_s5 }
  0xaf   :  { %p11746_p7 = scmp.lt.s32.totalorder %s11744_s14, %s11740_s28 }
  0xb1   :  { %p11747_p8 = por %p11746_p7, %p11745_p6 }
  0xb3   :  { %p11748_p9 = pnand %p11747_p8, %p11741_p5 }
  0xb5   :  { %11751 = shalt.err (!%p11748_p9)
}
  0xb6   :  { %158 = dma.hbm_to_vmem [thread:$0]  %s13881_s16, 16, %s156_s5, [#allocation21]  }
  0xb7   :  { %12068 = dma.done.wait [#allocation6], 32  }
  0xb8   :  { %12069 = vsyncadd [#allocation6], 4294967264 }
  0xb9   :  { %12070 = dma.done.wait [#allocation9], 624  }
  0xba   :  { %12071 = vsyncadd [#allocation9], 4294966672 }
  0xbb   :  { %12072 = dma.done.wait [#allocation12], 960  }
  0xbc   :  { %12073 = vsyncadd [#allocation12], 4294966336 }
  0xbd   :  { %12074 = dma.done.wait [#allocation15], 1152  }
  0xbe   :  { %12075 = vsyncadd [#allocation15], 4294966144 }
  0xbf   :  { %12076 = dma.done.wait [#allocation18], 112  }
  0xc0   :  { %12077 = vsyncadd [#allocation18], 4294967184 }
  0xc1   :  { %12078 = dma.done.wait [#allocation21], 16  }
  0xc2   :  { %12079 = vsyncadd [#allocation21], 4294967280  ;;  %v222_v0 = vlaneseq  ;;  %v12122_v1 = vmov 0.0   ;;  %vm12123_vm0 = vmmov 0   ;;  %s13898_s23 = sld [smem:[#allocation71_spill]]  ;;  %v11192_v5 = vld [vmem:[%s13869_s4] sm:$0xff]  }
  0xc3   :  { %10850 = vmatprep.subr.bf16.mxu1 %v12122_v1  ;;  %10854 = vmatprep.mubr.msk.bf16.mxu1 %vm12123_vm0, %v12122_v1  ;;  %v11193_v6 = vld [vmem:[%s13869_s4 + $0x8] ss:$0 sps:$4 sm:$0xff]   ;;  %vm252_vm1 = vcmask 1043456   ;;  %v12390_v7 = vld [vmem:[#allocation5] sm:$0x3]  ;;  %s13899_s10 = sld [smem:[#allocation68_spill]] }
  0xc4   :  { %v12374_v2 = vshrl.u32 %v222_v0, 7  ;;  %10851 = vmatpush3.bf16.msra.mxu1 %v11192_v5  ;;  %v254_v10 = vsel %vm252_vm1, %v11193_v6, 0  ;;  %vm248_vm2 = vcmask 195584   ;;  %v10143_v13 = vld [vmem:[#allocation10] ss:$0 sm:$0xff]  ;;  %s13900_s5 = sld [smem:[#allocation70_spill]] }
  0xc5   :  { %10852 = vmatprep.subr.bf16.mxu1 %v12122_v1  ;;  %s12124_s11 = smov 104   ;;  %vm423_vm3 = vcmask 64512   ;;  %s12125_s16 = smov 80  }
  0xc6   :  { %v12377_v3 = vsub.s32 0, %v12374_v2  ;;  %s12126_s2 = smov [#allocation2]   ;;  %s12127_s24 = smov [#allocation3]  }
  0xc7   :  { %s209_s6 = sshll.u32 %s12127_s24, 4  ;;  %s12507_s9 = scalar_lea.hbm %s13882_s17, 3072  ;;  %s12546_s6 = int_to_ptr.vmem [resolvable:$true] %s209_s6 }
  0xc8   :  { %v12382_v4 = vld [vmem:[%s13898_s23] sm:$0x3f]  ;;  %v225_v9 = vrot.slane %v12390_v7, %v12377_v3  ;;  %10853 = vmatpush3.bf16.msra.mxu1 %v254_v10  ;;  %s197_s23 = sshll.u32 %s12126_s2, 4  ;;  %p11753_p10 = scmp.ne.s32.totalorder %s13882_s17, %s12507_s9  ;;  %s12502_s23 = int_to_ptr.vmem [resolvable:$true] %s197_s23 }
  0xc9   :  { %v221_v8 = vld [vmem:[%s13899_s10] sm:$0xff]  ;;  %p11756_p12 = scmp.lt.u32.totalorder %s12507_s9, %s13882_s17 }
  0xca   :  { %v12399_v11 = vadd.f32 %v225_v9, %v221_v8  ;;  %v12407_v15 = vld [vmem:[%s13900_s5] sm:$0xff]  ;;  %v12419_v22 = vld [vmem:[%s13900_s5 + $0x8] sm:$0xff]  ;;  %v12425_v23 = vld [vmem:[%s13900_s5 + $0x10] sm:$0xff] }
  0xcb   :  { %v12436_v26 = vld [vmem:[%s13900_s5 + $0x18] sm:$0xff]  ;;  %v12442_v27 = vld [vmem:[%s13900_s5 + $0x20] sm:$0xff]  ;;  %v12452_v30 = vld [vmem:[%s13900_s5 + $0x28] sm:$0xff]  ;;  %s12516_s5 = scalar_lea.hbm %s13882_s17, 18432 }
  0xcc   :  { %v231_v12 = vpack.c.bf16 %v12399_v11, %v12399_v11  ;;  %p11755_p11 = scmp.lt.u32.totalorder %s12516_s5, %s12507_s9 }
  0xce   :  { %10855 = vmatmul.mubr.msk.bf16.vlgmr.msra.gmra.mrb[0].mxu1 %vm248_vm2, %v231_v12  ;;  %p11757_p13 = por %p11756_p12, %p11755_p11 }
  0xd0   :  { %p11758_p0 = pnand %p11757_p13, %p11753_p10 }
 0x1a1   :  { %v290_v14 = vpop.f32.mrb[0].mxu1 }
 0x1a2   :  { %v12409_v16 = vadd.f32 %v10143_v13, %v290_v14  ;;  %v10856_v17 = vpop.f32.mrb[1].mxu1 }
 0x1a3   :  { %v293_v18 = vpop.f32.mrb[2].mxu1 }
 0x1a4   :  { %306 = vrot.lane.b32.xlu0 %v12409_v16, %s12124_s11  ;;  %v10857_v19 = vpop.f32.mrb[3].mxu1  ;;  %v299_v20 = vmul.f32 %v12409_v16, %v12407_v15  ;;  %v300_v24 = vmul.f32 %v12409_v16, %v12419_v22  ;;  %v301_v25 = vmul.f32 %v12409_v16, %v12425_v23  ;;  %v302_v28 = vmul.f32 %v12409_v16, %v12436_v26 }
 0x1a5   :  { %v303_v29 = vmul.f32 %v12409_v16, %v12442_v27  ;;  %v304_v31 = vmul.f32 %v12409_v16, %v12452_v30 }
 0x1a6   :  { %10860 = vmatprep.mubr.msk.f32.mxu1 %vm248_vm2, %v299_v20 }
 0x216   :  { %v307_v21 = vpop.permute.xlu0 %306 }
 0x217   :  { %10858 = vmatprep.subr.msk.mxu1 %vm248_vm2, %v307_v21 }
 0x218   :  { %10859 = vmatpush3.xpose.msk.msra.mxu1 %vm248_vm2, %v307_v21 }
 0x219   :  { %10880 = vmatprep.subr.bf16.mxu1 %v12122_v1 }
 0x21b   :  { %10861 = vmatmul.mubr.msk.f32.vlgmr.msra.gmra.mrb[4].mxu1 %vm248_vm2, %v300_v24 }
 0x21c   :  { %10863 = vmatprep.mubr.msk.f32.mxu1 %vm248_vm2, %v301_v25 }
 0x21f   :  { %10864 = vmatmul.mubr.msk.f32.gmra.mrb[6].mxu1 %vm248_vm2, %v302_v28 }
 0x220   :  { %10866 = vmatprep.mubr.msk.f32.mxu1 %vm248_vm2, %v303_v29 }
 0x223   :  { %10867 = vmatmul.mubr.msk.f32.gmra.mrb[8].mxu1 %vm248_vm2, %v304_v31 }
 0x224   :  { %10884 = vmatprep.mubr.msk.bf16.mxu1 %vm12123_vm0, %v12122_v1 }
 0x2ee   :  { %v10862_v32 = vpop.f32.mrb[4].mxu1 }
 0x2ef   :  { %v394_v33 = vpop.f32.mrb[5].mxu1  ;;  %v427_v34 = vsel %vm423_vm3, %v10862_v32, -inf }
 0x2f0   :  { %428 = vmax.xlane.f32.xlu1 %v427_v34  ;;  %v424_v35 = vsel %vm423_vm3, %v394_v33, -inf }
 0x2f1   :  { %425 = vmax.xlane.f32.xlu0 %v424_v35 }
 0x2f2   :  { %v10865_v36 = vpop.f32.mrb[6].mxu1 }
 0x2f3   :  { %v404_v37 = vpop.f32.mrb[7].mxu1  ;;  %v433_v38 = vsel %vm423_vm3, %v10865_v36, -inf }
 0x2f4   :  { %434 = vmax.xlane.f32.xlu1 %v433_v38  ;;  %v430_v41 = vsel %vm423_vm3, %v404_v37, -inf }
 0x2f6   :  { %v10868_v39 = vpop.f32.mrb[8].mxu1 }
 0x2f7   :  { %v414_v40 = vpop.f32.mrb[9].mxu1  ;;  %v439_v43 = vsel %vm423_vm3, %v10868_v39, -inf }
 0x2f8   :  { %431 = vmax.xlane.f32.xlu1 %v430_v41  ;;  %v436_v42 = vsel %vm423_vm3, %v414_v40, -inf  ;;  %v11194_v41 = vld [vmem:[#allocation8] sm:$0xff]  }
 0x2f9   :  { %10881 = vmatpush3.bf16.msra.mxu1 %v11194_v41 }
 0x2fa   :  { %10882 = vmatprep.subr.bf16.mxu1 %v12122_v1 }
 0x2fc   :  { %437 = vmax.xlane.f32.xlu1 %v436_v42  ;;  %v11195_v42 = vld [vmem:[#allocation8 + $0x8] ss:$0 sps:$4 sm:$0xff]  }
 0x300   :  { %440 = vmax.xlane.f32.xlu1 %v439_v43  ;;  %v635_v43 = vsel %vm252_vm1, %v11195_v42, 0 }
 0x301   :  { %10883 = vmatpush3.bf16.msra.mxu1 %v635_v43 }
 0x37d   :  { %v429_v44 = vpop.xlane.xlu1 %428 }
 0x37e   :  { %v443_v45 = vsub.f32 %v10862_v32, %v429_v44  ;;  %v426_v46 = vpop.xlane.xlu0 %425 }
 0x37f   :  { %v442_v47 = vsub.f32 %v394_v33, %v426_v46 }
 0x380   :  { %v450_v48 = vmul.f32 1.442695, %v443_v45 }
 0x381   :  { %v448_v49 = vmul.f32 1.442695, %v442_v47  ;;  %v435_v50 = vpop.xlane.xlu1 %434 }
 0x382   :  { %11196 = vpow2.f32 %v450_v48  ;;  %v445_v51 = vsub.f32 %v10865_v36, %v435_v50 }
 0x383   :  { %11198 = vpow2.f32 %v448_v49 }
 0x384   :  { %v454_v54 = vmul.f32 1.442695, %v445_v51 }
 0x385   :  { %v432_v52 = vpop.xlane.xlu1 %431 }
 0x386   :  { %v444_v53 = vsub.f32 %v404_v37, %v432_v52 }
 0x388   :  { %v452_v55 = vmul.f32 1.442695, %v444_v53 }
 0x389   :  { %v438_v56 = vpop.xlane.xlu1 %437 }
 0x38a   :  { %11200 = vpow2.f32 %v452_v55  ;;  %v446_v57 = vsub.f32 %v414_v40, %v438_v56 }
 0x38b   :  { %11202 = vpow2.f32 %v454_v54 }
 0x38c   :  { %v11197_v58 = vpop.eup %11196  ;;  %v456_v59 = vmul.f32 1.442695, %v446_v57 }
 0x38d   :  { %v441_v60 = vpop.xlane.xlu1 %440  ;;  %v463_v61 = vsel %vm423_vm3, %v11197_v58, 0.0  ;;  %v11199_v62 = vpop.eup %11198 }
 0x38e   :  { %11204 = vpow2.f32 %v456_v59  ;;  %v447_v63 = vsub.f32 %v10868_v39, %v441_v60  ;;  %464 = vadd.xlane.f32.xlu1 %v463_v61  ;;  %v460_v5 = vsel %vm423_vm3, %v11199_v62, 0.0 }
 0x390   :  { %v458_v0 = vmul.f32 1.442695, %v447_v63 }
 0x392   :  { %11206 = vpow2.f32 %v458_v0  ;;  %461 = vadd.xlane.f32.xlu1 %v460_v5 }
 0x394   :  { %v11201_v6 = vpop.eup %11200 }
 0x395   :  { %v466_v8 = vsel %vm423_vm3, %v11201_v6, 0.0  ;;  %v11203_v9 = vpop.eup %11202 }
 0x396   :  { %467 = vadd.xlane.f32.xlu1 %v466_v8  ;;  %v469_v12 = vsel %vm423_vm3, %v11203_v9, 0.0 }
 0x398   :  { %v11205_v10 = vpop.eup %11204 }
 0x399   :  { %v472_v13 = vsel %vm423_vm3, %v11205_v10, 0.0 }
 0x39a   :  { %470 = vadd.xlane.f32.xlu1 %v469_v12  ;;  %473 = vadd.xlane.f32.xlu0 %v472_v13 }
 0x39c   :  { %v11207_v14 = vpop.eup %11206 }
 0x39d   :  { %v475_v17 = vsel %vm423_vm3, %v11207_v14, 0.0 }
 0x39e   :  { %476 = vadd.xlane.f32.xlu1 %v475_v17 }
 0x3b0   :  { %490 = vrot.lane.b32.xlu0 %v12409_v16, %s12125_s16 }
 0x41b   :  { %v465_v18 = vpop.xlane.xlu1 %464 }
 0x41c   :  { %11208 = vrcp.f32 %v465_v18 }
 0x41f   :  { %v462_v19 = vpop.xlane.xlu1 %461 }
 0x420   :  { %11210 = vrcp.f32 %v462_v19 }
 0x423   :  { %v468_v20 = vpop.xlane.xlu1 %467 }
 0x424   :  { %11212 = vrcp.f32 %v468_v20 }
 0x426   :  { %v11209_v25 = vpop.eup %11208 }
 0x427   :  { %v474_v21 = vpop.xlane.xlu0 %473  ;;  %v471_v24 = vpop.xlane.xlu1 %470  ;;  %v485_v33 = vmul.f32 %v11209_v25, %v11197_v58 }
 0x428   :  { %11214 = vrcp.f32 %v474_v21 }
 0x429   :  { %11216 = vrcp.f32 %v471_v24 }
 0x42a   :  { %v11211_v28 = vpop.eup %11210 }
 0x42b   :  { %v491_v29 = vpop.permute.xlu0 %490  ;;  %v477_v31 = vpop.xlane.xlu1 %476  ;;  %v484_v32 = vmul.f32 %v11211_v28, %v11199_v62  ;;  %v12490_v62 = vld [vmem:[#allocation11] sm:$0x3f] }
 0x42c   :  { %11218 = vrcp.f32 %v477_v31  ;;  %10869 = vmatprep.subr.mxu0 %v491_v29  ;;  %v621_v63 = vrot.slane %v12490_v62, %v12377_v3 }
 0x42d   :  { %10870 = vmatpush3.msra.mxu0 %v491_v29  ;;  %10871 = vmatprep.mubr.msk.f32.mxu0 %vm423_vm3, %v484_v32 }
 0x42e   :  { %v11213_v16 = vpop.eup %11212  ;;  %10872 = vmatmul.mubr.msk.f32.vlgmr.msra.gmra.mrb[0].mxu0 %vm423_vm3, %v485_v33 }
 0x42f   :  { %v486_v34 = vmul.f32 %v11213_v16, %v11201_v6 }
 0x431   :  { %10874 = vmatprep.mubr.msk.f32.mxu0 %vm423_vm3, %v486_v34 }
 0x432   :  { %v11215_v35 = vpop.eup %11214 }
 0x433   :  { %v11217_v36 = vpop.eup %11216  ;;  %v488_v37 = vmul.f32 %v11215_v35, %v11205_v10 }
 0x434   :  { %v487_v38 = vmul.f32 %v11217_v36, %v11203_v9 }
 0x436   :  { %v11219_v39 = vpop.eup %11218  ;;  %10875 = vmatmul.mubr.msk.f32.gmra.mrb[2].mxu0 %vm423_vm3, %v487_v38 }
 0x437   :  { %10877 = vmatprep.mubr.msk.f32.mxu0 %vm423_vm3, %v488_v37  ;;  %v489_v40 = vmul.f32 %v11219_v39, %v11207_v14 }
 0x43a   :  { %10878 = vmatmul.mubr.msk.f32.gmra.mrb[4].mxu0 %vm423_vm3, %v489_v40 }
 0x501   :  { %v10873_v44 = vpop.f32.mrb[0].mxu0 }
 0x502   :  { %v607_v45 = vmul.f32 %v10873_v44, %v12419_v22  ;;  %v577_v46 = vpop.f32.mrb[1].mxu0 }
 0x503   :  { %v606_v47 = vmul.f32 %v577_v46, %v12407_v15 }
 0x505   :  { %v612_v48 = vadd.f32 %v607_v45, %v606_v47 }
 0x509   :  { %v10876_v49 = vpop.f32.mrb[2].mxu0 }
 0x50a   :  { %v587_v50 = vpop.f32.mrb[3].mxu0  ;;  %v609_v52 = vmul.f32 %v10876_v49, %v12436_v26 }
 0x50b   :  { %v608_v51 = vmul.f32 %v587_v50, %v12425_v23 }
 0x50d   :  { %v613_v53 = vadd.f32 %v612_v48, %v608_v51  ;;  %v10879_v54 = vpop.f32.mrb[4].mxu0 }
 0x50e   :  { %v597_v55 = vpop.f32.mrb[5].mxu0  ;;  %v611_v58 = vmul.f32 %v10879_v54, %v12452_v30 }
 0x50f   :  { %v610_v56 = vmul.f32 %v597_v55, %v12442_v27  ;;  %v614_v57 = vadd.f32 %v613_v53, %v609_v52 }
 0x511   :  { %v615_v59 = vadd.f32 %v614_v57, %v610_v56 }
 0x513   :  { %v616_v60 = vadd.f32 %v615_v59, %v611_v58 }
 0x515   :  { %v617_v61 = vpack.c.bf16 %v616_v60, %v616_v60 }
 0x517   :  { %10885 = vmatmul.mubr.msk.bf16.vlgmr.msra.gmra.mrb[12].mxu1 %vm248_vm2, %v617_v61 }
 0x5ea   :  { %v671_v0 = vpop.f32.mrb[12].mxu1 }
 0x5eb   :  { %v672_v5 = vadd.f32 %v671_v0, %v621_v63  ;;  %v10886_v6 = vpop.f32.mrb[13].mxu1 }
 0x5ec   :  { %v674_v8 = vpop.f32.mrb[14].mxu1 }
 0x5ed   :  { %v12495_v9 = vadd.f32 %v672_v5, %v12399_v11  ;;  %v10887_v10 = vpop.f32.mrb[15].mxu1 }
 0x5ef   :  { %v678_v12 = vsel %vm248_vm2, %v12495_v9, 0.0  ;;  %v683_v13 = vmul.f32 %v12495_v9, %v12495_v9 }
 0x5f0   :  { %679 = vadd.xlane.f32.xlu1 %v678_v12 }
 0x5f1   :  { %v684_v14 = vsel %vm248_vm2, %v683_v13, 0.0 }
 0x5f4   :  { %685 = vadd.xlane.f32.xlu1 %v684_v14 }
 0x5f5   :  { %11761 = shalt.err (!%p11758_p0)  }
 0x5f6   :  { %s11762_s22 = scalar_lea.vmem %s12502_s23, 3072  ;;  %s11766_s8 = scalar_lea.vmem %s12502_s23, 6144 }
 0x5f7   :  { %p11763_p1 = scmp.ne.s32.totalorder %s12502_s23, %s11762_s22  ;;  %p11767_p2 = scmp.lt.s32.totalorder %s12502_s23, %s12502_s23 }
 0x5f8   :  { %p11768_p3 = scmp.lt.s32.totalorder %s11766_s8, %s11762_s22 }
 0x5fa   :  { %p11769_p4 = por %p11768_p3, %p11767_p2 }
 0x5fc   :  { %p12536_p5 = pnand %p11769_p4, %p11763_p1 }
 0x5fe   :  { %11773 = shalt.err (!%p12536_p5)  }
 0x5ff   :  { %200 = dma.hbm_to_vmem [thread:$0]  %s13882_s17, 3072, %s12502_s23, [#allocation4] }
 0x600   :  { %s12551_s24 = scalar_lea.hbm %s13883_s18, 3072  ;;  %s12560_s26 = scalar_lea.hbm %s13883_s18, 18432 }
 0x601   :  { %p11775_p6 = scmp.ne.s32.totalorder %s13883_s18, %s12551_s24  ;;  %p11777_p7 = scmp.lt.u32.totalorder %s12560_s26, %s12551_s24 }
 0x602   :  { %p13889_p8 = scmp.lt.u32.totalorder %s12551_s24, %s13883_s18 }
 0x604   :  { %p11779_p9 = por %p13889_p8, %p11777_p7 }
 0x606   :  { %p11780_p10 = pnand %p11779_p9, %p11775_p6 }
 0x608   :  { %11783 = shalt.err (!%p11780_p10)  }
 0x609   :  { %s11784_s21 = scalar_lea.vmem %s12546_s6, 3072  ;;  %s11788_s22 = scalar_lea.vmem %s12546_s6, 6144 }
 0x60a   :  { %p11785_p11 = scmp.ne.s32.totalorder %s12546_s6, %s11784_s21  ;;  %p11789_p13 = scmp.lt.s32.totalorder %s12546_s6, %s12546_s6 }
 0x60b   :  { %p11790_p0 = scmp.lt.s32.totalorder %s11788_s22, %s11784_s21 }
 0x60d   :  { %p11791_p1 = por %p11790_p0, %p11789_p13 }
 0x60f   :  { %p12580_p2 = pnand %p11791_p1, %p11785_p11 }
 0x611   :  { %11795 = shalt.err (!%p12580_p2)  }
 0x612   :  { %212 = dma.hbm_to_vmem [thread:$0]  %s13883_s18, 3072, %s12546_s6, [#allocation4 + $0x2] }
 0x613   :  { %s12128_s2 = smov [#allocation2 + $0xc0]   ;;  %s12129_s0 = smov [#allocation3 + $0xc0]  }
 0x614   :  { %s715_s25 = sshll.u32 %s12128_s2, 4  ;;  %s729_s1 = sshll.u32 %s12129_s0, 4  ;;  %s12590_s25 = int_to_ptr.vmem [resolvable:$true] %s715_s25  ;;  %s12622_s1 = int_to_ptr.vmem [resolvable:$true] %s729_s1 }
 0x615   :  { %s12595_s27 = scalar_lea.hbm %s13882_s17, 6144 }
 0x616   :  { %p11797_p3 = scmp.ne.s32.totalorder %s12507_s9, %s12595_s27  ;;  %p11800_p4 = scmp.lt.u32.totalorder %s12516_s5, %s12595_s27 }
 0x617   :  { %p11802_p7 = scmp.lt.u32.totalorder %s12595_s27, %s12507_s9 }
 0x618   :  { %p11801_p6 = por %p11800_p4, %p11756_p12 }
 0x61a   :  { %p11803_p9 = por %p11802_p7, %p11801_p6 }
 0x61c   :  { %p11804_p10 = pnand %p11803_p9, %p11797_p3 }
 0x61e   :  { %11807 = shalt.err (!%p11804_p10)  }
 0x61f   :  { %s11808_s21 = scalar_lea.vmem %s12590_s25, 3072  ;;  %p11813_p13 = scmp.lt.s32.totalorder %s12590_s25, %s12502_s23 }
 0x620   :  { %p11809_p11 = scmp.ne.s32.totalorder %s12590_s25, %s11808_s21  ;;  %p11814_p0 = scmp.lt.s32.totalorder %s11766_s8, %s11808_s21 }
 0x622   :  { %p11815_p1 = por %p11814_p0, %p11813_p13 }
 0x624   :  { %p12614_p8 = pnand %p11815_p1, %p11809_p11 }
 0x626   :  { %s13903_s29 = scalar_select %p12614_p8, 1, 0 }
 0x627   :  { %11819 = shalt.err (!%p12614_p8)  }
 0x628   :  { %718 = dma.hbm_to_vmem [thread:$0]  %s12507_s9, 3072, %s12590_s25, [#allocation4 + $0x1] }
 0x629   :  { %s12627_s8 = scalar_lea.hbm %s13883_s18, 6144  ;;  %p13904_p4 = scmp.lt.u32.totalorder %s12551_s24, %s13883_s18 }
 0x62a   :  { %p11822_p12 = scmp.ne.s32.totalorder %s12551_s24, %s12627_s8  ;;  %p11825_p3 = scmp.lt.u32.totalorder %s12560_s26, %s12627_s8 }
 0x62b   :  { %p11827_p7 = scmp.lt.u32.totalorder %s12627_s8, %s12551_s24 }
 0x62c   :  { %p11826_p6 = por %p11825_p3, %p13904_p4 }
 0x62e   :  { %p11828_p9 = por %p11827_p7, %p11826_p6 }
 0x630   :  { %p11829_p10 = pnand %p11828_p9, %p11822_p12 }
 0x632   :  { %11832 = shalt.err (!%p11829_p10)  }
 0x633   :  { %s11833_s9 = scalar_lea.vmem %s12622_s1, 3072  ;;  %p11838_p13 = scmp.lt.s32.totalorder %s12622_s1, %s12546_s6 }
 0x634   :  { %p11834_p11 = scmp.ne.s32.totalorder %s12622_s1, %s11833_s9  ;;  %p11839_p0 = scmp.lt.s32.totalorder %s11788_s22, %s11833_s9 }
 0x636   :  { %p11840_p1 = por %p11839_p0, %p11838_p13 }
 0x638   :  { %p12646_p8 = pnand %p11840_p1, %p11834_p11 }
 0x63a   :  { %11844 = shalt.err (!%p12646_p8)  }
 0x63b   :  { %732 = dma.hbm_to_vmem [thread:$0]  %s12551_s24, 3072, %s12622_s1, [#allocation4 + $0x3]  ;;  %v12655_v28 = vsub.s32 1, %v12374_v2  ;;  %v12658_v29 = vsub.s32 2, %v12374_v2 }
 0x63d   :  { %v698_v31 = vrot.slane %v12490_v62, %v12655_v28  ;;  %v703_v16 = vrot.slane %v12490_v62, %v12658_v29 }
 0x67d   :  { %v680_v11 = vpop.xlane.xlu1 %679 }
 0x67e   :  { %v682_v17 = vmul.f32 0.041666668, %v680_v11 }
 0x680   :  { %v688_v19 = vmul.f32 %v682_v17, %v682_v17  ;;  %v691_v32 = vsub.f32 %v12495_v9, %v682_v17 }
 0x681   :  { %v686_v18 = vpop.xlane.xlu1 %685 }
 0x682   :  { %v687_v20 = vmul.f32 0.041666668, %v686_v18 }
 0x684   :  { %v689_v21 = vsub.f32 %v687_v20, %v688_v19 }
 0x686   :  { %v690_v24 = vmax.f32 %v689_v21, 0.0 }
 0x688   :  { %v692_v25 = vadd.f32 1e-05, %v690_v24 }
 0x68a   :  { %11220 = vrsqrt.f32 %v692_v25 }
 0x694   :  { %v11221_v33 = vpop.eup %11220 }
 0x695   :  { %v694_v34 = vmul.f32 %v11221_v33, %v691_v32 }
 0x697   :  { %v699_v35 = vmul.f32 %v698_v31, %v694_v34 }
 0x699   :  { %v12665_v36 = vadd.f32 %v703_v16, %v699_v35 }
 0x69a   :  { %12080 = dma.done.wait [#allocation4], 3072 }
 0x69b   :  { %12081 = vsyncadd [#allocation4], 4294964224 }
 0x69c   :  { %12082 = dma.done.wait [#allocation4 + $0x2], 3072 }
 0x69d   :  { %12083 = vsyncadd [#allocation4 + $0x2], 4294964224  ;;  %v12130_v37 = vmov 0   ;;  %v739_v38 = vld [vmem:[#allocation2] sm:$0xff]  ;;  %v740_v45 = vld [vmem:[#allocation2 + $0x8] sm:$0xff]  ;;  %v12675_v61 = vpack.c.bf16 %v12665_v36, %v12665_v36  ;;  %s12883_s24 = scalar_lea.hbm %s13882_s17, 9216  ;;  %p11849_p3 = scmp.lt.u32.totalorder %s12595_s27, %s13882_s17 }
 0x69e   :  { %1075 = vmatprep.mubr.bf16.mxu1 %v12130_v37  ;;  %1116 = vmatprep.mubr.bf16.mxu0 %v12130_v37  ;;  %v747_v39 = vld [vmem:[#allocation2 + $0x40] sm:$0xff]  ;;  %v748_v46 = vld [vmem:[#allocation2 + $0x48] sm:$0xff]  ;;  %v741_v52 = vld [vmem:[#allocation2 + $0x10] sm:$0xff]  ;;  %p11847_p12 = scmp.ne.s32.totalorder %s12595_s27, %s12883_s24  ;;  %p11850_p4 = scmp.lt.u32.totalorder %s12516_s5, %s12883_s24 }
 0x69f   :  { %v755_v40 = vld [vmem:[#allocation2 + $0x80] sm:$0xff]  ;;  %v10164_v41 = vcombine.high %v739_v38, %v747_v39  ;;  %v10163_v42 = vcombine.low %v739_v38, %v747_v39  ;;  %v756_v47 = vld [vmem:[#allocation2 + $0x88] sm:$0xff]  ;;  %v10166_v48 = vcombine.high %v740_v45, %v748_v46  ;;  %v10165_v49 = vcombine.low %v740_v45, %v748_v46  ;;  %v749_v53 = vld [vmem:[#allocation2 + $0x50] sm:$0xff]  ;;  %p11852_p7 = scmp.lt.u32.totalorder %s12883_s24, %s12595_s27 }
 0x6a0   :  { %v10180_v43 = vcombine.high %v755_v40, %v755_v40  ;;  %v10179_v44 = vcombine.low %v755_v40, %v755_v40  ;;  %v10182_v50 = vcombine.high %v756_v47, %v756_v47  ;;  %v10181_v51 = vcombine.low %v756_v47, %v756_v47  ;;  %v742_v54 = vld [vmem:[#allocation2 + $0x18] sm:$0xff]  ;;  %v757_v59 = vld [vmem:[#allocation2 + $0x90] sm:$0xff]  ;;  %v743_v5 = vld [vmem:[#allocation2 + $0x20] sm:$0xff]  ;;  %p11851_p6 = por %p11850_p4, %p11849_p3 }
 0x6a1   :  { %1043 = vmatprep.subr.bf16.mxu1 %v10164_v41  ;;  %v750_v55 = vld [vmem:[#allocation2 + $0x58] sm:$0xff]  ;;  %1084 = vmatprep.subr.bf16.mxu0 %v10166_v48  ;;  %v10168_v57 = vcombine.high %v741_v52, %v749_v53  ;;  %v10167_v63 = vcombine.low %v741_v52, %v749_v53  ;;  %v10184_v6 = vcombine.high %v757_v59, %v757_v59  ;;  %v751_v10 = vld [vmem:[#allocation2 + $0x60] sm:$0xff]  ;;  %v744_v14 = vld [vmem:[#allocation2 + $0x28] sm:$0xff] }
 0x6a2   :  { %1044 = vmatpush1.bf16.msra.mxu1 %v10163_v42  ;;  %v996_v56 = vsel %vm252_vm1, %v10179_v44, 0  ;;  %1085 = vmatpush1.bf16.msra.mxu0 %v10165_v49  ;;  %v1002_v58 = vsel %vm252_vm1, %v10181_v51, 0  ;;  %v10170_v60 = vcombine.high %v742_v54, %v750_v55  ;;  %v758_v0 = vld [vmem:[#allocation2 + $0x98] sm:$0xff]  ;;  %v10183_v8 = vcombine.low %v757_v59, %v757_v59  ;;  %v752_v11 = vld [vmem:[#allocation2 + $0x68] sm:$0xff]  ;;  %v759_v19 = vld [vmem:[#allocation2 + $0xa0] sm:$0xff]  ;;  %p11853_p9 = por %p11852_p7, %p11851_p6 }
 0x6a3   :  { %10195 = vmatprep.subr.msk.bf16.mxu1 %vm252_vm1, %v10180_v43  ;;  %10197 = vmatprep.subr.msk.bf16.mxu0 %vm252_vm1, %v10182_v50  ;;  %v10169_v9 = vcombine.low %v742_v54, %v750_v55  ;;  %v10186_v12 = vcombine.high %v758_v0, %v758_v0  ;;  %v10185_v13 = vcombine.low %v758_v0, %v758_v0  ;;  %v760_v25 = vld [vmem:[#allocation2 + $0xa8] sm:$0xff]  ;;  %v745_v16 = vld [vmem:[#allocation2 + $0x30] sm:$0xff]  ;;  %v746_v39 = vld [vmem:[#allocation2 + $0x38] sm:$0xff] }
 0x6a4   :  { %v1008_v17 = vsel %vm252_vm1, %v10183_v8, 0  ;;  %v10172_v18 = vcombine.high %v743_v5, %v751_v10  ;;  %v10174_v21 = vcombine.high %v744_v14, %v752_v11  ;;  %v10171_v24 = vcombine.low %v743_v5, %v751_v10  ;;  %v753_v34 = vld [vmem:[#allocation2 + $0x70] sm:$0xff]  ;;  %v754_v40 = vld [vmem:[#allocation2 + $0x78] sm:$0xff]  ;;  %v765_v51 = vld [vmem:[#allocation3] sm:$0xff]  ;;  %p11854_p10 = pnand %p11853_p9, %p11847_p12 }
 0x6a5   :  { %v1014_v20 = vsel %vm252_vm1, %v10185_v13, 0  ;;  %v10188_v31 = vcombine.high %v759_v19, %v759_v19  ;;  %v10187_v32 = vcombine.low %v759_v19, %v759_v19  ;;  %v10173_v33 = vcombine.low %v744_v14, %v752_v11  ;;  %v761_v43 = vld [vmem:[#allocation2 + $0xb0] sm:$0xff]  ;;  %v762_v47 = vld [vmem:[#allocation2 + $0xb8] sm:$0xff]  ;;  %v773_v52 = vld [vmem:[#allocation3 + $0x40] sm:$0xff] }
 0x6a6   :  { %1046 = vmatpush1.bf16.msra.mxu1 %v996_v56  ;;  %1087 = vmatpush1.bf16.msra.mxu0 %v1002_v58  ;;  %v10190_v35 = vcombine.high %v760_v25, %v760_v25  ;;  %v10189_v38 = vcombine.low %v760_v25, %v760_v25  ;;  %v10176_v42 = vcombine.high %v745_v16, %v753_v34  ;;  %v781_v59 = vld [vmem:[#allocation3 + $0x80] sm:$0xff]  ;;  %v766_v0 = vld [vmem:[#allocation3 + $0x8] sm:$0xff]  ;;  %v772_v8 = vld [vmem:[#allocation3 + $0x38] sm:$0xff] }
 0x6a7   :  { %1125 = vmatprep.subr.bf16.mxu1 %v10168_v57  ;;  %1166 = vmatprep.subr.bf16.mxu0 %v10170_v60  ;;  %v1020_v41 = vsel %vm252_vm1, %v10187_v32, 0  ;;  %v10178_v45 = vcombine.high %v746_v39, %v754_v40  ;;  %v10175_v46 = vcombine.low %v745_v16, %v753_v34  ;;  %v10192_v48 = vcombine.high %v761_v43, %v761_v43  ;;  %v774_v5 = vld [vmem:[#allocation3 + $0x48] sm:$0xff]  ;;  %v788_v13 = vld [vmem:[#allocation3 + $0xb8] sm:$0xff]  ;;  %v12714_v11 = vld [vmem:[%s13878_s13] sm:$0xff] }
 0x6a8   :  { %v1026_v44 = vsel %vm252_vm1, %v10189_v38, 0  ;;  %v10191_v49 = vcombine.low %v761_v43, %v761_v43  ;;  %v10177_v50 = vcombine.low %v746_v39, %v754_v40  ;;  %v10194_v53 = vcombine.high %v762_v47, %v762_v47 }
 0x6a9   :  { %10196 = vmatmul.mubr.msk.bf16.vlgmr.msra.gmra.mrb[16].mxu1 %vm248_vm2, %v12675_v61  ;;  %10198 = vmatmul.mubr.msk.bf16.vlgmr.msra.gmra.mrb[8].mxu0 %vm248_vm2, %v12675_v61  ;;  %v10193_v54 = vcombine.low %v762_v47, %v762_v47  ;;  %v10212_v56 = vcombine.high %v765_v51, %v773_v52  ;;  %v10211_v58 = vcombine.low %v765_v51, %v773_v52 }
 0x6aa   :  { %1126 = vmatpush1.bf16.msra.mxu1 %v10167_v63  ;;  %1157 = vmatprep.mubr.bf16.mxu1 %v12130_v37  ;;  %v1032_v55 = vsel %vm252_vm1, %v10191_v49, 0  ;;  %v10228_v60 = vcombine.high %v781_v59, %v781_v59  ;;  %v10227_v63 = vcombine.low %v781_v59, %v781_v59  ;;  %v10242_v14 = vcombine.high %v788_v13, %v788_v13  ;;  %v775_v59 = vld [vmem:[#allocation3 + $0x50] sm:$0xff] }
 0x6ab   :  { %10199 = vmatprep.subr.msk.bf16.mxu1 %vm252_vm1, %v10184_v6  ;;  %1167 = vmatpush1.bf16.msra.mxu0 %v10169_v9  ;;  %v1038_v57 = vsel %vm252_vm1, %v10193_v54, 0  ;;  %v10214_v6 = vcombine.high %v766_v0, %v774_v5  ;;  %v780_v9 = vld [vmem:[#allocation3 + $0x78] sm:$0xff]  ;;  %v799_v19 = vrot.slane %v12714_v11, %v12655_v28  ;;  %v803_v51 = vrot.slane %v12714_v11, %v12658_v29 }
 0x6ac   :  { %1198 = vmatprep.mubr.bf16.mxu0 %v12130_v37  ;;  %10201 = vmatprep.subr.msk.bf16.mxu0 %vm252_vm1, %v10186_v12  ;;  %v10226_v10 = vcombine.high %v772_v8, %v780_v9  ;;  %v10225_v12 = vcombine.low %v772_v8, %v780_v9  ;;  %v12739_v9 = vld [vmem:[%s13878_s13 + $0x8] sm:$0xff] }
 0x6ae   :  { %1128 = vmatpush1.bf16.msra.mxu1 %v1008_v17  ;;  %v12717_v17 = vsub.s32 3, %v12374_v2 }
 0x6af   :  { %1207 = vmatprep.subr.bf16.mxu1 %v10172_v18  ;;  %1169 = vmatpush1.bf16.msra.mxu0 %v1014_v20  ;;  %v795_v18 = vrot.slane %v12714_v11, %v12377_v3 }
 0x6b0   :  { %1248 = vmatprep.subr.bf16.mxu0 %v10174_v21  ;;  %v807_v20 = vrot.slane %v12714_v11, %v12717_v17 }
 0x6b1   :  { %10200 = vmatmul.mubr.msk.bf16.vlgmr.msra.gmra.mrb[20].mxu1 %vm248_vm2, %v12675_v61 }
 0x6b2   :  { %1208 = vmatpush1.bf16.msra.mxu1 %v10171_v24  ;;  %1239 = vmatprep.mubr.bf16.mxu1 %v12130_v37 }
 0x6b3   :  { %10202 = vmatmul.mubr.msk.bf16.vlgmr.msra.gmra.mrb[12].mxu0 %vm248_vm2, %v12675_v61  ;;  %10203 = vmatprep.subr.msk.bf16.mxu1 %vm252_vm1, %v10188_v31 }
 0x6b4   :  { %1249 = vmatpush1.bf16.msra.mxu0 %v10173_v33  ;;  %1280 = vmatprep.mubr.bf16.mxu0 %v12130_v37 }
 0x6b5   :  { %10205 = vmatprep.subr.msk.bf16.mxu0 %vm252_vm1, %v10190_v35 }
 0x6b6   :  { %1210 = vmatpush1.bf16.msra.mxu1 %v1020_v41 }
 0x6b7   :  { %1289 = vmatprep.subr.bf16.mxu1 %v10176_v42  ;;  %v782_v42 = vld [vmem:[#allocation3 + $0x88] sm:$0xff] }
 0x6b8   :  { %1251 = vmatpush1.bf16.msra.mxu0 %v1026_v44  ;;  %v10230_v49 = vcombine.high %v782_v42, %v782_v42 }
 0x6b9   :  { %10204 = vmatmul.mubr.msk.bf16.vlgmr.msra.gmra.mrb[24].mxu1 %vm248_vm2, %v12675_v61  ;;  %1330 = vmatprep.subr.bf16.mxu0 %v10178_v45  ;;  %v10213_v45 = vcombine.low %v766_v0, %v774_v5  ;;  %v10229_v5 = vcombine.low %v782_v42, %v782_v42 }
 0x6ba   :  { %1290 = vmatpush1.bf16.msra.mxu1 %v10175_v46  ;;  %1321 = vmatprep.mubr.bf16.mxu1 %v12130_v37  ;;  %v12726_v46 = vsub.s32 5, %v12374_v2 }
 0x6bb   :  { %10206 = vmatmul.mubr.msk.bf16.vlgmr.msra.gmra.mrb[16].mxu0 %vm248_vm2, %v12675_v61  ;;  %10207 = vmatprep.subr.msk.bf16.mxu1 %vm252_vm1, %v10192_v48 }
 0x6bc   :  { %1331 = vmatpush1.bf16.msra.mxu0 %v10177_v50  ;;  %1362 = vmatprep.mubr.bf16.mxu0 %v12130_v37 }
 0x6bd   :  { %10209 = vmatprep.subr.msk.bf16.mxu0 %vm252_vm1, %v10194_v53  ;;  %v815_v53 = vrot.slane %v12714_v11, %v12726_v46 }
 0x6be   :  { %1292 = vmatpush1.bf16.msra.mxu1 %v1032_v55 }
 0x6bf   :  { %1543 = vmatprep.subr.bf16.mxu1 %v10212_v56 }
 0x6c0   :  { %1333 = vmatpush1.bf16.msra.mxu0 %v1038_v57 }
 0x6c1   :  { %10208 = vmatmul.mubr.msk.bf16.vlgmr.msra.gmra.mrb[28].mxu1 %vm248_vm2, %v12675_v61  ;;  %1823 = vmatprep.subr.bf16.mxu0 %v10226_v10 }
 0x6c3   :  { %10210 = vmatmul.mubr.msk.bf16.vlgmr.msra.gmra.mrb[20].mxu0 %vm248_vm2, %v12675_v61  ;;  %v10241_v61 = vcombine.low %v788_v13, %v788_v13 }
 0x6c7   :  { %1544 = vmatpush1.bf16.xpose.msra.mxu1 %v10211_v58  ;;  %v767_v58 = vld [vmem:[#allocation3 + $0x10] sm:$0xff] }
 0x6c8   :  { %1545 = vmatprep.subr.bf16.mxu1 %v10228_v60  ;;  %v10216_v8 = vcombine.high %v767_v58, %v775_v59 }
 0x6c9   :  { %1824 = vmatpush1.bf16.xpose.msra.mxu0 %v10225_v12  ;;  %v839_v12 = vrot.slane %v12739_v9, %v12717_v17 }
 0x6ca   :  { %1825 = vmatprep.subr.bf16.mxu0 %v10242_v14 }
 0x6cf   :  { %1546 = vmatpush1.bf16.xpose.msra.mxu1 %v10227_v63 }
 0x6d0   :  { %1583 = vmatprep.subr.bf16.mxu1 %v10214_v6 }
 0x6d1   :  { %1826 = vmatpush1.bf16.xpose.msra.mxu0 %v10241_v61 }
 0x77c   :  { %v1077_v21 = vpop.f32.mrb[16].mxu1  ;;  %v1118_v31 = vpop.f32.mrb[8].mxu0 }
 0x77d   :  { %v1078_v24 = vadd.f32 %v1077_v21, %v795_v18  ;;  %v1079_v25 = vpop.f32.mrb[17].mxu1  ;;  %v1120_v16 = vpop.f32.mrb[9].mxu0  ;;  %v1119_v63 = vadd.f32 %v1118_v31, %v803_v51 }
 0x77e   :  { %v1080_v32 = vadd.f32 %v1079_v25, %v799_v19  ;;  %v1081_v33 = vpop.f32.mrb[18].mxu1  ;;  %v1121_v38 = vadd.f32 %v1120_v16, %v807_v20  ;;  %v1122_v39 = vpop.f32.mrb[10].mxu0  ;;  %v12750_v20 = vsub.s32 4, %v12374_v2  ;;  %v783_v25 = vld [vmem:[#allocation3 + $0x90] sm:$0xff]  ;;  %v12755_v16 = vsub.s32 6, %v12374_v2 }
 0x77f   :  { %v1371_v34 = vmax.f32 %v1078_v24, 0.0  ;;  %v1082_v35 = vpop.f32.mrb[19].mxu1  ;;  %v1123_v41 = vpop.f32.mrb[11].mxu0  ;;  %v1373_v13 = vmax.f32 %v1119_v63, 0.0 }
 0x780   :  { %v1372_v40 = vmax.f32 %v1080_v32, 0.0  ;;  %v1374_v43 = vmax.f32 %v1121_v38, 0.0  ;;  %v843_v35 = vrot.slane %v12739_v9, %v12750_v20  ;;  %v10215_v38 = vcombine.low %v767_v58, %v775_v59  ;;  %v776_v58 = vld [vmem:[#allocation3 + $0x58] sm:$0xff] }
 0x781   :  { %v1387_v47 = vpack.c.bf16 %v1371_v34, %v1371_v34  ;;  %v1389_v33 = vpack.c.bf16 %v1373_v13, %v1373_v13  ;;  %v10232_v41 = vcombine.high %v783_v25, %v783_v25  ;;  %v851_v42 = vrot.slane %v12739_v9, %v12755_v16 }
 0x782   :  { %v1388_v44 = vpack.c.bf16 %v1372_v40, %v1372_v40  ;;  %v1390_v48 = vpack.c.bf16 %v1374_v43, %v1374_v43  ;;  %v12760_v40 = vsub.s32 7, %v12374_v2 }
 0x784   :  { %1575 = vmatprep.mubr.bf16.mxu1 %v1388_v44  ;;  %v12728_v50 = vpop.f32.mrb[20].mxu1  ;;  %v855_v44 = vrot.slane %v12739_v9, %v12760_v40  ;;  %v823_v2 = vrot.slane %v12714_v11, %v12760_v40 }
 0x785   :  { %1576 = vmatmul.mubr.bf16.vlgmr.msra.gmra.mrb[32].mxu1 %v1387_v47  ;;  %v1161_v52 = vpop.f32.mrb[21].mxu1 }
 0x786   :  { %1584 = vmatpush1.bf16.xpose.msra.mxu1 %v10213_v45  ;;  %1615 = vmatprep.mubr.bf16.mxu1 %v1390_v48  ;;  %v1163_v54 = vpop.f32.mrb[22].mxu1  ;;  %v12734_v55 = vpop.f32.mrb[12].mxu0  ;;  %v1162_v6 = vadd.f32 %v1161_v52, %v815_v53  ;;  %v811_v45 = vrot.slane %v12714_v11, %v12750_v20 }
 0x787   :  { %1585 = vmatprep.subr.bf16.mxu1 %v10230_v49  ;;  %v1164_v56 = vpop.f32.mrb[23].mxu1  ;;  %v1202_v57 = vpop.f32.mrb[13].mxu0 }
 0x788   :  { %v1204_v60 = vpop.f32.mrb[14].mxu0  ;;  %v1376_v61 = vmax.f32 %v1162_v6, 0.0  ;;  %v768_v56 = vld [vmem:[#allocation3 + $0x18] sm:$0xff]  ;;  %v1160_v63 = vadd.f32 %v12728_v50, %v811_v45  ;;  %v10231_v6 = vcombine.low %v783_v25, %v783_v25  ;;  %v819_v50 = vrot.slane %v12714_v11, %v12755_v16  ;;  %v769_v25 = vld [vmem:[#allocation3 + $0x20] sm:$0xff] }
 0x789   :  { %v1205_v0 = vpop.f32.mrb[15].mxu0  ;;  %v10218_v13 = vcombine.high %v768_v56, %v776_v58 }
 0x78a   :  { %v1392_v39 = vpack.c.bf16 %v1376_v61, %v1376_v61 }
 0x78c   :  { %v12741_v10 = vpop.f32.mrb[24].mxu1 }
 0x78d   :  { %v12745_v14 = vpop.f32.mrb[25].mxu1 }
 0x78e   :  { %1586 = vmatpush1.bf16.xpose.msra.mxu1 %v10229_v5  ;;  %v1245_v18 = vpop.f32.mrb[26].mxu1  ;;  %v12747_v19 = vpop.f32.mrb[16].mxu0 }
 0x78f   :  { %1623 = vmatprep.subr.bf16.mxu1 %v10216_v8  ;;  %v1246_v21 = vpop.f32.mrb[27].mxu1  ;;  %v1284_v24 = vpop.f32.mrb[17].mxu0  ;;  %v1203_v8 = vadd.f32 %v1202_v57, %v823_v2  ;;  %v831_v57 = vrot.slane %v12739_v9, %v12655_v28 }
 0x790   :  { %v12752_v31 = vadd.f32 %v1284_v24, %v839_v12  ;;  %v1286_v32 = vpop.f32.mrb[18].mxu0  ;;  %v1375_v21 = vmax.f32 %v1160_v63, 0.0 }
 0x791   :  { %v1287_v34 = vpop.f32.mrb[19].mxu0  ;;  %v1378_v24 = vmax.f32 %v1203_v8, 0.0  ;;  %v784_v32 = vld [vmem:[#allocation3 + $0x98] sm:$0xff] }
 0x792   :  { %v10217_v34 = vcombine.low %v768_v56, %v776_v58  ;;  %v778_v56 = vld [vmem:[#allocation3 + $0x68] sm:$0xff]  ;;  %v1382_v63 = vmax.f32 %v12752_v31, 0.0 }
 0x794   :  { %v1323_v43 = vpop.f32.mrb[28].mxu1  ;;  %v1398_v8 = vpack.c.bf16 %v1382_v63, %v1382_v63 }
 0x795   :  { %1616 = vmatmul.mubr.bf16.vlgmr.msra.gmra.mrb[36].mxu1 %v1389_v33  ;;  %v12768_v47 = vadd.f32 %v1323_v43, %v843_v35  ;;  %v12770_v48 = vpop.f32.mrb[29].mxu1  ;;  %v1391_v33 = vpack.c.bf16 %v1375_v21, %v1375_v21  ;;  %v1394_v35 = vpack.c.bf16 %v1378_v24, %v1378_v24  ;;  %v1244_v43 = vadd.f32 %v12745_v14, %v831_v57 }
 0x796   :  { %1624 = vmatpush1.bf16.xpose.msra.mxu1 %v10215_v38  ;;  %1655 = vmatprep.mubr.bf16.mxu1 %v1392_v39  ;;  %v1364_v49 = vpop.f32.mrb[20].mxu0  ;;  %v1327_v51 = vpop.f32.mrb[30].mxu1  ;;  %v10234_v38 = vcombine.high %v784_v32, %v784_v32  ;;  %v777_v39 = vld [vmem:[#allocation3 + $0x60] sm:$0xff] }
 0x797   :  { %1625 = vmatprep.subr.bf16.mxu1 %v10232_v41  ;;  %v1365_v52 = vadd.f32 %v1364_v49, %v851_v42  ;;  %v1366_v53 = vpop.f32.mrb[21].mxu0  ;;  %v1328_v54 = vpop.f32.mrb[31].mxu1  ;;  %v1201_v41 = vadd.f32 %v12734_v55, %v819_v50  ;;  %v10233_v42 = vcombine.low %v784_v32, %v784_v32  ;;  %v1380_v2 = vmax.f32 %v1244_v43, 0.0  ;;  %v785_v49 = vld [vmem:[#allocation3 + $0xa0] sm:$0xff]  ;;  %v770_v55 = vld [vmem:[#allocation3 + $0x28] sm:$0xff] }
 0x798   :  { %v1367_v59 = vadd.f32 %v1366_v53, %v855_v44  ;;  %v1368_v60 = vpop.f32.mrb[22].mxu0  ;;  %v10220_v44 = vcombine.high %v769_v25, %v777_v39  ;;  %v10219_v51 = vcombine.low %v769_v25, %v777_v39  ;;  %v10236_v53 = vcombine.high %v785_v49, %v785_v49 }
 0x799   :  { %v1385_v0 = vmax.f32 %v1365_v52, 0.0  ;;  %v1369_v5 = vpop.f32.mrb[23].mxu0  ;;  %v1377_v45 = vmax.f32 %v1201_v41, 0.0  ;;  %v1396_v52 = vpack.c.bf16 %v1380_v2, %v1380_v2  ;;  %v827_v54 = vrot.slane %v12739_v9, %v12377_v3 }
 0x79a   :  { %v1386_v12 = vmax.f32 %v1367_v59, 0.0  ;;  %v10235_v58 = vcombine.low %v785_v49, %v785_v49  ;;  %v10222_v59 = vcombine.high %v770_v55, %v778_v56 }
 0x79b   :  { %v1401_v61 = vpack.c.bf16 %v1385_v0, %v1385_v0  ;;  %v1393_v11 = vpack.c.bf16 %v1377_v45, %v1377_v45  ;;  %v1242_v14 = vadd.f32 %v12741_v10, %v827_v54  ;;  %v786_v0 = vld [vmem:[#allocation3 + $0xa8] sm:$0xff]  ;;  %v847_v10 = vrot.slane %v12739_v9, %v12726_v46 }
 0x79c   :  { %v1402_v18 = vpack.c.bf16 %v1386_v12, %v1386_v12  ;;  %v10238_v12 = vcombine.high %v786_v0, %v786_v0  ;;  %v10237_v21 = vcombine.low %v786_v0, %v786_v0 }
 0x79d   :  { %v1379_v60 = vmax.f32 %v1242_v14, 0.0  ;;  %v1326_v24 = vadd.f32 %v12770_v48, %v847_v10 }
 0x79e   :  { %1626 = vmatpush1.bf16.xpose.msra.mxu1 %v10231_v6  ;;  %1855 = vmatprep.mubr.bf16.mxu0 %v1402_v18  ;;  %v10221_v6 = vcombine.low %v770_v55, %v778_v56  ;;  %v779_v18 = vld [vmem:[#allocation3 + $0x70] sm:$0xff] }
 0x79f   :  { %1663 = vmatprep.subr.bf16.mxu1 %v10218_v13  ;;  %1856 = vmatmul.mubr.bf16.vlgmr.msra.gmra.mrb[24].mxu0 %v1401_v61  ;;  %v1395_v5 = vpack.c.bf16 %v1379_v60, %v1379_v60  ;;  %v835_v13 = vrot.slane %v12739_v9, %v12658_v29  ;;  %v771_v61 = vld [vmem:[#allocation3 + $0x30] sm:$0xff] }
 0x7a0   :  { %v10224_v32 = vcombine.high %v771_v61, %v779_v18  ;;  %v10223_v50 = vcombine.low %v771_v61, %v779_v18 }
 0x7a1   :  { %v1283_v31 = vadd.f32 %v12747_v19, %v835_v13  ;;  %v1383_v19 = vmax.f32 %v12768_v47, 0.0 }
 0x7a3   :  { %v1399_v48 = vpack.c.bf16 %v1383_v19, %v1383_v19 }
 0x7a5   :  { %1656 = vmatmul.mubr.bf16.vlgmr.msra.gmra.mrb[40].mxu1 %v1391_v33  ;;  %v1381_v33 = vmax.f32 %v1283_v31, 0.0 }
 0x7a6   :  { %1664 = vmatpush1.bf16.xpose.msra.mxu1 %v10217_v34  ;;  %1695 = vmatprep.mubr.bf16.mxu1 %v1394_v35  ;;  %v1384_v34 = vmax.f32 %v1326_v24, 0.0  ;;  %v787_v35 = vld [vmem:[#allocation3 + $0xb0] sm:$0xff] }
 0x7a7   :  { %1665 = vmatprep.subr.bf16.mxu1 %v10234_v38  ;;  %v1397_v38 = vpack.c.bf16 %v1381_v33, %v1381_v33  ;;  %v10240_v25 = vcombine.high %v787_v35, %v787_v35  ;;  %v10239_v9 = vcombine.low %v787_v35, %v787_v35 }
 0x7a8   :  { %v1400_v57 = vpack.c.bf16 %v1384_v34, %v1384_v34 }
 0x7ae   :  { %1666 = vmatpush1.bf16.xpose.msra.mxu1 %v10233_v42 }
 0x7af   :  { %1703 = vmatprep.subr.bf16.mxu1 %v10220_v44  ;;  %v1406_v44 = vrot.slane %v12490_v62, %v12726_v46 }
 0x7b5   :  { %1696 = vmatmul.mubr.bf16.vlgmr.msra.gmra.mrb[44].mxu1 %v1393_v11 }
 0x7b6   :  { %1704 = vmatpush1.bf16.xpose.msra.mxu1 %v10219_v51  ;;  %1735 = vmatprep.mubr.bf16.mxu1 %v1396_v52 }
 0x7b7   :  { %1705 = vmatprep.subr.bf16.mxu1 %v10236_v53 }
 0x7be   :  { %1706 = vmatpush1.bf16.xpose.msra.mxu1 %v10235_v58 }
 0x7bf   :  { %1743 = vmatprep.subr.bf16.mxu1 %v10222_v59 }
 0x7c5   :  { %1736 = vmatmul.mubr.bf16.vlgmr.msra.gmra.mrb[48].mxu1 %v1395_v5 }
 0x7c6   :  { %1744 = vmatpush1.bf16.xpose.msra.mxu1 %v10221_v6  ;;  %1775 = vmatprep.mubr.bf16.mxu1 %v1398_v8 }
 0x7c7   :  { %1745 = vmatprep.subr.bf16.mxu1 %v10238_v12 }
 0x7ce   :  { %1746 = vmatpush1.bf16.xpose.msra.mxu1 %v10237_v21 }
 0x7cf   :  { %1783 = vmatprep.subr.bf16.mxu1 %v10224_v32 }
 0x7d5   :  { %1776 = vmatmul.mubr.bf16.vlgmr.msra.gmra.mrb[52].mxu1 %v1397_v38 }
 0x7d6   :  { %1784 = vmatpush1.bf16.xpose.msra.mxu1 %v10223_v50  ;;  %1815 = vmatprep.mubr.bf16.mxu1 %v1400_v57 }
 0x7d7   :  { %1785 = vmatprep.subr.bf16.mxu1 %v10240_v25 }
 0x7de   :  { %1786 = vmatpush1.bf16.xpose.msra.mxu1 %v10239_v9 }
 0x7df   :  { %10888 = vmatprep.subr.bf16.mxu1 %v12122_v1 }
 0x7e5   :  { %1816 = vmatmul.mubr.bf16.vlgmr.msra.gmra.mrb[56].mxu1 %v1399_v48 }
 0x7e6   :  { %10892 = vmatprep.mubr.msk.bf16.mxu1 %vm12123_vm0, %v12122_v1 }
 0x858   :  { %v1577_v39 = vpop.f32.mrb[32].mxu1 }
 0x859   :  { %v1579_v41 = vpop.f32.mrb[33].mxu1  ;;  %v1578_v45 = vadd.f32 %v1577_v39, %v1406_v44 }
 0x85a   :  { %v1580_v42 = vpop.f32.mrb[34].mxu1  ;;  %v11254_v41 = vld [vmem:[%s13869_s4 + $0xc] sm:$0xff]  }
 0x85b   :  { %v1581_v43 = vpop.f32.mrb[35].mxu1  ;;  %v11255_v42 = vld [vmem:[%s13869_s4 + $0x14] ss:$0 sps:$4 sm:$0xff]   ;;  %10889 = vmatpush3.bf16.msra.mxu1 %v11254_v41 }
 0x85c   :  { %10890 = vmatprep.subr.bf16.mxu1 %v12122_v1 }
 0x868   :  { %v1617_v2 = vpop.f32.mrb[36].mxu1 }
 0x869   :  { %v1618_v49 = vadd.f32 %v1617_v2, %v1578_v45  ;;  %v1619_v11 = vpop.f32.mrb[37].mxu1 }
 0x86a   :  { %v1620_v51 = vpop.f32.mrb[38].mxu1 }
 0x86b   :  { %v1621_v47 = vpop.f32.mrb[39].mxu1 }
 0x872   :  { %v1857_v52 = vpop.f32.mrb[24].mxu0 }
 0x873   :  { %v1859_v53 = vpop.f32.mrb[25].mxu0 }
 0x874   :  { %v1860_v54 = vpop.f32.mrb[26].mxu0 }
 0x875   :  { %v1861_v55 = vpop.f32.mrb[27].mxu0 }
 0x878   :  { %v1657_v56 = vpop.f32.mrb[40].mxu1 }
 0x879   :  { %v1658_v14 = vadd.f32 %v1657_v56, %v1618_v49  ;;  %v1659_v58 = vpop.f32.mrb[41].mxu1  ;;  %v1888_v56 = vrot.slane %v12490_v62, %v12750_v20 }
 0x87a   :  { %v1660_v59 = vpop.f32.mrb[42].mxu1 }
 0x87b   :  { %v1661_v60 = vpop.f32.mrb[43].mxu1 }
 0x87c   :  { %v10246_v60 = vld [vmem:[#allocation10 + $0x1] ss:$0 sm:$0xff] }
 0x888   :  { %v1697_v63 = vpop.f32.mrb[44].mxu1 }
 0x889   :  { %v1698_v0 = vadd.f32 %v1697_v63, %v1658_v14  ;;  %v1699_v5 = vpop.f32.mrb[45].mxu1 }
 0x88a   :  { %v1700_v6 = vpop.f32.mrb[46].mxu1 }
 0x88b   :  { %v1701_v8 = vpop.f32.mrb[47].mxu1 }
 0x898   :  { %v1737_v12 = vpop.f32.mrb[48].mxu1 }
 0x899   :  { %v1738_v13 = vadd.f32 %v1737_v12, %v1698_v0  ;;  %v1739_v10 = vpop.f32.mrb[49].mxu1 }
 0x89a   :  { %v1740_v61 = vpop.f32.mrb[50].mxu1 }
 0x89b   :  { %v1741_v18 = vpop.f32.mrb[51].mxu1 }
 0x8a8   :  { %v1777_v31 = vpop.f32.mrb[52].mxu1 }
 0x8a9   :  { %v1778_v21 = vadd.f32 %v1777_v31, %v1738_v13  ;;  %v1779_v24 = vpop.f32.mrb[53].mxu1 }
 0x8aa   :  { %v1780_v32 = vpop.f32.mrb[54].mxu1 }
 0x8ab   :  { %v1781_v33 = vpop.f32.mrb[55].mxu1 }
 0x8b8   :  { %v1817_v34 = vpop.f32.mrb[56].mxu1 }
 0x8b9   :  { %v1818_v35 = vadd.f32 %v1817_v34, %v1778_v21  ;;  %v1819_v38 = vpop.f32.mrb[57].mxu1 }
 0x8ba   :  { %v1820_v50 = vpop.f32.mrb[58].mxu1 }
 0x8bb   :  { %v1858_v57 = vadd.f32 %v1857_v52, %v1818_v35  ;;  %v1821_v25 = vpop.f32.mrb[59].mxu1  ;;  %v1883_v52 = vrot.slane %v12490_v62, %v12717_v17 }
 0x8bd   :  { %v1863_v9 = vadd.f32 %v1858_v57, %v12665_v36  ;;  %v1918_v36 = vsel %vm252_vm1, %v11255_v42, 0 }
 0x8be   :  { %10891 = vmatpush3.bf16.msra.mxu1 %v1918_v36 }
 0x8bf   :  { %v1864_v19 = vsel %vm248_vm2, %v1863_v9, 0.0  ;;  %v1868_v48 = vmul.f32 %v1863_v9, %v1863_v9 }
 0x8c0   :  { %1865 = vadd.xlane.f32.xlu0 %v1864_v19 }
 0x8c1   :  { %v1869_v39 = vsel %vm248_vm2, %v1868_v48, 0.0 }
 0x8c4   :  { %1870 = vadd.xlane.f32.xlu0 %v1869_v39 }
 0x94d   :  { %v1866_v43 = vpop.xlane.xlu0 %1865 }
 0x94e   :  { %v1867_v44 = vmul.f32 0.041666668, %v1866_v43 }
 0x950   :  { %v1873_v2 = vmul.f32 %v1867_v44, %v1867_v44  ;;  %v1876_v53 = vsub.f32 %v1863_v9, %v1867_v44 }
 0x951   :  { %v1871_v45 = vpop.xlane.xlu0 %1870 }
 0x952   :  { %v1872_v49 = vmul.f32 0.041666668, %v1871_v45 }
 0x954   :  { %v1874_v11 = vsub.f32 %v1872_v49, %v1873_v2 }
 0x956   :  { %v1875_v51 = vmax.f32 %v1874_v11, 0.0 }
 0x958   :  { %v1877_v47 = vadd.f32 1e-05, %v1875_v51 }
 0x95a   :  { %11258 = vrsqrt.f32 %v1877_v47 }
 0x964   :  { %v11259_v54 = vpop.eup %11258 }
 0x965   :  { %v1879_v55 = vmul.f32 %v11259_v54, %v1876_v53 }
 0x967   :  { %v1884_v14 = vmul.f32 %v1883_v52, %v1879_v55 }
 0x969   :  { %v12812_v58 = vadd.f32 %v1888_v56, %v1884_v14 }
 0x96b   :  { %v1896_v59 = vpack.c.bf16 %v12812_v58, %v12812_v58 }
 0x96d   :  { %10893 = vmatmul.mubr.msk.bf16.vlgmr.msra.gmra.mrb[60].mxu1 %vm248_vm2, %v1896_v59 }
 0xa40   :  { %v1954_v63 = vpop.f32.mrb[60].mxu1 }
 0xa41   :  { %v12817_v0 = vadd.f32 %v10246_v60, %v1954_v63  ;;  %v10894_v5 = vpop.f32.mrb[61].mxu1 }
 0xa42   :  { %v1957_v6 = vpop.f32.mrb[62].mxu1 }
 0xa43   :  { %1971 = vrot.lane.b32.xlu1 %v12817_v0, %s12124_s11  ;;  %v10895_v8 = vpop.f32.mrb[63].mxu1  ;;  %v1964_v62 = vmul.f32 %v12817_v0, %v12407_v15  ;;  %v1965_v13 = vmul.f32 %v12817_v0, %v12419_v22  ;;  %v1966_v10 = vmul.f32 %v12817_v0, %v12425_v23  ;;  %v1967_v61 = vmul.f32 %v12817_v0, %v12436_v26 }
 0xa44   :  { %v1968_v18 = vmul.f32 %v12817_v0, %v12442_v27  ;;  %v1969_v31 = vmul.f32 %v12817_v0, %v12452_v30 }
 0xa45   :  { %10898 = vmatprep.mubr.msk.f32.mxu0 %vm248_vm2, %v1964_v62 }
 0xab5   :  { %v1972_v12 = vpop.permute.xlu1 %1971 }
 0xab6   :  { %10896 = vmatprep.subr.msk.mxu0 %vm248_vm2, %v1972_v12 }
 0xab7   :  { %10897 = vmatpush3.xpose.msk.msra.mxu0 %vm248_vm2, %v1972_v12 }
 0xab8   :  { %10918 = vmatprep.subr.bf16.mxu0 %v12122_v1 }
 0xaba   :  { %10899 = vmatmul.mubr.msk.f32.vlgmr.msra.gmra.mrb[6].mxu0 %vm248_vm2, %v1965_v13 }
 0xabb   :  { %10901 = vmatprep.mubr.msk.f32.mxu0 %vm248_vm2, %v1966_v10 }
 0xabe   :  { %10902 = vmatmul.mubr.msk.f32.gmra.mrb[28].mxu0 %vm248_vm2, %v1967_v61 }
 0xabf   :  { %10904 = vmatprep.mubr.msk.f32.mxu0 %vm248_vm2, %v1968_v18 }
 0xac2   :  { %10905 = vmatmul.mubr.msk.f32.gmra.mrb[30].mxu0 %vm248_vm2, %v1969_v31 }
 0xac3   :  { %10922 = vmatprep.mubr.msk.bf16.mxu0 %vm12123_vm0, %v12122_v1 }
 0xb8d   :  { %v10900_v21 = vpop.f32.mrb[6].mxu0 }
 0xb8e   :  { %v2059_v24 = vpop.f32.mrb[7].mxu0  ;;  %v2091_v32 = vsel %vm423_vm3, %v10900_v21, -inf }
 0xb8f   :  { %2092 = vmax.xlane.f32.xlu0 %v2091_v32  ;;  %v2088_v33 = vsel %vm423_vm3, %v2059_v24, -inf }
 0xb90   :  { %2089 = vmax.xlane.f32.xlu1 %v2088_v33 }
 0xb91   :  { %v10903_v34 = vpop.f32.mrb[28].mxu0 }
 0xb92   :  { %v2069_v35 = vpop.f32.mrb[29].mxu0  ;;  %v2097_v38 = vsel %vm423_vm3, %v10903_v34, -inf }
 0xb93   :  { %2098 = vmax.xlane.f32.xlu0 %v2097_v38  ;;  %v2094_v25 = vsel %vm423_vm3, %v2069_v35, -inf }
 0xb95   :  { %v10906_v50 = vpop.f32.mrb[30].mxu0 }
 0xb96   :  { %v2079_v57 = vpop.f32.mrb[31].mxu0  ;;  %v2103_v19 = vsel %vm423_vm3, %v10906_v50, -inf }
 0xb97   :  { %2095 = vmax.xlane.f32.xlu0 %v2094_v25  ;;  %v2100_v9 = vsel %vm423_vm3, %v2079_v57, -inf }
 0xb9b   :  { %2101 = vmax.xlane.f32.xlu0 %v2100_v9 }
 0xb9f   :  { %2104 = vmax.xlane.f32.xlu0 %v2103_v19 }
 0xc1c   :  { %v2093_v48 = vpop.xlane.xlu0 %2092 }
 0xc1d   :  { %v2107_v39 = vsub.f32 %v10900_v21, %v2093_v48  ;;  %v2090_v41 = vpop.xlane.xlu1 %2089 }
 0xc1e   :  { %v2106_v42 = vsub.f32 %v2059_v24, %v2090_v41 }
 0xc1f   :  { %v2114_v36 = vmul.f32 1.442695, %v2107_v39 }
 0xc20   :  { %v2112_v43 = vmul.f32 1.442695, %v2106_v42  ;;  %v2099_v44 = vpop.xlane.xlu0 %2098 }
 0xc21   :  { %11260 = vpow2.f32 %v2114_v36  ;;  %v2109_v45 = vsub.f32 %v10903_v34, %v2099_v44  ;;  %v11256_v36 = vld [vmem:[#allocation8 + $0xc] sm:$0xff]  }
 0xc22   :  { %11262 = vpow2.f32 %v2112_v43  ;;  %10919 = vmatpush3.bf16.msra.mxu0 %v11256_v36  ;;  %v11257_v43 = vld [vmem:[#allocation8 + $0x14] ss:$0 sps:$4 sm:$0xff]  }
 0xc23   :  { %v2118_v11 = vmul.f32 1.442695, %v2109_v45  ;;  %10920 = vmatprep.subr.bf16.mxu0 %v12122_v1  ;;  %v2299_v44 = vsel %vm252_vm1, %v11257_v43, 0 }
 0xc24   :  { %v2096_v2 = vpop.xlane.xlu0 %2095 }
 0xc25   :  { %v2108_v49 = vsub.f32 %v2069_v35, %v2096_v2 }
 0xc26   :  { %10921 = vmatpush3.bf16.msra.mxu0 %v2299_v44 }
 0xc27   :  { %v2116_v51 = vmul.f32 1.442695, %v2108_v49 }
 0xc28   :  { %v2102_v47 = vpop.xlane.xlu0 %2101 }
 0xc29   :  { %11264 = vpow2.f32 %v2116_v51  ;;  %v2110_v52 = vsub.f32 %v2079_v57, %v2102_v47 }
 0xc2a   :  { %11266 = vpow2.f32 %v2118_v11 }
 0xc2b   :  { %v11261_v53 = vpop.eup %11260  ;;  %v2120_v54 = vmul.f32 1.442695, %v2110_v52 }
 0xc2c   :  { %v2105_v55 = vpop.xlane.xlu0 %2104  ;;  %v2127_v56 = vsel %vm423_vm3, %v11261_v53, 0.0  ;;  %v11263_v14 = vpop.eup %11262 }
 0xc2d   :  { %11268 = vpow2.f32 %v2120_v54  ;;  %v2111_v59 = vsub.f32 %v10906_v50, %v2105_v55  ;;  %2128 = vadd.xlane.f32.xlu0 %v2127_v56  ;;  %v2124_v63 = vsel %vm423_vm3, %v11263_v14, 0.0 }
 0xc2f   :  { %v2122_v60 = vmul.f32 1.442695, %v2111_v59 }
 0xc31   :  { %11270 = vpow2.f32 %v2122_v60  ;;  %2125 = vadd.xlane.f32.xlu0 %v2124_v63 }
 0xc33   :  { %v11265_v5 = vpop.eup %11264 }
 0xc34   :  { %v2130_v6 = vsel %vm423_vm3, %v11265_v5, 0.0  ;;  %v11267_v8 = vpop.eup %11266 }
 0xc35   :  { %2131 = vadd.xlane.f32.xlu0 %v2130_v6  ;;  %v2133_v12 = vsel %vm423_vm3, %v11267_v8, 0.0 }
 0xc37   :  { %v11269_v62 = vpop.eup %11268 }
 0xc38   :  { %v2136_v13 = vsel %vm423_vm3, %v11269_v62, 0.0 }
 0xc39   :  { %2134 = vadd.xlane.f32.xlu0 %v2133_v12  ;;  %2137 = vadd.xlane.f32.xlu1 %v2136_v13 }
 0xc3b   :  { %v11271_v10 = vpop.eup %11270 }
 0xc3c   :  { %v2139_v61 = vsel %vm423_vm3, %v11271_v10, 0.0 }
 0xc3d   :  { %2140 = vadd.xlane.f32.xlu0 %v2139_v61 }
 0xc4a   :  { %2154 = vrot.lane.b32.xlu1 %v12817_v0, %s12125_s16 }
 0xcba   :  { %v2129_v18 = vpop.xlane.xlu0 %2128 }
 0xcbb   :  { %11272 = vrcp.f32 %v2129_v18 }
 0xcbe   :  { %v2126_v31 = vpop.xlane.xlu0 %2125 }
 0xcbf   :  { %11274 = vrcp.f32 %v2126_v31 }
 0xcc2   :  { %v2132_v21 = vpop.xlane.xlu0 %2131 }
 0xcc3   :  { %11276 = vrcp.f32 %v2132_v21 }
 0xcc5   :  { %v11273_v33 = vpop.eup %11272 }
 0xcc6   :  { %v2138_v24 = vpop.xlane.xlu1 %2137  ;;  %v2135_v32 = vpop.xlane.xlu0 %2134  ;;  %v2149_v57 = vmul.f32 %v11273_v33, %v11261_v53 }
 0xcc7   :  { %11278 = vrcp.f32 %v2138_v24 }
 0xcc8   :  { %11280 = vrcp.f32 %v2135_v32 }
 0xcc9   :  { %v11275_v34 = vpop.eup %11274 }
 0xcca   :  { %v2155_v35 = vpop.permute.xlu1 %2154  ;;  %v2141_v38 = vpop.xlane.xlu0 %2140  ;;  %v2148_v50 = vmul.f32 %v11275_v34, %v11263_v14 }
 0xccb   :  { %11282 = vrcp.f32 %v2141_v38  ;;  %10907 = vmatprep.subr.mxu1 %v2155_v35 }
 0xccc   :  { %10908 = vmatpush3.msra.mxu1 %v2155_v35  ;;  %10909 = vmatprep.mubr.msk.f32.mxu1 %vm423_vm3, %v2148_v50 }
 0xccd   :  { %v11277_v0 = vpop.eup %11276  ;;  %10910 = vmatmul.mubr.msk.f32.vlgmr.msra.gmra.mrb[10].mxu1 %vm423_vm3, %v2149_v57 }
 0xcce   :  { %v2150_v25 = vmul.f32 %v11277_v0, %v11265_v5 }
 0xcd0   :  { %10912 = vmatprep.mubr.msk.f32.mxu1 %vm423_vm3, %v2150_v25 }
 0xcd1   :  { %v11279_v9 = vpop.eup %11278 }
 0xcd2   :  { %v11281_v19 = vpop.eup %11280  ;;  %v2152_v48 = vmul.f32 %v11279_v9, %v11269_v62  ;;  %v12873_v62 = vld [vmem:[#allocation11 + $0x8] sm:$0x3f] }
 0xcd3   :  { %v2151_v39 = vmul.f32 %v11281_v19, %v11267_v8  ;;  %v2285_v12 = vrot.slane %v12873_v62, %v12377_v3 }
 0xcd5   :  { %v11283_v41 = vpop.eup %11282  ;;  %10913 = vmatmul.mubr.msk.f32.gmra.mrb[64].mxu1 %vm423_vm3, %v2151_v39 }
 0xcd6   :  { %10915 = vmatprep.mubr.msk.f32.mxu1 %vm423_vm3, %v2152_v48  ;;  %v2153_v42 = vmul.f32 %v11283_v41, %v11271_v10 }
 0xcd9   :  { %10916 = vmatmul.mubr.msk.f32.gmra.mrb[66].mxu1 %vm423_vm3, %v2153_v42 }
 0xda0   :  { %v10911_v45 = vpop.f32.mrb[10].mxu1 }
 0xda1   :  { %v2271_v2 = vmul.f32 %v10911_v45, %v12419_v22  ;;  %v2241_v49 = vpop.f32.mrb[11].mxu1 }
 0xda2   :  { %v2270_v11 = vmul.f32 %v2241_v49, %v12407_v15 }
 0xda4   :  { %v2276_v51 = vadd.f32 %v2271_v2, %v2270_v11 }
 0xda8   :  { %v10914_v47 = vpop.f32.mrb[64].mxu1 }
 0xda9   :  { %v2251_v52 = vpop.f32.mrb[65].mxu1  ;;  %v2273_v54 = vmul.f32 %v10914_v47, %v12436_v26 }
 0xdaa   :  { %v2272_v53 = vmul.f32 %v2251_v52, %v12425_v23 }
 0xdac   :  { %v2277_v55 = vadd.f32 %v2276_v51, %v2272_v53  ;;  %v10917_v56 = vpop.f32.mrb[66].mxu1 }
 0xdad   :  { %v2261_v14 = vpop.f32.mrb[67].mxu1  ;;  %v2275_v63 = vmul.f32 %v10917_v56, %v12452_v30 }
 0xdae   :  { %v2274_v59 = vmul.f32 %v2261_v14, %v12442_v27  ;;  %v2278_v60 = vadd.f32 %v2277_v55, %v2273_v54 }
 0xdb0   :  { %v2279_v5 = vadd.f32 %v2278_v60, %v2274_v59 }
 0xdb2   :  { %v2280_v6 = vadd.f32 %v2279_v5, %v2275_v63 }
 0xdb4   :  { %v2281_v8 = vpack.c.bf16 %v2280_v6, %v2280_v6 }
 0xdb6   :  { %10923 = vmatmul.mubr.msk.bf16.vlgmr.msra.gmra.mrb[32].mxu0 %vm248_vm2, %v2281_v8 }
 0xe89   :  { %v2335_v13 = vpop.f32.mrb[32].mxu0 }
 0xe8a   :  { %v2336_v10 = vadd.f32 %v2335_v13, %v2285_v12  ;;  %v10924_v61 = vpop.f32.mrb[33].mxu0 }
 0xe8b   :  { %v2338_v18 = vpop.f32.mrb[34].mxu0 }
 0xe8c   :  { %v2341_v31 = vadd.f32 %v2336_v10, %v12812_v58  ;;  %v10925_v21 = vpop.f32.mrb[35].mxu0 }
 0xe8e   :  { %v2342_v24 = vsel %vm248_vm2, %v2341_v31, 0.0  ;;  %v2346_v32 = vmul.f32 %v2341_v31, %v2341_v31 }
 0xe8f   :  { %2343 = vadd.xlane.f32.xlu0 %v2342_v24 }
 0xe90   :  { %v2347_v33 = vsel %vm248_vm2, %v2346_v32, 0.0 }
 0xe93   :  { %2348 = vadd.xlane.f32.xlu0 %v2347_v33 }
 0xe94   :  { %11857 = shalt.err (!%p11854_p10)  }
 0xe95   :  { %11869 = shalt.err (!%p12536_p5)  }
 0xe96   :  { %2379 = dma.hbm_to_vmem [thread:$0]  %s12595_s27, 3072, %s12502_s23, [#allocation4] }
 0xe97   :  { %s12902_s3 = scalar_lea.hbm %s13883_s18, 9216  ;;  %p11874_p13 = scmp.lt.u32.totalorder %s12627_s8, %s13883_s18 }
 0xe98   :  { %p11872_p11 = scmp.ne.s32.totalorder %s12627_s8, %s12902_s3  ;;  %p11875_p0 = scmp.lt.u32.totalorder %s12560_s26, %s12902_s3 }
 0xe99   :  { %p11877_p12 = scmp.lt.u32.totalorder %s12902_s3, %s12627_s8 }
 0xe9a   :  { %p11876_p1 = por %p11875_p0, %p11874_p13 }
 0xe9c   :  { %p11878_p3 = por %p11877_p12, %p11876_p1 }
 0xe9e   :  { %p11879_p4 = pnand %p11878_p3, %p11872_p11 }
 0xea0   :  { %11882 = shalt.err (!%p11879_p4)  }
 0xea1   :  { %11894 = shalt.err (!%p12580_p2)  }
 0xea2   :  { %2391 = dma.hbm_to_vmem [thread:$0]  %s12627_s8, 3072, %s12546_s6, [#allocation4 + $0x2]  ;;  %v2361_v9 = vrot.slane %v12873_v62, %v12655_v28  ;;  %v2366_v39 = vrot.slane %v12873_v62, %v12658_v29 }
 0xf1c   :  { %v2344_v58 = vpop.xlane.xlu0 %2343 }
 0xf1d   :  { %v2345_v34 = vmul.f32 0.041666668, %v2344_v58 }
 0xf1f   :  { %v2351_v38 = vmul.f32 %v2345_v34, %v2345_v34  ;;  %v2354_v19 = vsub.f32 %v2341_v31, %v2345_v34 }
 0xf20   :  { %v2349_v35 = vpop.xlane.xlu0 %2348 }
 0xf21   :  { %v2350_v50 = vmul.f32 0.041666668, %v2349_v35 }
 0xf23   :  { %v2352_v57 = vsub.f32 %v2350_v50, %v2351_v38 }
 0xf25   :  { %v2353_v0 = vmax.f32 %v2352_v57, 0.0 }
 0xf27   :  { %v2355_v25 = vadd.f32 1e-05, %v2353_v0 }
 0xf29   :  { %11284 = vrsqrt.f32 %v2355_v25 }
 0xf33   :  { %v11285_v48 = vpop.eup %11284 }
 0xf34   :  { %v2357_v41 = vmul.f32 %v11285_v48, %v2354_v19 }
 0xf36   :  { %v2362_v42 = vmul.f32 %v2361_v9, %v2357_v41 }
 0xf38   :  { %v12922_v36 = vadd.f32 %v2366_v39, %v2362_v42 }
 0xf39   :  { %12084 = dma.done.wait [#allocation4 + $0x1], 3072 }
 0xf3a   :  { %12085 = vsyncadd [#allocation4 + $0x1], 4294964224 }
 0xf3b   :  { %12086 = dma.done.wait [#allocation4 + $0x3], 3072 }
 0xf3c   :  { %12087 = vsyncadd [#allocation4 + $0x3], 4294964224  ;;  %2733 = vmatprep.mubr.bf16.mxu1 %v12130_v37  ;;  %2774 = vmatprep.mubr.bf16.mxu0 %v12130_v37  ;;  %v2396_v43 = vld [vmem:[#allocation2 + $0xc0] sm:$0xff]  ;;  %v2397_v45 = vld [vmem:[#allocation2 + $0xc8] sm:$0xff]  ;;  %v12932_v61 = vpack.c.bf16 %v12922_v36, %v12922_v36  ;;  %s13104_s2 = scalar_lea.hbm %s13882_s17, 12288  ;;  %p11899_p7 = scmp.lt.u32.totalorder %s12883_s24, %s13882_s17 }
 0xf3d   :  { %v2404_v44 = vld [vmem:[#allocation2 + $0x100] sm:$0xff]  ;;  %v2405_v49 = vld [vmem:[#allocation2 + $0x108] sm:$0xff]  ;;  %v2398_v56 = vld [vmem:[#allocation2 + $0xd0] sm:$0xff]  ;;  %p11897_p6 = scmp.ne.s32.totalorder %s12883_s24, %s13104_s2  ;;  %p11900_p9 = scmp.lt.u32.totalorder %s12516_s5, %s13104_s2 }
 0xf3e   :  { %v10269_v2 = vcombine.high %v2396_v43, %v2404_v44  ;;  %v10268_v11 = vcombine.low %v2396_v43, %v2404_v44  ;;  %v2412_v51 = vld [vmem:[#allocation2 + $0x140] sm:$0xff]  ;;  %v2413_v47 = vld [vmem:[#allocation2 + $0x148] sm:$0xff]  ;;  %v10271_v52 = vcombine.high %v2397_v45, %v2405_v49  ;;  %v10270_v53 = vcombine.low %v2397_v45, %v2405_v49  ;;  %v2406_v14 = vld [vmem:[#allocation2 + $0x110] sm:$0xff]  ;;  %p11902_p11 = scmp.lt.u32.totalorder %s13104_s2, %s12883_s24 }
 0xf3f   :  { %v10285_v54 = vcombine.high %v2412_v51, %v2412_v51  ;;  %v10287_v55 = vcombine.high %v2413_v47, %v2413_v47  ;;  %v10284_v59 = vcombine.low %v2412_v51, %v2412_v51  ;;  %v10286_v60 = vcombine.low %v2413_v47, %v2413_v47  ;;  %v2399_v63 = vld [vmem:[#allocation2 + $0xd8] sm:$0xff]  ;;  %v2414_v10 = vld [vmem:[#allocation2 + $0x150] sm:$0xff]  ;;  %v2400_v21 = vld [vmem:[#allocation2 + $0xe0] sm:$0xff]  ;;  %p11901_p10 = por %p11900_p9, %p11899_p7 }
 0xf40   :  { %2701 = vmatprep.subr.bf16.mxu1 %v10269_v2  ;;  %v2407_v5 = vld [vmem:[#allocation2 + $0x118] sm:$0xff]  ;;  %2742 = vmatprep.subr.bf16.mxu0 %v10271_v52  ;;  %v10273_v8 = vcombine.high %v2398_v56, %v2406_v14  ;;  %v10272_v31 = vcombine.low %v2398_v56, %v2406_v14  ;;  %v10289_v32 = vcombine.high %v2414_v10, %v2414_v10  ;;  %v2408_v58 = vld [vmem:[#allocation2 + $0x120] sm:$0xff]  ;;  %v2401_v34 = vld [vmem:[#allocation2 + $0xe8] sm:$0xff] }
 0xf41   :  { %2702 = vmatpush1.bf16.msra.mxu1 %v10268_v11  ;;  %2743 = vmatpush1.bf16.msra.mxu0 %v10270_v53  ;;  %v2654_v6 = vsel %vm252_vm1, %v10284_v59, 0  ;;  %v2660_v12 = vsel %vm252_vm1, %v10286_v60, 0  ;;  %v10275_v13 = vcombine.high %v2399_v63, %v2407_v5  ;;  %v2415_v18 = vld [vmem:[#allocation2 + $0x158] sm:$0xff]  ;;  %v10274_v24 = vcombine.low %v2399_v63, %v2407_v5  ;;  %v2409_v50 = vld [vmem:[#allocation2 + $0x128] sm:$0xff]  ;;  %v2416_v19 = vld [vmem:[#allocation2 + $0x160] sm:$0xff]  ;;  %p11903_p13 = por %p11902_p11, %p11901_p10 }
 0xf42   :  { %10300 = vmatprep.subr.msk.bf16.mxu1 %vm252_vm1, %v10285_v54  ;;  %10302 = vmatprep.subr.msk.bf16.mxu0 %vm252_vm1, %v10287_v55  ;;  %v10288_v33 = vcombine.low %v2414_v10, %v2414_v10  ;;  %v10291_v35 = vcombine.high %v2415_v18, %v2415_v18  ;;  %v10290_v38 = vcombine.low %v2415_v18, %v2415_v18  ;;  %v2417_v48 = vld [vmem:[#allocation2 + $0x168] sm:$0xff]  ;;  %v2402_v2 = vld [vmem:[#allocation2 + $0xf0] sm:$0xff]  ;;  %v2403_v11 = vld [vmem:[#allocation2 + $0xf8] sm:$0xff] }
 0xf43   :  { %v10277_v0 = vcombine.high %v2400_v21, %v2408_v58  ;;  %v10279_v9 = vcombine.high %v2401_v34, %v2409_v50  ;;  %v10276_v39 = vcombine.low %v2400_v21, %v2408_v58  ;;  %v10278_v41 = vcombine.low %v2401_v34, %v2409_v50  ;;  %v2410_v49 = vld [vmem:[#allocation2 + $0x130] sm:$0xff]  ;;  %v2411_v51 = vld [vmem:[#allocation2 + $0x138] sm:$0xff]  ;;  %v2432_v10 = vld [vmem:[#allocation3 + $0x108] sm:$0xff]  ;;  %p11904_p0 = pnand %p11903_p13, %p11897_p6 }
 0xf44   :  { %v2666_v57 = vsel %vm252_vm1, %v10288_v33, 0  ;;  %v2672_v25 = vsel %vm252_vm1, %v10290_v38, 0  ;;  %v10293_v42 = vcombine.high %v2416_v19, %v2416_v19  ;;  %v10292_v43 = vcombine.low %v2416_v19, %v2416_v19  ;;  %v2418_v55 = vld [vmem:[#allocation2 + $0x170] sm:$0xff]  ;;  %v2419_v56 = vld [vmem:[#allocation2 + $0x178] sm:$0xff]  ;;  %v2439_v58 = vld [vmem:[#allocation3 + $0x140] sm:$0xff] }
 0xf45   :  { %2704 = vmatpush1.bf16.msra.mxu1 %v2654_v6  ;;  %2745 = vmatpush1.bf16.msra.mxu0 %v2660_v12  ;;  %v10295_v44 = vcombine.high %v2417_v48, %v2417_v48  ;;  %v10294_v45 = vcombine.low %v2417_v48, %v2417_v48  ;;  %v10281_v52 = vcombine.high %v2402_v2, %v2410_v49  ;;  %v2431_v12 = vld [vmem:[#allocation3 + $0x100] sm:$0xff]  ;;  %v2440_v34 = vld [vmem:[#allocation3 + $0x148] sm:$0xff]  ;;  %v2434_v48 = vld [vmem:[#allocation3 + $0x118] sm:$0xff] }
 0xf46   :  { %2783 = vmatprep.subr.bf16.mxu1 %v10273_v8  ;;  %2824 = vmatprep.subr.bf16.mxu0 %v10275_v13  ;;  %v2678_v47 = vsel %vm252_vm1, %v10292_v43, 0  ;;  %v10283_v54 = vcombine.high %v2403_v11, %v2411_v51  ;;  %v10280_v14 = vcombine.low %v2402_v2, %v2410_v49  ;;  %v10282_v59 = vcombine.low %v2403_v11, %v2411_v51  ;;  %v2423_v8 = vld [vmem:[#allocation3 + $0xc0] sm:$0xff]  ;;  %v2424_v13 = vld [vmem:[#allocation3 + $0xc8] sm:$0xff] }
 0xf47   :  { %v2684_v53 = vsel %vm252_vm1, %v10294_v45, 0  ;;  %v10297_v60 = vcombine.high %v2418_v55, %v2418_v55  ;;  %v10296_v63 = vcombine.low %v2418_v55, %v2418_v55  ;;  %v10299_v5 = vcombine.high %v2419_v56, %v2419_v56 }
 0xf48   :  { %10301 = vmatmul.mubr.msk.bf16.vlgmr.msra.gmra.mrb[68].mxu1 %vm248_vm2, %v12932_v61  ;;  %10303 = vmatmul.mubr.msk.bf16.vlgmr.msra.gmra.mrb[36].mxu0 %vm248_vm2, %v12932_v61  ;;  %v10298_v6 = vcombine.low %v2419_v56, %v2419_v56  ;;  %v10318_v33 = vcombine.low %v2424_v13, %v2432_v10  ;;  %v10335_v38 = vcombine.high %v2440_v34, %v2440_v34 }
 0xf49   :  { %2784 = vmatpush1.bf16.msra.mxu1 %v10272_v31  ;;  %2825 = vmatpush1.bf16.msra.mxu0 %v10274_v24  ;;  %v2690_v18 = vsel %vm252_vm1, %v10296_v63, 0  ;;  %v10317_v31 = vcombine.high %v2423_v8, %v2431_v12  ;;  %v10319_v24 = vcombine.high %v2424_v13, %v2432_v10  ;;  %v10332_v50 = vcombine.low %v2439_v58, %v2439_v58 }
 0xf4a   :  { %10304 = vmatprep.subr.msk.bf16.mxu1 %vm252_vm1, %v10289_v32  ;;  %10306 = vmatprep.subr.msk.bf16.mxu0 %vm252_vm1, %v10291_v35  ;;  %v2696_v21 = vsel %vm252_vm1, %v10298_v6, 0  ;;  %v10316_v32 = vcombine.low %v2423_v8, %v2431_v12  ;;  %v10333_v35 = vcombine.high %v2439_v58, %v2439_v58  ;;  %v2442_v12 = vld [vmem:[#allocation3 + $0x158] sm:$0xff] }
 0xf4b   :  { %2815 = vmatprep.mubr.bf16.mxu1 %v12130_v37  ;;  %2856 = vmatprep.mubr.bf16.mxu0 %v12130_v37 }
 0xf4d   :  { %2786 = vmatpush1.bf16.msra.mxu1 %v2666_v57  ;;  %2827 = vmatpush1.bf16.msra.mxu0 %v2672_v25  ;;  %v10334_v57 = vcombine.low %v2440_v34, %v2440_v34  ;;  %v2433_v25 = vld [vmem:[#allocation3 + $0x110] sm:$0xff]  ;;  %v10339_v34 = vcombine.high %v2442_v12, %v2442_v12 }
 0xf4e   :  { %2865 = vmatprep.subr.bf16.mxu1 %v10277_v0  ;;  %2906 = vmatprep.subr.bf16.mxu0 %v10279_v9  ;;  %v2425_v0 = vld [vmem:[#allocation3 + $0xd0] sm:$0xff]  ;;  %v2426_v9 = vld [vmem:[#allocation3 + $0xd8] sm:$0xff] }
 0xf4f   :  { %v10321_v19 = vcombine.high %v2425_v0, %v2433_v25  ;;  %v10320_v8 = vcombine.low %v2425_v0, %v2433_v25 }
 0xf50   :  { %10305 = vmatmul.mubr.msk.bf16.vlgmr.msra.gmra.mrb[72].mxu1 %vm248_vm2, %v12932_v61  ;;  %10307 = vmatmul.mubr.msk.bf16.vlgmr.msra.gmra.mrb[40].mxu0 %vm248_vm2, %v12932_v61 }
 0xf51   :  { %2866 = vmatpush1.bf16.msra.mxu1 %v10276_v39  ;;  %2907 = vmatpush1.bf16.msra.mxu0 %v10278_v41  ;;  %v12971_v39 = vld [vmem:[%s13878_s13 + $0x10] sm:$0xff] }
 0xf52   :  { %10308 = vmatprep.subr.msk.bf16.mxu1 %vm252_vm1, %v10293_v42  ;;  %10310 = vmatprep.subr.msk.bf16.mxu0 %vm252_vm1, %v10295_v44  ;;  %v2453_v41 = vrot.slane %v12971_v39, %v12377_v3  ;;  %v2461_v42 = vrot.slane %v12971_v39, %v12658_v29  ;;  %v2457_v43 = vrot.slane %v12971_v39, %v12655_v28 }
 0xf53   :  { %2897 = vmatprep.mubr.bf16.mxu1 %v12130_v37  ;;  %2938 = vmatprep.mubr.bf16.mxu0 %v12130_v37  ;;  %v2465_v44 = vrot.slane %v12971_v39, %v12717_v17  ;;  %v2477_v25 = vrot.slane %v12971_v39, %v12755_v16 }
 0xf55   :  { %2868 = vmatpush1.bf16.msra.mxu1 %v2678_v47  ;;  %2909 = vmatpush1.bf16.msra.mxu0 %v2684_v53 }
 0xf56   :  { %2947 = vmatprep.subr.bf16.mxu1 %v10281_v52  ;;  %2988 = vmatprep.subr.bf16.mxu0 %v10283_v54 }
 0xf58   :  { %10309 = vmatmul.mubr.msk.bf16.vlgmr.msra.gmra.mrb[76].mxu1 %vm248_vm2, %v12932_v61  ;;  %10311 = vmatmul.mubr.msk.bf16.vlgmr.msra.gmra.mrb[44].mxu0 %vm248_vm2, %v12932_v61 }
 0xf59   :  { %2948 = vmatpush1.bf16.msra.mxu1 %v10280_v14  ;;  %2989 = vmatpush1.bf16.msra.mxu0 %v10282_v59 }
 0xf5a   :  { %10312 = vmatprep.subr.msk.bf16.mxu1 %vm252_vm1, %v10297_v60  ;;  %10314 = vmatprep.subr.msk.bf16.mxu0 %vm252_vm1, %v10299_v5  ;;  %v2441_v5 = vld [vmem:[#allocation3 + $0x150] sm:$0xff] }
 0xf5b   :  { %2979 = vmatprep.mubr.bf16.mxu1 %v12130_v37  ;;  %3020 = vmatprep.mubr.bf16.mxu0 %v12130_v37 }
 0xf5d   :  { %2950 = vmatpush1.bf16.msra.mxu1 %v2690_v18  ;;  %2991 = vmatpush1.bf16.msra.mxu0 %v2696_v21  ;;  %v10322_v18 = vcombine.low %v2426_v9, %v2434_v48 }
 0xf5e   :  { %3201 = vmatprep.subr.bf16.mxu1 %v10317_v31  ;;  %3241 = vmatprep.subr.bf16.mxu0 %v10319_v24  ;;  %v2473_v31 = vrot.slane %v12971_v39, %v12726_v46 }
 0xf60   :  { %10313 = vmatmul.mubr.msk.bf16.vlgmr.msra.gmra.mrb[80].mxu1 %vm248_vm2, %v12932_v61  ;;  %10315 = vmatmul.mubr.msk.bf16.vlgmr.msra.gmra.mrb[48].mxu0 %vm248_vm2, %v12932_v61  ;;  %v10323_v61 = vcombine.high %v2426_v9, %v2434_v48 }
 0xf66   :  { %3202 = vmatpush1.bf16.xpose.msra.mxu1 %v10316_v32  ;;  %3242 = vmatpush1.bf16.xpose.msra.mxu0 %v10318_v33  ;;  %v2481_v32 = vrot.slane %v12971_v39, %v12760_v40  ;;  %v10337_v33 = vcombine.high %v2441_v5, %v2441_v5 }
 0xf67   :  { %3203 = vmatprep.subr.bf16.mxu1 %v10333_v35  ;;  %3243 = vmatprep.subr.bf16.mxu0 %v10335_v38  ;;  %v2469_v35 = vrot.slane %v12971_v39, %v12750_v20  ;;  %v2436_v39 = vld [vmem:[#allocation3 + $0x128] sm:$0xff] }
 0xf6e   :  { %3204 = vmatpush1.bf16.xpose.msra.mxu1 %v10332_v50  ;;  %3244 = vmatpush1.bf16.xpose.msra.mxu0 %v10334_v57 }
 0xf6f   :  { %3281 = vmatprep.subr.bf16.mxu1 %v10321_v19  ;;  %3321 = vmatprep.subr.bf16.mxu0 %v10323_v61 }
0x101b   :  { %v2735_v45 = vpop.f32.mrb[68].mxu1  ;;  %v2776_v49 = vpop.f32.mrb[36].mxu0 }
0x101c   :  { %v2736_v2 = vadd.f32 %v2735_v45, %v2453_v41  ;;  %v2737_v11 = vpop.f32.mrb[69].mxu1  ;;  %v2777_v51 = vadd.f32 %v2776_v49, %v2461_v42  ;;  %v2778_v52 = vpop.f32.mrb[37].mxu0  ;;  %v12992_v41 = vld [vmem:[%s13878_s13 + $0x18] sm:$0xff]  ;;  %v2435_v45 = vld [vmem:[#allocation3 + $0x120] sm:$0xff] }
0x101d   :  { %v2738_v47 = vadd.f32 %v2737_v11, %v2457_v43  ;;  %v2739_v53 = vpop.f32.mrb[70].mxu1  ;;  %v2779_v55 = vadd.f32 %v2778_v52, %v2465_v44  ;;  %v2780_v56 = vpop.f32.mrb[38].mxu0  ;;  %v2427_v44 = vld [vmem:[#allocation3 + $0xe0] sm:$0xff]  ;;  %v2428_v11 = vld [vmem:[#allocation3 + $0xe8] sm:$0xff]  ;;  %v10336_v52 = vcombine.low %v2441_v5, %v2441_v5 }
0x101e   :  { %v3029_v54 = vmax.f32 %v2736_v2, 0.0  ;;  %v2740_v14 = vpop.f32.mrb[71].mxu1  ;;  %v3031_v59 = vmax.f32 %v2777_v51, 0.0  ;;  %v2781_v63 = vpop.f32.mrb[39].mxu0  ;;  %v2489_v53 = vrot.slane %v12992_v41, %v12655_v28  ;;  %v10325_v56 = vcombine.high %v2427_v44, %v2435_v45 }
0x101f   :  { %v3030_v60 = vmax.f32 %v2738_v47, 0.0  ;;  %v3032_v6 = vmax.f32 %v2779_v55, 0.0  ;;  %v10338_v55 = vcombine.low %v2442_v12, %v2442_v12  ;;  %v2497_v14 = vrot.slane %v12992_v41, %v12717_v17 }
0x1020   :  { %v3047_v13 = vpack.c.bf16 %v3031_v59, %v3031_v59  ;;  %v3045_v21 = vpack.c.bf16 %v3029_v54, %v3029_v54  ;;  %v10327_v59 = vcombine.high %v2428_v11, %v2436_v39 }
0x1021   :  { %v3046_v10 = vpack.c.bf16 %v3030_v60, %v3030_v60  ;;  %v3048_v24 = vpack.c.bf16 %v3032_v6, %v3032_v6 }
0x1023   :  { %3233 = vmatprep.mubr.bf16.mxu1 %v3046_v10  ;;  %v2817_v58 = vpop.f32.mrb[72].mxu1  ;;  %3273 = vmatprep.mubr.bf16.mxu0 %v3048_v24  ;;  %v2858_v50 = vpop.f32.mrb[40].mxu0 }
0x1024   :  { %3234 = vmatmul.mubr.bf16.vlgmr.msra.gmra.mrb[84].mxu1 %v3045_v21  ;;  %v2819_v38 = vpop.f32.mrb[73].mxu1  ;;  %3274 = vmatmul.mubr.bf16.vlgmr.msra.gmra.mrb[52].mxu0 %v3047_v13  ;;  %v2860_v9 = vpop.f32.mrb[41].mxu0  ;;  %v2818_v2 = vadd.f32 %v2817_v58, %v2469_v35  ;;  %v2859_v47 = vadd.f32 %v2858_v50, %v2477_v25  ;;  %v2444_v35 = vld [vmem:[#allocation3 + $0x168] sm:$0xff]  ;;  %v10324_v50 = vcombine.low %v2427_v44, %v2435_v45 }
0x1025   :  { %3282 = vmatpush1.bf16.xpose.msra.mxu1 %v10320_v8  ;;  %v2820_v57 = vadd.f32 %v2819_v38, %v2473_v31  ;;  %v2821_v0 = vpop.f32.mrb[74].mxu1  ;;  %3322 = vmatpush1.bf16.xpose.msra.mxu0 %v10322_v18  ;;  %v2861_v48 = vadd.f32 %v2860_v9, %v2481_v32  ;;  %v2862_v61 = vpop.f32.mrb[42].mxu0  ;;  %v2443_v32 = vld [vmem:[#allocation3 + $0x160] sm:$0xff]  ;;  %v10343_v9 = vcombine.high %v2444_v35, %v2444_v35 }
0x1026   :  { %v2822_v19 = vpop.f32.mrb[75].mxu1  ;;  %3283 = vmatprep.subr.bf16.mxu1 %v10337_v33  ;;  %3323 = vmatprep.subr.bf16.mxu0 %v10339_v34  ;;  %v2863_v43 = vpop.f32.mrb[43].mxu0  ;;  %v3033_v63 = vmax.f32 %v2818_v2, 0.0  ;;  %v3035_v13 = vmax.f32 %v2859_v47, 0.0  ;;  %v10341_v0 = vcombine.high %v2443_v32, %v2443_v32  ;;  %v2493_v2 = vrot.slane %v12992_v41, %v12658_v29 }
0x1027   :  { %v3034_v42 = vmax.f32 %v2820_v57, 0.0  ;;  %v3036_v49 = vmax.f32 %v2861_v48, 0.0  ;;  %v10326_v57 = vcombine.low %v2428_v11, %v2436_v39  ;;  %v2485_v48 = vrot.slane %v12992_v41, %v12377_v3  ;;  %v2429_v39 = vld [vmem:[#allocation3 + $0xf0] sm:$0xff] }
0x1028   :  { %v3049_v58 = vpack.c.bf16 %v3033_v63, %v3033_v63  ;;  %v3051_v38 = vpack.c.bf16 %v3035_v13, %v3035_v13  ;;  %v2505_v47 = vrot.slane %v12992_v41, %v12726_v46  ;;  %v10342_v63 = vcombine.low %v2444_v35, %v2444_v35 }
0x1029   :  { %v3050_v51 = vpack.c.bf16 %v3034_v42, %v3034_v42  ;;  %v3052_v54 = vpack.c.bf16 %v3036_v49, %v3036_v49 }
0x102b   :  { %3313 = vmatprep.mubr.bf16.mxu1 %v3050_v51  ;;  %v2899_v60 = vpop.f32.mrb[76].mxu1  ;;  %3353 = vmatprep.mubr.bf16.mxu0 %v3052_v54  ;;  %v2940_v8 = vpop.f32.mrb[44].mxu0  ;;  %v2437_v51 = vld [vmem:[#allocation3 + $0x130] sm:$0xff]  ;;  %v2430_v54 = vld [vmem:[#allocation3 + $0xf8] sm:$0xff] }
0x102c   :  { %v2901_v6 = vpop.f32.mrb[77].mxu1  ;;  %v2942_v18 = vpop.f32.mrb[45].mxu0 }
0x102d   :  { %3284 = vmatpush1.bf16.xpose.msra.mxu1 %v10336_v52  ;;  %v2902_v10 = vadd.f32 %v2901_v6, %v2489_v53  ;;  %v2903_v5 = vpop.f32.mrb[78].mxu1  ;;  %3324 = vmatpush1.bf16.xpose.msra.mxu0 %v10338_v55  ;;  %v2943_v12 = vadd.f32 %v2942_v18, %v2497_v14  ;;  %v2944_v21 = vpop.f32.mrb[46].mxu0  ;;  %v2900_v53 = vadd.f32 %v2899_v60, %v2485_v48  ;;  %v2438_v55 = vld [vmem:[#allocation3 + $0x138] sm:$0xff] }
0x102e   :  { %3361 = vmatprep.subr.bf16.mxu1 %v10325_v56  ;;  %v2904_v31 = vpop.f32.mrb[79].mxu1  ;;  %3401 = vmatprep.subr.bf16.mxu0 %v10327_v59  ;;  %v2945_v33 = vpop.f32.mrb[47].mxu0  ;;  %v2513_v56 = vrot.slane %v12992_v41, %v12760_v40  ;;  %v2941_v14 = vadd.f32 %v2940_v8, %v2493_v2  ;;  %v10340_v59 = vcombine.low %v2443_v32, %v2443_v32 }
0x102f   :  { %v3038_v24 = vmax.f32 %v2902_v10, 0.0  ;;  %v3040_v34 = vmax.f32 %v2943_v12, 0.0  ;;  %v10329_v6 = vcombine.high %v2429_v39, %v2437_v51  ;;  %v10331_v13 = vcombine.high %v2430_v54, %v2438_v55  ;;  %v2445_v12 = vld [vmem:[#allocation3 + $0x170] sm:$0xff]  ;;  %v2446_v33 = vld [vmem:[#allocation3 + $0x178] sm:$0xff] }
0x1030   :  { %v3037_v5 = vmax.f32 %v2900_v53, 0.0  ;;  %v3039_v31 = vmax.f32 %v2941_v14, 0.0  ;;  %v10330_v8 = vcombine.low %v2430_v54, %v2438_v55  ;;  %v10345_v32 = vcombine.high %v2445_v12, %v2445_v12 }
0x1031   :  { %v3054_v25 = vpack.c.bf16 %v3038_v24, %v3038_v24  ;;  %v3056_v61 = vpack.c.bf16 %v3040_v34, %v3040_v34  ;;  %v10328_v34 = vcombine.low %v2429_v39, %v2437_v51 }
0x1032   :  { %v3053_v21 = vpack.c.bf16 %v3037_v5, %v3037_v5 }
0x1033   :  { %v12998_v19 = vpop.f32.mrb[80].mxu1  ;;  %v3022_v43 = vpop.f32.mrb[48].mxu0 }
0x1034   :  { %3314 = vmatmul.mubr.bf16.vlgmr.msra.gmra.mrb[88].mxu1 %v3049_v58  ;;  %v2983_v42 = vpop.f32.mrb[81].mxu1  ;;  %3354 = vmatmul.mubr.bf16.vlgmr.msra.gmra.mrb[56].mxu0 %v3051_v38  ;;  %v3024_v44 = vpop.f32.mrb[49].mxu0  ;;  %v3055_v58 = vpack.c.bf16 %v3039_v31, %v3039_v31  ;;  %v10347_v38 = vcombine.high %v2446_v33, %v2446_v33 }
0x1035   :  { %3362 = vmatpush1.bf16.xpose.msra.mxu1 %v10324_v50  ;;  %v2985_v49 = vpop.f32.mrb[82].mxu1  ;;  %3402 = vmatpush1.bf16.xpose.msra.mxu0 %v10326_v57  ;;  %v3026_v11 = vpop.f32.mrb[50].mxu0  ;;  %v2984_v10 = vadd.f32 %v2983_v42, %v2505_v47  ;;  %v3025_v18 = vadd.f32 %v3024_v44, %v2513_v56  ;;  %v2509_v57 = vrot.slane %v12992_v41, %v12755_v16 }
0x1036   :  { %3363 = vmatprep.subr.bf16.mxu1 %v10341_v0  ;;  %v2986_v45 = vpop.f32.mrb[83].mxu1  ;;  %3403 = vmatprep.subr.bf16.mxu0 %v10343_v9  ;;  %v3027_v52 = vpop.f32.mrb[51].mxu0  ;;  %v2501_v0 = vrot.slane %v12992_v41, %v12750_v20  ;;  %v10344_v9 = vcombine.low %v2445_v12, %v2445_v12  ;;  %v3064_v41 = vrot.slane %v12873_v62, %v12726_v46 }
0x1037   :  { %3393 = vmatprep.mubr.bf16.mxu1 %v3054_v25  ;;  %3433 = vmatprep.mubr.bf16.mxu0 %v3056_v61  ;;  %v3042_v60 = vmax.f32 %v2984_v10, 0.0  ;;  %v3044_v24 = vmax.f32 %v3025_v18, 0.0  ;;  %v3023_v25 = vadd.f32 %v3022_v43, %v2509_v57  ;;  %v10346_v61 = vcombine.low %v2446_v33, %v2446_v33 }
0x1038   :  { %v2982_v48 = vadd.f32 %v12998_v19, %v2501_v0 }
0x1039   :  { %v3058_v35 = vpack.c.bf16 %v3042_v60, %v3042_v60  ;;  %v3060_v50 = vpack.c.bf16 %v3044_v24, %v3044_v24  ;;  %v3043_v42 = vmax.f32 %v3023_v25, 0.0 }
0x103a   :  { %v3041_v2 = vmax.f32 %v2982_v48, 0.0 }
0x103b   :  { %v3059_v49 = vpack.c.bf16 %v3043_v42, %v3043_v42 }
0x103c   :  { %v3057_v44 = vpack.c.bf16 %v3041_v2, %v3041_v2 }
0x103d   :  { %3364 = vmatpush1.bf16.xpose.msra.mxu1 %v10340_v59  ;;  %3404 = vmatpush1.bf16.xpose.msra.mxu0 %v10342_v63 }
0x103e   :  { %3441 = vmatprep.subr.bf16.mxu1 %v10329_v6  ;;  %3481 = vmatprep.subr.bf16.mxu0 %v10331_v13 }
0x1044   :  { %3394 = vmatmul.mubr.bf16.vlgmr.msra.gmra.mrb[92].mxu1 %v3053_v21  ;;  %3434 = vmatmul.mubr.bf16.vlgmr.msra.gmra.mrb[60].mxu0 %v3055_v58 }
0x1045   :  { %3442 = vmatpush1.bf16.xpose.msra.mxu1 %v10328_v34  ;;  %3482 = vmatpush1.bf16.xpose.msra.mxu0 %v10330_v8 }
0x1046   :  { %3443 = vmatprep.subr.bf16.mxu1 %v10345_v32  ;;  %3483 = vmatprep.subr.bf16.mxu0 %v10347_v38 }
0x1047   :  { %3473 = vmatprep.mubr.bf16.mxu1 %v3058_v35  ;;  %3513 = vmatprep.mubr.bf16.mxu0 %v3060_v50 }
0x104d   :  { %3444 = vmatpush1.bf16.xpose.msra.mxu1 %v10344_v9  ;;  %3484 = vmatpush1.bf16.xpose.msra.mxu0 %v10346_v61 }
0x104e   :  { %10926 = vmatprep.subr.bf16.mxu1 %v12122_v1 }
0x1054   :  { %3474 = vmatmul.mubr.bf16.vlgmr.msra.gmra.mrb[96].mxu1 %v3057_v44  ;;  %3514 = vmatmul.mubr.bf16.vlgmr.msra.gmra.mrb[64].mxu0 %v3059_v49 }
0x1055   :  { %10930 = vmatprep.mubr.msk.bf16.mxu1 %vm12123_vm0, %v12122_v1 }
0x10f7   :  { %v3235_v43 = vpop.f32.mrb[84].mxu1  ;;  %v3275_v19 = vpop.f32.mrb[52].mxu0 }
0x10f8   :  { %v3236_v45 = vadd.f32 %v3235_v43, %v3064_v41  ;;  %v3237_v11 = vpop.f32.mrb[85].mxu1  ;;  %v3277_v39 = vpop.f32.mrb[53].mxu0  ;;  %v11318_v43 = vld [vmem:[%s13869_s4 + $0x18] sm:$0xff]  }
0x10f9   :  { %v3238_v51 = vpop.f32.mrb[86].mxu1  ;;  %v3278_v52 = vpop.f32.mrb[54].mxu0  ;;  %10927 = vmatpush3.bf16.msra.mxu1 %v11318_v43 }
0x10fa   :  { %v3276_v47 = vadd.f32 %v3275_v19, %v3236_v45  ;;  %v3239_v53 = vpop.f32.mrb[87].mxu1  ;;  %v3279_v54 = vpop.f32.mrb[55].mxu0  ;;  %v11319_v45 = vld [vmem:[%s13869_s4 + $0x20] ss:$0 sps:$4 sm:$0xff]   ;;  %10928 = vmatprep.subr.bf16.mxu1 %v12122_v1 }
0x1107   :  { %v3315_v55 = vpop.f32.mrb[88].mxu1  ;;  %v3355_v14 = vpop.f32.mrb[56].mxu0 }
0x1108   :  { %v3316_v56 = vadd.f32 %v3315_v55, %v3276_v47  ;;  %v3317_v59 = vpop.f32.mrb[89].mxu1  ;;  %v3357_v63 = vpop.f32.mrb[57].mxu0 }
0x1109   :  { %v3318_v6 = vpop.f32.mrb[90].mxu1  ;;  %v3358_v10 = vpop.f32.mrb[58].mxu0  ;;  %v3546_v63 = vrot.slane %v12873_v62, %v12750_v20 }
0x110a   :  { %v3356_v13 = vadd.f32 %v3355_v14, %v3316_v56  ;;  %v3319_v5 = vpop.f32.mrb[91].mxu1  ;;  %v3359_v18 = vpop.f32.mrb[59].mxu0  ;;  %v3541_v56 = vrot.slane %v12873_v62, %v12717_v17 }
0x110b   :  { %v10351_v5 = vld [vmem:[#allocation10 + $0x2] ss:$0 sm:$0xff] }
0x1117   :  { %v3395_v31 = vpop.f32.mrb[92].mxu1  ;;  %v3435_v12 = vpop.f32.mrb[60].mxu0 }
0x1118   :  { %v3396_v60 = vadd.f32 %v3395_v31, %v3356_v13  ;;  %v3397_v21 = vpop.f32.mrb[93].mxu1  ;;  %v3437_v24 = vpop.f32.mrb[61].mxu0 }
0x1119   :  { %v3398_v33 = vpop.f32.mrb[94].mxu1  ;;  %v3438_v34 = vpop.f32.mrb[62].mxu0 }
0x111a   :  { %v3436_v58 = vadd.f32 %v3435_v12, %v3396_v60  ;;  %v3399_v8 = vpop.f32.mrb[95].mxu1  ;;  %v3439_v32 = vpop.f32.mrb[63].mxu0 }
0x1127   :  { %v3475_v35 = vpop.f32.mrb[96].mxu1  ;;  %v3515_v50 = vpop.f32.mrb[64].mxu0 }
0x1128   :  { %v3476_v38 = vadd.f32 %v3475_v35, %v3436_v58  ;;  %v3477_v57 = vpop.f32.mrb[97].mxu1  ;;  %v3517_v0 = vpop.f32.mrb[65].mxu0 }
0x1129   :  { %v3478_v25 = vpop.f32.mrb[98].mxu1  ;;  %v3518_v48 = vpop.f32.mrb[66].mxu0 }
0x112a   :  { %v3516_v9 = vadd.f32 %v3515_v50, %v3476_v38  ;;  %v3479_v61 = vpop.f32.mrb[99].mxu1  ;;  %v3519_v42 = vpop.f32.mrb[67].mxu0 }
0x112c   :  { %v3521_v2 = vadd.f32 %v3516_v9, %v12922_v36  ;;  %v3576_v36 = vsel %vm252_vm1, %v11319_v45, 0 }
0x112d   :  { %10929 = vmatpush3.bf16.msra.mxu1 %v3576_v36 }
0x112e   :  { %v3522_v49 = vsel %vm248_vm2, %v3521_v2, 0.0  ;;  %v3526_v44 = vmul.f32 %v3521_v2, %v3521_v2 }
0x112f   :  { %3523 = vadd.xlane.f32.xlu0 %v3522_v49 }
0x1130   :  { %v3527_v41 = vsel %vm248_vm2, %v3526_v44, 0.0 }
0x1133   :  { %3528 = vadd.xlane.f32.xlu0 %v3527_v41 }
0x11bc   :  { %v3524_v19 = vpop.xlane.xlu0 %3523 }
0x11bd   :  { %v3525_v11 = vmul.f32 0.041666668, %v3524_v19 }
0x11bf   :  { %v3531_v51 = vmul.f32 %v3525_v11, %v3525_v11  ;;  %v3534_v55 = vsub.f32 %v3521_v2, %v3525_v11 }
0x11c0   :  { %v3529_v39 = vpop.xlane.xlu0 %3528 }
0x11c1   :  { %v3530_v47 = vmul.f32 0.041666668, %v3529_v39 }
0x11c3   :  { %v3532_v52 = vsub.f32 %v3530_v47, %v3531_v51 }
0x11c5   :  { %v3533_v53 = vmax.f32 %v3532_v52, 0.0 }
0x11c7   :  { %v3535_v54 = vadd.f32 1e-05, %v3533_v53 }
0x11c9   :  { %11322 = vrsqrt.f32 %v3535_v54 }
0x11d3   :  { %v11323_v14 = vpop.eup %11322 }
0x11d4   :  { %v3537_v59 = vmul.f32 %v11323_v14, %v3534_v55 }
0x11d6   :  { %v3542_v6 = vmul.f32 %v3541_v56, %v3537_v59 }
0x11d8   :  { %v13033_v13 = vadd.f32 %v3546_v63, %v3542_v6 }
0x11da   :  { %v3554_v10 = vpack.c.bf16 %v13033_v13, %v13033_v13 }
0x11dc   :  { %10931 = vmatmul.mubr.msk.bf16.vlgmr.msra.gmra.mrb[100].mxu1 %vm248_vm2, %v3554_v10 }
0x12af   :  { %v3612_v18 = vpop.f32.mrb[100].mxu1 }
0x12b0   :  { %v13038_v31 = vadd.f32 %v10351_v5, %v3612_v18  ;;  %v10932_v60 = vpop.f32.mrb[101].mxu1 }
0x12b1   :  { %v3615_v12 = vpop.f32.mrb[102].mxu1 }
0x12b2   :  { %3629 = vrot.lane.b32.xlu1 %v13038_v31, %s12124_s11  ;;  %v10933_v21 = vpop.f32.mrb[103].mxu1  ;;  %v3622_v62 = vmul.f32 %v13038_v31, %v12407_v15  ;;  %v3623_v33 = vmul.f32 %v13038_v31, %v12419_v22  ;;  %v3624_v58 = vmul.f32 %v13038_v31, %v12425_v23  ;;  %v3625_v34 = vmul.f32 %v13038_v31, %v12436_v26 }
0x12b3   :  { %v3626_v8 = vmul.f32 %v13038_v31, %v12442_v27  ;;  %v3627_v32 = vmul.f32 %v13038_v31, %v12452_v30 }
0x12b4   :  { %10936 = vmatprep.mubr.msk.f32.mxu0 %vm248_vm2, %v3622_v62 }
0x1324   :  { %v3630_v24 = vpop.permute.xlu1 %3629 }
0x1325   :  { %10934 = vmatprep.subr.msk.mxu0 %vm248_vm2, %v3630_v24 }
0x1326   :  { %10935 = vmatpush3.xpose.msk.msra.mxu0 %vm248_vm2, %v3630_v24 }
0x1327   :  { %10956 = vmatprep.subr.bf16.mxu0 %v12122_v1 }
0x1329   :  { %10937 = vmatmul.mubr.msk.f32.vlgmr.msra.gmra.mrb[68].mxu0 %vm248_vm2, %v3623_v33 }
0x132a   :  { %10939 = vmatprep.mubr.msk.f32.mxu0 %vm248_vm2, %v3624_v58 }
0x132d   :  { %10940 = vmatmul.mubr.msk.f32.gmra.mrb[70].mxu0 %vm248_vm2, %v3625_v34 }
0x132e   :  { %10942 = vmatprep.mubr.msk.f32.mxu0 %vm248_vm2, %v3626_v8 }
0x1331   :  { %10943 = vmatmul.mubr.msk.f32.gmra.mrb[72].mxu0 %vm248_vm2, %v3627_v32 }
0x1332   :  { %10960 = vmatprep.mubr.msk.bf16.mxu0 %vm12123_vm0, %v12122_v1 }
0x13fc   :  { %v10938_v35 = vpop.f32.mrb[68].mxu0 }
0x13fd   :  { %v3717_v38 = vpop.f32.mrb[69].mxu0  ;;  %v3749_v50 = vsel %vm423_vm3, %v10938_v35, -inf }
0x13fe   :  { %3750 = vmax.xlane.f32.xlu0 %v3749_v50  ;;  %v3746_v57 = vsel %vm423_vm3, %v3717_v38, -inf }
0x13ff   :  { %3747 = vmax.xlane.f32.xlu1 %v3746_v57 }
0x1400   :  { %v10941_v0 = vpop.f32.mrb[70].mxu0 }
0x1401   :  { %v3727_v25 = vpop.f32.mrb[71].mxu0  ;;  %v3755_v9 = vsel %vm423_vm3, %v10941_v0, -inf }
0x1402   :  { %3756 = vmax.xlane.f32.xlu0 %v3755_v9  ;;  %v3752_v42 = vsel %vm423_vm3, %v3727_v25, -inf }
0x1404   :  { %v10944_v48 = vpop.f32.mrb[72].mxu0 }
0x1405   :  { %v3737_v61 = vpop.f32.mrb[73].mxu0  ;;  %v3761_v49 = vsel %vm423_vm3, %v10944_v48, -inf }
0x1406   :  { %3753 = vmax.xlane.f32.xlu0 %v3752_v42  ;;  %v3758_v2 = vsel %vm423_vm3, %v3737_v61, -inf }
0x140a   :  { %3759 = vmax.xlane.f32.xlu0 %v3758_v2 }
0x140e   :  { %3762 = vmax.xlane.f32.xlu0 %v3761_v49 }
0x148b   :  { %v3751_v44 = vpop.xlane.xlu0 %3750 }
0x148c   :  { %v3765_v41 = vsub.f32 %v10938_v35, %v3751_v44  ;;  %v3748_v43 = vpop.xlane.xlu1 %3747 }
0x148d   :  { %v3764_v45 = vsub.f32 %v3717_v38, %v3748_v43 }
0x148e   :  { %v3772_v36 = vmul.f32 1.442695, %v3765_v41 }
0x148f   :  { %v3770_v19 = vmul.f32 1.442695, %v3764_v45  ;;  %v3757_v11 = vpop.xlane.xlu0 %3756 }
0x1490   :  { %11324 = vpow2.f32 %v3772_v36  ;;  %v3767_v39 = vsub.f32 %v10941_v0, %v3757_v11  ;;  %v11320_v36 = vld [vmem:[#allocation8 + $0x18] sm:$0xff]  }
0x1491   :  { %11326 = vpow2.f32 %v3770_v19  ;;  %10957 = vmatpush3.bf16.msra.mxu0 %v11320_v36  ;;  %v11321_v19 = vld [vmem:[#allocation8 + $0x20] ss:$0 sps:$4 sm:$0xff]  }
0x1492   :  { %v3776_v52 = vmul.f32 1.442695, %v3767_v39  ;;  %10958 = vmatprep.subr.bf16.mxu0 %v12122_v1  ;;  %v3957_v11 = vsel %vm252_vm1, %v11321_v19, 0 }
0x1493   :  { %v3754_v51 = vpop.xlane.xlu0 %3753 }
0x1494   :  { %v3766_v47 = vsub.f32 %v3727_v25, %v3754_v51 }
0x1495   :  { %10959 = vmatpush3.bf16.msra.mxu0 %v3957_v11 }
0x1496   :  { %v3774_v53 = vmul.f32 1.442695, %v3766_v47 }
0x1497   :  { %v3760_v54 = vpop.xlane.xlu0 %3759 }
0x1498   :  { %11328 = vpow2.f32 %v3774_v53  ;;  %v3768_v55 = vsub.f32 %v3737_v61, %v3760_v54 }
0x1499   :  { %11330 = vpow2.f32 %v3776_v52 }
0x149a   :  { %v11325_v56 = vpop.eup %11324  ;;  %v3778_v14 = vmul.f32 1.442695, %v3768_v55 }
0x149b   :  { %v3763_v59 = vpop.xlane.xlu0 %3762  ;;  %v3785_v63 = vsel %vm423_vm3, %v11325_v56, 0.0  ;;  %v11327_v6 = vpop.eup %11326 }
0x149c   :  { %11332 = vpow2.f32 %v3778_v14  ;;  %v3769_v10 = vsub.f32 %v10944_v48, %v3763_v59  ;;  %3786 = vadd.xlane.f32.xlu0 %v3785_v63  ;;  %v3782_v18 = vsel %vm423_vm3, %v11327_v6, 0.0 }
0x149e   :  { %v3780_v5 = vmul.f32 1.442695, %v3769_v10 }
0x14a0   :  { %11334 = vpow2.f32 %v3780_v5  ;;  %3783 = vadd.xlane.f32.xlu0 %v3782_v18 }
0x14a2   :  { %v11329_v60 = vpop.eup %11328 }
0x14a3   :  { %v3788_v12 = vsel %vm423_vm3, %v11329_v60, 0.0  ;;  %v11331_v21 = vpop.eup %11330 }
0x14a4   :  { %3789 = vadd.xlane.f32.xlu0 %v3788_v12  ;;  %v3791_v24 = vsel %vm423_vm3, %v11331_v21, 0.0 }
0x14a6   :  { %v11333_v62 = vpop.eup %11332 }
0x14a7   :  { %v3794_v33 = vsel %vm423_vm3, %v11333_v62, 0.0 }
0x14a8   :  { %3792 = vadd.xlane.f32.xlu0 %v3791_v24  ;;  %3795 = vadd.xlane.f32.xlu1 %v3794_v33 }
0x14aa   :  { %v11335_v58 = vpop.eup %11334 }
0x14ab   :  { %v3797_v34 = vsel %vm423_vm3, %v11335_v58, 0.0 }
0x14ac   :  { %3798 = vadd.xlane.f32.xlu0 %v3797_v34 }
0x14b9   :  { %3812 = vrot.lane.b32.xlu1 %v13038_v31, %s12125_s16 }
0x1529   :  { %v3787_v8 = vpop.xlane.xlu0 %3786 }
0x152a   :  { %11336 = vrcp.f32 %v3787_v8 }
0x152d   :  { %v3784_v32 = vpop.xlane.xlu0 %3783 }
0x152e   :  { %11338 = vrcp.f32 %v3784_v32 }
0x1531   :  { %v3790_v35 = vpop.xlane.xlu0 %3789 }
0x1532   :  { %11340 = vrcp.f32 %v3790_v35 }
0x1534   :  { %v11337_v57 = vpop.eup %11336 }
0x1535   :  { %v3796_v38 = vpop.xlane.xlu1 %3795  ;;  %v3793_v50 = vpop.xlane.xlu0 %3792  ;;  %v3807_v61 = vmul.f32 %v11337_v57, %v11325_v56 }
0x1536   :  { %11342 = vrcp.f32 %v3796_v38 }
0x1537   :  { %11344 = vrcp.f32 %v3793_v50 }
0x1538   :  { %v11339_v0 = vpop.eup %11338 }
0x1539   :  { %v3813_v25 = vpop.permute.xlu1 %3812  ;;  %v3799_v9 = vpop.xlane.xlu0 %3798  ;;  %v3806_v48 = vmul.f32 %v11339_v0, %v11327_v6 }
0x153a   :  { %11346 = vrcp.f32 %v3799_v9  ;;  %10945 = vmatprep.subr.mxu1 %v3813_v25 }
0x153b   :  { %10946 = vmatpush3.msra.mxu1 %v3813_v25  ;;  %10947 = vmatprep.mubr.msk.f32.mxu1 %vm423_vm3, %v3806_v48 }
0x153c   :  { %v11341_v31 = vpop.eup %11340  ;;  %10948 = vmatmul.mubr.msk.f32.vlgmr.msra.gmra.mrb[104].mxu1 %vm423_vm3, %v3807_v61 }
0x153d   :  { %v3808_v42 = vmul.f32 %v11341_v31, %v11329_v60 }
0x153f   :  { %10950 = vmatprep.mubr.msk.f32.mxu1 %vm423_vm3, %v3808_v42 }
0x1540   :  { %v11343_v2 = vpop.eup %11342 }
0x1541   :  { %v11345_v49 = vpop.eup %11344  ;;  %v3810_v44 = vmul.f32 %v11343_v2, %v11333_v62 }
0x1542   :  { %v3809_v41 = vmul.f32 %v11345_v49, %v11331_v21 }
0x1544   :  { %v11347_v43 = vpop.eup %11346  ;;  %10951 = vmatmul.mubr.msk.f32.gmra.mrb[106].mxu1 %vm423_vm3, %v3809_v41 }
0x1545   :  { %10953 = vmatprep.mubr.msk.f32.mxu1 %vm423_vm3, %v3810_v44  ;;  %v3811_v45 = vmul.f32 %v11347_v43, %v11335_v58 }
0x1548   :  { %10954 = vmatmul.mubr.msk.f32.gmra.mrb[108].mxu1 %vm423_vm3, %v3811_v45 }
0x160f   :  { %v10949_v39 = vpop.f32.mrb[104].mxu1 }
0x1610   :  { %v3929_v51 = vmul.f32 %v10949_v39, %v12419_v22  ;;  %v3899_v47 = vpop.f32.mrb[105].mxu1 }
0x1611   :  { %v3928_v52 = vmul.f32 %v3899_v47, %v12407_v15  ;;  %v13094_v15 = vld [vmem:[#allocation11 + $0x10] sm:$0x3f] }
0x1613   :  { %v3934_v53 = vadd.f32 %v3929_v51, %v3928_v52 }
0x1617   :  { %v10952_v54 = vpop.f32.mrb[106].mxu1 }
0x1618   :  { %v3909_v55 = vpop.f32.mrb[107].mxu1  ;;  %v3931_v14 = vmul.f32 %v10952_v54, %v12436_v26 }
0x1619   :  { %v3930_v56 = vmul.f32 %v3909_v55, %v12425_v23  ;;  %v3943_v23 = vrot.slane %v13094_v15, %v12377_v3 }
0x161b   :  { %v3935_v59 = vadd.f32 %v3934_v53, %v3930_v56  ;;  %v10955_v63 = vpop.f32.mrb[108].mxu1 }
0x161c   :  { %v3919_v6 = vpop.f32.mrb[109].mxu1  ;;  %v3933_v18 = vmul.f32 %v10955_v63, %v12452_v30 }
0x161d   :  { %v3932_v10 = vmul.f32 %v3919_v6, %v12442_v27  ;;  %v3936_v5 = vadd.f32 %v3935_v59, %v3931_v14 }
0x161f   :  { %v3937_v60 = vadd.f32 %v3936_v5, %v3932_v10 }
0x1621   :  { %v3938_v22 = vadd.f32 %v3937_v60, %v3933_v18 }
0x1623   :  { %v3939_v12 = vpack.c.bf16 %v3938_v22, %v3938_v22 }
0x1625   :  { %10961 = vmatmul.mubr.msk.bf16.vlgmr.msra.gmra.mrb[76].mxu0 %vm248_vm2, %v3939_v12 }
0x16f8   :  { %v3993_v26 = vpop.f32.mrb[76].mxu0 }
0x16f9   :  { %v3994_v21 = vadd.f32 %v3993_v26, %v3943_v23  ;;  %v10962_v27 = vpop.f32.mrb[77].mxu0 }
0x16fa   :  { %v3996_v62 = vpop.f32.mrb[78].mxu0 }
0x16fb   :  { %v3999_v30 = vadd.f32 %v3994_v21, %v13033_v13  ;;  %v10963_v24 = vpop.f32.mrb[79].mxu0 }
0x16fd   :  { %v4000_v33 = vsel %vm248_vm2, %v3999_v30, 0.0  ;;  %v4004_v58 = vmul.f32 %v3999_v30, %v3999_v30 }
0x16fe   :  { %4001 = vadd.xlane.f32.xlu0 %v4000_v33 }
0x16ff   :  { %v4005_v34 = vsel %vm248_vm2, %v4004_v58, 0.0 }
0x1702   :  { %4006 = vadd.xlane.f32.xlu0 %v4005_v34 }
0x1703   :  { %11907 = shalt.err (!%p11904_p0)  }
0x1704   :  { %p13906_p1 = scmp.ne.s32.totalorder %s13903_s29, 0 }
0x1706   :  { %11919 = shalt.err (!%p13906_p1)  }
0x1707   :  { %4037 = dma.hbm_to_vmem [thread:$0]  %s12883_s24, 3072, %s12590_s25, [#allocation4 + $0x1] }
0x1708   :  { %s13123_s9 = scalar_lea.hbm %s13883_s18, 12288  ;;  %p11924_p3 = scmp.lt.u32.totalorder %s12902_s3, %s13883_s18 }
0x1709   :  { %p11922_p12 = scmp.ne.s32.totalorder %s12902_s3, %s13123_s9  ;;  %p11925_p4 = scmp.lt.u32.totalorder %s12560_s26, %s13123_s9 }
0x170a   :  { %p11927_p7 = scmp.lt.u32.totalorder %s13123_s9, %s12902_s3 }
0x170b   :  { %p11926_p6 = por %p11925_p4, %p11924_p3 }
0x170d   :  { %p11928_p9 = por %p11927_p7, %p11926_p6 }
0x170f   :  { %p11929_p10 = pnand %p11928_p9, %p11922_p12 }
0x1711   :  { %11932 = shalt.err (!%p11929_p10)  }
0x1712   :  { %11944 = shalt.err (!%p12646_p8)  }
0x1713   :  { %4049 = dma.hbm_to_vmem [thread:$0]  %s12902_s3, 3072, %s12622_s1, [#allocation4 + $0x3]  ;;  %v4019_v25 = vrot.slane %v13094_v15, %v12655_v28  ;;  %v4024_v61 = vrot.slane %v13094_v15, %v12658_v29 }
0x178b   :  { %v4002_v13 = vpop.xlane.xlu0 %4001 }
0x178c   :  { %v4003_v8 = vmul.f32 0.041666668, %v4002_v13 }
0x178e   :  { %v4009_v35 = vmul.f32 %v4003_v8, %v4003_v8  ;;  %v4012_v9 = vsub.f32 %v3999_v30, %v4003_v8 }
0x178f   :  { %v4007_v32 = vpop.xlane.xlu0 %4006 }
0x1790   :  { %v4008_v38 = vmul.f32 0.041666668, %v4007_v32 }
0x1792   :  { %v4010_v50 = vsub.f32 %v4008_v38, %v4009_v35 }
0x1794   :  { %v4011_v57 = vmax.f32 %v4010_v50, 0.0 }
0x1796   :  { %v4013_v0 = vadd.f32 1e-05, %v4011_v57 }
0x1798   :  { %11348 = vrsqrt.f32 %v4013_v0 }
0x17a2   :  { %v11349_v48 = vpop.eup %11348 }
0x17a3   :  { %v4015_v31 = vmul.f32 %v11349_v48, %v4012_v9 }
0x17a5   :  { %v4020_v42 = vmul.f32 %v4019_v25, %v4015_v31 }
0x17a7   :  { %v13143_v2 = vadd.f32 %v4024_v61, %v4020_v42 }
0x17a8   :  { %12088 = dma.done.wait [#allocation4], 3072 }
0x17a9   :  { %12089 = vsyncadd [#allocation4], 4294964224 }
0x17aa   :  { %12090 = dma.done.wait [#allocation4 + $0x2], 3072 }
0x17ab   :  { %12091 = vsyncadd [#allocation4 + $0x2], 4294964224  ;;  %4391 = vmatprep.mubr.bf16.mxu1 %v12130_v37  ;;  %4432 = vmatprep.mubr.bf16.mxu0 %v12130_v37  ;;  %v13150_v49 = vld [vmem:[%s13877_s12 + $0x8] sm:$0x1]  ;;  %v4054_v44 = vld [vmem:[#allocation2] sm:$0xff]  ;;  %v13158_v22 = vpack.c.bf16 %v13143_v2, %v13143_v2  ;;  %vm5236_vm4 = vcmask 189441   ;;  %p11949_p13 = scmp.lt.u32.totalorder %s13104_s2, %s13882_s17 }
0x17ac   :  { %v4062_v41 = vld [vmem:[#allocation2 + $0x40] sm:$0xff]  ;;  %v4055_v45 = vld [vmem:[#allocation2 + $0x8] sm:$0xff]  ;;  %v4056_v54 = vld [vmem:[#allocation2 + $0x10] sm:$0xff]  ;;  %vm5472_vm5 = vcmask 62464   ;;  %vm5561_vm6 = vcmask 193536   ;;  %s13319_s22 = scalar_lea.hbm %s13882_s17, 15360 }
0x17ad   :  { %v10374_v43 = vcombine.high %v4054_v44, %v4062_v41  ;;  %v4063_v36 = vld [vmem:[#allocation2 + $0x48] sm:$0xff]  ;;  %v10373_v19 = vcombine.low %v4054_v44, %v4062_v41  ;;  %v4070_v11 = vld [vmem:[#allocation2 + $0x80] sm:$0xff]  ;;  %v4064_v55 = vld [vmem:[#allocation2 + $0x50] sm:$0xff]  ;;  %p11947_p11 = scmp.ne.s32.totalorder %s13104_s2, %s13319_s22  ;;  %p11950_p0 = scmp.lt.u32.totalorder %s12516_s5, %s13319_s22 }
0x17ae   :  { %v10376_v39 = vcombine.high %v4055_v45, %v4063_v36  ;;  %v10375_v51 = vcombine.low %v4055_v45, %v4063_v36  ;;  %v10390_v47 = vcombine.high %v4070_v11, %v4070_v11  ;;  %v4071_v52 = vld [vmem:[#allocation2 + $0x88] sm:$0xff]  ;;  %v10389_v53 = vcombine.low %v4070_v11, %v4070_v11  ;;  %v4057_v59 = vld [vmem:[#allocation2 + $0x18] sm:$0xff]  ;;  %v4072_v60 = vld [vmem:[#allocation2 + $0x90] sm:$0xff]  ;;  %p11952_p3 = scmp.lt.u32.totalorder %s13319_s22, %s13104_s2 }
0x17af   :  { %4359 = vmatprep.subr.bf16.mxu1 %v10374_v43  ;;  %v10392_v56 = vcombine.high %v4071_v52, %v4071_v52  ;;  %v10391_v14 = vcombine.low %v4071_v52, %v4071_v52  ;;  %v4065_v63 = vld [vmem:[#allocation2 + $0x58] sm:$0xff]  ;;  %v10378_v10 = vcombine.high %v4056_v54, %v4064_v55  ;;  %v10377_v23 = vcombine.low %v4056_v54, %v4064_v55  ;;  %v4058_v62 = vld [vmem:[#allocation2 + $0x20] sm:$0xff]  ;;  %v4059_v24 = vld [vmem:[#allocation2 + $0x28] sm:$0xff]  ;;  %p11951_p12 = por %p11950_p0, %p11949_p13 }
0x17b0   :  { %4400 = vmatprep.subr.bf16.mxu0 %v10376_v39  ;;  %4360 = vmatpush1.bf16.msra.mxu1 %v10373_v19  ;;  %v4312_v6 = vsel %vm252_vm1, %v10389_v53, 0  ;;  %v10380_v18 = vcombine.high %v4057_v59, %v4065_v63  ;;  %v4073_v12 = vld [vmem:[#allocation2 + $0x98] sm:$0xff]  ;;  %v10379_v26 = vcombine.low %v4057_v59, %v4065_v63  ;;  %v10394_v21 = vcombine.high %v4072_v60, %v4072_v60  ;;  %v4066_v30 = vld [vmem:[#allocation2 + $0x60] sm:$0xff]  ;;  %v4067_v34 = vld [vmem:[#allocation2 + $0x68] sm:$0xff] }
0x17b1   :  { %4401 = vmatpush1.bf16.msra.mxu0 %v10375_v51  ;;  %10405 = vmatprep.subr.msk.bf16.mxu1 %vm252_vm1, %v10390_v47  ;;  %v4318_v5 = vsel %vm252_vm1, %v10391_v14, 0  ;;  %v10393_v27 = vcombine.low %v4072_v60, %v4072_v60  ;;  %v10396_v33 = vcombine.high %v4073_v12, %v4073_v12  ;;  %v10395_v58 = vcombine.low %v4073_v12, %v4073_v12  ;;  %v4074_v38 = vld [vmem:[#allocation2 + $0xa0] sm:$0xff]  ;;  %v4075_v50 = vld [vmem:[#allocation2 + $0xa8] sm:$0xff]  ;;  %v4060_v31 = vld [vmem:[#allocation2 + $0x30] sm:$0xff]  ;;  %p11953_p4 = por %p11952_p3, %p11951_p12 }
0x17b2   :  { %10407 = vmatprep.subr.msk.bf16.mxu0 %vm252_vm1, %v10392_v56  ;;  %v10382_v8 = vcombine.high %v4058_v62, %v4066_v30  ;;  %v10384_v35 = vcombine.high %v4059_v24, %v4067_v34  ;;  %v10381_v57 = vcombine.low %v4058_v62, %v4066_v30  ;;  %v10383_v0 = vcombine.low %v4059_v24, %v4067_v34  ;;  %v4068_v42 = vld [vmem:[#allocation2 + $0x70] sm:$0xff]  ;;  %v4061_v44 = vld [vmem:[#allocation2 + $0x38] sm:$0xff]  ;;  %v4081_v56 = vld [vmem:[#allocation3] sm:$0xff] }
0x17b3   :  { %v4324_v13 = vsel %vm252_vm1, %v10393_v27, 0  ;;  %v4330_v32 = vsel %vm252_vm1, %v10395_v58, 0  ;;  %v10398_v25 = vcombine.high %v4074_v38, %v4074_v38  ;;  %v10397_v9 = vcombine.low %v4074_v38, %v4074_v38  ;;  %v4069_v41 = vld [vmem:[#allocation2 + $0x78] sm:$0xff]  ;;  %v4076_v11 = vld [vmem:[#allocation2 + $0xb0] sm:$0xff]  ;;  %v4089_v14 = vld [vmem:[#allocation3 + $0x40] sm:$0xff]  ;;  %p11954_p6 = pnand %p11953_p4, %p11947_p11 }
0x17b4   :  { %4362 = vmatpush1.bf16.msra.mxu1 %v4312_v6  ;;  %v10400_v48 = vcombine.high %v4075_v50, %v4075_v50  ;;  %v10399_v61 = vcombine.low %v4075_v50, %v4075_v50  ;;  %v10386_v45 = vcombine.high %v4060_v31, %v4068_v42  ;;  %v10388_v19 = vcombine.high %v4061_v44, %v4069_v41  ;;  %v4077_v39 = vld [vmem:[#allocation2 + $0xb8] sm:$0xff]  ;;  %v4082_v59 = vld [vmem:[#allocation3 + $0x8] sm:$0xff]  ;;  %v4083_v24 = vld [vmem:[#allocation3 + $0x10] sm:$0xff] }
0x17b5   :  { %4403 = vmatpush1.bf16.msra.mxu0 %v4318_v5  ;;  %4441 = vmatprep.subr.bf16.mxu1 %v10378_v10  ;;  %v4336_v43 = vsel %vm252_vm1, %v10397_v9, 0  ;;  %v10385_v51 = vcombine.low %v4060_v31, %v4068_v42  ;;  %v10387_v47 = vcombine.low %v4061_v44, %v4069_v41  ;;  %v10402_v52 = vcombine.high %v4076_v11, %v4076_v11  ;;  %v4090_v63 = vld [vmem:[#allocation3 + $0x48] sm:$0xff]  ;;  %v4084_v58 = vld [vmem:[#allocation3 + $0x18] sm:$0xff] }
0x17b6   :  { %4482 = vmatprep.subr.bf16.mxu0 %v10380_v18  ;;  %v4342_v36 = vsel %vm252_vm1, %v10399_v61, 0  ;;  %v10401_v53 = vcombine.low %v4076_v11, %v4076_v11  ;;  %v10404_v54 = vcombine.high %v4077_v39, %v4077_v39  ;;  %v10403_v55 = vcombine.low %v4077_v39, %v4077_v39  ;;  %v4099_v39 = vld [vmem:[#allocation3 + $0x90] sm:$0xff] }
0x17b7   :  { %10406 = vmatmul.mubr.msk.bf16.vlgmr.msra.gmra.mrb[112].mxu1 %vm248_vm2, %v13158_v22  ;;  %v10422_v10 = vcombine.high %v4081_v56, %v4089_v14  ;;  %v10424_v18 = vcombine.high %v4082_v59, %v4090_v63  ;;  %v10421_v60 = vcombine.low %v4081_v56, %v4089_v14  ;;  %v10423_v12 = vcombine.low %v4082_v59, %v4090_v63 }
0x17b8   :  { %10408 = vmatmul.mubr.msk.bf16.vlgmr.msra.gmra.mrb[80].mxu0 %vm248_vm2, %v13158_v22  ;;  %4442 = vmatpush1.bf16.msra.mxu1 %v10377_v23  ;;  %v4348_v6 = vsel %vm252_vm1, %v10401_v53, 0  ;;  %v4354_v5 = vsel %vm252_vm1, %v10403_v55, 0  ;;  %v4097_v23 = vld [vmem:[#allocation3 + $0x80] sm:$0xff] }
0x17b9   :  { %4483 = vmatpush1.bf16.msra.mxu0 %v10379_v26  ;;  %10409 = vmatprep.subr.msk.bf16.mxu1 %vm252_vm1, %v10394_v21  ;;  %v4098_v26 = vld [vmem:[#allocation3 + $0x88] sm:$0xff]  ;;  %v10438_v21 = vcombine.high %v4097_v23, %v4097_v23  ;;  %v10437_v62 = vcombine.low %v4097_v23, %v4097_v23 }
0x17ba   :  { %10411 = vmatprep.subr.msk.bf16.mxu0 %vm252_vm1, %v10396_v33  ;;  %4473 = vmatprep.mubr.bf16.mxu1 %v12130_v37  ;;  %v10440_v27 = vcombine.high %v4098_v26, %v4098_v26  ;;  %v10439_v30 = vcombine.low %v4098_v26, %v4098_v26  ;;  %v4091_v33 = vld [vmem:[#allocation3 + $0x50] sm:$0xff] }
0x17bb   :  { %4514 = vmatprep.mubr.bf16.mxu0 %v12130_v37  ;;  %v10426_v34 = vcombine.high %v4083_v24, %v4091_v33 }
0x17bc   :  { %4444 = vmatpush1.bf16.msra.mxu1 %v4324_v13  ;;  %v4092_v13 = vld [vmem:[#allocation3 + $0x58] sm:$0xff] }
0x17bd   :  { %4485 = vmatpush1.bf16.msra.mxu0 %v4330_v32  ;;  %4523 = vmatprep.subr.bf16.mxu1 %v10382_v8  ;;  %v13197_v8 = vld [vmem:[%s13878_s13 + $0x20] sm:$0xff]  ;;  %v10427_v55 = vcombine.low %v4084_v58, %v4092_v13 }
0x17be   :  { %4564 = vmatprep.subr.bf16.mxu0 %v10384_v35  ;;  %v4111_v32 = vrot.slane %v13197_v8, %v12377_v3  ;;  %v4119_v35 = vrot.slane %v13197_v8, %v12658_v29  ;;  %v4115_v38 = vrot.slane %v13197_v8, %v12655_v28  ;;  %v4123_v50 = vrot.slane %v13197_v8, %v12717_v17 }
0x17bf   :  { %10410 = vmatmul.mubr.msk.bf16.vlgmr.msra.gmra.mrb[116].mxu1 %vm248_vm2, %v13158_v22  ;;  %v4131_v56 = vrot.slane %v13197_v8, %v12726_v46  ;;  %v4139_v63 = vrot.slane %v13197_v8, %v12760_v40 }
0x17c0   :  { %10412 = vmatmul.mubr.msk.bf16.vlgmr.msra.gmra.mrb[84].mxu0 %vm248_vm2, %v13158_v22  ;;  %4524 = vmatpush1.bf16.msra.mxu1 %v10381_v57 }
0x17c1   :  { %4565 = vmatpush1.bf16.msra.mxu0 %v10383_v0  ;;  %10413 = vmatprep.subr.msk.bf16.mxu1 %vm252_vm1, %v10398_v25 }
0x17c2   :  { %10415 = vmatprep.subr.msk.bf16.mxu0 %vm252_vm1, %v10400_v48  ;;  %4555 = vmatprep.mubr.bf16.mxu1 %v12130_v37 }
0x17c3   :  { %4596 = vmatprep.mubr.bf16.mxu0 %v12130_v37 }
0x17c4   :  { %4526 = vmatpush1.bf16.msra.mxu1 %v4336_v43 }
0x17c5   :  { %4567 = vmatpush1.bf16.msra.mxu0 %v4342_v36  ;;  %4605 = vmatprep.subr.bf16.mxu1 %v10386_v45 }
0x17c6   :  { %4646 = vmatprep.subr.bf16.mxu0 %v10388_v19 }
0x17c7   :  { %10414 = vmatmul.mubr.msk.bf16.vlgmr.msra.gmra.mrb[120].mxu1 %vm248_vm2, %v13158_v22 }
0x17c8   :  { %10416 = vmatmul.mubr.msk.bf16.vlgmr.msra.gmra.mrb[88].mxu0 %vm248_vm2, %v13158_v22  ;;  %4606 = vmatpush1.bf16.msra.mxu1 %v10385_v51 }
0x17c9   :  { %4647 = vmatpush1.bf16.msra.mxu0 %v10387_v47  ;;  %10417 = vmatprep.subr.msk.bf16.mxu1 %vm252_vm1, %v10402_v52  ;;  %v10425_v47 = vcombine.low %v4083_v24, %v4091_v33  ;;  %v4100_v52 = vld [vmem:[#allocation3 + $0x98] sm:$0xff]  ;;  %v13218_v33 = vld [vmem:[%s13878_s13 + $0x28] sm:$0xff] }
0x17ca   :  { %10419 = vmatprep.subr.msk.bf16.mxu0 %vm252_vm1, %v10404_v54  ;;  %4637 = vmatprep.mubr.bf16.mxu1 %v12130_v37 }
0x17cb   :  { %4678 = vmatprep.mubr.bf16.mxu0 %v12130_v37 }
0x17cc   :  { %4608 = vmatpush1.bf16.msra.mxu1 %v4348_v6  ;;  %v10442_v6 = vcombine.high %v4099_v39, %v4099_v39 }
0x17cd   :  { %4649 = vmatpush1.bf16.msra.mxu0 %v4354_v5  ;;  %4859 = vmatprep.subr.bf16.mxu1 %v10422_v10  ;;  %v10444_v5 = vcombine.high %v4100_v52, %v4100_v52 }
0x17ce   :  { %4899 = vmatprep.subr.bf16.mxu0 %v10424_v18  ;;  %v4127_v18 = vrot.slane %v13197_v8, %v12750_v20 }
0x17cf   :  { %10418 = vmatmul.mubr.msk.bf16.vlgmr.msra.gmra.mrb[124].mxu1 %vm248_vm2, %v13158_v22 }
0x17d0   :  { %10420 = vmatmul.mubr.msk.bf16.vlgmr.msra.gmra.mrb[92].mxu0 %vm248_vm2, %v13158_v22  ;;  %v10428_v22 = vcombine.high %v4084_v58, %v4092_v13  ;;  %v4085_v13 = vld [vmem:[#allocation3 + $0x20] sm:$0xff] }
0x17d5   :  { %4860 = vmatpush1.bf16.xpose.msra.mxu1 %v10421_v60 }
0x17d6   :  { %4900 = vmatpush1.bf16.xpose.msra.mxu0 %v10423_v12  ;;  %4861 = vmatprep.subr.bf16.mxu1 %v10438_v21  ;;  %v4135_v21 = vrot.slane %v13197_v8, %v12755_v16  ;;  %v4094_v8 = vld [vmem:[#allocation3 + $0x68] sm:$0xff] }
0x17d7   :  { %4901 = vmatprep.subr.bf16.mxu0 %v10440_v27 }
0x17dd   :  { %4862 = vmatpush1.bf16.xpose.msra.mxu1 %v10437_v62 }
0x17de   :  { %4902 = vmatpush1.bf16.xpose.msra.mxu0 %v10439_v30  ;;  %4939 = vmatprep.subr.bf16.mxu1 %v10426_v34 }
0x17df   :  { %4979 = vmatprep.subr.bf16.mxu0 %v10428_v22  ;;  %v4093_v22 = vld [vmem:[#allocation3 + $0x60] sm:$0xff] }
0x188a   :  { %v4393_v57 = vpop.f32.mrb[112].mxu1 }
0x188b   :  { %v4394_v0 = vadd.f32 %v4393_v57, %v4111_v32  ;;  %v4434_v25 = vpop.f32.mrb[80].mxu0  ;;  %v4395_v9 = vpop.f32.mrb[113].mxu1 }
0x188c   :  { %v4435_v48 = vadd.f32 %v4434_v25, %v4119_v35  ;;  %v4396_v61 = vadd.f32 %v4395_v9, %v4115_v38  ;;  %v4436_v31 = vpop.f32.mrb[81].mxu0  ;;  %v4397_v42 = vpop.f32.mrb[114].mxu1  ;;  %v4086_v38 = vld [vmem:[#allocation3 + $0x28] sm:$0xff]  ;;  %v4147_v25 = vrot.slane %v13218_v33, %v12655_v28 }
0x188d   :  { %v4687_v44 = vmax.f32 %v4394_v0, 0.0  ;;  %v4437_v41 = vadd.f32 %v4436_v31, %v4123_v50  ;;  %v4438_v43 = vpop.f32.mrb[82].mxu0  ;;  %v4398_v45 = vpop.f32.mrb[115].mxu1  ;;  %v10441_v0 = vcombine.low %v4099_v39, %v4099_v39  ;;  %v4155_v31 = vrot.slane %v13218_v33, %v12717_v17 }
0x188e   :  { %v4689_v36 = vmax.f32 %v4435_v48, 0.0  ;;  %v4688_v19 = vmax.f32 %v4396_v61, 0.0  ;;  %v4439_v11 = vpop.f32.mrb[83].mxu0  ;;  %v10443_v48 = vcombine.low %v4100_v52, %v4100_v52  ;;  %v10430_v61 = vcombine.high %v4085_v13, %v4093_v22 }
0x188f   :  { %v4690_v51 = vmax.f32 %v4437_v41, 0.0  ;;  %v4703_v14 = vpack.c.bf16 %v4687_v44, %v4687_v44  ;;  %v10432_v42 = vcombine.high %v4086_v38, %v4094_v8 }
0x1890   :  { %v4705_v53 = vpack.c.bf16 %v4689_v36, %v4689_v36  ;;  %v4704_v54 = vpack.c.bf16 %v4688_v19, %v4688_v19 }
0x1891   :  { %v4706_v59 = vpack.c.bf16 %v4690_v51, %v4690_v51 }
0x1892   :  { %4891 = vmatprep.mubr.bf16.mxu1 %v4704_v54  ;;  %v4475_v10 = vpop.f32.mrb[116].mxu1  ;;  %v4101_v54 = vld [vmem:[#allocation3 + $0xa0] sm:$0xff] }
0x1893   :  { %4931 = vmatprep.mubr.bf16.mxu0 %v4706_v59  ;;  %4892 = vmatmul.mubr.bf16.vlgmr.msra.gmra.mrb[128].mxu1 %v4703_v14  ;;  %v4477_v60 = vpop.f32.mrb[117].mxu1  ;;  %v4516_v12 = vpop.f32.mrb[84].mxu0  ;;  %v4476_v32 = vadd.f32 %v4475_v10, %v4127_v18  ;;  %v4102_v59 = vld [vmem:[#allocation3 + $0xa8] sm:$0xff]  ;;  %v10431_v10 = vcombine.low %v4086_v38, %v4094_v8  ;;  %v4088_v8 = vld [vmem:[#allocation3 + $0x38] sm:$0xff] }
0x1894   :  { %4932 = vmatmul.mubr.bf16.vlgmr.msra.gmra.mrb[96].mxu0 %v4705_v53  ;;  %4940 = vmatpush1.bf16.xpose.msra.mxu1 %v10425_v47  ;;  %v4478_v23 = vadd.f32 %v4477_v60, %v4131_v56  ;;  %v4479_v26 = vpop.f32.mrb[118].mxu1  ;;  %v4518_v27 = vpop.f32.mrb[85].mxu0  ;;  %v4517_v57 = vadd.f32 %v4516_v12, %v4135_v21  ;;  %v10448_v60 = vcombine.high %v4102_v59, %v4102_v59 }
0x1895   :  { %4980 = vmatpush1.bf16.xpose.msra.mxu0 %v10427_v55  ;;  %v4480_v62 = vpop.f32.mrb[119].mxu1  ;;  %v4519_v30 = vadd.f32 %v4518_v27, %v4139_v63  ;;  %4941 = vmatprep.subr.bf16.mxu1 %v10442_v6  ;;  %v4520_v24 = vpop.f32.mrb[86].mxu0  ;;  %v4691_v41 = vmax.f32 %v4476_v32, 0.0  ;;  %v10429_v6 = vcombine.low %v4085_v13, %v4093_v22  ;;  %v4087_v13 = vld [vmem:[#allocation3 + $0x30] sm:$0xff]  ;;  %v4163_v32 = vrot.slane %v13218_v33, %v12726_v46 }
0x1896   :  { %v4692_v58 = vmax.f32 %v4478_v23, 0.0  ;;  %4981 = vmatprep.subr.bf16.mxu0 %v10444_v5  ;;  %v4521_v34 = vpop.f32.mrb[87].mxu0  ;;  %v4693_v36 = vmax.f32 %v4517_v57, 0.0  ;;  %v10446_v5 = vcombine.high %v4101_v54, %v4101_v54  ;;  %v4143_v23 = vrot.slane %v13218_v33, %v12377_v3  ;;  %v4095_v22 = vld [vmem:[#allocation3 + $0x70] sm:$0xff] }
0x1897   :  { %v4694_v35 = vmax.f32 %v4519_v30, 0.0  ;;  %v4707_v56 = vpack.c.bf16 %v4691_v41, %v4691_v41  ;;  %v4151_v62 = vrot.slane %v13218_v33, %v12658_v29  ;;  %v4171_v57 = vrot.slane %v13218_v33, %v12760_v40 }
0x1898   :  { %v4708_v50 = vpack.c.bf16 %v4692_v58, %v4692_v58  ;;  %v4709_v63 = vpack.c.bf16 %v4693_v36, %v4693_v36  ;;  %v4103_v36 = vld [vmem:[#allocation3 + $0xb0] sm:$0xff] }
0x1899   :  { %v4710_v9 = vpack.c.bf16 %v4694_v35, %v4694_v35 }
0x189a   :  { %4971 = vmatprep.mubr.bf16.mxu1 %v4708_v50  ;;  %v4557_v44 = vpop.f32.mrb[120].mxu1  ;;  %v4096_v50 = vld [vmem:[#allocation3 + $0x78] sm:$0xff] }
0x189b   :  { %5011 = vmatprep.mubr.bf16.mxu0 %v4710_v9  ;;  %v4559_v43 = vpop.f32.mrb[121].mxu1  ;;  %v4598_v45 = vpop.f32.mrb[88].mxu0  ;;  %v4558_v38 = vadd.f32 %v4557_v44, %v4143_v23  ;;  %v10447_v9 = vcombine.low %v4102_v59, %v4102_v59 }
0x189c   :  { %4942 = vmatpush1.bf16.xpose.msra.mxu1 %v10441_v0  ;;  %v4560_v19 = vadd.f32 %v4559_v43, %v4147_v25  ;;  %v4561_v11 = vpop.f32.mrb[122].mxu1  ;;  %v4600_v39 = vpop.f32.mrb[89].mxu0  ;;  %v4599_v0 = vadd.f32 %v4598_v45, %v4151_v62  ;;  %v10445_v25 = vcombine.low %v4101_v54, %v4101_v54  ;;  %v10435_v45 = vcombine.low %v4088_v8, %v4096_v50 }
0x189d   :  { %4982 = vmatpush1.bf16.xpose.msra.mxu0 %v10443_v48  ;;  %5019 = vmatprep.subr.bf16.mxu1 %v10430_v61  ;;  %v4562_v51 = vpop.f32.mrb[123].mxu1  ;;  %v4601_v47 = vadd.f32 %v4600_v39, %v4155_v31  ;;  %v4602_v52 = vpop.f32.mrb[90].mxu0  ;;  %v10434_v48 = vcombine.high %v4087_v13, %v4095_v22  ;;  %v10436_v61 = vcombine.high %v4088_v8, %v4096_v50  ;;  %v4104_v39 = vld [vmem:[#allocation3 + $0xb8] sm:$0xff] }
0x189e   :  { %5059 = vmatprep.subr.bf16.mxu0 %v10432_v42  ;;  %v4696_v53 = vmax.f32 %v4560_v19, 0.0  ;;  %v4603_v55 = vpop.f32.mrb[91].mxu0  ;;  %v4695_v42 = vmax.f32 %v4558_v38, 0.0  ;;  %v4697_v43 = vmax.f32 %v4599_v0, 0.0  ;;  %v10450_v52 = vcombine.high %v4103_v36, %v4103_v36 }
0x189f   :  { %v4698_v14 = vmax.f32 %v4601_v47, 0.0  ;;  %v10433_v47 = vcombine.low %v4087_v13, %v4095_v22  ;;  %v10452_v54 = vcombine.high %v4104_v39, %v4104_v39 }
0x18a0   :  { %v4712_v18 = vpack.c.bf16 %v4696_v53, %v4696_v53  ;;  %v4711_v19 = vpack.c.bf16 %v4695_v42, %v4695_v42  ;;  %v4713_v51 = vpack.c.bf16 %v4697_v43, %v4697_v43 }
0x18a1   :  { %v4714_v26 = vpack.c.bf16 %v4698_v14, %v4698_v14  ;;  %v4159_v14 = vrot.slane %v13218_v33, %v12750_v20 }
0x18a2   :  { %v13224_v12 = vpop.f32.mrb[124].mxu1 }
0x18a3   :  { %4972 = vmatmul.mubr.bf16.vlgmr.msra.gmra.mrb[132].mxu1 %v4707_v56  ;;  %v4641_v21 = vpop.f32.mrb[125].mxu1  ;;  %v4680_v27 = vpop.f32.mrb[92].mxu0  ;;  %v4167_v56 = vrot.slane %v13218_v33, %v12755_v16  ;;  %v4722_v33 = vrot.slane %v13094_v15, %v12726_v46 }
0x18a4   :  { %5012 = vmatmul.mubr.bf16.vlgmr.msra.gmra.mrb[100].mxu0 %v4709_v63  ;;  %5020 = vmatpush1.bf16.xpose.msra.mxu1 %v10429_v6  ;;  %v4643_v30 = vpop.f32.mrb[126].mxu1  ;;  %v4682_v24 = vpop.f32.mrb[93].mxu0  ;;  %v4642_v31 = vadd.f32 %v4641_v21, %v4163_v32  ;;  %v10449_v63 = vcombine.low %v4103_v36, %v4103_v36  ;;  %v4640_v6 = vadd.f32 %v13224_v12, %v4159_v14 }
0x18a5   :  { %5060 = vmatpush1.bf16.xpose.msra.mxu0 %v10431_v10  ;;  %5021 = vmatprep.subr.bf16.mxu1 %v10446_v5  ;;  %v4644_v58 = vpop.f32.mrb[127].mxu1  ;;  %v4684_v34 = vpop.f32.mrb[94].mxu0  ;;  %v4683_v41 = vadd.f32 %v4682_v24, %v4171_v57  ;;  %v4681_v59 = vadd.f32 %v4680_v27, %v4167_v56  ;;  %v10451_v10 = vcombine.low %v4104_v39, %v4104_v39 }
0x18a6   :  { %5061 = vmatprep.subr.bf16.mxu0 %v10448_v60  ;;  %5051 = vmatprep.mubr.bf16.mxu1 %v4712_v18  ;;  %v4685_v35 = vpop.f32.mrb[95].mxu0  ;;  %v4700_v44 = vmax.f32 %v4642_v31, 0.0  ;;  %v4699_v18 = vmax.f32 %v4640_v6, 0.0 }
0x18a7   :  { %5091 = vmatprep.mubr.bf16.mxu0 %v4714_v26  ;;  %v4702_v11 = vmax.f32 %v4683_v41, 0.0  ;;  %v4701_v5 = vmax.f32 %v4681_v59, 0.0 }
0x18a8   :  { %v4716_v53 = vpack.c.bf16 %v4700_v44, %v4700_v44  ;;  %v4715_v23 = vpack.c.bf16 %v4699_v18, %v4699_v18 }
0x18a9   :  { %v4718_v55 = vpack.c.bf16 %v4702_v11, %v4702_v11  ;;  %v4717_v60 = vpack.c.bf16 %v4701_v5, %v4701_v5  ;;  %v5235_v5 = vadd.f32 %v12390_v7, %v12390_v7 }
0x18ab   :  { %v5237_v18 = vsel %vm5236_vm4, %v5235_v5, 0.0 }
0x18ac   :  { %5022 = vmatpush1.bf16.xpose.msra.mxu1 %v10445_v25  ;;  %5238 = vadd.xlane.f32.xlu1 %v5237_v18 }
0x18ad   :  { %5062 = vmatpush1.bf16.xpose.msra.mxu0 %v10447_v9  ;;  %5099 = vmatprep.subr.bf16.mxu1 %v10434_v48 }
0x18ae   :  { %5139 = vmatprep.subr.bf16.mxu0 %v10436_v61 }
0x18b3   :  { %5052 = vmatmul.mubr.bf16.vlgmr.msra.gmra.mrb[136].mxu1 %v4711_v19 }
0x18b4   :  { %5092 = vmatmul.mubr.bf16.vlgmr.msra.gmra.mrb[104].mxu0 %v4713_v51  ;;  %5100 = vmatpush1.bf16.xpose.msra.mxu1 %v10433_v47 }
0x18b5   :  { %5140 = vmatpush1.bf16.xpose.msra.mxu0 %v10435_v45  ;;  %5101 = vmatprep.subr.bf16.mxu1 %v10450_v52 }
0x18b6   :  { %5141 = vmatprep.subr.bf16.mxu0 %v10452_v54  ;;  %5131 = vmatprep.mubr.bf16.mxu1 %v4716_v53 }
0x18b7   :  { %5171 = vmatprep.mubr.bf16.mxu0 %v4718_v55 }
0x18bc   :  { %5102 = vmatpush1.bf16.xpose.msra.mxu1 %v10449_v63 }
0x18bd   :  { %5142 = vmatpush1.bf16.xpose.msra.mxu0 %v10451_v10  ;;  %10964 = vmatprep.subr.bf16.mxu1 %v12122_v1 }
0x18be   :  { %10972 = vmatprep.subr.bf16.mxu0 %v12122_v1 }
0x18c3   :  { %5132 = vmatmul.mubr.bf16.vlgmr.msra.gmra.mrb[140].mxu1 %v4715_v23 }
0x18c4   :  { %5172 = vmatmul.mubr.bf16.vlgmr.msra.gmra.mrb[108].mxu0 %v4717_v60  ;;  %10968 = vmatprep.mubr.msk.bf16.mxu1 %vm12123_vm0, %v12122_v1  ;;  %v5241_v60 = vmul.f32 %v5235_v5, %v5235_v5 }
0x18c5   :  { %10976 = vmatprep.mubr.msk.bf16.mxu0 %vm12123_vm0, %v12122_v1 }
0x18c6   :  { %v5242_v23 = vsel %vm5236_vm4, %v5241_v60, 0.0  ;;  %v13282_v60 = vld [vmem:[#allocation19] sm:$0xf] }
0x18c7   :  { %5243 = vadd.xlane.f32.xlu1 %v5242_v23 }
0x1966   :  { %v4893_v12 = vpop.f32.mrb[128].mxu1 }
0x1967   :  { %v4894_v26 = vadd.f32 %v4893_v12, %v4722_v33  ;;  %v4933_v21 = vpop.f32.mrb[96].mxu0  ;;  %v4895_v27 = vpop.f32.mrb[129].mxu1  ;;  %v11382_v33 = vld [vmem:[#allocation13] sm:$0xff]  }
0x1968   :  { %v4935_v62 = vpop.f32.mrb[97].mxu0  ;;  %v4896_v30 = vpop.f32.mrb[130].mxu1  ;;  %10965 = vmatpush3.bf16.msra.mxu1 %v11382_v33  ;;  %v5226_v33 = vrot.slane %v13282_v60, %v12377_v3 }
0x1969   :  { %v4934_v24 = vadd.f32 %v4933_v21, %v4894_v26  ;;  %v4936_v58 = vpop.f32.mrb[98].mxu0  ;;  %v4897_v34 = vpop.f32.mrb[131].mxu1  ;;  %10966 = vmatprep.subr.bf16.mxu1 %v12122_v1 }
0x196a   :  { %v4937_v13 = vpop.f32.mrb[99].mxu0 }
0x1976   :  { %v4973_v22 = vpop.f32.mrb[132].mxu1 }
0x1977   :  { %v4974_v32 = vadd.f32 %v4973_v22, %v4934_v24  ;;  %v5013_v35 = vpop.f32.mrb[100].mxu0  ;;  %v4975_v38 = vpop.f32.mrb[133].mxu1 }
0x1978   :  { %v5015_v8 = vpop.f32.mrb[101].mxu0  ;;  %v4976_v50 = vpop.f32.mrb[134].mxu1 }
0x1979   :  { %v5014_v57 = vadd.f32 %v5013_v35, %v4974_v32  ;;  %v5016_v0 = vpop.f32.mrb[102].mxu0  ;;  %v4977_v25 = vpop.f32.mrb[135].mxu1  ;;  %v5199_v32 = vrot.slane %v13094_v15, %v12717_v17  ;;  %v5204_v50 = vrot.slane %v13094_v15, %v12750_v20 }
0x197a   :  { %v5017_v9 = vpop.f32.mrb[103].mxu0  ;;  %v5239_v24 = vpop.xlane.xlu1 %5238 }
0x197b   :  { %v5240_v58 = vmul.f32 0.041666668, %v5239_v24 }
0x197d   :  { %v5246_v34 = vmul.f32 %v5240_v58, %v5240_v58 }
0x197e   :  { %v5244_v13 = vpop.xlane.xlu1 %5243 }
0x197f   :  { %v5245_v35 = vmul.f32 0.041666668, %v5244_v13  ;;  %v10456_v13 = vld [vmem:[#allocation17] ss:$0 sm:$0xff] }
0x1986   :  { %v5053_v48 = vpop.f32.mrb[136].mxu1 }
0x1987   :  { %v5054_v61 = vadd.f32 %v5053_v48, %v5014_v57  ;;  %v5093_v31 = vpop.f32.mrb[104].mxu0  ;;  %v5055_v42 = vpop.f32.mrb[137].mxu1  ;;  %v5247_v57 = vsub.f32 %v5245_v35, %v5246_v34 }
0x1988   :  { %v5095_v41 = vpop.f32.mrb[105].mxu0  ;;  %v5056_v43 = vpop.f32.mrb[138].mxu1 }
0x1989   :  { %v5094_v44 = vadd.f32 %v5093_v31, %v5054_v61  ;;  %v5096_v36 = vpop.f32.mrb[106].mxu0  ;;  %v5057_v19 = vpop.f32.mrb[139].mxu1  ;;  %v5248_v25 = vmax.f32 %v5247_v57, 0.0  ;;  %v5249_v41 = vsub.f32 %v5235_v5, %v5240_v58 }
0x198a   :  { %v5097_v11 = vpop.f32.mrb[107].mxu0 }
0x198b   :  { %v5250_v48 = vadd.f32 1e-05, %v5248_v25 }
0x1996   :  { %v5133_v39 = vpop.f32.mrb[140].mxu1 }
0x1997   :  { %v5134_v51 = vadd.f32 %v5133_v39, %v5094_v44  ;;  %v5173_v47 = vpop.f32.mrb[108].mxu0  ;;  %v5135_v45 = vpop.f32.mrb[141].mxu1  ;;  %v13264_v44 = vld [vmem:[%s13877_s12] sm:$0xff]  ;;  %v11383_v39 = vld [vmem:[#allocation13 + $0x8] ss:$0 sps:$4 sm:$0xff]  }
0x1998   :  { %v5175_v52 = vpop.f32.mrb[109].mxu0  ;;  %v5136_v53 = vpop.f32.mrb[142].mxu1  ;;  %v5254_v36 = vrot.slane %v13264_v44, 1  ;;  %v5257_v11 = vrot.slane %v13264_v44, 2 }
0x1999   :  { %v5174_v54 = vadd.f32 %v5173_v47, %v5134_v51  ;;  %v5176_v55 = vpop.f32.mrb[110].mxu0  ;;  %v5137_v56 = vpop.f32.mrb[143].mxu1  ;;  %v5280_v47 = vsel %vm252_vm1, %v11383_v39, 0  ;;  %v11384_v53 = vld [vmem:[#allocation14] sm:$0xff]  }
0x199a   :  { %v5177_v14 = vpop.f32.mrb[111].mxu0  ;;  %10967 = vmatpush3.bf16.msra.mxu1 %v5280_v47  ;;  %10973 = vmatpush3.bf16.msra.mxu0 %v11384_v53  ;;  %v11386_v39 = vld [vmem:[#allocation16] sm:$0xff]   ;;  %v11387_v47 = vld [vmem:[#allocation16 + $0x8] ss:$0 sps:$4 sm:$0xff]  }
0x199b   :  { %v5179_v59 = vadd.f32 %v5174_v54, %v13143_v2  ;;  %10980 = vmatprep.subr.mxu1 %v12122_v1  ;;  %v11385_v54 = vld [vmem:[#allocation14 + $0x8] ss:$0 sps:$4 sm:$0xff]   ;;  %10974 = vmatprep.subr.bf16.mxu0 %v12122_v1 }
0x199c   :  { %v5346_v55 = vsel %vm252_vm1, %v11385_v54, 0 }
0x199d   :  { %v5180_v63 = vsel %vm248_vm2, %v5179_v59, 0.0  ;;  %v5184_v6 = vmul.f32 %v5179_v59, %v5179_v59 }
0x199e   :  { %5181 = vadd.xlane.f32.xlu0 %v5180_v63  ;;  %10975 = vmatpush3.bf16.msra.mxu0 %v5346_v55 }
0x199f   :  { %v5185_v10 = vsel %vm248_vm2, %v5184_v6, 0.0  ;;  %10985 = vmatprep.subr.mxu0 %v12122_v1 }
0x19a2   :  { %5186 = vadd.xlane.f32.xlu0 %v5185_v10 }
0x1a2b   :  { %v5182_v2 = vpop.xlane.xlu0 %5181 }
0x1a2c   :  { %v5183_v12 = vmul.f32 0.041666668, %v5182_v2 }
0x1a2e   :  { %v5189_v21 = vmul.f32 %v5183_v12, %v5183_v12  ;;  %v5192_v22 = vsub.f32 %v5179_v59, %v5183_v12 }
0x1a2f   :  { %v5187_v26 = vpop.xlane.xlu0 %5186 }
0x1a30   :  { %v5188_v27 = vmul.f32 0.041666668, %v5187_v26  ;;  %v5231_v26 = vrot.slane %v13282_v60, %v12655_v28 }
0x1a32   :  { %v5190_v62 = vsub.f32 %v5188_v27, %v5189_v21 }
0x1a34   :  { %v5191_v30 = vmax.f32 %v5190_v62, 0.0 }
0x1a36   :  { %v5193_v7 = vadd.f32 1e-05, %v5191_v30 }
0x1a38   :  { %11388 = vrsqrt.f32 %v5193_v7 }
0x1a39   :  { %11390 = vrsqrt.f32 %v5250_v48 }
0x1a42   :  { %v11389_v38 = vpop.eup %11388 }
0x1a43   :  { %v5195_v8 = vmul.f32 %v11389_v38, %v5192_v22  ;;  %v11391_v43 = vpop.eup %11390 }
0x1a44   :  { %v5252_v15 = vmul.f32 %v11391_v43, %v5249_v41 }
0x1a45   :  { %v5200_v0 = vmul.f32 %v5199_v32, %v5195_v8 }
0x1a46   :  { %v5256_v19 = vmul.f32 %v5254_v36, %v5252_v15 }
0x1a47   :  { %v5205_v9 = vadd.f32 %v5204_v50, %v5200_v0 }
0x1a48   :  { %v13270_v51 = vadd.f32 %v5257_v11, %v5256_v19 }
0x1a49   :  { %v5207_v61 = vsel %vm248_vm2, %v5205_v9, 0.0  ;;  %v5211_v31 = vmul.f32 %v5205_v9, %v5205_v9 }
0x1a4a   :  { %5208 = vadd.xlane.f32.xlu0 %v5207_v61  ;;  %v5263_v45 = vpack.c.bf16 %v13270_v51, %v13270_v51 }
0x1a4b   :  { %v5212_v42 = vsel %vm248_vm2, %v5211_v31, 0.0 }
0x1a4c   :  { %5213 = vadd.xlane.f32.xlu1 %v5212_v42  ;;  %v5265_v52 = vshrl.u32 %v5263_v45, 16  ;;  %v5583_v45 = vsel %vm252_vm1, %v11387_v47, 0 }
0x1a4e   :  { %10969 = vmatmul.mubr.msk.bf16.vlgmr.msra.gmra.mrb[144].mxu1 %vm248_vm2, %v5265_v52 }
0x1a4f   :  { %10982 = vmatprep.mubr.msk.f32.mxu1 %vm12123_vm0, %v12122_v1 }
0x1ad7   :  { %v5209_v56 = vpop.xlane.xlu0 %5208 }
0x1ad8   :  { %v5210_v14 = vmul.f32 0.041666668, %v5209_v56 }
0x1ad9   :  { %v5214_v59 = vpop.xlane.xlu1 %5213 }
0x1ada   :  { %v5216_v63 = vmul.f32 %v5210_v14, %v5210_v14  ;;  %v5215_v6 = vmul.f32 0.041666668, %v5214_v59  ;;  %v5219_v23 = vsub.f32 %v5205_v9, %v5210_v14 }
0x1adc   :  { %v5217_v10 = vsub.f32 %v5215_v6, %v5216_v63 }
0x1ade   :  { %v5218_v5 = vmax.f32 %v5217_v10, 0.0 }
0x1ae0   :  { %v5220_v18 = vadd.f32 1e-05, %v5218_v5 }
0x1ae2   :  { %11392 = vrsqrt.f32 %v5220_v18 }
0x1aec   :  { %v11393_v2 = vpop.eup %11392 }
0x1aed   :  { %v5222_v12 = vmul.f32 %v11393_v2, %v5219_v23 }
0x1aef   :  { %v5227_v21 = vmul.f32 %v5226_v33, %v5222_v12 }
0x1af1   :  { %v5232_v27 = vadd.f32 %v5231_v26, %v5227_v21 }
0x1af3   :  { %v13288_v62 = vpack.c.bf16 %v5232_v27, %v5232_v27 }
0x1af5   :  { %10977 = vmatmul.mubr.msk.bf16.vlgmr.msra.gmra.mrb[112].mxu0 %vm248_vm2, %v13288_v62 }
0x1af6   :  { %10987 = vmatprep.mubr.msk.f32.mxu0 %vm12123_vm0, %v12122_v1 }
0x1b21   :  { %v5316_v30 = vpop.f32.mrb[144].mxu1 }
0x1b22   :  { %v10970_v7 = vpop.f32.mrb[145].mxu1  ;;  %v5317_v34 = vadd.f32 %v5316_v30, %v13264_v44 }
0x1b23   :  { %v5319_v24 = vpop.f32.mrb[146].mxu1 }
0x1b24   :  { %v10971_v58 = vpop.f32.mrb[147].mxu1  ;;  %v5394_v22 = vrot.slane %v5317_v34, %v12377_v3 }
0x1b26   :  { %v5395_v57 = vmul.f32 %v5394_v22, %v12382_v4 }
0x1bc8   :  { %v5382_v32 = vpop.f32.mrb[112].mxu0 }
0x1bc9   :  { %v5383_v35 = vadd.f32 %v10456_v13, %v5382_v32  ;;  %v10978_v38 = vpop.f32.mrb[113].mxu0 }
0x1bca   :  { %v5385_v8 = vpop.f32.mrb[114].mxu0 }
0x1bcb   :  { %v10979_v50 = vpop.f32.mrb[115].mxu0  ;;  %10981 = vmatpush3.xpose.msk.msra.mxu1 %vm248_vm2, %v5383_v35 }
0x1bcc   :  { %10990 = vmatprep.subr.bf16.mxu1 %v12122_v1 }
0x1bce   :  { %10983 = vmatmul.mubr.msk.f32.vlgmr.msra.gmra.mrb[110].mxu1 %vm248_vm2, %v5395_v57 }
0x1bcf   :  { %10994 = vmatprep.mubr.msk.bf16.mxu1 %vm12123_vm0, %v12122_v1  ;;  %10991 = vmatpush3.bf16.msra.mxu1 %v11386_v39 }
0x1bd0   :  { %10992 = vmatprep.subr.bf16.mxu1 %v12122_v1 }
0x1bd3   :  { %10993 = vmatpush3.bf16.msra.mxu1 %v5583_v45 }
0x1ca1   :  { %v5468_v0 = vpop.f32.mrb[110].mxu1 }
0x1ca2   :  { %v10984_v25 = vpop.f32.mrb[111].mxu1  ;;  %v5473_v9 = vsel %vm5472_vm5, %v5468_v0, -inf }
0x1ca3   :  { %5474 = vmax.xlane.f32.xlu0 %v5473_v9 }
0x1cb9   :  { %5484 = vrot.lane.b32.xlu0 %v5383_v35, %s12124_s11 }
0x1d30   :  { %v5475_v48 = vpop.xlane.xlu0 %5474 }
0x1d31   :  { %v5476_v61 = vsub.f32 %v5468_v0, %v5475_v48 }
0x1d33   :  { %v5477_v31 = vmul.f32 1.442695, %v5476_v61 }
0x1d34   :  { %v5485_v42 = vpop.permute.xlu0 %5484 }
0x1d35   :  { %11394 = vpow2.f32 %v5477_v31  ;;  %10986 = vmatpush3.msra.mxu0 %v5485_v42 }
0x1d3f   :  { %v11395_v41 = vpop.eup %11394 }
0x1d40   :  { %v5479_v43 = vsel %vm5472_vm5, %v11395_v41, 0.0 }
0x1d41   :  { %5480 = vadd.xlane.f32.xlu1 %v5479_v43 }
0x1dce   :  { %v5481_v15 = vpop.xlane.xlu1 %5480 }
0x1dcf   :  { %11396 = vrcp.f32 %v5481_v15 }
0x1dd9   :  { %v11397_v19 = vpop.eup %11396 }
0x1dda   :  { %v5483_v11 = vmul.f32 %v11397_v19, %v11395_v41 }
0x1ddc   :  { %10988 = vmatmul.mubr.msk.f32.vlgmr.msra.gmra.mrb[74].mxu0 %vm423_vm3, %v5483_v11 }
0x1eaf   :  { %v5556_v52 = vpop.f32.mrb[74].mxu0 }
0x1eb0   :  { %v5560_v53 = vmul.f32 %v5556_v52, %v12382_v4  ;;  %v10989_v54 = vpop.f32.mrb[75].mxu0 }
0x1eb2   :  { %v5562_v55 = vsel %vm5561_vm6, %v5560_v53, 0.0 }
0x1eb3   :  { %v5563_v56 = vrot.slane %v5562_v55, 4 }
0x1eb5   :  { %v5564_v14 = vadd.f32 %v5563_v56, %v5562_v55 }
0x1eb7   :  { %v5565_v59 = vrot.slane %v5564_v14, 2 }
0x1eb9   :  { %v5566_v63 = vadd.f32 %v5565_v59, %v5564_v14 }
0x1ebb   :  { %v5567_v6 = vrot.slane %v5566_v63, 1 }
0x1ebd   :  { %v5568_v10 = vadd.f32 %v5567_v6, %v5566_v63 }
0x1ebf   :  { %v5569_v5 = vpack.c.bf16 %v5568_v10, %v5568_v10 }
0x1ec1   :  { %10995 = vmatmul.mubr.msk.bf16.vlgmr.msra.gmra.mrb[148].mxu1 %vm248_vm2, %v5569_v5 }
0x1f94   :  { %v5619_v18 = vpop.f32.mrb[148].mxu1 }
0x1f95   :  { %v5620_v23 = vadd.f32 %v5619_v18, %v5254_v36  ;;  %v10996_v33 = vpop.f32.mrb[149].mxu1 }
0x1f96   :  { %v5622_v2 = vpop.f32.mrb[150].mxu1 }
0x1f97   :  { %v5626_v12 = vrot.slane %v5620_v23, 7  ;;  %v10997_v26 = vpop.f32.mrb[151].mxu1 }
0x1f99   :  { %v5628_v21 = vadd.f32 %v5626_v12, %v13270_v51 }
0x1f9b   :  { %v5629_v27 = vsel %vm5236_vm4, %v5628_v21, 0.0  ;;  %v5633_v30 = vmul.f32 %v5628_v21, %v5628_v21 }
0x1f9c   :  { %5630 = vadd.xlane.f32.xlu1 %v5629_v27 }
0x1f9d   :  { %v5634_v7 = vsel %vm5236_vm4, %v5633_v30, 0.0 }
0x1fa0   :  { %5635 = vadd.xlane.f32.xlu1 %v5634_v7 }
0x1fa1   :  { %11957 = shalt.err (!%p11954_p6)  }
0x1fa2   :  { %11969 = shalt.err (!%p12536_p5)  }
0x1fa3   :  { %5662 = dma.hbm_to_vmem [thread:$0]  %s13104_s2, 3072, %s12502_s23, [#allocation4] }
0x1fa4   :  { %s13341_s21 = scalar_lea.hbm %s13883_s18, 15360  ;;  %p11974_p5 = scmp.lt.u32.totalorder %s13123_s9, %s13883_s18 }
0x1fa5   :  { %p11972_p7 = scmp.ne.s32.totalorder %s13123_s9, %s13341_s21  ;;  %p11975_p9 = scmp.lt.u32.totalorder %s12560_s26, %s13341_s21 }
0x1fa6   :  { %p11977_p11 = scmp.lt.u32.totalorder %s13341_s21, %s13123_s9 }
0x1fa7   :  { %p11976_p10 = por %p11975_p9, %p11974_p5 }
0x1fa9   :  { %p11978_p13 = por %p11977_p11, %p11976_p10 }
0x1fab   :  { %p11979_p12 = pnand %p11978_p13, %p11972_p7 }
0x1fad   :  { %11982 = shalt.err (!%p11979_p12)  }
0x1fae   :  { %11994 = shalt.err (!%p12580_p2)  }
0x1faf   :  { %5674 = dma.hbm_to_vmem [thread:$0]  %s13123_s9, 3072, %s12546_s6, [#allocation4 + $0x2]  ;;  %v5645_v38 = vrot.slane %v13264_v44, 3  ;;  %v5648_v50 = vrot.slane %v13264_v44, 4 }
0x2029   :  { %v5631_v36 = vpop.xlane.xlu1 %5630 }
0x202a   :  { %v5632_v51 = vmul.f32 0.041666668, %v5631_v36 }
0x202c   :  { %v5638_v58 = vmul.f32 %v5632_v51, %v5632_v51  ;;  %v5641_v35 = vsub.f32 %v5628_v21, %v5632_v51 }
0x202d   :  { %v5636_v24 = vpop.xlane.xlu1 %5635 }
0x202e   :  { %v5637_v34 = vmul.f32 0.041666668, %v5636_v24 }
0x2030   :  { %v5639_v13 = vsub.f32 %v5637_v34, %v5638_v58 }
0x2032   :  { %v5640_v22 = vmax.f32 %v5639_v13, 0.0 }
0x2034   :  { %v5642_v32 = vadd.f32 1e-05, %v5640_v22 }
0x2036   :  { %11398 = vrsqrt.f32 %v5642_v32 }
0x2040   :  { %v11399_v8 = vpop.eup %11398 }
0x2041   :  { %v5644_v57 = vmul.f32 %v11399_v8, %v5641_v35 }
0x2043   :  { %v5647_v0 = vmul.f32 %v5645_v38, %v5644_v57 }
0x2045   :  { %v13362_v25 = vadd.f32 %v5648_v50, %v5647_v0 }
0x2046   :  { %12092 = dma.done.wait [#allocation4 + $0x1], 3072 }
0x2047   :  { %12093 = vsyncadd [#allocation4 + $0x1], 4294964224 }
0x2048   :  { %12094 = dma.done.wait [#allocation4 + $0x3], 3072 }
0x2049   :  { %12095 = vsyncadd [#allocation4 + $0x3], 4294964224  ;;  %6019 = vmatprep.mubr.bf16.mxu0 %v12130_v37  ;;  %6060 = vmatprep.mubr.bf16.mxu1 %v12130_v37  ;;  %v13369_v9 = vld [vmem:[%s13877_s12 + $0x18] sm:$0x1]  ;;  %v5679_v48 = vld [vmem:[#allocation2 + $0xc0] sm:$0xff]  ;;  %v5730_v54 = vpack.c.bf16 %v13362_v25, %v13362_v25  ;;  %p11997_p2 = scmp.ne.s32.totalorder %s13319_s22, %s12516_s5  ;;  %p11999_p3 = scmp.lt.u32.totalorder %s13319_s22, %s13882_s17 }
0x204a   :  { %v5687_v61 = vld [vmem:[#allocation2 + $0x100] sm:$0xff]  ;;  %v5680_v43 = vld [vmem:[#allocation2 + $0xc8] sm:$0xff]  ;;  %v5681_v52 = vld [vmem:[#allocation2 + $0xd0] sm:$0xff]  ;;  %p12000_p4 = scmp.lt.u32.totalorder %s12516_s5, %s12516_s5 }
0x204b   :  { %v10469_v31 = vcombine.high %v5679_v48, %v5687_v61  ;;  %v10468_v42 = vcombine.low %v5679_v48, %v5687_v61  ;;  %v5695_v41 = vld [vmem:[#allocation2 + $0x140] sm:$0xff]  ;;  %v5688_v15 = vld [vmem:[#allocation2 + $0x108] sm:$0xff]  ;;  %v5689_v53 = vld [vmem:[#allocation2 + $0x110] sm:$0xff]  ;;  %v13377_v23 = vshrl.u32 %v5730_v54, 16 }
0x204c   :  { %v10485_v19 = vcombine.high %v5695_v41, %v5695_v41  ;;  %v10484_v11 = vcombine.low %v5695_v41, %v5695_v41  ;;  %v10471_v39 = vcombine.high %v5680_v43, %v5688_v15  ;;  %v10470_v47 = vcombine.low %v5680_v43, %v5688_v15  ;;  %v5696_v45 = vld [vmem:[#allocation2 + $0x148] sm:$0xff]  ;;  %v5682_v14 = vld [vmem:[#allocation2 + $0xd8] sm:$0xff]  ;;  %v5697_v5 = vld [vmem:[#allocation2 + $0x150] sm:$0xff]  ;;  %p12001_p6 = por %p12000_p4, %p11999_p3 }
0x204d   :  { %5987 = vmatprep.subr.bf16.mxu0 %v10469_v31  ;;  %v10487_v55 = vcombine.high %v5696_v45, %v5696_v45  ;;  %v10486_v56 = vcombine.low %v5696_v45, %v5696_v45  ;;  %v5690_v59 = vld [vmem:[#allocation2 + $0x118] sm:$0xff]  ;;  %v10473_v6 = vcombine.high %v5681_v52, %v5689_v53  ;;  %v10472_v33 = vcombine.low %v5681_v52, %v5689_v53  ;;  %v5683_v21 = vld [vmem:[#allocation2 + $0xe0] sm:$0xff]  ;;  %v5684_v51 = vld [vmem:[#allocation2 + $0xe8] sm:$0xff] }
0x204e   :  { %5988 = vmatpush1.bf16.msra.mxu0 %v10468_v42  ;;  %6028 = vmatprep.subr.bf16.mxu1 %v10471_v39  ;;  %v5940_v63 = vsel %vm252_vm1, %v10484_v11, 0  ;;  %v10475_v18 = vcombine.high %v5682_v14, %v5690_v59  ;;  %v5698_v2 = vld [vmem:[#allocation2 + $0x158] sm:$0xff]  ;;  %v10489_v12 = vcombine.high %v5697_v5, %v5697_v5  ;;  %v10488_v26 = vcombine.low %v5697_v5, %v5697_v5  ;;  %v5691_v30 = vld [vmem:[#allocation2 + $0x120] sm:$0xff]  ;;  %v5692_v24 = vld [vmem:[#allocation2 + $0x128] sm:$0xff]  ;;  %p12003_p7 = por %p12001_p6, %p11950_p0 }
0x204f   :  { %10500 = vmatprep.subr.msk.bf16.mxu0 %vm252_vm1, %v10485_v19  ;;  %6029 = vmatpush1.bf16.msra.mxu1 %v10470_v47  ;;  %v5946_v10 = vsel %vm252_vm1, %v10486_v56, 0  ;;  %v10474_v27 = vcombine.low %v5682_v14, %v5690_v59  ;;  %v10491_v7 = vcombine.high %v5698_v2, %v5698_v2  ;;  %v10490_v36 = vcombine.low %v5698_v2, %v5698_v2  ;;  %v5699_v13 = vld [vmem:[#allocation2 + $0x160] sm:$0xff]  ;;  %v5700_v38 = vld [vmem:[#allocation2 + $0x168] sm:$0xff]  ;;  %v5685_v0 = vld [vmem:[#allocation2 + $0xf0] sm:$0xff] }
0x2050   :  { %10502 = vmatprep.subr.msk.bf16.mxu1 %vm252_vm1, %v10487_v55  ;;  %v5952_v58 = vsel %vm252_vm1, %v10488_v26, 0  ;;  %v10477_v34 = vcombine.high %v5683_v21, %v5691_v30  ;;  %v10479_v32 = vcombine.high %v5684_v51, %v5692_v24  ;;  %v10476_v35 = vcombine.low %v5683_v21, %v5691_v30  ;;  %v5693_v48 = vld [vmem:[#allocation2 + $0x130] sm:$0xff]  ;;  %v5686_v42 = vld [vmem:[#allocation2 + $0xf8] sm:$0xff]  ;;  %v5706_v55 = vld [vmem:[#allocation3 + $0xc0] sm:$0xff]  ;;  %p12004_p5 = pnand %p12003_p7, %p11997_p2 }
0x2051   :  { %v5958_v22 = vsel %vm252_vm1, %v10490_v36, 0  ;;  %v10493_v8 = vcombine.high %v5699_v13, %v5699_v13  ;;  %v10492_v50 = vcombine.low %v5699_v13, %v5699_v13  ;;  %v10478_v57 = vcombine.low %v5684_v51, %v5692_v24  ;;  %v5694_v41 = vld [vmem:[#allocation2 + $0x138] sm:$0xff]  ;;  %v5701_v19 = vld [vmem:[#allocation2 + $0x170] sm:$0xff]  ;;  %v5714_v56 = vld [vmem:[#allocation3 + $0x100] sm:$0xff] }
0x2052   :  { %5990 = vmatpush1.bf16.msra.mxu0 %v5940_v63  ;;  %v10495_v61 = vcombine.high %v5700_v38, %v5700_v38  ;;  %v10494_v31 = vcombine.low %v5700_v38, %v5700_v38  ;;  %v10481_v15 = vcombine.high %v5685_v0, %v5693_v48  ;;  %v10483_v39 = vcombine.high %v5686_v42, %v5694_v41  ;;  %v5702_v45 = vld [vmem:[#allocation2 + $0x178] sm:$0xff]  ;;  %v5715_v26 = vld [vmem:[#allocation3 + $0x108] sm:$0xff] }
0x2053   :  { %6031 = vmatpush1.bf16.msra.mxu1 %v5946_v10  ;;  %6069 = vmatprep.subr.bf16.mxu0 %v10473_v6  ;;  %v5964_v43 = vsel %vm252_vm1, %v10492_v50, 0  ;;  %v10480_v47 = vcombine.low %v5685_v0, %v5693_v48  ;;  %v10497_v52 = vcombine.high %v5701_v19, %v5701_v19  ;;  %v10496_v53 = vcombine.low %v5701_v19, %v5701_v19  ;;  %v5723_v0 = vld [vmem:[#allocation3 + $0x148] sm:$0xff] }
0x2054   :  { %6110 = vmatprep.subr.bf16.mxu1 %v10475_v18  ;;  %v5970_v11 = vsel %vm252_vm1, %v10494_v31, 0  ;;  %v10482_v54 = vcombine.low %v5686_v42, %v5694_v41  ;;  %v10499_v14 = vcombine.high %v5702_v45, %v5702_v45  ;;  %v10498_v59 = vcombine.low %v5702_v45, %v5702_v45  ;;  %v5722_v18 = vld [vmem:[#allocation3 + $0x140] sm:$0xff] }
0x2055   :  { %10501 = vmatmul.mubr.msk.bf16.vlgmr.msra.gmra.mrb[116].mxu0 %vm248_vm2, %v13377_v23  ;;  %v5976_v63 = vsel %vm252_vm1, %v10496_v53, 0  ;;  %v10517_v6 = vcombine.high %v5706_v55, %v5714_v56  ;;  %v10516_v5 = vcombine.low %v5706_v55, %v5714_v56  ;;  %v10532_v2 = vcombine.low %v5722_v18, %v5722_v18  ;;  %v5716_v55 = vld [vmem:[#allocation3 + $0x110] sm:$0xff] }
0x2056   :  { %10503 = vmatmul.mubr.msk.bf16.vlgmr.msra.gmra.mrb[152].mxu1 %vm248_vm2, %v13377_v23  ;;  %6070 = vmatpush1.bf16.msra.mxu0 %v10472_v33  ;;  %v5982_v10 = vsel %vm252_vm1, %v10498_v59, 0  ;;  %v10533_v33 = vcombine.high %v5722_v18, %v5722_v18 }
0x2057   :  { %10504 = vmatprep.subr.msk.bf16.mxu0 %vm252_vm1, %v10489_v12  ;;  %6101 = vmatprep.mubr.bf16.mxu0 %v12130_v37  ;;  %v5707_v12 = vld [vmem:[#allocation3 + $0xc8] sm:$0xff] }
0x2058   :  { %6111 = vmatpush1.bf16.msra.mxu1 %v10474_v27  ;;  %6142 = vmatprep.mubr.bf16.mxu1 %v12130_v37  ;;  %v10519_v21 = vcombine.high %v5707_v12, %v5715_v26  ;;  %v13419_v27 = vld [vmem:[%s13878_s13 + $0x30] sm:$0xff]  ;;  %v10518_v31 = vcombine.low %v5707_v12, %v5715_v26 }
0x2059   :  { %10506 = vmatprep.subr.msk.bf16.mxu1 %vm252_vm1, %v10491_v7  ;;  %v5863_v30 = vrot.slane %v13419_v27, %v12655_v28  ;;  %v5871_v7 = vrot.slane %v13419_v27, %v12717_v17  ;;  %v5867_v19 = vrot.slane %v13419_v27, %v12658_v29 }
0x205a   :  { %6072 = vmatpush1.bf16.msra.mxu0 %v5952_v58 }
0x205b   :  { %6151 = vmatprep.subr.bf16.mxu0 %v10477_v34 }
0x205c   :  { %6113 = vmatpush1.bf16.msra.mxu1 %v5958_v22 }
0x205d   :  { %10505 = vmatmul.mubr.msk.bf16.vlgmr.msra.gmra.mrb[120].mxu0 %vm248_vm2, %v13377_v23  ;;  %6192 = vmatprep.subr.bf16.mxu1 %v10479_v32 }
0x205e   :  { %6152 = vmatpush1.bf16.msra.mxu0 %v10476_v35  ;;  %6183 = vmatprep.mubr.bf16.mxu0 %v12130_v37 }
0x205f   :  { %10507 = vmatmul.mubr.msk.bf16.vlgmr.msra.gmra.mrb[156].mxu1 %vm248_vm2, %v13377_v23  ;;  %10508 = vmatprep.subr.msk.bf16.mxu0 %vm252_vm1, %v10493_v8 }
0x2060   :  { %6193 = vmatpush1.bf16.msra.mxu1 %v10478_v57  ;;  %6224 = vmatprep.mubr.bf16.mxu1 %v12130_v37 }
0x2061   :  { %10510 = vmatprep.subr.msk.bf16.mxu1 %vm252_vm1, %v10495_v61 }
0x2062   :  { %6154 = vmatpush1.bf16.msra.mxu0 %v5964_v43  ;;  %v10535_v43 = vcombine.high %v5723_v0, %v5723_v0 }
0x2063   :  { %6233 = vmatprep.subr.bf16.mxu0 %v10481_v15 }
0x2064   :  { %6195 = vmatpush1.bf16.msra.mxu1 %v5970_v11 }
0x2065   :  { %10509 = vmatmul.mubr.msk.bf16.vlgmr.msra.gmra.mrb[124].mxu0 %vm248_vm2, %v13377_v23  ;;  %6274 = vmatprep.subr.bf16.mxu1 %v10483_v39  ;;  %v5879_v39 = vrot.slane %v13419_v27, %v12726_v46 }
0x2066   :  { %6234 = vmatpush1.bf16.msra.mxu0 %v10480_v47  ;;  %6265 = vmatprep.mubr.bf16.mxu0 %v12130_v37 }
0x2067   :  { %10511 = vmatmul.mubr.msk.bf16.vlgmr.msra.gmra.mrb[160].mxu1 %vm248_vm2, %v13377_v23  ;;  %10512 = vmatprep.subr.msk.bf16.mxu0 %vm252_vm1, %v10497_v52 }
0x2068   :  { %6275 = vmatpush1.bf16.msra.mxu1 %v10482_v54  ;;  %6306 = vmatprep.mubr.bf16.mxu1 %v12130_v37  ;;  %v5708_v54 = vld [vmem:[#allocation3 + $0xd0] sm:$0xff] }
0x2069   :  { %10514 = vmatprep.subr.msk.bf16.mxu1 %vm252_vm1, %v10499_v14 }
0x206a   :  { %6236 = vmatpush1.bf16.msra.mxu0 %v5976_v63  ;;  %v10534_v63 = vcombine.low %v5723_v0, %v5723_v0  ;;  %v5709_v0 = vld [vmem:[#allocation3 + $0xd8] sm:$0xff] }
0x206b   :  { %6483 = vmatprep.subr.bf16.mxu0 %v10517_v6 }
0x206c   :  { %6277 = vmatpush1.bf16.msra.mxu1 %v5982_v10  ;;  %v10521_v10 = vcombine.high %v5708_v54, %v5716_v55 }
0x206d   :  { %10513 = vmatmul.mubr.msk.bf16.vlgmr.msra.gmra.mrb[128].mxu0 %vm248_vm2, %v13377_v23  ;;  %10998 = vmatprep.subr.bf16.mxu1 %v12122_v1 }
0x206f   :  { %10515 = vmatmul.mubr.msk.bf16.vlgmr.msra.gmra.mrb[164].mxu1 %vm248_vm2, %v13377_v23  ;;  %v5859_v23 = vrot.slane %v13419_v27, %v12377_v3 }
0x2070   :  { %11002 = vmatprep.mubr.msk.bf16.mxu1 %vm12123_vm0, %v12122_v1 }
0x2073   :  { %6484 = vmatpush1.bf16.xpose.msra.mxu0 %v10516_v5 }
0x2074   :  { %6485 = vmatprep.subr.bf16.mxu0 %v10533_v33 }
0x207b   :  { %6486 = vmatpush1.bf16.xpose.msra.mxu0 %v10532_v2 }
0x207c   :  { %6523 = vmatprep.subr.bf16.mxu0 %v10519_v21 }
0x2128   :  { %v6021_v36 = vpop.f32.mrb[116].mxu0 }
0x2129   :  { %v6022_v51 = vadd.f32 %v6021_v36, %v5859_v23  ;;  %v6023_v24 = vpop.f32.mrb[117].mxu0  ;;  %v6062_v58 = vpop.f32.mrb[152].mxu1 }
0x212a   :  { %v6024_v34 = vadd.f32 %v6023_v24, %v5863_v30  ;;  %v6025_v13 = vpop.f32.mrb[118].mxu0  ;;  %v6064_v22 = vpop.f32.mrb[153].mxu1  ;;  %v6063_v14 = vadd.f32 %v6062_v58, %v5867_v19  ;;  %v5724_v30 = vld [vmem:[#allocation3 + $0x150] sm:$0xff]  ;;  %v10520_v24 = vcombine.low %v5708_v54, %v5716_v55 }
0x212b   :  { %v6315_v32 = vmax.f32 %v6022_v51, 0.0  ;;  %v6026_v35 = vpop.f32.mrb[119].mxu0  ;;  %v6065_v38 = vadd.f32 %v6064_v22, %v5871_v7  ;;  %v6066_v8 = vpop.f32.mrb[154].mxu1  ;;  %v5875_v22 = vrot.slane %v13419_v27, %v12750_v20 }
0x212c   :  { %v6316_v50 = vmax.f32 %v6024_v34, 0.0  ;;  %v6067_v57 = vpop.f32.mrb[155].mxu1  ;;  %v6317_v18 = vmax.f32 %v6063_v14, 0.0  ;;  %v10537_v34 = vcombine.high %v5724_v30, %v5724_v30  ;;  %v5887_v35 = vrot.slane %v13419_v27, %v12760_v40  ;;  %v13454_v14 = vld [vmem:[%s13878_s13 + $0x38] sm:$0xff] }
0x212d   :  { %v6318_v48 = vmax.f32 %v6065_v38, 0.0  ;;  %v6331_v42 = vpack.c.bf16 %v6315_v32, %v6315_v32 }
0x212e   :  { %v6332_v61 = vpack.c.bf16 %v6316_v50, %v6316_v50  ;;  %v6333_v36 = vpack.c.bf16 %v6317_v18, %v6317_v18 }
0x212f   :  { %v6334_v41 = vpack.c.bf16 %v6318_v48, %v6318_v48  ;;  %v5717_v48 = vld [vmem:[#allocation3 + $0x118] sm:$0xff] }
0x2130   :  { %6515 = vmatprep.mubr.bf16.mxu0 %v6332_v61  ;;  %v6103_v15 = vpop.f32.mrb[120].mxu0  ;;  %v10523_v19 = vcombine.high %v5709_v0, %v5717_v48  ;;  %v10522_v54 = vcombine.low %v5709_v0, %v5717_v48  ;;  %v5727_v48 = vld [vmem:[#allocation3 + $0x168] sm:$0xff] }
0x2131   :  { %6516 = vmatmul.mubr.bf16.vlgmr.msra.gmra.mrb[132].mxu0 %v6331_v42  ;;  %v6105_v11 = vpop.f32.mrb[121].mxu0 }
0x2132   :  { %6524 = vmatpush1.bf16.xpose.msra.mxu0 %v10518_v31  ;;  %6555 = vmatprep.mubr.bf16.mxu0 %v6334_v41  ;;  %v6107_v47 = vpop.f32.mrb[122].mxu0  ;;  %v13431_v45 = vpop.f32.mrb[156].mxu1  ;;  %v6106_v6 = vadd.f32 %v6105_v11, %v5879_v39  ;;  %v6104_v31 = vadd.f32 %v6103_v15, %v5875_v22  ;;  %v10536_v41 = vcombine.low %v5724_v30, %v5724_v30  ;;  %v5726_v30 = vld [vmem:[#allocation3 + $0x160] sm:$0xff] }
0x2133   :  { %6525 = vmatprep.subr.bf16.mxu0 %v10535_v43  ;;  %v6108_v52 = vpop.f32.mrb[123].mxu0  ;;  %v6146_v53 = vpop.f32.mrb[157].mxu1  ;;  %v5725_v47 = vld [vmem:[#allocation3 + $0x158] sm:$0xff]  ;;  %v5883_v15 = vrot.slane %v13419_v27, %v12755_v16  ;;  %v10540_v22 = vcombine.low %v5726_v30, %v5726_v30 }
0x2134   :  { %v6148_v56 = vpop.f32.mrb[158].mxu1  ;;  %v6320_v2 = vmax.f32 %v6106_v6, 0.0  ;;  %v6147_v43 = vadd.f32 %v6146_v53, %v5887_v35  ;;  %v6319_v11 = vmax.f32 %v6104_v31, 0.0  ;;  %v5895_v53 = vrot.slane %v13454_v14, %v12655_v28 }
0x2135   :  { %v6149_v59 = vpop.f32.mrb[159].mxu1  ;;  %v10539_v56 = vcombine.high %v5725_v47, %v5725_v47  ;;  %v6145_v6 = vadd.f32 %v13431_v45, %v5883_v15  ;;  %v5903_v45 = vrot.slane %v13454_v14, %v12717_v17 }
0x2136   :  { %v6336_v58 = vpack.c.bf16 %v6320_v2, %v6320_v2  ;;  %v6322_v39 = vmax.f32 %v6147_v43, 0.0  ;;  %v6335_v52 = vpack.c.bf16 %v6319_v11, %v6319_v11  ;;  %v5710_v59 = vld [vmem:[#allocation3 + $0xe0] sm:$0xff]  ;;  %v5899_v43 = vrot.slane %v13454_v14, %v12658_v29 }
0x2138   :  { %v13433_v5 = vpop.f32.mrb[124].mxu0  ;;  %v6338_v55 = vpack.c.bf16 %v6322_v39, %v6322_v39  ;;  %v10542_v39 = vcombine.low %v5727_v48, %v5727_v48 }
0x2139   :  { %v6187_v33 = vpop.f32.mrb[125].mxu0 }
0x213a   :  { %6526 = vmatpush1.bf16.xpose.msra.mxu0 %v10534_v63  ;;  %v6189_v12 = vpop.f32.mrb[126].mxu0  ;;  %v13435_v26 = vpop.f32.mrb[160].mxu1  ;;  %v5718_v63 = vld [vmem:[#allocation3 + $0x120] sm:$0xff]  ;;  %v6188_v18 = vadd.f32 %v6187_v33, %v5895_v53  ;;  %v5711_v33 = vld [vmem:[#allocation3 + $0xe8] sm:$0xff] }
0x213b   :  { %6563 = vmatprep.subr.bf16.mxu0 %v10521_v10  ;;  %v6190_v21 = vpop.f32.mrb[127].mxu0  ;;  %v13437_v23 = vpop.f32.mrb[161].mxu1  ;;  %v10538_v10 = vcombine.low %v5725_v47, %v5725_v47  ;;  %v10525_v2 = vcombine.high %v5710_v59, %v5718_v63  ;;  %v6321_v12 = vmax.f32 %v6145_v6, 0.0  ;;  %v10524_v27 = vcombine.low %v5710_v59, %v5718_v63 }
0x213c   :  { %v6230_v7 = vpop.f32.mrb[162].mxu1  ;;  %v6324_v21 = vmax.f32 %v6188_v18, 0.0  ;;  %v6229_v35 = vadd.f32 %v13437_v23, %v5903_v45  ;;  %v5712_v23 = vld [vmem:[#allocation3 + $0xf0] sm:$0xff]  ;;  %v6227_v11 = vadd.f32 %v13435_v26, %v5899_v43  ;;  %v5907_v6 = vrot.slane %v13454_v14, %v12750_v20 }
0x213d   :  { %v6231_v51 = vpop.f32.mrb[163].mxu1  ;;  %v6337_v7 = vpack.c.bf16 %v6321_v12, %v6321_v12  ;;  %v5919_v26 = vrot.slane %v13454_v14, %v12760_v40 }
0x213e   :  { %v10541_v51 = vcombine.high %v5726_v30, %v5726_v30  ;;  %v6326_v0 = vmax.f32 %v6229_v35, 0.0 }
0x2140   :  { %v13439_v13 = vpop.f32.mrb[128].mxu0 }
0x2141   :  { %6556 = vmatmul.mubr.bf16.vlgmr.msra.gmra.mrb[132].mxu0 %v6333_v36  ;;  %v13443_v32 = vpop.f32.mrb[129].mxu0  ;;  %v6340_v36 = vpack.c.bf16 %v6324_v21, %v6324_v21  ;;  %v6268_v18 = vadd.f32 %v13439_v13, %v5907_v6  ;;  %v11432_v6 = vld [vmem:[#allocation13 + $0xc] sm:$0xff]  }
0x2142   :  { %6564 = vmatpush1.bf16.xpose.msra.mxu0 %v10520_v24  ;;  %6595 = vmatprep.mubr.bf16.mxu0 %v6336_v58  ;;  %v6271_v38 = vpop.f32.mrb[130].mxu0  ;;  %v13447_v8 = vpop.f32.mrb[164].mxu1  ;;  %v5891_v24 = vrot.slane %v13454_v14, %v12377_v3  ;;  %v5719_v58 = vld [vmem:[#allocation3 + $0x128] sm:$0xff] }
0x2143   :  { %6565 = vmatprep.subr.bf16.mxu0 %v10537_v34  ;;  %v6272_v50 = vpop.f32.mrb[131].mxu0  ;;  %v13449_v57 = vpop.f32.mrb[165].mxu1  ;;  %v10527_v38 = vcombine.high %v5711_v33, %v5719_v58  ;;  %v10526_v31 = vcombine.low %v5711_v33, %v5719_v58  ;;  %v6327_v30 = vmax.f32 %v6268_v18, 0.0  ;;  %v5915_v33 = vrot.slane %v13454_v14, %v12755_v16  ;;  %10999 = vmatpush3.bf16.msra.mxu1 %v11432_v6  ;;  %v11437_v6 = vld [vmem:[#allocation16 + $0x14] ss:$0 sps:$4 sm:$0xff]  }
0x2144   :  { %v6312_v61 = vpop.f32.mrb[166].mxu1  ;;  %v6186_v34 = vadd.f32 %v13433_v5, %v5891_v24  ;;  %v5911_v5 = vrot.slane %v13454_v14, %v12726_v46  ;;  %v6311_v12 = vadd.f32 %v13449_v57, %v5919_v26  ;;  %v11433_v26 = vld [vmem:[#allocation13 + $0x14] ss:$0 sps:$4 sm:$0xff]   ;;  %11000 = vmatprep.subr.bf16.mxu1 %v12122_v1 }
0x2145   :  { %v6313_v42 = vpop.f32.mrb[167].mxu1  ;;  %v6309_v57 = vadd.f32 %v13447_v8, %v5915_v33 }
0x2146   :  { %v6323_v50 = vmax.f32 %v6186_v34, 0.0  ;;  %v6342_v42 = vpack.c.bf16 %v6326_v0, %v6326_v0  ;;  %v6270_v47 = vadd.f32 %v13443_v32, %v5911_v5  ;;  %v5713_v32 = vld [vmem:[#allocation3 + $0xf8] sm:$0xff] }
0x2147   :  { %v6329_v58 = vmax.f32 %v6309_v57, 0.0 }
0x2148   :  { %v6339_v61 = vpack.c.bf16 %v6323_v50, %v6323_v50 }
0x2149   :  { %v6345_v34 = vpack.c.bf16 %v6329_v58, %v6329_v58 }
0x214a   :  { %6566 = vmatpush1.bf16.xpose.msra.mxu0 %v10536_v41  ;;  %v10543_v41 = vcombine.high %v5727_v48, %v5727_v48 }
0x214b   :  { %6603 = vmatprep.subr.bf16.mxu0 %v10523_v19  ;;  %v5720_v19 = vld [vmem:[#allocation3 + $0x130] sm:$0xff] }
0x214c   :  { %v10528_v53 = vcombine.low %v5712_v23, %v5720_v19 }
0x2151   :  { %6596 = vmatmul.mubr.bf16.vlgmr.msra.gmra.mrb[132].mxu0 %v6335_v52  ;;  %v10529_v52 = vcombine.high %v5712_v23, %v5720_v19 }
0x2152   :  { %6604 = vmatpush1.bf16.xpose.msra.mxu0 %v10522_v54  ;;  %6635 = vmatprep.mubr.bf16.mxu0 %v6338_v55  ;;  %v6325_v54 = vmax.f32 %v6227_v11, 0.0  ;;  %v6328_v55 = vmax.f32 %v6270_v47, 0.0  ;;  %v6823_v47 = vrot.slane %v13264_v44, 5 }
0x2153   :  { %6605 = vmatprep.subr.bf16.mxu0 %v10539_v56  ;;  %v5728_v56 = vld [vmem:[#allocation3 + $0x170] sm:$0xff] }
0x2154   :  { %v6341_v15 = vpack.c.bf16 %v6325_v54, %v6325_v54  ;;  %v6344_v59 = vpack.c.bf16 %v6328_v55, %v6328_v55  ;;  %v10545_v63 = vcombine.high %v5728_v56, %v5728_v56  ;;  %v6826_v54 = vrot.slane %v13264_v44, 6 }
0x215a   :  { %6606 = vmatpush1.bf16.xpose.msra.mxu0 %v10538_v10  ;;  %v5721_v10 = vld [vmem:[#allocation3 + $0x138] sm:$0xff] }
0x215b   :  { %6643 = vmatprep.subr.bf16.mxu0 %v10525_v2  ;;  %v10544_v2 = vcombine.low %v5728_v56, %v5728_v56  ;;  %v10531_v21 = vcombine.high %v5713_v32, %v5721_v10 }
0x2161   :  { %6636 = vmatmul.mubr.bf16.vlgmr.msra.gmra.mrb[132].mxu0 %v6337_v7  ;;  %v6330_v7 = vmax.f32 %v6311_v12, 0.0 }
0x2162   :  { %6644 = vmatpush1.bf16.xpose.msra.mxu0 %v10524_v27  ;;  %6675 = vmatprep.mubr.bf16.mxu0 %v6340_v36  ;;  %v5729_v27 = vld [vmem:[#allocation3 + $0x178] sm:$0xff]  ;;  %v6343_v36 = vpack.c.bf16 %v6327_v30, %v6327_v30 }
0x2163   :  { %6645 = vmatprep.subr.bf16.mxu0 %v10541_v51  ;;  %v10530_v51 = vcombine.low %v5713_v32, %v5721_v10  ;;  %v6346_v24 = vpack.c.bf16 %v6330_v7, %v6330_v7  ;;  %v10547_v45 = vcombine.high %v5729_v27, %v5729_v27  ;;  %v10546_v13 = vcombine.low %v5729_v27, %v5729_v27  ;;  %v13496_v27 = vld [vmem:[%s13877_s12 + $0x10] sm:$0xff] }
0x2164   :  { %v6877_v32 = vsel %vm252_vm1, %v11433_v26, 0  ;;  %v6853_v33 = vrot.slane %v13496_v27, 2  ;;  %v7177_v26 = vsel %vm252_vm1, %v11437_v6, 0 }
0x2165   :  { %11001 = vmatpush3.bf16.msra.mxu1 %v6877_v32 }
0x2166   :  { %11006 = vmatprep.subr.bf16.mxu1 %v12122_v1 }
0x216a   :  { %6646 = vmatpush1.bf16.xpose.msra.mxu0 %v10540_v22 }
0x216b   :  { %6683 = vmatprep.subr.bf16.mxu0 %v10527_v38 }
0x2171   :  { %6676 = vmatmul.mubr.bf16.vlgmr.msra.gmra.mrb[132].mxu0 %v6339_v61 }
0x2172   :  { %6684 = vmatpush1.bf16.xpose.msra.mxu0 %v10526_v31  ;;  %6715 = vmatprep.mubr.bf16.mxu0 %v6342_v42 }
0x2173   :  { %6685 = vmatprep.subr.bf16.mxu0 %v10543_v41 }
0x217a   :  { %6686 = vmatpush1.bf16.xpose.msra.mxu0 %v10542_v39 }
0x217b   :  { %6723 = vmatprep.subr.bf16.mxu0 %v10529_v52 }
0x2181   :  { %6716 = vmatmul.mubr.bf16.vlgmr.msra.gmra.mrb[132].mxu0 %v6341_v15 }
0x2182   :  { %6724 = vmatpush1.bf16.xpose.msra.mxu0 %v10528_v53  ;;  %6755 = vmatprep.mubr.bf16.mxu0 %v6344_v59 }
0x2183   :  { %6725 = vmatprep.subr.bf16.mxu0 %v10545_v63 }
0x218a   :  { %6726 = vmatpush1.bf16.xpose.msra.mxu0 %v10544_v2 }
0x218b   :  { %6763 = vmatprep.subr.bf16.mxu0 %v10531_v21 }
0x2191   :  { %6756 = vmatmul.mubr.bf16.vlgmr.msra.gmra.mrb[132].mxu0 %v6343_v36 }
0x2192   :  { %6764 = vmatpush1.bf16.xpose.msra.mxu0 %v10530_v51  ;;  %6795 = vmatprep.mubr.bf16.mxu0 %v6346_v24  ;;  %v6850_v51 = vrot.slane %v13496_v27, 1 }
0x2193   :  { %6765 = vmatprep.subr.bf16.mxu0 %v10547_v45 }
0x219a   :  { %6766 = vmatpush1.bf16.xpose.msra.mxu0 %v10546_v13 }
0x21a1   :  { %6796 = vmatmul.mubr.bf16.vlgmr.msra.gmra.mrb[132].mxu0 %v6345_v34  ;;  %v11434_v34 = vld [vmem:[#allocation14 + $0xc] sm:$0xff]  }
0x2274   :  { %v6797_v22 = vpop.f32.mrb[132].mxu0 }
0x2275   :  { %v11078_v35 = vadd.f32 %v6797_v22, %v13150_v49  ;;  %v6799_v38 = vpop.f32.mrb[133].mxu0 }
0x2276   :  { %v6800_v50 = vpop.f32.mrb[134].mxu0 }
0x2277   :  { %v6804_v0 = vrot.slane %v11078_v35, 7  ;;  %v6801_v48 = vpop.f32.mrb[135].mxu0  ;;  %v11435_v35 = vld [vmem:[#allocation14 + $0x14] ss:$0 sps:$4 sm:$0xff]  }
0x2278   :  { %v6941_v38 = vsel %vm252_vm1, %v11435_v35, 0 }
0x2279   :  { %v6806_v61 = vadd.f32 %v6804_v0, %v13362_v25 }
0x227b   :  { %v6807_v31 = vsel %vm5236_vm4, %v6806_v61, 0.0  ;;  %v6811_v14 = vmul.f32 %v6806_v61, %v6806_v61 }
0x227c   :  { %6808 = vadd.xlane.f32.xlu0 %v6807_v31 }
0x227d   :  { %v6812_v42 = vsel %vm5236_vm4, %v6811_v14, 0.0  ;;  %v10553_v14 = vld [vmem:[#allocation17 + $0x1] ss:$0 sm:$0xff] }
0x2280   :  { %6813 = vadd.xlane.f32.xlu0 %v6812_v42 }
0x2309   :  { %v6809_v8 = vpop.xlane.xlu0 %6808 }
0x230a   :  { %v6810_v41 = vmul.f32 0.041666668, %v6809_v8 }
0x230c   :  { %v6816_v5 = vmul.f32 %v6810_v41, %v6810_v41  ;;  %v6819_v39 = vsub.f32 %v6806_v61, %v6810_v41 }
0x230d   :  { %v6814_v43 = vpop.xlane.xlu0 %6813 }
0x230e   :  { %v6815_v23 = vmul.f32 0.041666668, %v6814_v43 }
0x2310   :  { %v6817_v19 = vsub.f32 %v6815_v23, %v6816_v5 }
0x2312   :  { %v6818_v49 = vmax.f32 %v6817_v19, 0.0 }
0x2314   :  { %v6820_v11 = vadd.f32 1e-05, %v6818_v49 }
0x2316   :  { %11438 = vrsqrt.f32 %v6820_v11 }
0x2320   :  { %v11439_v25 = vpop.eup %11438 }
0x2321   :  { %v6822_v52 = vmul.f32 %v11439_v25, %v6819_v39 }
0x2323   :  { %v6825_v55 = vmul.f32 %v6823_v47, %v6822_v52 }
0x2325   :  { %v6828_v56 = vadd.f32 %v6826_v54, %v6825_v55 }
0x2327   :  { %v6832_v15 = vadd.f32 %v6828_v56, %v6828_v56 }
0x2329   :  { %v6833_v53 = vsel %vm5236_vm4, %v6832_v15, 0.0  ;;  %v6837_v59 = vmul.f32 %v6832_v15, %v6832_v15 }
0x232a   :  { %6834 = vadd.xlane.f32.xlu1 %v6833_v53 }
0x232b   :  { %v6838_v63 = vsel %vm5236_vm4, %v6837_v59, 0.0 }
0x232e   :  { %6839 = vadd.xlane.f32.xlu1 %v6838_v63  ;;  %v11436_v63 = vld [vmem:[#allocation16 + $0xc] sm:$0xff]  }
0x23b7   :  { %v6835_v44 = vpop.xlane.xlu1 %6834 }
0x23b8   :  { %v6836_v10 = vmul.f32 0.041666668, %v6835_v44 }
0x23ba   :  { %v6842_v2 = vmul.f32 %v6836_v10, %v6836_v10  ;;  %v6845_v36 = vsub.f32 %v6832_v15, %v6836_v10 }
0x23bb   :  { %v6840_v18 = vpop.xlane.xlu1 %6839 }
0x23bc   :  { %v6841_v12 = vmul.f32 0.041666668, %v6840_v18 }
0x23be   :  { %v6843_v21 = vsub.f32 %v6841_v12, %v6842_v2 }
0x23c0   :  { %v6844_v30 = vmax.f32 %v6843_v21, 0.0 }
0x23c2   :  { %v6846_v7 = vadd.f32 1e-05, %v6844_v30 }
0x23c4   :  { %11440 = vrsqrt.f32 %v6846_v7 }
0x23ce   :  { %v11441_v24 = vpop.eup %11440 }
0x23cf   :  { %v6848_v45 = vmul.f32 %v11441_v24, %v6845_v36 }
0x23d1   :  { %v6852_v13 = vmul.f32 %v6850_v51, %v6848_v45 }
0x23d3   :  { %v13502_v57 = vadd.f32 %v6853_v33, %v6852_v13 }
0x23d5   :  { %v6860_v58 = vpack.c.bf16 %v13502_v57, %v13502_v57 }
0x23d7   :  { %v6862_v22 = vshrl.u32 %v6860_v58, 16 }
0x23d9   :  { %11003 = vmatmul.mubr.msk.bf16.vlgmr.msra.gmra.mrb[168].mxu1 %vm248_vm2, %v6862_v22 }
0x23da   :  { %11007 = vmatpush3.bf16.msra.mxu1 %v11434_v34  ;;  %11010 = vmatprep.mubr.msk.bf16.mxu1 %vm12123_vm0, %v12122_v1 }
0x23db   :  { %11008 = vmatprep.subr.bf16.mxu1 %v12122_v1 }
0x23de   :  { %11009 = vmatpush3.bf16.msra.mxu1 %v6941_v38 }
0x23df   :  { %11014 = vmatprep.subr.mxu1 %v12122_v1 }
0x23e1   :  { %11011 = vmatmul.mubr.msk.bf16.vlgmr.msra.gmra.mrb[172].mxu1 %vm248_vm2, %v13288_v62 }
0x23e2   :  { %11016 = vmatprep.mubr.msk.f32.mxu1 %vm12123_vm0, %v12122_v1 }
0x24ac   :  { %v6913_v50 = vpop.f32.mrb[168].mxu1 }
0x24ad   :  { %v11004_v0 = vpop.f32.mrb[169].mxu1  ;;  %v6914_v31 = vadd.f32 %v13496_v27, %v6913_v50 }
0x24ae   :  { %v6916_v48 = vpop.f32.mrb[170].mxu1 }
0x24af   :  { %v11005_v61 = vpop.f32.mrb[171].mxu1  ;;  %v6990_v42 = vrot.slane %v6914_v31, %v12377_v3 }
0x24b1   :  { %v6991_v19 = vmul.f32 %v6990_v42, %v12382_v4 }
0x24b4   :  { %v6977_v8 = vpop.f32.mrb[172].mxu1 }
0x24b5   :  { %v6978_v41 = vadd.f32 %v10553_v14, %v6977_v8  ;;  %v11012_v43 = vpop.f32.mrb[173].mxu1 }
0x24b6   :  { %v6980_v5 = vpop.f32.mrb[174].mxu1 }
0x24b7   :  { %v11013_v23 = vpop.f32.mrb[175].mxu1  ;;  %11015 = vmatpush3.xpose.msk.msra.mxu1 %vm248_vm2, %v6978_v41 }
0x24b8   :  { %11019 = vmatprep.subr.mxu1 %v12122_v1 }
0x24ba   :  { %11017 = vmatmul.mubr.msk.f32.vlgmr.msra.gmra.mrb[176].mxu1 %vm248_vm2, %v6991_v19 }
0x24bb   :  { %11021 = vmatprep.mubr.msk.f32.mxu1 %vm12123_vm0, %v12122_v1 }
0x258d   :  { %v7064_v49 = vpop.f32.mrb[176].mxu1 }
0x258e   :  { %v11018_v11 = vpop.f32.mrb[177].mxu1  ;;  %v7068_v39 = vsel %vm5472_vm5, %v7064_v49, -inf }
0x258f   :  { %7069 = vmax.xlane.f32.xlu0 %v7068_v39 }
0x25a5   :  { %7079 = vrot.lane.b32.xlu0 %v6978_v41, %s12124_s11 }
0x261c   :  { %v7070_v47 = vpop.xlane.xlu0 %7069 }
0x261d   :  { %v7071_v25 = vsub.f32 %v7064_v49, %v7070_v47 }
0x261f   :  { %v7072_v52 = vmul.f32 1.442695, %v7071_v25 }
0x2620   :  { %v7080_v54 = vpop.permute.xlu0 %7079 }
0x2621   :  { %11442 = vpow2.f32 %v7072_v52  ;;  %11020 = vmatpush3.msra.mxu1 %v7080_v54 }
0x2622   :  { %11024 = vmatprep.subr.bf16.mxu1 %v12122_v1 }
0x262b   :  { %v11443_v55 = vpop.eup %11442 }
0x262c   :  { %v7074_v56 = vsel %vm5472_vm5, %v11443_v55, 0.0 }
0x262d   :  { %7075 = vadd.xlane.f32.xlu1 %v7074_v56 }
0x26ba   :  { %v7076_v15 = vpop.xlane.xlu1 %7075 }
0x26bb   :  { %11444 = vrcp.f32 %v7076_v15 }
0x26c5   :  { %v11445_v53 = vpop.eup %11444 }
0x26c6   :  { %v7078_v59 = vmul.f32 %v11445_v53, %v11443_v55 }
0x26c8   :  { %11022 = vmatmul.mubr.msk.f32.vlgmr.msra.gmra.mrb[178].mxu1 %vm423_vm3, %v7078_v59 }
0x26c9   :  { %11028 = vmatprep.mubr.msk.bf16.mxu1 %vm12123_vm0, %v12122_v1  ;;  %11025 = vmatpush3.bf16.msra.mxu1 %v11436_v63 }
0x26ca   :  { %11026 = vmatprep.subr.bf16.mxu1 %v12122_v1 }
0x26cd   :  { %11027 = vmatpush3.bf16.msra.mxu1 %v7177_v26 }
0x279b   :  { %v7151_v32 = vpop.f32.mrb[178].mxu1 }
0x279c   :  { %v7155_v44 = vmul.f32 %v7151_v32, %v12382_v4  ;;  %v11023_v10 = vpop.f32.mrb[179].mxu1 }
0x279e   :  { %v7156_v18 = vsel %vm5561_vm6, %v7155_v44, 0.0 }
0x279f   :  { %v7157_v2 = vrot.slane %v7156_v18, 4 }
0x27a1   :  { %v7158_v12 = vadd.f32 %v7157_v2, %v7156_v18 }
0x27a3   :  { %v7159_v21 = vrot.slane %v7158_v12, 2 }
0x27a5   :  { %v7160_v30 = vadd.f32 %v7159_v21, %v7158_v12 }
0x27a7   :  { %v7161_v7 = vrot.slane %v7160_v30, 1 }
0x27a9   :  { %v7162_v36 = vadd.f32 %v7161_v7, %v7160_v30 }
0x27ab   :  { %v7163_v24 = vpack.c.bf16 %v7162_v36, %v7162_v36 }
0x27ad   :  { %11029 = vmatmul.mubr.msk.bf16.vlgmr.msra.gmra.mrb[180].mxu1 %vm248_vm2, %v7163_v24 }
0x2880   :  { %v7213_v45 = vpop.f32.mrb[180].mxu1 }
0x2881   :  { %v7214_v33 = vadd.f32 %v7213_v45, %v6850_v51  ;;  %v11030_v13 = vpop.f32.mrb[181].mxu1 }
0x2882   :  { %v7216_v58 = vpop.f32.mrb[182].mxu1 }
0x2883   :  { %v7220_v34 = vrot.slane %v7214_v33, 7  ;;  %v11031_v22 = vpop.f32.mrb[183].mxu1 }
0x2885   :  { %v7222_v35 = vadd.f32 %v7220_v34, %v13502_v57 }
0x2887   :  { %v7223_v38 = vsel %vm5236_vm4, %v7222_v35, 0.0  ;;  %v7227_v50 = vmul.f32 %v7222_v35, %v7222_v35 }
0x2888   :  { %7224 = vadd.xlane.f32.xlu1 %v7223_v38 }
0x2889   :  { %v7228_v0 = vsel %vm5236_vm4, %v7227_v50, 0.0 }
0x288c   :  { %7229 = vadd.xlane.f32.xlu1 %v7228_v0 }
0x288d   :  { %12007 = shalt.err (!%p12004_p5)  }
0x288e   :  { %12019 = shalt.err (!%p13906_p1)  }
0x288f   :  { %7256 = dma.hbm_to_vmem [thread:$0]  %s13319_s22, 3072, %s12590_s25, [#allocation4 + $0x1] }
0x2890   :  { %p12022_p10 = scmp.ne.s32.totalorder %s13341_s21, %s12560_s26  ;;  %p12024_p11 = scmp.lt.u32.totalorder %s13341_s21, %s13883_s18 }
0x2891   :  { %p12025_p0 = scmp.lt.u32.totalorder %s12560_s26, %s12560_s26 }
0x2893   :  { %p12026_p13 = por %p12025_p0, %p12024_p11 }
0x2895   :  { %p12028_p12 = por %p12026_p13, %p11975_p9 }
0x2897   :  { %p12029_p1 = pnand %p12028_p12, %p12022_p10 }
0x2899   :  { %12032 = shalt.err (!%p12029_p1)  }
0x289a   :  { %12044 = shalt.err (!%p12646_p8)  }
0x289b   :  { %7268 = dma.hbm_to_vmem [thread:$0]  %s13341_s21, 3072, %s12622_s1, [#allocation4 + $0x3]  ;;  %v7239_v43 = vrot.slane %v13496_v27, 3  ;;  %v7242_v23 = vrot.slane %v13496_v27, 4 }
0x2915   :  { %v7225_v51 = vpop.xlane.xlu1 %7224 }
0x2916   :  { %v7226_v57 = vmul.f32 0.041666668, %v7225_v51 }
0x2918   :  { %v7232_v61 = vmul.f32 %v7226_v57, %v7226_v57  ;;  %v7235_v41 = vsub.f32 %v7222_v35, %v7226_v57 }
0x2919   :  { %v7230_v48 = vpop.xlane.xlu1 %7229 }
0x291a   :  { %v7231_v31 = vmul.f32 0.041666668, %v7230_v48 }
0x291c   :  { %v7233_v14 = vsub.f32 %v7231_v31, %v7232_v61 }
0x291e   :  { %v7234_v42 = vmax.f32 %v7233_v14, 0.0 }
0x2920   :  { %v7236_v8 = vadd.f32 1e-05, %v7234_v42 }
0x2922   :  { %11446 = vrsqrt.f32 %v7236_v8 }
0x292c   :  { %v11447_v5 = vpop.eup %11446 }
0x292d   :  { %v7238_v19 = vmul.f32 %v11447_v5, %v7235_v41 }
0x292f   :  { %v7241_v49 = vmul.f32 %v7239_v43, %v7238_v19 }
0x2931   :  { %v13573_v11 = vadd.f32 %v7242_v23, %v7241_v49 }
0x2932   :  { %12096 = dma.done.wait [#allocation4], 3072 }
0x2933   :  { %12097 = vsyncadd [#allocation4], 4294964224 }
0x2934   :  { %12098 = dma.done.wait [#allocation4 + $0x2], 3072 }
0x2935   :  { %12099 = vsyncadd [#allocation4 + $0x2], 4294964224  ;;  %7613 = vmatprep.mubr.bf16.mxu1 %v12130_v37  ;;  %11032 = vmatprep.subr.bf16.mxu0 %v12122_v1  ;;  %v13582_v39 = vld [vmem:[%s13877_s12 + $0x28] sm:$0x1]  ;;  %v7273_v47 = vld [vmem:[#allocation2] sm:$0xff]  ;;  %v7324_v63 = vpack.c.bf16 %v13573_v11, %v13573_v11 }
0x2936   :  { %11036 = vmatprep.mubr.msk.bf16.mxu0 %vm12123_vm0, %v12122_v1  ;;  %v7281_v25 = vld [vmem:[#allocation2 + $0x40] sm:$0xff]  ;;  %v7274_v53 = vld [vmem:[#allocation2 + $0x8] sm:$0xff]  ;;  %v7275_v12 = vld [vmem:[#allocation2 + $0x10] sm:$0xff] }
0x2937   :  { %v10566_v52 = vcombine.high %v7273_v47, %v7281_v25  ;;  %v10565_v54 = vcombine.low %v7273_v47, %v7281_v25  ;;  %v7289_v55 = vld [vmem:[#allocation2 + $0x80] sm:$0xff]  ;;  %v7282_v59 = vld [vmem:[#allocation2 + $0x48] sm:$0xff]  ;;  %v13588_v44 = vshrl.u32 %v7324_v63, 16  ;;  %v7283_v21 = vld [vmem:[#allocation2 + $0x50] sm:$0xff] }
0x2938   :  { %v10582_v56 = vcombine.high %v7289_v55, %v7289_v55  ;;  %v10581_v15 = vcombine.low %v7289_v55, %v7289_v55  ;;  %v10568_v26 = vcombine.high %v7274_v53, %v7282_v59  ;;  %v7290_v32 = vld [vmem:[#allocation2 + $0x88] sm:$0xff]  ;;  %v10567_v10 = vcombine.low %v7274_v53, %v7282_v59  ;;  %v7291_v36 = vld [vmem:[#allocation2 + $0x90] sm:$0xff]  ;;  %v7276_v13 = vld [vmem:[#allocation2 + $0x18] sm:$0xff] }
0x2939   :  { %7581 = vmatprep.subr.bf16.mxu1 %v10566_v52  ;;  %v10584_v18 = vcombine.high %v7290_v32, %v7290_v32  ;;  %v10583_v2 = vcombine.low %v7290_v32, %v7290_v32  ;;  %v10570_v7 = vcombine.high %v7275_v12, %v7283_v21  ;;  %v10569_v24 = vcombine.low %v7275_v12, %v7283_v21  ;;  %v7284_v58 = vld [vmem:[#allocation2 + $0x58] sm:$0xff]  ;;  %v7277_v51 = vld [vmem:[#allocation2 + $0x20] sm:$0xff]  ;;  %v7278_v41 = vld [vmem:[#allocation2 + $0x28] sm:$0xff] }
0x293a   :  { %7582 = vmatpush1.bf16.msra.mxu1 %v10565_v54  ;;  %v7534_v6 = vsel %vm252_vm1, %v10581_v15, 0  ;;  %v10586_v45 = vcombine.high %v7291_v36, %v7291_v36  ;;  %v10585_v33 = vcombine.low %v7291_v36, %v7291_v36  ;;  %v10572_v22 = vcombine.high %v7276_v13, %v7284_v58  ;;  %v7292_v35 = vld [vmem:[#allocation2 + $0x98] sm:$0xff]  ;;  %v7285_v57 = vld [vmem:[#allocation2 + $0x60] sm:$0xff]  ;;  %v7286_v43 = vld [vmem:[#allocation2 + $0x68] sm:$0xff] }
0x293b   :  { %10597 = vmatprep.subr.msk.bf16.mxu1 %vm252_vm1, %v10582_v56  ;;  %v7540_v30 = vsel %vm252_vm1, %v10583_v2, 0  ;;  %v10571_v38 = vcombine.low %v7276_v13, %v7284_v58  ;;  %v10588_v50 = vcombine.high %v7292_v35, %v7292_v35  ;;  %v10587_v0 = vcombine.low %v7292_v35, %v7292_v35  ;;  %v7293_v31 = vld [vmem:[#allocation2 + $0xa0] sm:$0xff]  ;;  %v7294_v19 = vld [vmem:[#allocation2 + $0xa8] sm:$0xff]  ;;  %v7279_v52 = vld [vmem:[#allocation2 + $0x30] sm:$0xff] }
0x293c   :  { %v7546_v34 = vsel %vm252_vm1, %v10585_v33, 0  ;;  %v10574_v61 = vcombine.high %v7277_v51, %v7285_v57  ;;  %v10573_v14 = vcombine.low %v7277_v51, %v7285_v57  ;;  %v10590_v42 = vcombine.high %v7293_v31, %v7293_v31  ;;  %v7287_v54 = vld [vmem:[#allocation2 + $0x70] sm:$0xff]  ;;  %v7316_v33 = vld [vmem:[#allocation3 + $0x80] sm:$0xff] }
0x293d   :  { %v7552_v48 = vsel %vm252_vm1, %v10587_v0, 0  ;;  %v10589_v8 = vcombine.low %v7293_v31, %v7293_v31  ;;  %v10576_v23 = vcombine.high %v7278_v41, %v7286_v43  ;;  %v10575_v49 = vcombine.low %v7278_v41, %v7286_v43  ;;  %v7295_v15 = vld [vmem:[#allocation2 + $0xb0] sm:$0xff]  ;;  %v7317_v41 = vld [vmem:[#allocation3 + $0x88] sm:$0xff] }
0x293e   :  { %7584 = vmatpush1.bf16.msra.mxu1 %v7534_v6  ;;  %v10592_v47 = vcombine.high %v7294_v19, %v7294_v19  ;;  %v10591_v25 = vcombine.low %v7294_v19, %v7294_v19  ;;  %v10578_v56 = vcombine.high %v7279_v52, %v7287_v54  ;;  %v10577_v53 = vcombine.low %v7279_v52, %v7287_v54  ;;  %v7280_v6 = vld [vmem:[#allocation2 + $0x38] sm:$0xff] }
0x293f   :  { %7622 = vmatprep.subr.bf16.mxu1 %v10568_v26  ;;  %v7558_v5 = vsel %vm252_vm1, %v10589_v8, 0  ;;  %v10594_v59 = vcombine.high %v7295_v15, %v7295_v15  ;;  %v10593_v63 = vcombine.low %v7295_v15, %v7295_v15  ;;  %v7288_v26 = vld [vmem:[#allocation2 + $0x78] sm:$0xff]  ;;  %v10630_v13 = vcombine.high %v7316_v33, %v7316_v33  ;;  %v7302_v15 = vld [vmem:[#allocation3 + $0x10] sm:$0xff] }
0x2940   :  { %v7564_v55 = vsel %vm252_vm1, %v10591_v25, 0  ;;  %v10579_v2 = vcombine.low %v7280_v6, %v7288_v26  ;;  %v10629_v58 = vcombine.low %v7316_v33, %v7316_v33  ;;  %v10632_v19 = vcombine.high %v7317_v41, %v7317_v41 }
0x2941   :  { %10598 = vmatmul.mubr.msk.bf16.vlgmr.msra.gmra.mrb[184].mxu1 %vm248_vm2, %v13588_v44  ;;  %v7570_v32 = vsel %vm252_vm1, %v10593_v63, 0 }
0x2942   :  { %7623 = vmatpush1.bf16.msra.mxu1 %v10567_v10  ;;  %7654 = vmatprep.mubr.bf16.mxu1 %v12130_v37  ;;  %v10580_v10 = vcombine.high %v7280_v6, %v7288_v26  ;;  %v10631_v6 = vcombine.low %v7317_v41, %v7317_v41 }
0x2943   :  { %10599 = vmatprep.subr.msk.bf16.mxu1 %vm252_vm1, %v10584_v18  ;;  %v7296_v18 = vld [vmem:[#allocation2 + $0xb8] sm:$0xff] }
0x2944   :  { %v10596_v12 = vcombine.high %v7296_v18, %v7296_v18  ;;  %v10595_v21 = vcombine.low %v7296_v18, %v7296_v18 }
0x2946   :  { %7625 = vmatpush1.bf16.msra.mxu1 %v7540_v30  ;;  %v7300_v30 = vld [vmem:[#allocation3] sm:$0xff]  ;;  %v7576_v36 = vsel %vm252_vm1, %v10595_v21, 0 }
0x2947   :  { %7663 = vmatprep.subr.bf16.mxu1 %v10570_v7  ;;  %v7308_v7 = vld [vmem:[#allocation3 + $0x40] sm:$0xff] }
0x2949   :  { %10600 = vmatmul.mubr.msk.bf16.vlgmr.msra.gmra.mrb[188].mxu1 %vm248_vm2, %v13588_v44 }
0x294a   :  { %7664 = vmatpush1.bf16.msra.mxu1 %v10569_v24  ;;  %7695 = vmatprep.mubr.bf16.mxu1 %v12130_v37  ;;  %v10614_v24 = vcombine.high %v7300_v30, %v7308_v7 }
0x294b   :  { %10601 = vmatprep.subr.msk.bf16.mxu1 %vm252_vm1, %v10586_v45  ;;  %v10613_v45 = vcombine.low %v7300_v30, %v7308_v7 }
0x294e   :  { %7666 = vmatpush1.bf16.msra.mxu1 %v7546_v34  ;;  %v7301_v34 = vld [vmem:[#allocation3 + $0x8] sm:$0xff] }
0x294f   :  { %7704 = vmatprep.subr.bf16.mxu1 %v10572_v22  ;;  %v7309_v22 = vld [vmem:[#allocation3 + $0x48] sm:$0xff] }
0x2950   :  { %v10616_v35 = vcombine.high %v7301_v34, %v7309_v22 }
0x2951   :  { %10602 = vmatmul.mubr.msk.bf16.vlgmr.msra.gmra.mrb[192].mxu1 %vm248_vm2, %v13588_v44 }
0x2952   :  { %7705 = vmatpush1.bf16.msra.mxu1 %v10571_v38  ;;  %7736 = vmatprep.mubr.bf16.mxu1 %v12130_v37  ;;  %v10615_v38 = vcombine.low %v7301_v34, %v7309_v22 }
0x2953   :  { %10603 = vmatprep.subr.msk.bf16.mxu1 %vm252_vm1, %v10588_v50  ;;  %v13630_v50 = vld [vmem:[%s13878_s13 + $0x40] sm:$0xff] }
0x2954   :  { %v7457_v0 = vrot.slane %v13630_v50, %v12655_v28  ;;  %v7473_v26 = vrot.slane %v13630_v50, %v12726_v46  ;;  %v7469_v34 = vrot.slane %v13630_v50, %v12750_v20 }
0x2956   :  { %7707 = vmatpush1.bf16.msra.mxu1 %v7552_v48 }
0x2957   :  { %7745 = vmatprep.subr.bf16.mxu1 %v10574_v61 }
0x2959   :  { %10604 = vmatmul.mubr.msk.bf16.vlgmr.msra.gmra.mrb[196].mxu1 %vm248_vm2, %v13588_v44 }
0x295a   :  { %7746 = vmatpush1.bf16.msra.mxu1 %v10573_v14  ;;  %7777 = vmatprep.mubr.bf16.mxu1 %v12130_v37 }
0x295b   :  { %10605 = vmatprep.subr.msk.bf16.mxu1 %vm252_vm1, %v10590_v42 }
0x295e   :  { %7748 = vmatpush1.bf16.msra.mxu1 %v7558_v5  ;;  %v7465_v5 = vrot.slane %v13630_v50, %v12717_v17 }
0x295f   :  { %7786 = vmatprep.subr.bf16.mxu1 %v10576_v23 }
0x2961   :  { %10606 = vmatmul.mubr.msk.bf16.vlgmr.msra.gmra.mrb[200].mxu1 %vm248_vm2, %v13588_v44 }
0x2962   :  { %7787 = vmatpush1.bf16.msra.mxu1 %v10575_v49  ;;  %7818 = vmatprep.mubr.bf16.mxu1 %v12130_v37 }
0x2963   :  { %10607 = vmatprep.subr.msk.bf16.mxu1 %vm252_vm1, %v10592_v47  ;;  %v7461_v47 = vrot.slane %v13630_v50, %v12658_v29 }
0x2966   :  { %7789 = vmatpush1.bf16.msra.mxu1 %v7564_v55 }
0x2967   :  { %7827 = vmatprep.subr.bf16.mxu1 %v10578_v56 }
0x2969   :  { %10608 = vmatmul.mubr.msk.bf16.vlgmr.msra.gmra.mrb[204].mxu1 %vm248_vm2, %v13588_v44 }
0x296a   :  { %7828 = vmatpush1.bf16.msra.mxu1 %v10577_v53  ;;  %7859 = vmatprep.mubr.bf16.mxu1 %v12130_v37  ;;  %v7310_v53 = vld [vmem:[#allocation3 + $0x50] sm:$0xff] }
0x296b   :  { %10609 = vmatprep.subr.msk.bf16.mxu1 %vm252_vm1, %v10594_v59 }
0x296e   :  { %7830 = vmatpush1.bf16.msra.mxu1 %v7570_v32  ;;  %v10618_v32 = vcombine.high %v7302_v15, %v7310_v53 }
0x296f   :  { %7868 = vmatprep.subr.bf16.mxu1 %v10580_v10 }
0x2971   :  { %10610 = vmatmul.mubr.msk.bf16.vlgmr.msra.gmra.mrb[208].mxu1 %vm248_vm2, %v13588_v44 }
0x2972   :  { %7869 = vmatpush1.bf16.msra.mxu1 %v10579_v2  ;;  %7900 = vmatprep.mubr.bf16.mxu1 %v12130_v37 }
0x2973   :  { %10611 = vmatprep.subr.msk.bf16.mxu1 %vm252_vm1, %v10596_v12 }
0x2976   :  { %7871 = vmatpush1.bf16.msra.mxu1 %v7576_v36  ;;  %v7318_v36 = vld [vmem:[#allocation3 + $0x90] sm:$0xff] }
0x2977   :  { %8077 = vmatprep.subr.bf16.mxu1 %v10614_v24 }
0x2979   :  { %10612 = vmatmul.mubr.msk.bf16.vlgmr.msra.gmra.mrb[212].mxu1 %vm248_vm2, %v13588_v44  ;;  %v7453_v44 = vrot.slane %v13630_v50, %v12377_v3 }
0x297f   :  { %8078 = vmatpush1.bf16.xpose.msra.mxu1 %v10613_v45  ;;  %v10617_v45 = vcombine.low %v7302_v15, %v7310_v53 }
0x2980   :  { %8079 = vmatprep.subr.bf16.mxu1 %v10630_v13  ;;  %v10634_v13 = vcombine.high %v7318_v36, %v7318_v36 }
0x2987   :  { %8080 = vmatpush1.bf16.xpose.msra.mxu1 %v10629_v58 }
0x2988   :  { %8117 = vmatprep.subr.bf16.mxu1 %v10616_v35  ;;  %v7481_v35 = vrot.slane %v13630_v50, %v12760_v40 }
0x2a14   :  { %v7615_v51 = vpop.f32.mrb[184].mxu1 }
0x2a15   :  { %v7616_v57 = vadd.f32 %v7615_v51, %v7453_v44  ;;  %v7617_v48 = vpop.f32.mrb[185].mxu1  ;;  %v7311_v51 = vld [vmem:[#allocation3 + $0x58] sm:$0xff] }
0x2a16   :  { %v7618_v61 = vadd.f32 %v7617_v48, %v7457_v0  ;;  %v7619_v31 = vpop.f32.mrb[186].mxu1  ;;  %v7303_v0 = vld [vmem:[#allocation3 + $0x18] sm:$0xff]  ;;  %v10633_v48 = vcombine.low %v7318_v36, %v7318_v36  ;;  %v7320_v36 = vld [vmem:[#allocation3 + $0xa0] sm:$0xff] }
0x2a17   :  { %v7909_v14 = vmax.f32 %v7616_v57, 0.0  ;;  %v7620_v42 = vpop.f32.mrb[187].mxu1  ;;  %v10620_v31 = vcombine.high %v7303_v0, %v7311_v51 }
0x2a18   :  { %v7910_v8 = vmax.f32 %v7618_v61, 0.0 }
0x2a19   :  { %v7925_v23 = vpack.c.bf16 %v7909_v14, %v7909_v14 }
0x2a1a   :  { %v7926_v43 = vpack.c.bf16 %v7910_v8, %v7910_v8 }
0x2a1c   :  { %8109 = vmatprep.mubr.bf16.mxu1 %v7926_v43  ;;  %v7656_v49 = vpop.f32.mrb[188].mxu1 }
0x2a1d   :  { %8110 = vmatmul.mubr.bf16.vlgmr.msra.gmra.mrb[216].mxu1 %v7925_v23  ;;  %v7658_v25 = vpop.f32.mrb[189].mxu1  ;;  %v7657_v59 = vadd.f32 %v7656_v49, %v7461_v47  ;;  %v7319_v23 = vld [vmem:[#allocation3 + $0x98] sm:$0xff]  ;;  %v10619_v49 = vcombine.low %v7303_v0, %v7311_v51  ;;  %v7305_v0 = vld [vmem:[#allocation3 + $0x28] sm:$0xff] }
0x2a1e   :  { %8118 = vmatpush1.bf16.xpose.msra.mxu1 %v10615_v38  ;;  %v7659_v52 = vadd.f32 %v7658_v25, %v7465_v5  ;;  %v7660_v54 = vpop.f32.mrb[190].mxu1  ;;  %v10636_v25 = vcombine.high %v7319_v23, %v7319_v23  ;;  %v7313_v51 = vld [vmem:[#allocation3 + $0x68] sm:$0xff] }
0x2a1f   :  { %v7661_v55 = vpop.f32.mrb[191].mxu1  ;;  %8119 = vmatprep.subr.bf16.mxu1 %v10632_v19  ;;  %v7911_v18 = vmax.f32 %v7657_v59, 0.0 }
0x2a20   :  { %v7912_v56 = vmax.f32 %v7659_v52, 0.0  ;;  %v13649_v52 = vld [vmem:[%s13878_s13 + $0x48] sm:$0xff]  ;;  %v7477_v55 = vrot.slane %v13630_v50, %v12755_v16 }
0x2a21   :  { %v7927_v24 = vpack.c.bf16 %v7911_v18, %v7911_v18  ;;  %v7489_v15 = vrot.slane %v13649_v52, %v12655_v28 }
0x2a22   :  { %v7928_v63 = vpack.c.bf16 %v7912_v56, %v7912_v56 }
0x2a24   :  { %8149 = vmatprep.mubr.bf16.mxu1 %v7928_v63  ;;  %v7697_v10 = vpop.f32.mrb[192].mxu1  ;;  %v7304_v63 = vld [vmem:[#allocation3 + $0x20] sm:$0xff] }
0x2a25   :  { %v7699_v2 = vpop.f32.mrb[193].mxu1  ;;  %v7698_v57 = vadd.f32 %v7697_v10, %v7469_v34 }
0x2a26   :  { %8120 = vmatpush1.bf16.xpose.msra.mxu1 %v10631_v6  ;;  %v7700_v12 = vadd.f32 %v7699_v2, %v7473_v26  ;;  %v7701_v21 = vpop.f32.mrb[194].mxu1  ;;  %v7312_v6 = vld [vmem:[#allocation3 + $0x60] sm:$0xff] }
0x2a27   :  { %8157 = vmatprep.subr.bf16.mxu1 %v10618_v32  ;;  %v7702_v30 = vpop.f32.mrb[195].mxu1  ;;  %v7913_v42 = vmax.f32 %v7698_v57, 0.0  ;;  %v10635_v32 = vcombine.low %v7319_v23, %v7319_v23  ;;  %v10622_v18 = vcombine.high %v7304_v63, %v7312_v6 }
0x2a28   :  { %v7914_v7 = vmax.f32 %v7700_v12, 0.0 }
0x2a29   :  { %v7929_v19 = vpack.c.bf16 %v7913_v42, %v7913_v42 }
0x2a2a   :  { %v7930_v33 = vpack.c.bf16 %v7914_v7, %v7914_v7 }
0x2a2c   :  { %v7738_v58 = vpop.f32.mrb[196].mxu1 }
0x2a2d   :  { %8150 = vmatmul.mubr.bf16.vlgmr.msra.gmra.mrb[216].mxu1 %v7927_v24  ;;  %v7740_v22 = vpop.f32.mrb[197].mxu1  ;;  %v7739_v26 = vadd.f32 %v7738_v58, %v7477_v55  ;;  %v7485_v58 = vrot.slane %v13649_v52, %v12377_v3 }
0x2a2e   :  { %8158 = vmatpush1.bf16.xpose.msra.mxu1 %v10617_v45  ;;  %8189 = vmatprep.mubr.bf16.mxu1 %v7930_v33  ;;  %v7742_v38 = vpop.f32.mrb[198].mxu1  ;;  %v7741_v61 = vadd.f32 %v7740_v22, %v7481_v35  ;;  %v10621_v45 = vcombine.low %v7304_v63, %v7312_v6  ;;  %v7497_v35 = vrot.slane %v13649_v52, %v12717_v17  ;;  %v7322_v6 = vld [vmem:[#allocation3 + $0xb0] sm:$0xff] }
0x2a2f   :  { %8159 = vmatprep.subr.bf16.mxu1 %v10634_v13  ;;  %v7743_v44 = vpop.f32.mrb[199].mxu1  ;;  %v7915_v12 = vmax.f32 %v7739_v26, 0.0  ;;  %v10638_v13 = vcombine.high %v7320_v36, %v7320_v36 }
0x2a30   :  { %v7916_v41 = vmax.f32 %v7741_v61, 0.0 }
0x2a31   :  { %v7931_v24 = vpack.c.bf16 %v7915_v12, %v7915_v12  ;;  %v7501_v12 = vrot.slane %v13649_v52, %v12750_v20 }
0x2a32   :  { %v7932_v47 = vpack.c.bf16 %v7916_v41, %v7916_v41  ;;  %v7321_v41 = vld [vmem:[#allocation3 + $0xa8] sm:$0xff] }
0x2a34   :  { %v7779_v14 = vpop.f32.mrb[200].mxu1 }
0x2a35   :  { %v7781_v8 = vpop.f32.mrb[201].mxu1  ;;  %v7780_v57 = vadd.f32 %v7779_v14, %v7485_v58  ;;  %v7505_v14 = vrot.slane %v13649_v52, %v12726_v46 }
0x2a36   :  { %8160 = vmatpush1.bf16.xpose.msra.mxu1 %v10633_v48  ;;  %v7783_v43 = vpop.f32.mrb[202].mxu1  ;;  %v7782_v10 = vadd.f32 %v7781_v8, %v7489_v15  ;;  %v10637_v48 = vcombine.low %v7320_v36, %v7320_v36 }
0x2a37   :  { %8197 = vmatprep.subr.bf16.mxu1 %v10620_v31  ;;  %v7784_v5 = vpop.f32.mrb[203].mxu1  ;;  %v10624_v31 = vcombine.high %v7305_v0, %v7313_v51  ;;  %v7917_v42 = vmax.f32 %v7780_v57, 0.0 }
0x2a38   :  { %v7918_v50 = vmax.f32 %v7782_v10, 0.0  ;;  %v10623_v5 = vcombine.low %v7305_v0, %v7313_v51  ;;  %v7509_v0 = vrot.slane %v13649_v52, %v12755_v16 }
0x2a39   :  { %v7933_v43 = vpack.c.bf16 %v7917_v42, %v7917_v42 }
0x2a3a   :  { %v7934_v33 = vpack.c.bf16 %v7918_v50, %v7918_v50  ;;  %v7315_v50 = vld [vmem:[#allocation3 + $0x78] sm:$0xff] }
0x2a3c   :  { %v7820_v54 = vpop.f32.mrb[204].mxu1 }
0x2a3d   :  { %8190 = vmatmul.mubr.bf16.vlgmr.msra.gmra.mrb[216].mxu1 %v7929_v19  ;;  %v7822_v56 = vpop.f32.mrb[205].mxu1  ;;  %v10640_v19 = vcombine.high %v7321_v41, %v7321_v41 }
0x2a3e   :  { %8198 = vmatpush1.bf16.xpose.msra.mxu1 %v10619_v49  ;;  %8229 = vmatprep.mubr.bf16.mxu1 %v7932_v47  ;;  %v7824_v53 = vpop.f32.mrb[206].mxu1  ;;  %v7823_v61 = vadd.f32 %v7822_v56, %v7497_v35  ;;  %v7493_v49 = vrot.slane %v13649_v52, %v12658_v29  ;;  %v7306_v47 = vld [vmem:[#allocation3 + $0x30] sm:$0xff]  ;;  %v10639_v56 = vcombine.low %v7321_v41, %v7321_v41 }
0x2a3f   :  { %8199 = vmatprep.subr.bf16.mxu1 %v10636_v25  ;;  %v7825_v59 = vpop.f32.mrb[207].mxu1  ;;  %v7314_v25 = vld [vmem:[#allocation3 + $0x70] sm:$0xff] }
0x2a40   :  { %v7920_v8 = vmax.f32 %v7823_v61, 0.0  ;;  %v7821_v55 = vadd.f32 %v7820_v54, %v7493_v49  ;;  %v10626_v53 = vcombine.high %v7306_v47, %v7314_v25  ;;  %v7513_v54 = vrot.slane %v13649_v52, %v12760_v40 }
0x2a42   :  { %v7936_v23 = vpack.c.bf16 %v7920_v8, %v7920_v8  ;;  %v7919_v59 = vmax.f32 %v7821_v55, 0.0 }
0x2a44   :  { %v13655_v2 = vpop.f32.mrb[208].mxu1  ;;  %v7935_v26 = vpack.c.bf16 %v7919_v59, %v7919_v59  ;;  %v8420_v59 = vrot.slane %v13496_v27, 6 }
0x2a45   :  { %v7863_v21 = vpop.f32.mrb[209].mxu1 }
0x2a46   :  { %8200 = vmatpush1.bf16.xpose.msra.mxu1 %v10635_v32  ;;  %v7865_v30 = vpop.f32.mrb[210].mxu1  ;;  %v7864_v15 = vadd.f32 %v7863_v21, %v7505_v14  ;;  %v10625_v32 = vcombine.low %v7306_v47, %v7314_v25  ;;  %v7307_v21 = vld [vmem:[#allocation3 + $0x38] sm:$0xff] }
0x2a47   :  { %8237 = vmatprep.subr.bf16.mxu1 %v10622_v18  ;;  %v7866_v7 = vpop.f32.mrb[211].mxu1  ;;  %v10642_v18 = vcombine.high %v7322_v6, %v7322_v6  ;;  %v7862_v30 = vadd.f32 %v13655_v2, %v7501_v12  ;;  %v10627_v35 = vcombine.low %v7307_v21, %v7315_v50  ;;  %v11480_v12 = vld [vmem:[#allocation13 + $0x18] sm:$0xff]  }
0x2a48   :  { %v7922_v63 = vmax.f32 %v7864_v15, 0.0  ;;  %v10641_v7 = vcombine.low %v7322_v6, %v7322_v6  ;;  %v8417_v15 = vrot.slane %v13496_v27, 5  ;;  %11033 = vmatpush3.bf16.msra.mxu0 %v11480_v12 }
0x2a49   :  { %11034 = vmatprep.subr.bf16.mxu0 %v12122_v1 }
0x2a4a   :  { %v7938_v10 = vpack.c.bf16 %v7922_v63, %v7922_v63 }
0x2a4c   :  { %v13657_v34 = vpop.f32.mrb[212].mxu1 }
0x2a4d   :  { %8230 = vmatmul.mubr.bf16.vlgmr.msra.gmra.mrb[216].mxu1 %v7931_v24  ;;  %v7904_v22 = vpop.f32.mrb[213].mxu1  ;;  %v10628_v24 = vcombine.high %v7307_v21, %v7315_v50 }
0x2a4e   :  { %8238 = vmatpush1.bf16.xpose.msra.mxu1 %v10621_v45  ;;  %8269 = vmatprep.mubr.bf16.mxu1 %v7934_v33  ;;  %v7906_v38 = vpop.f32.mrb[214].mxu1  ;;  %v7905_v36 = vadd.f32 %v7904_v22, %v7513_v54  ;;  %v7921_v45 = vmax.f32 %v7862_v30, 0.0  ;;  %v7903_v22 = vadd.f32 %v13657_v34, %v7509_v0  ;;  %v11481_v54 = vld [vmem:[#allocation13 + $0x20] ss:$0 sps:$4 sm:$0xff]  }
0x2a4f   :  { %8239 = vmatprep.subr.bf16.mxu1 %v10638_v13  ;;  %v7907_v44 = vpop.f32.mrb[215].mxu1  ;;  %v7323_v13 = vld [vmem:[#allocation3 + $0xb8] sm:$0xff]  ;;  %v8471_v21 = vsel %vm252_vm1, %v11481_v54, 0 }
0x2a50   :  { %v7924_v33 = vmax.f32 %v7905_v36, 0.0  ;;  %v7937_v58 = vpack.c.bf16 %v7921_v45, %v7921_v45  ;;  %v10644_v44 = vcombine.high %v7323_v13, %v7323_v13  ;;  %v10643_v2 = vcombine.low %v7323_v13, %v7323_v13  ;;  %11035 = vmatpush3.bf16.msra.mxu0 %v8471_v21  ;;  %v13689_v13 = vld [vmem:[%s13877_s12 + $0x20] sm:$0xff] }
0x2a51   :  { %v7923_v51 = vmax.f32 %v7903_v22, 0.0  ;;  %11040 = vmatprep.subr.bf16.mxu0 %v12122_v1  ;;  %v8447_v0 = vrot.slane %v13689_v13, 2 }
0x2a52   :  { %v7940_v38 = vpack.c.bf16 %v7924_v33, %v7924_v33 }
0x2a53   :  { %v7939_v57 = vpack.c.bf16 %v7923_v51, %v7923_v51 }
0x2a56   :  { %8240 = vmatpush1.bf16.xpose.msra.mxu1 %v10637_v48 }
0x2a57   :  { %8277 = vmatprep.subr.bf16.mxu1 %v10624_v31 }
0x2a5d   :  { %8270 = vmatmul.mubr.bf16.vlgmr.msra.gmra.mrb[216].mxu1 %v7933_v43 }
0x2a5e   :  { %8278 = vmatpush1.bf16.xpose.msra.mxu1 %v10623_v5  ;;  %8309 = vmatprep.mubr.bf16.mxu1 %v7936_v23 }
0x2a5f   :  { %8279 = vmatprep.subr.bf16.mxu1 %v10640_v19 }
0x2a66   :  { %8280 = vmatpush1.bf16.xpose.msra.mxu1 %v10639_v56 }
0x2a67   :  { %8317 = vmatprep.subr.bf16.mxu1 %v10626_v53 }
0x2a6d   :  { %8310 = vmatmul.mubr.bf16.vlgmr.msra.gmra.mrb[216].mxu1 %v7935_v26 }
0x2a6e   :  { %8318 = vmatpush1.bf16.xpose.msra.mxu1 %v10625_v32  ;;  %8349 = vmatprep.mubr.bf16.mxu1 %v7938_v10 }
0x2a6f   :  { %8319 = vmatprep.subr.bf16.mxu1 %v10642_v18 }
0x2a76   :  { %8320 = vmatpush1.bf16.xpose.msra.mxu1 %v10641_v7 }
0x2a77   :  { %8357 = vmatprep.subr.bf16.mxu1 %v10628_v24 }
0x2a7d   :  { %8350 = vmatmul.mubr.bf16.vlgmr.msra.gmra.mrb[216].mxu1 %v7937_v58 }
0x2a7e   :  { %8358 = vmatpush1.bf16.xpose.msra.mxu1 %v10627_v35  ;;  %8389 = vmatprep.mubr.bf16.mxu1 %v7940_v38  ;;  %v8444_v35 = vrot.slane %v13689_v13, 1 }
0x2a7f   :  { %8359 = vmatprep.subr.bf16.mxu1 %v10644_v44 }
0x2a86   :  { %8360 = vmatpush1.bf16.xpose.msra.mxu1 %v10643_v2 }
0x2a8d   :  { %8390 = vmatmul.mubr.bf16.vlgmr.msra.gmra.mrb[216].mxu1 %v7939_v57  ;;  %v11482_v57 = vld [vmem:[#allocation14 + $0x18] sm:$0xff]  }
0x2b60   :  { %v8391_v48 = vpop.f32.mrb[216].mxu1 }
0x2b61   :  { %v11079_v61 = vadd.f32 %v13369_v9, %v8391_v48  ;;  %v8393_v31 = vpop.f32.mrb[217].mxu1 }
0x2b62   :  { %v8394_v42 = vpop.f32.mrb[218].mxu1 }
0x2b63   :  { %v8398_v8 = vrot.slane %v11079_v61, 7  ;;  %v8395_v41 = vpop.f32.mrb[219].mxu1  ;;  %v11483_v61 = vld [vmem:[#allocation14 + $0x20] ss:$0 sps:$4 sm:$0xff]  }
0x2b64   :  { %v8535_v31 = vsel %vm252_vm1, %v11483_v61, 0 }
0x2b65   :  { %v8400_v43 = vadd.f32 %v8398_v8, %v13573_v11 }
0x2b67   :  { %v8401_v5 = vsel %vm5236_vm4, %v8400_v43, 0.0  ;;  %v8405_v52 = vmul.f32 %v8400_v43, %v8400_v43 }
0x2b68   :  { %8402 = vadd.xlane.f32.xlu0 %v8401_v5 }
0x2b69   :  { %v8406_v23 = vsel %vm5236_vm4, %v8405_v52, 0.0  ;;  %v10650_v52 = vld [vmem:[#allocation17 + $0x2] ss:$0 sm:$0xff] }
0x2b6c   :  { %8407 = vadd.xlane.f32.xlu0 %v8406_v23 }
0x2bf5   :  { %v8403_v34 = vpop.xlane.xlu0 %8402 }
0x2bf6   :  { %v8404_v19 = vmul.f32 0.041666668, %v8403_v34 }
0x2bf8   :  { %v8410_v14 = vmul.f32 %v8404_v19, %v8404_v19  ;;  %v8413_v56 = vsub.f32 %v8400_v43, %v8404_v19 }
0x2bf9   :  { %v8408_v49 = vpop.xlane.xlu0 %8407 }
0x2bfa   :  { %v8409_v47 = vmul.f32 0.041666668, %v8408_v49 }
0x2bfc   :  { %v8411_v25 = vsub.f32 %v8409_v47, %v8410_v14 }
0x2bfe   :  { %v8412_v9 = vmax.f32 %v8411_v25, 0.0 }
0x2c00   :  { %v8414_v55 = vadd.f32 1e-05, %v8412_v9 }
0x2c02   :  { %11486 = vrsqrt.f32 %v8414_v55 }
0x2c0c   :  { %v11487_v11 = vpop.eup %11486 }
0x2c0d   :  { %v8416_v53 = vmul.f32 %v11487_v11, %v8413_v56 }
0x2c0f   :  { %v8419_v63 = vmul.f32 %v8417_v15, %v8416_v53 }
0x2c11   :  { %v8422_v6 = vadd.f32 %v8420_v59, %v8419_v63 }
0x2c13   :  { %v8426_v26 = vadd.f32 %v8422_v6, %v8422_v6 }
0x2c15   :  { %v8427_v32 = vsel %vm5236_vm4, %v8426_v26, 0.0  ;;  %v8431_v10 = vmul.f32 %v8426_v26, %v8426_v26 }
0x2c16   :  { %8428 = vadd.xlane.f32.xlu1 %v8427_v32 }
0x2c17   :  { %v8432_v18 = vsel %vm5236_vm4, %v8431_v10, 0.0  ;;  %v11484_v10 = vld [vmem:[#allocation16 + $0x18] sm:$0xff]  }
0x2c1a   :  { %8433 = vadd.xlane.f32.xlu1 %v8432_v18  ;;  %v11485_v18 = vld [vmem:[#allocation16 + $0x20] ss:$0 sps:$4 sm:$0xff]  }
0x2c1b   :  { %v8771_v12 = vsel %vm252_vm1, %v11485_v18, 0 }
0x2ca3   :  { %v8429_v27 = vpop.xlane.xlu1 %8428 }
0x2ca4   :  { %v8430_v50 = vmul.f32 0.041666668, %v8429_v27 }
0x2ca6   :  { %v8436_v7 = vmul.f32 %v8430_v50, %v8430_v50  ;;  %v8439_v58 = vsub.f32 %v8426_v26, %v8430_v50 }
0x2ca7   :  { %v8434_v30 = vpop.xlane.xlu1 %8433 }
0x2ca8   :  { %v8435_v36 = vmul.f32 0.041666668, %v8434_v30 }
0x2caa   :  { %v8437_v24 = vsub.f32 %v8435_v36, %v8436_v7 }
0x2cac   :  { %v8438_v45 = vmax.f32 %v8437_v24, 0.0 }
0x2cae   :  { %v8440_v33 = vadd.f32 1e-05, %v8438_v45 }
0x2cb0   :  { %11488 = vrsqrt.f32 %v8440_v33 }
0x2cba   :  { %v11489_v38 = vpop.eup %11488 }
0x2cbb   :  { %v8442_v44 = vmul.f32 %v11489_v38, %v8439_v58 }
0x2cbd   :  { %v8446_v2 = vmul.f32 %v8444_v35, %v8442_v44 }
0x2cbf   :  { %v13695_v22 = vadd.f32 %v8447_v0, %v8446_v2 }
0x2cc1   :  { %v8454_v51 = vpack.c.bf16 %v13695_v22, %v13695_v22 }
0x2cc3   :  { %v8456_v48 = vshrl.u32 %v8454_v51, 16 }
0x2cc5   :  { %11037 = vmatmul.mubr.msk.bf16.vlgmr.msra.gmra.mrb[136].mxu0 %vm248_vm2, %v8456_v48 }
0x2cc6   :  { %11041 = vmatpush3.bf16.msra.mxu0 %v11482_v57  ;;  %11044 = vmatprep.mubr.msk.bf16.mxu0 %vm12123_vm0, %v12122_v1 }
0x2cc7   :  { %11042 = vmatprep.subr.bf16.mxu0 %v12122_v1 }
0x2cca   :  { %11043 = vmatpush3.bf16.msra.mxu0 %v8535_v31 }
0x2ccb   :  { %11048 = vmatprep.subr.mxu0 %v12122_v1 }
0x2ccd   :  { %11045 = vmatmul.mubr.msk.bf16.vlgmr.msra.gmra.mrb[140].mxu0 %vm248_vm2, %v13288_v62 }
0x2cce   :  { %11050 = vmatprep.mubr.msk.f32.mxu0 %vm12123_vm0, %v12122_v1 }
0x2d98   :  { %v8507_v42 = vpop.f32.mrb[136].mxu0 }
0x2d99   :  { %v11038_v8 = vpop.f32.mrb[137].mxu0  ;;  %v8508_v5 = vadd.f32 %v13689_v13, %v8507_v42 }
0x2d9a   :  { %v8510_v41 = vpop.f32.mrb[138].mxu0 }
0x2d9b   :  { %v11039_v43 = vpop.f32.mrb[139].mxu0  ;;  %v8584_v23 = vrot.slane %v8508_v5, %v12377_v3 }
0x2d9d   :  { %v8585_v62 = vmul.f32 %v8584_v23, %v12382_v4 }
0x2da0   :  { %v8571_v34 = vpop.f32.mrb[140].mxu0 }
0x2da1   :  { %v8572_v19 = vadd.f32 %v10650_v52, %v8571_v34  ;;  %v11046_v49 = vpop.f32.mrb[141].mxu0 }
0x2da2   :  { %v8574_v14 = vpop.f32.mrb[142].mxu0  ;;  %v8836_v49 = vrot.slane %v13689_v13, 4 }
0x2da3   :  { %v11047_v47 = vpop.f32.mrb[143].mxu0  ;;  %11049 = vmatpush3.xpose.msk.msra.mxu0 %vm248_vm2, %v8572_v19 }
0x2da4   :  { %11053 = vmatprep.subr.mxu0 %v12122_v1 }
0x2da6   :  { %11051 = vmatmul.mubr.msk.f32.vlgmr.msra.gmra.mrb[144].mxu0 %vm248_vm2, %v8585_v62 }
0x2da7   :  { %11055 = vmatprep.mubr.msk.f32.mxu0 %vm12123_vm0, %v12122_v1 }
0x2e79   :  { %v8658_v25 = vpop.f32.mrb[144].mxu0 }
0x2e7a   :  { %v11052_v9 = vpop.f32.mrb[145].mxu0  ;;  %v8662_v55 = vsel %vm5472_vm5, %v8658_v25, -inf }
0x2e7b   :  { %8663 = vmax.xlane.f32.xlu0 %v8662_v55 }
0x2e91   :  { %8673 = vrot.lane.b32.xlu0 %v8572_v19, %s12124_s11  ;;  %v8833_v19 = vrot.slane %v13689_v13, 3 }
0x2f08   :  { %v8664_v56 = vpop.xlane.xlu0 %8663 }
0x2f09   :  { %v8665_v15 = vsub.f32 %v8658_v25, %v8664_v56 }
0x2f0b   :  { %v8666_v11 = vmul.f32 1.442695, %v8665_v15 }
0x2f0c   :  { %v8674_v53 = vpop.permute.xlu0 %8673 }
0x2f0d   :  { %11490 = vpow2.f32 %v8666_v11  ;;  %11054 = vmatpush3.msra.mxu0 %v8674_v53 }
0x2f0e   :  { %11058 = vmatprep.subr.bf16.mxu0 %v12122_v1 }
0x2f17   :  { %v11491_v59 = vpop.eup %11490 }
0x2f18   :  { %v8668_v63 = vsel %vm5472_vm5, %v11491_v59, 0.0 }
0x2f19   :  { %8669 = vadd.xlane.f32.xlu1 %v8668_v63 }
0x2fa6   :  { %v8670_v6 = vpop.xlane.xlu1 %8669 }
0x2fa7   :  { %11492 = vrcp.f32 %v8670_v6 }
0x2fb1   :  { %v11493_v26 = vpop.eup %11492 }
0x2fb2   :  { %v8672_v32 = vmul.f32 %v11493_v26, %v11491_v59 }
0x2fb4   :  { %11056 = vmatmul.mubr.msk.f32.vlgmr.msra.gmra.mrb[146].mxu0 %vm423_vm3, %v8672_v32 }
0x2fb5   :  { %11062 = vmatprep.mubr.msk.bf16.mxu0 %vm12123_vm0, %v12122_v1  ;;  %11059 = vmatpush3.bf16.msra.mxu0 %v11484_v10 }
0x2fb6   :  { %11060 = vmatprep.subr.bf16.mxu0 %v12122_v1 }
0x2fb9   :  { %11061 = vmatpush3.bf16.msra.mxu0 %v8771_v12 }
0x3087   :  { %v8745_v54 = vpop.f32.mrb[146].mxu0 }
0x3088   :  { %v8749_v21 = vmul.f32 %v8745_v54, %v12382_v4  ;;  %v11057_v27 = vpop.f32.mrb[147].mxu0 }
0x308a   :  { %v8750_v50 = vsel %vm5561_vm6, %v8749_v21, 0.0 }
0x308b   :  { %v8751_v30 = vrot.slane %v8750_v50, 4 }
0x308d   :  { %v8752_v7 = vadd.f32 %v8751_v30, %v8750_v50 }
0x308f   :  { %v8753_v36 = vrot.slane %v8752_v7, 2 }
0x3091   :  { %v8754_v24 = vadd.f32 %v8753_v36, %v8752_v7 }
0x3093   :  { %v8755_v45 = vrot.slane %v8754_v24, 1 }
0x3095   :  { %v8756_v33 = vadd.f32 %v8755_v45, %v8754_v24 }
0x3097   :  { %v8757_v58 = vpack.c.bf16 %v8756_v33, %v8756_v33 }
0x3099   :  { %11063 = vmatmul.mubr.msk.bf16.vlgmr.msra.gmra.mrb[148].mxu0 %vm248_vm2, %v8757_v58 }
0x316c   :  { %v8807_v38 = vpop.f32.mrb[148].mxu0 }
0x316d   :  { %v8808_v44 = vadd.f32 %v8807_v38, %v8444_v35  ;;  %v11064_v0 = vpop.f32.mrb[149].mxu0 }
0x316e   :  { %v8810_v2 = vpop.f32.mrb[150].mxu0 }
0x316f   :  { %v8814_v51 = vrot.slane %v8808_v44, 7  ;;  %v11065_v4 = vpop.f32.mrb[151].mxu0 }
0x3171   :  { %v8816_v57 = vadd.f32 %v8814_v51, %v13695_v22 }
0x3173   :  { %v8817_v48 = vsel %vm5236_vm4, %v8816_v57, 0.0  ;;  %v8821_v61 = vmul.f32 %v8816_v57, %v8816_v57 }
0x3174   :  { %8818 = vadd.xlane.f32.xlu1 %v8817_v48 }
0x3175   :  { %v8822_v31 = vsel %vm5236_vm4, %v8821_v61, 0.0 }
0x3178   :  { %8823 = vadd.xlane.f32.xlu1 %v8822_v31 }
0x3201   :  { %v8819_v42 = vpop.xlane.xlu1 %8818 }
0x3202   :  { %v8820_v8 = vmul.f32 0.041666668, %v8819_v42 }
0x3204   :  { %v8826_v43 = vmul.f32 %v8820_v8, %v8820_v8  ;;  %v8829_v34 = vsub.f32 %v8816_v57, %v8820_v8 }
0x3205   :  { %v8824_v41 = vpop.xlane.xlu1 %8823 }
0x3206   :  { %v8825_v5 = vmul.f32 0.041666668, %v8824_v41 }
0x3208   :  { %v8827_v52 = vsub.f32 %v8825_v5, %v8826_v43 }
0x320a   :  { %v8828_v35 = vmax.f32 %v8827_v52, 0.0 }
0x320c   :  { %v8830_v23 = vadd.f32 1e-05, %v8828_v35 }
0x320e   :  { %11494 = vrsqrt.f32 %v8830_v23 }
0x3218   :  { %v11495_v22 = vpop.eup %11494 }
0x3219   :  { %v8832_v14 = vmul.f32 %v11495_v22, %v8829_v34 }
0x321b   :  { %v8835_v47 = vmul.f32 %v8833_v19, %v8832_v14 }
0x321d   :  { %v13736_v62 = vadd.f32 %v8836_v49, %v8835_v47 }
0x321e   :  { %12100 = dma.done.wait [#allocation4 + $0x1], 3072 }
0x321f   :  { %12101 = vsyncadd [#allocation4 + $0x1], 4294964224 }
0x3220   :  { %12102 = dma.done.wait [#allocation4 + $0x3], 3072 }
0x3221   :  { %12103 = vsyncadd [#allocation4 + $0x3], 4294964224  ;;  %9183 = vmatprep.mubr.bf16.mxu0 %v12130_v37  ;;  %11072 = vmatprep.mubr.msk.f32.mxu1 %vm12123_vm0, %v12122_v1  ;;  %v8843_v25 = vld [vmem:[#allocation2 + $0xc0] sm:$0xff]  ;;  %v8844_v59 = vld [vmem:[#allocation2 + $0xc8] sm:$0xff]  ;;  %v8894_v6 = vpack.c.bf16 %v13736_v62, %v13736_v62  ;;  %vm10094_vm7 = vcmask 73728  }
0x3222   :  { %v8851_v9 = vld [vmem:[#allocation2 + $0x100] sm:$0xff]  ;;  %v8852_v63 = vld [vmem:[#allocation2 + $0x108] sm:$0xff]  ;;  %v8845_v27 = vld [vmem:[#allocation2 + $0xd0] sm:$0xff] }
0x3223   :  { %v8859_v55 = vld [vmem:[#allocation2 + $0x140] sm:$0xff]  ;;  %v10663_v56 = vcombine.high %v8843_v25, %v8851_v9  ;;  %v10662_v15 = vcombine.low %v8843_v25, %v8851_v9  ;;  %v10665_v32 = vcombine.high %v8844_v59, %v8852_v63  ;;  %v8860_v10 = vld [vmem:[#allocation2 + $0x148] sm:$0xff]  ;;  %v13745_v18 = vshrl.u32 %v8894_v6, 16  ;;  %v8853_v50 = vld [vmem:[#allocation2 + $0x110] sm:$0xff] }
0x3224   :  { %v10679_v11 = vcombine.high %v8859_v55, %v8859_v55  ;;  %v10678_v53 = vcombine.low %v8859_v55, %v8859_v55  ;;  %v10664_v12 = vcombine.low %v8844_v59, %v8852_v63  ;;  %v10681_v54 = vcombine.high %v8860_v10, %v8860_v10  ;;  %v8861_v36 = vld [vmem:[#allocation2 + $0x150] sm:$0xff]  ;;  %v8846_v58 = vld [vmem:[#allocation2 + $0xd8] sm:$0xff]  ;;  %v8847_v48 = vld [vmem:[#allocation2 + $0xe0] sm:$0xff] }
0x3225   :  { %9151 = vmatprep.subr.bf16.mxu0 %v10663_v56  ;;  %v10680_v21 = vcombine.low %v8860_v10, %v8860_v10  ;;  %v10667_v7 = vcombine.high %v8845_v27, %v8853_v50  ;;  %v10666_v24 = vcombine.low %v8845_v27, %v8853_v50  ;;  %v10683_v45 = vcombine.high %v8861_v36, %v8861_v36  ;;  %v8854_v38 = vld [vmem:[#allocation2 + $0x118] sm:$0xff]  ;;  %v8855_v61 = vld [vmem:[#allocation2 + $0x120] sm:$0xff]  ;;  %v8848_v52 = vld [vmem:[#allocation2 + $0xe8] sm:$0xff] }
0x3226   :  { %9152 = vmatpush1.bf16.msra.mxu0 %v10662_v15  ;;  %v9104_v26 = vsel %vm252_vm1, %v10678_v53, 0  ;;  %v10682_v33 = vcombine.low %v8861_v36, %v8861_v36  ;;  %v10669_v0 = vcombine.high %v8846_v58, %v8854_v38  ;;  %v8862_v2 = vld [vmem:[#allocation2 + $0x158] sm:$0xff]  ;;  %v10668_v51 = vcombine.low %v8846_v58, %v8854_v38  ;;  %v8863_v8 = vld [vmem:[#allocation2 + $0x160] sm:$0xff]  ;;  %v8856_v35 = vld [vmem:[#allocation2 + $0x128] sm:$0xff] }
0x3227   :  { %10694 = vmatprep.subr.msk.bf16.mxu0 %vm252_vm1, %v10679_v11  ;;  %v9110_v30 = vsel %vm252_vm1, %v10680_v21, 0  ;;  %v10685_v4 = vcombine.high %v8862_v2, %v8862_v2  ;;  %v10684_v57 = vcombine.low %v8862_v2, %v8862_v2  ;;  %v10671_v42 = vcombine.high %v8847_v48, %v8855_v61  ;;  %v8864_v19 = vld [vmem:[#allocation2 + $0x168] sm:$0xff]  ;;  %v8849_v47 = vld [vmem:[#allocation2 + $0xf0] sm:$0xff]  ;;  %v8850_v59 = vld [vmem:[#allocation2 + $0xf8] sm:$0xff] }
0x3228   :  { %v9116_v44 = vsel %vm252_vm1, %v10682_v33, 0  ;;  %v10670_v41 = vcombine.low %v8847_v48, %v8855_v61  ;;  %v10687_v43 = vcombine.high %v8863_v8, %v8863_v8  ;;  %v10686_v5 = vcombine.low %v8863_v8, %v8863_v8  ;;  %v8857_v25 = vld [vmem:[#allocation2 + $0x130] sm:$0xff]  ;;  %v8858_v63 = vld [vmem:[#allocation2 + $0x138] sm:$0xff]  ;;  %v8870_v21 = vld [vmem:[#allocation3 + $0xc0] sm:$0xff] }
0x3229   :  { %v9122_v31 = vsel %vm252_vm1, %v10684_v57, 0  ;;  %v10673_v34 = vcombine.high %v8848_v52, %v8856_v35  ;;  %v10672_v22 = vcombine.low %v8848_v52, %v8856_v35  ;;  %v10689_v49 = vcombine.high %v8864_v19, %v8864_v19  ;;  %v8865_v56 = vld [vmem:[#allocation2 + $0x170] sm:$0xff]  ;;  %v8878_v27 = vld [vmem:[#allocation3 + $0x100] sm:$0xff]  ;;  %v8871_v33 = vld [vmem:[#allocation3 + $0xc8] sm:$0xff] }
0x322a   :  { %9154 = vmatpush1.bf16.msra.mxu0 %v9104_v26  ;;  %v9128_v23 = vsel %vm252_vm1, %v10686_v5, 0  ;;  %v10688_v14 = vcombine.low %v8864_v19, %v8864_v19  ;;  %v10675_v55 = vcombine.high %v8849_v47, %v8857_v25  ;;  %v10674_v15 = vcombine.low %v8849_v47, %v8857_v25  ;;  %v8886_v36 = vld [vmem:[#allocation3 + $0x140] sm:$0xff]  ;;  %v8879_v58 = vld [vmem:[#allocation3 + $0x108] sm:$0xff]  ;;  %v8872_v47 = vld [vmem:[#allocation3 + $0xd0] sm:$0xff] }
0x322b   :  { %9192 = vmatprep.subr.bf16.mxu0 %v10665_v32  ;;  %v10691_v11 = vcombine.high %v8865_v56, %v8865_v56  ;;  %v10690_v53 = vcombine.low %v8865_v56, %v8865_v56  ;;  %v10677_v26 = vcombine.high %v8850_v59, %v8858_v63  ;;  %v8866_v32 = vld [vmem:[#allocation2 + $0x178] sm:$0xff]  ;;  %v10676_v10 = vcombine.low %v8850_v59, %v8858_v63  ;;  %v8887_v8 = vld [vmem:[#allocation3 + $0x148] sm:$0xff]  ;;  %v8880_v25 = vld [vmem:[#allocation3 + $0x110] sm:$0xff] }
0x322c   :  { %v9134_v9 = vsel %vm252_vm1, %v10688_v14, 0  ;;  %v10712_v38 = vcombine.low %v8871_v33, %v8879_v58  ;;  %v10729_v52 = vcombine.high %v8887_v8, %v8887_v8  ;;  %v10728_v56 = vcombine.low %v8887_v8, %v8887_v8 }
0x322d   :  { %10695 = vmatmul.mubr.msk.bf16.vlgmr.msra.gmra.mrb[152].mxu0 %vm248_vm2, %v13745_v18  ;;  %v9140_v6 = vsel %vm252_vm1, %v10690_v53, 0 }
0x322e   :  { %9193 = vmatpush1.bf16.msra.mxu0 %v10664_v12  ;;  %9224 = vmatprep.mubr.bf16.mxu0 %v12130_v37  ;;  %v10693_v12 = vcombine.high %v8866_v32, %v8866_v32 }
0x322f   :  { %10696 = vmatprep.subr.msk.bf16.mxu0 %vm252_vm1, %v10681_v54  ;;  %v10692_v54 = vcombine.low %v8866_v32, %v8866_v32 }
0x3231   :  { %v9146_v50 = vsel %vm252_vm1, %v10692_v54, 0 }
0x3232   :  { %9195 = vmatpush1.bf16.msra.mxu0 %v9110_v30  ;;  %v10711_v30 = vcombine.high %v8870_v21, %v8878_v27 }
0x3233   :  { %9233 = vmatprep.subr.bf16.mxu0 %v10667_v7  ;;  %v10710_v7 = vcombine.low %v8870_v21, %v8878_v27  ;;  %v10714_v21 = vcombine.low %v8872_v47, %v8880_v25 }
0x3235   :  { %10697 = vmatmul.mubr.msk.bf16.vlgmr.msra.gmra.mrb[156].mxu0 %vm248_vm2, %v13745_v18 }
0x3236   :  { %9234 = vmatpush1.bf16.msra.mxu0 %v10666_v24  ;;  %9265 = vmatprep.mubr.bf16.mxu0 %v12130_v37  ;;  %v10727_v24 = vcombine.high %v8886_v36, %v8886_v36 }
0x3237   :  { %10698 = vmatprep.subr.msk.bf16.mxu0 %vm252_vm1, %v10683_v45  ;;  %v10726_v45 = vcombine.low %v8886_v36, %v8886_v36 }
0x323a   :  { %9236 = vmatpush1.bf16.msra.mxu0 %v9116_v44  ;;  %v13787_v44 = vld [vmem:[%s13878_s13 + $0x50] sm:$0xff] }
0x323b   :  { %9274 = vmatprep.subr.bf16.mxu0 %v10669_v0  ;;  %v9027_v0 = vrot.slane %v13787_v44, %v12655_v28 }
0x323d   :  { %10699 = vmatmul.mubr.msk.bf16.vlgmr.msra.gmra.mrb[160].mxu0 %vm248_vm2, %v13745_v18 }
0x323e   :  { %9275 = vmatpush1.bf16.msra.mxu0 %v10668_v51  ;;  %9306 = vmatprep.mubr.bf16.mxu0 %v12130_v37 }
0x323f   :  { %10700 = vmatprep.subr.msk.bf16.mxu0 %vm252_vm1, %v10685_v4 }
0x3242   :  { %9277 = vmatpush1.bf16.msra.mxu0 %v9122_v31 }
0x3243   :  { %9315 = vmatprep.subr.bf16.mxu0 %v10671_v42 }
0x3245   :  { %10701 = vmatmul.mubr.msk.bf16.vlgmr.msra.gmra.mrb[164].mxu0 %vm248_vm2, %v13745_v18 }
0x3246   :  { %9316 = vmatpush1.bf16.msra.mxu0 %v10670_v41  ;;  %9347 = vmatprep.mubr.bf16.mxu0 %v12130_v37 }
0x3247   :  { %10702 = vmatprep.subr.msk.bf16.mxu0 %vm252_vm1, %v10687_v43  ;;  %v9035_v43 = vrot.slane %v13787_v44, %v12717_v17 }
0x324a   :  { %9318 = vmatpush1.bf16.msra.mxu0 %v9128_v23  ;;  %v9031_v23 = vrot.slane %v13787_v44, %v12658_v29 }
0x324b   :  { %9356 = vmatprep.subr.bf16.mxu0 %v10673_v34 }
0x324d   :  { %10703 = vmatmul.mubr.msk.bf16.vlgmr.msra.gmra.mrb[168].mxu0 %vm248_vm2, %v13745_v18 }
0x324e   :  { %9357 = vmatpush1.bf16.msra.mxu0 %v10672_v22  ;;  %9388 = vmatprep.mubr.bf16.mxu0 %v12130_v37 }
0x324f   :  { %10704 = vmatprep.subr.msk.bf16.mxu0 %vm252_vm1, %v10689_v49 }
0x3252   :  { %9359 = vmatpush1.bf16.msra.mxu0 %v9134_v9 }
0x3253   :  { %9397 = vmatprep.subr.bf16.mxu0 %v10675_v55 }
0x3255   :  { %10705 = vmatmul.mubr.msk.bf16.vlgmr.msra.gmra.mrb[172].mxu0 %vm248_vm2, %v13745_v18 }
0x3256   :  { %9398 = vmatpush1.bf16.msra.mxu0 %v10674_v15  ;;  %9429 = vmatprep.mubr.bf16.mxu0 %v12130_v37  ;;  %v9043_v15 = vrot.slane %v13787_v44, %v12726_v46 }
0x3257   :  { %10706 = vmatprep.subr.msk.bf16.mxu0 %vm252_vm1, %v10691_v11  ;;  %v10715_v11 = vcombine.high %v8872_v47, %v8880_v25  ;;  %v8882_v47 = vld [vmem:[#allocation3 + $0x120] sm:$0xff] }
0x325a   :  { %9400 = vmatpush1.bf16.msra.mxu0 %v9140_v6 }
0x325b   :  { %9438 = vmatprep.subr.bf16.mxu0 %v10677_v26 }
0x325d   :  { %10707 = vmatmul.mubr.msk.bf16.vlgmr.msra.gmra.mrb[176].mxu0 %vm248_vm2, %v13745_v18 }
0x325e   :  { %9439 = vmatpush1.bf16.msra.mxu0 %v10676_v10  ;;  %9470 = vmatprep.mubr.bf16.mxu0 %v12130_v37  ;;  %v10713_v37 = vcombine.high %v8871_v33, %v8879_v58  ;;  %v8873_v58 = vld [vmem:[#allocation3 + $0xd8] sm:$0xff] }
0x325f   :  { %10708 = vmatprep.subr.msk.bf16.mxu0 %vm252_vm1, %v10693_v12  ;;  %v8888_v12 = vld [vmem:[#allocation3 + $0x150] sm:$0xff] }
0x3262   :  { %9441 = vmatpush1.bf16.msra.mxu0 %v9146_v50  ;;  %v10731_v50 = vcombine.high %v8888_v12, %v8888_v12 }
0x3263   :  { %9647 = vmatprep.subr.bf16.mxu0 %v10711_v30 }
0x3265   :  { %10709 = vmatmul.mubr.msk.bf16.vlgmr.msra.gmra.mrb[180].mxu0 %vm248_vm2, %v13745_v18  ;;  %v9023_v18 = vrot.slane %v13787_v44, %v12377_v3 }
0x326b   :  { %9648 = vmatpush1.bf16.xpose.msra.mxu0 %v10710_v7  ;;  %v9039_v7 = vrot.slane %v13787_v44, %v12750_v20 }
0x326c   :  { %9649 = vmatprep.subr.bf16.mxu0 %v10727_v24  ;;  %v9051_v24 = vrot.slane %v13787_v44, %v12760_v40 }
0x3273   :  { %9650 = vmatpush1.bf16.xpose.msra.mxu0 %v10726_v45 }
0x3274   :  { %9687 = vmatprep.subr.bf16.mxu0 %v10713_v37  ;;  %v8881_v37 = vld [vmem:[#allocation3 + $0x118] sm:$0xff] }
0x3300   :  { %v9185_v2 = vpop.f32.mrb[152].mxu0 }
0x3301   :  { %v9186_v51 = vadd.f32 %v9185_v2, %v9023_v18  ;;  %v9187_v4 = vpop.f32.mrb[153].mxu0  ;;  %v10730_v18 = vcombine.low %v8888_v12, %v8888_v12  ;;  %v10717_v2 = vcombine.high %v8873_v58, %v8881_v37 }
0x3302   :  { %v9188_v57 = vadd.f32 %v9187_v4, %v9027_v0  ;;  %v9189_v48 = vpop.f32.mrb[154].mxu0 }
0x3303   :  { %v9479_v61 = vmax.f32 %v9186_v51, 0.0  ;;  %v9190_v31 = vpop.f32.mrb[155].mxu0 }
0x3304   :  { %v9480_v42 = vmax.f32 %v9188_v57, 0.0 }
0x3305   :  { %v9495_v5 = vpack.c.bf16 %v9479_v61, %v9479_v61 }
0x3306   :  { %v9496_v41 = vpack.c.bf16 %v9480_v42, %v9480_v42  ;;  %v8889_v42 = vld [vmem:[#allocation3 + $0x158] sm:$0xff] }
0x3308   :  { %9679 = vmatprep.mubr.bf16.mxu0 %v9496_v41  ;;  %v9226_v35 = vpop.f32.mrb[156].mxu0  ;;  %v10716_v41 = vcombine.low %v8873_v58, %v8881_v37 }
0x3309   :  { %9680 = vmatmul.mubr.bf16.vlgmr.msra.gmra.mrb[184].mxu0 %v9495_v5  ;;  %v9228_v34 = vpop.f32.mrb[157].mxu0  ;;  %v9227_v9 = vadd.f32 %v9226_v35, %v9031_v23  ;;  %v10733_v5 = vcombine.high %v8889_v42, %v8889_v42  ;;  %v9047_v23 = vrot.slane %v13787_v44, %v12755_v16 }
0x330a   :  { %9688 = vmatpush1.bf16.xpose.msra.mxu0 %v10712_v38  ;;  %v9229_v19 = vadd.f32 %v9228_v34, %v9035_v43  ;;  %v9230_v22 = vpop.f32.mrb[158].mxu0 }
0x330b   :  { %v9231_v49 = vpop.f32.mrb[159].mxu0  ;;  %9689 = vmatprep.subr.bf16.mxu0 %v10729_v52  ;;  %v9481_v59 = vmax.f32 %v9227_v9, 0.0  ;;  %v13806_v52 = vld [vmem:[%s13878_s13 + $0x58] sm:$0xff]  ;;  %v10732_v9 = vcombine.low %v8889_v42, %v8889_v42 }
0x330c   :  { %v9482_v14 = vmax.f32 %v9229_v19, 0.0  ;;  %v9059_v19 = vrot.slane %v13806_v52, %v12655_v28 }
0x330d   :  { %v9497_v54 = vpack.c.bf16 %v9481_v59, %v9481_v59 }
0x330e   :  { %v9498_v55 = vpack.c.bf16 %v9482_v14, %v9482_v14  ;;  %v8874_v14 = vld [vmem:[#allocation3 + $0xe0] sm:$0xff] }
0x3310   :  { %9719 = vmatprep.mubr.bf16.mxu0 %v9498_v55  ;;  %v9267_v53 = vpop.f32.mrb[160].mxu0 }
0x3311   :  { %v9269_v63 = vpop.f32.mrb[161].mxu0  ;;  %v9268_v38 = vadd.f32 %v9267_v53, %v9039_v7  ;;  %v8875_v7 = vld [vmem:[#allocation3 + $0xe8] sm:$0xff] }
0x3312   :  { %9690 = vmatpush1.bf16.xpose.msra.mxu0 %v10728_v56  ;;  %v9270_v6 = vadd.f32 %v9269_v63, %v9043_v15  ;;  %v9271_v26 = vpop.f32.mrb[162].mxu0  ;;  %v10719_v56 = vcombine.high %v8874_v14, %v8882_v47 }
0x3313   :  { %9727 = vmatprep.subr.bf16.mxu0 %v10715_v11  ;;  %v9272_v32 = vpop.f32.mrb[163].mxu0  ;;  %v9483_v4 = vmax.f32 %v9268_v38, 0.0  ;;  %v10718_v26 = vcombine.low %v8874_v14, %v8882_v47 }
0x3314   :  { %v9484_v10 = vmax.f32 %v9270_v6, 0.0  ;;  %v8890_v6 = vld [vmem:[#allocation3 + $0x160] sm:$0xff] }
0x3315   :  { %v9499_v8 = vpack.c.bf16 %v9483_v4, %v9483_v4 }
0x3316   :  { %v9500_v27 = vpack.c.bf16 %v9484_v10, %v9484_v10  ;;  %v10735_v10 = vcombine.high %v8890_v6, %v8890_v6 }
0x3318   :  { %v9308_v30 = vpop.f32.mrb[164].mxu0 }
0x3319   :  { %9720 = vmatmul.mubr.bf16.vlgmr.msra.gmra.mrb[184].mxu0 %v9497_v54  ;;  %v9310_v36 = vpop.f32.mrb[165].mxu0  ;;  %v9309_v25 = vadd.f32 %v9308_v30, %v9047_v23  ;;  %v9055_v54 = vrot.slane %v13806_v52, %v12377_v3  ;;  %v8891_v3 = vld [vmem:[#allocation3 + $0x168] sm:$0xff] }
0x331a   :  { %9728 = vmatpush1.bf16.xpose.msra.mxu0 %v10714_v21  ;;  %9759 = vmatprep.mubr.bf16.mxu0 %v9500_v27  ;;  %v9312_v45 = vpop.f32.mrb[166].mxu0  ;;  %v9311_v0 = vadd.f32 %v9310_v36, %v9051_v24  ;;  %v9067_v27 = vrot.slane %v13806_v52, %v12717_v17  ;;  %v8883_v36 = vld [vmem:[#allocation3 + $0x128] sm:$0xff]  ;;  %v10737_v4 = vcombine.high %v8891_v3, %v8891_v3 }
0x331b   :  { %9729 = vmatprep.subr.bf16.mxu0 %v10731_v50  ;;  %v9313_v33 = vpop.f32.mrb[167].mxu0  ;;  %v9485_v11 = vmax.f32 %v9309_v25, 0.0  ;;  %v10734_v45 = vcombine.low %v8890_v6, %v8890_v6  ;;  %v10721_v58 = vcombine.high %v8875_v7, %v8883_v36  ;;  %v9063_v17 = vrot.slane %v13806_v52, %v12658_v29 }
0x331c   :  { %v9486_v48 = vmax.f32 %v9311_v0, 0.0  ;;  %v10720_v0 = vcombine.low %v8875_v7, %v8883_v36 }
0x331d   :  { %v9501_v28 = vpack.c.bf16 %v9485_v11, %v9485_v11  ;;  %v8893_v11 = vld [vmem:[#allocation3 + $0x178] sm:$0xff] }
0x331e   :  { %v9502_v43 = vpack.c.bf16 %v9486_v48, %v9486_v48  ;;  %v8884_v48 = vld [vmem:[#allocation3 + $0x130] sm:$0xff] }
0x3320   :  { %v9349_v51 = vpop.f32.mrb[168].mxu0 }
0x3321   :  { %v9351_v57 = vpop.f32.mrb[169].mxu0  ;;  %v9350_v24 = vadd.f32 %v9349_v51, %v9055_v54  ;;  %v9075_v51 = vrot.slane %v13806_v52, %v12726_v46  ;;  %v9071_v46 = vrot.slane %v13806_v52, %v12750_v20 }
0x3322   :  { %9730 = vmatpush1.bf16.xpose.msra.mxu0 %v10730_v18  ;;  %v9353_v61 = vpop.f32.mrb[170].mxu0  ;;  %v9352_v55 = vadd.f32 %v9351_v57, %v9059_v19  ;;  %v8876_v57 = vld [vmem:[#allocation3 + $0xf0] sm:$0xff] }
0x3323   :  { %9767 = vmatprep.subr.bf16.mxu0 %v10717_v2  ;;  %v9354_v31 = vpop.f32.mrb[171].mxu0  ;;  %v9487_v37 = vmax.f32 %v9350_v24, 0.0 }
0x3324   :  { %v9488_v44 = vmax.f32 %v9352_v55, 0.0  ;;  %v10736_v31 = vcombine.low %v8891_v3, %v8891_v3 }
0x3325   :  { %v9503_v18 = vpack.c.bf16 %v9487_v37, %v9487_v37 }
0x3326   :  { %v9504_v32 = vpack.c.bf16 %v9488_v44, %v9488_v44 }
0x3328   :  { %v9390_v35 = vpop.f32.mrb[172].mxu0 }
0x3329   :  { %9760 = vmatmul.mubr.bf16.vlgmr.msra.gmra.mrb[184].mxu0 %v9499_v8  ;;  %v9392_v34 = vpop.f32.mrb[173].mxu0  ;;  %v9391_v61 = vadd.f32 %v9390_v35, %v9063_v17  ;;  %v10723_v8 = vcombine.high %v8876_v57, %v8884_v48  ;;  %v9083_v35 = vrot.slane %v13806_v52, %v12760_v40  ;;  %v9079_v40 = vrot.slane %v13806_v52, %v12755_v16 }
0x332a   :  { %9768 = vmatpush1.bf16.xpose.msra.mxu0 %v10716_v41  ;;  %9799 = vmatprep.mubr.bf16.mxu0 %v9502_v43  ;;  %v9394_v22 = vpop.f32.mrb[174].mxu0  ;;  %v9393_v33 = vadd.f32 %v9392_v34, %v9067_v27  ;;  %v10722_v34 = vcombine.low %v8876_v57, %v8884_v48  ;;  %v10016_v57 = vld [vmem:[%s13880_s15] sm:$0xff]  ;;  %v10017_v48 = vld [vmem:[%s13880_s15 + $0x8] sm:$0xff] }
0x332b   :  { %9769 = vmatprep.subr.bf16.mxu0 %v10733_v5  ;;  %v9395_v49 = vpop.f32.mrb[175].mxu0  ;;  %v9489_v41 = vmax.f32 %v9391_v61, 0.0  ;;  %v8892_v5 = vld [vmem:[#allocation3 + $0x170] sm:$0xff]  ;;  %v8877_v22 = vld [vmem:[#allocation3 + $0xf8] sm:$0xff]  ;;  %v12131_v61 = vmov 0.0|0.0  }
0x332c   :  { %v9490_v38 = vmax.f32 %v9393_v33, 0.0  ;;  %v10739_v19 = vcombine.high %v8892_v5, %v8892_v5  ;;  %v8885_v49 = vld [vmem:[#allocation3 + $0x138] sm:$0xff]  ;;  %v10738_v47 = vcombine.low %v8892_v5, %v8892_v5  ;;  %11075 = vmatprep.subr.bf16.mxu1 %v12131_v61 }
0x332d   :  { %v9505_v23 = vpack.c.bf16 %v9489_v41, %v9489_v41  ;;  %v10724_v20 = vcombine.low %v8877_v22, %v8885_v49 }
0x332e   :  { %v9506_v2 = vpack.c.bf16 %v9490_v38, %v9490_v38  ;;  %v9987_v38 = vrot.slane %v13689_v13, 5 }
0x3330   :  { %v13812_v15 = vpop.f32.mrb[176].mxu0 }
0x3331   :  { %v9433_v53 = vpop.f32.mrb[177].mxu0  ;;  %v9432_v14 = vadd.f32 %v13812_v15, %v9071_v46  ;;  %v10740_v15 = vcombine.low %v8893_v11, %v8893_v11  ;;  %v10010_v46 = vrot.slane %v13282_v60, 1 }
0x3332   :  { %9770 = vmatpush1.bf16.xpose.msra.mxu0 %v10732_v9  ;;  %v9435_v59 = vpop.f32.mrb[178].mxu0  ;;  %v9434_v42 = vadd.f32 %v9433_v53, %v9075_v51  ;;  %v10725_v9 = vcombine.high %v8877_v22, %v8885_v49 }
0x3333   :  { %9807 = vmatprep.subr.bf16.mxu0 %v10719_v56  ;;  %v9436_v63 = vpop.f32.mrb[179].mxu0  ;;  %v9491_v55 = vmax.f32 %v9432_v14, 0.0  ;;  %v10741_v59 = vcombine.high %v8893_v11, %v8893_v11 }
0x3334   :  { %v9492_v43 = vmax.f32 %v9434_v42, 0.0 }
0x3335   :  { %v9507_v53 = vpack.c.bf16 %v9491_v55, %v9491_v55 }
0x3336   :  { %v9508_v29 = vpack.c.bf16 %v9492_v43, %v9492_v43 }
0x3338   :  { %v13814_v12 = vpop.f32.mrb[180].mxu0 }
0x3339   :  { %9800 = vmatmul.mubr.bf16.vlgmr.msra.gmra.mrb[184].mxu0 %v9501_v28  ;;  %v9474_v21 = vpop.f32.mrb[181].mxu0  ;;  %v9473_v63 = vadd.f32 %v13814_v12, %v9079_v40 }
0x333a   :  { %9808 = vmatpush1.bf16.xpose.msra.mxu0 %v10718_v26  ;;  %9839 = vmatprep.mubr.bf16.mxu0 %v9504_v32  ;;  %v9476_v50 = vpop.f32.mrb[182].mxu0  ;;  %v9475_v25 = vadd.f32 %v9474_v21, %v9083_v35 }
0x333b   :  { %9809 = vmatprep.subr.bf16.mxu0 %v10735_v10  ;;  %v9477_v30 = vpop.f32.mrb[183].mxu0  ;;  %v9493_v6 = vmax.f32 %v9473_v63, 0.0 }
0x333c   :  { %v9494_v56 = vmax.f32 %v9475_v25, 0.0  ;;  %v10019_v25 = vld [vmem:[#allocation20] sm:$0x1] }
0x333d   :  { %v9509_v28 = vpack.c.bf16 %v9493_v6, %v9493_v6 }
0x333e   :  { %v9510_v44 = vpack.c.bf16 %v9494_v56, %v9494_v56 }
0x3342   :  { %9810 = vmatpush1.bf16.xpose.msra.mxu0 %v10734_v45 }
0x3343   :  { %9847 = vmatprep.subr.bf16.mxu0 %v10721_v58 }
0x3349   :  { %9840 = vmatmul.mubr.bf16.vlgmr.msra.gmra.mrb[184].mxu0 %v9503_v18  ;;  %v9990_v18 = vrot.slane %v13689_v13, 6  ;;  %v11076_v13 = vpack.c.bf16 %v10017_v48, %v10016_v57 }
0x334a   :  { %9848 = vmatpush1.bf16.xpose.msra.mxu0 %v10720_v0  ;;  %9879 = vmatprep.mubr.bf16.mxu0 %v9506_v2 }
0x334b   :  { %9849 = vmatprep.subr.bf16.mxu0 %v10737_v4  ;;  %11077 = vmatpush3.bf16.msra.mxu1 %v11076_v13 }
0x334c   :  { %11070 = vmatprep.subr.mxu1 %v12122_v1  ;;  %v10013_v1 = vrot.slane %v13282_v60, 2 }
0x3352   :  { %9850 = vmatpush1.bf16.xpose.msra.mxu0 %v10736_v31  ;;  %v10018_v31 = vld [vmem:[%s13880_s15 + $0x10] sm:$0xff]  ;;  %s12132_s15 = smov [#allocation22]  }
0x3353   :  { %9887 = vmatprep.subr.bf16.mxu0 %v10723_v8  ;;  %11071 = vmatpush3.msra.mxu1 %v10018_v31  ;;  %s10102_s6 = sshll.u32 %s12132_s15, 4  ;;  %s10103_s6 = int_to_ptr.vmem [resolvable:$true] %s10102_s6 }
0x3354   :  { %s12046_s14 = scalar_lea.vmem %s10103_s6, 16  ;;  %s12050_s2 = scalar_lea.vmem %s10103_s6, 32 }
0x3355   :  { %p12047_p8 = scmp.ne.s32.totalorder %s10103_s6, %s12046_s14  ;;  %p12051_p9 = scmp.lt.s32.totalorder %s10103_s6, %s10103_s6 }
0x3356   :  { %p12052_p2 = scmp.lt.s32.totalorder %s12050_s2, %s12046_s14 }
0x3358   :  { %p12053_p3 = por %p12052_p2, %p12051_p9 }
0x3359   :  { %9880 = vmatmul.mubr.bf16.vlgmr.msra.gmra.mrb[184].mxu0 %v9505_v23 }
0x335a   :  { %9888 = vmatpush1.bf16.xpose.msra.mxu0 %v10722_v34  ;;  %9919 = vmatprep.mubr.bf16.mxu0 %v9508_v29  ;;  %p12054_p4 = pnand %p12053_p3, %p12047_p8 }
0x335b   :  { %9889 = vmatprep.subr.bf16.mxu0 %v10739_v19 }
0x3362   :  { %9890 = vmatpush1.bf16.xpose.msra.mxu0 %v10738_v47 }
0x3363   :  { %9927 = vmatprep.subr.bf16.mxu0 %v10725_v9 }
0x3369   :  { %9920 = vmatmul.mubr.bf16.vlgmr.msra.gmra.mrb[184].mxu0 %v9507_v53 }
0x336a   :  { %9928 = vmatpush1.bf16.xpose.msra.mxu0 %v10724_v20  ;;  %9959 = vmatprep.mubr.bf16.mxu0 %v9510_v44 }
0x336b   :  { %9929 = vmatprep.subr.bf16.mxu0 %v10741_v59 }
0x3372   :  { %9930 = vmatpush1.bf16.xpose.msra.mxu0 %v10740_v15 }
0x3379   :  { %9960 = vmatmul.mubr.bf16.vlgmr.msra.gmra.mrb[184].mxu0 %v9509_v28 }
0x344c   :  { %v9961_v26 = vpop.f32.mrb[184].mxu0 }
0x344d   :  { %v11080_v32 = vadd.f32 %v13582_v39, %v9961_v26  ;;  %v9963_v10 = vpop.f32.mrb[185].mxu0 }
0x344e   :  { %v9964_v54 = vpop.f32.mrb[186].mxu0 }
0x344f   :  { %v9968_v21 = vrot.slane %v11080_v32, 7  ;;  %v9965_v27 = vpop.f32.mrb[187].mxu0 }
0x3451   :  { %v9970_v50 = vadd.f32 %v9968_v21, %v13736_v62 }
0x3453   :  { %v9971_v30 = vsel %vm5236_vm4, %v9970_v50, 0.0  ;;  %v9975_v16 = vmul.f32 %v9970_v50, %v9970_v50 }
0x3454   :  { %9972 = vadd.xlane.f32.xlu0 %v9971_v30 }
0x3455   :  { %v9976_v52 = vsel %vm5236_vm4, %v9975_v16, 0.0 }
0x3458   :  { %9977 = vadd.xlane.f32.xlu0 %v9976_v52 }
0x34e1   :  { %v9973_v12 = vpop.xlane.xlu0 %9972 }
0x34e2   :  { %v9974_v7 = vmul.f32 0.041666668, %v9973_v12 }
0x34e4   :  { %v9980_v24 = vmul.f32 %v9974_v7, %v9974_v7  ;;  %v9983_v37 = vsub.f32 %v9970_v50, %v9974_v7 }
0x34e5   :  { %v9978_v36 = vpop.xlane.xlu0 %9977 }
0x34e6   :  { %v9979_v45 = vmul.f32 0.041666668, %v9978_v36 }
0x34e8   :  { %v9981_v33 = vsub.f32 %v9979_v45, %v9980_v24 }
0x34ea   :  { %v9982_v39 = vmax.f32 %v9981_v33, 0.0 }
0x34ec   :  { %v9984_v58 = vadd.f32 1e-05, %v9982_v39 }
0x34ee   :  { %11528 = vrsqrt.f32 %v9984_v58 }
0x34f8   :  { %v11529_v62 = vpop.eup %11528 }
0x34f9   :  { %v9986_v3 = vmul.f32 %v11529_v62, %v9983_v37 }
0x34fb   :  { %v9989_v0 = vmul.f32 %v9987_v38, %v9986_v3 }
0x34fd   :  { %v9992_v2 = vadd.f32 %v9990_v18, %v9989_v0 }
0x34ff   :  { %v9993_v4 = vsel %vm5236_vm4, %v9992_v2, 0.0  ;;  %v9997_v17 = vmul.f32 %v9992_v2, %v9992_v2 }
0x3500   :  { %9994 = vadd.xlane.f32.xlu1 %v9993_v4 }
0x3501   :  { %v9998_v51 = vsel %vm5236_vm4, %v9997_v17, 0.0 }
0x3504   :  { %9999 = vadd.xlane.f32.xlu1 %v9998_v51 }
0x358d   :  { %v9995_v42 = vpop.xlane.xlu1 %9994 }
0x358e   :  { %v9996_v8 = vmul.f32 0.041666668, %v9995_v42 }
0x3590   :  { %v10002_v43 = vmul.f32 %v9996_v8, %v9996_v8  ;;  %v10005_v19 = vsub.f32 %v9992_v2, %v9996_v8 }
0x3591   :  { %v10000_v41 = vpop.xlane.xlu1 %9999 }
0x3592   :  { %v10001_v5 = vmul.f32 0.041666668, %v10000_v41 }
0x3594   :  { %v10003_v23 = vsub.f32 %v10001_v5, %v10002_v43 }
0x3596   :  { %v10004_v34 = vmax.f32 %v10003_v23, 0.0 }
0x3598   :  { %v10006_v29 = vadd.f32 1e-05, %v10004_v34 }
0x359a   :  { %11530 = vrsqrt.f32 %v10006_v29 }
0x35a4   :  { %v11531_v35 = vpop.eup %11530 }
0x35a5   :  { %v10008_v22 = vmul.f32 %v11531_v35, %v10005_v19 }
0x35a7   :  { %v10012_v49 = vmul.f32 %v10010_v46, %v10008_v22 }
0x35a9   :  { %v10015_v14 = vadd.f32 %v10013_v1, %v10012_v49 }
0x35ab   :  { %v10021_v47 = vrot.slane %v10015_v14, 1 }
0x35ad   :  { %11073 = vmatmul.mubr.msk.f32.vlgmr.msra.gmra.mrb[220].mxu1 %vm248_vm2, %v10021_v47 }
0x3680   :  { %v10090_v9 = vpop.f32.mrb[220].mxu1 }
0x3681   :  { %v10091_v55 = vadd.f32 %v10090_v9, %v10019_v25  ;;  %v11074_v56 = vpop.f32.mrb[221].mxu1 }
0x3683   :  { %10095 = vst.msk [vmem:[#allocation22] sm:$0x1] %vm10094_vm7, %v10091_v55 }
0x3684   :  { %12057 = shalt.err (!%p12054_p4)
}
0x3685   :  { %s12058_s0 = scalar_lea.hbm %s13884_s19, 16 }
0x3686   :  { %p12059_p6 = scmp.ne.s32.totalorder %s13884_s19, %s12058_s0  ;;  %p12062_p7 = scmp.lt.u32.totalorder %s12058_s0, %s13884_s19 }
0x3688   :  { %p12064_p5 = pnand %p12062_p7, %p12059_p6 }
0x368a   :  { %12067 = shalt.err (!%p12064_p5)
}
0x368b   :  { %10105 = dma.vmem_to_hbm [thread:$0]  %s10103_s6, 16, %s13884_s19, [#allocation7]  }
0x368c   :  { %12104 = dma.done.wait [#allocation7], 16  }
0x368d   :  { %12105 = vsyncadd [#allocation7], 4294967280 }
0x368e   :  { %10109 = vsyncpa [#allocation6], 1 }
0x368f   :  { %10110 = vsyncpa [#allocation9], 1 }
0x3690   :  { %10111 = vsyncpa [#allocation12], 1 }
0x3691   :  { %10112 = vsyncpa [#allocation15], 1 }
0x3692   :  { %10113 = vsyncpa [#allocation18], 1 }
0x3693   :  { %10114 = vsyncpa [#allocation21], 1 }
0x3694   :  { %10115 = vsyncpa [#allocation7], 1 }
0x3695   :  { %10116 = vsyncmov [#allocation4] }
0x3698   :  { %s10117_s5 = vpop.sfrf %10116 }
0x3699   :  { %p10743_p10 = scmp.ne.s32.totalorder %s10117_s5, 0 }
0x369b   :  { %10121 = shalt.err (%p10743_p10)  }
0x369c   :  { %10123 = vsyncmov [#allocation4 + $0x1] }
0x369f   :  { %s10124_s26 = vpop.sfrf %10123 }
0x36a0   :  { %p10744_p11 = scmp.ne.s32.totalorder %s10124_s26, 0 }
0x36a2   :  { %10128 = shalt.err (%p10744_p11)  }
0x36a3   :  { %10130 = vsyncmov [#allocation4 + $0x2] }
0x36a6   :  { %s10131_s25 = vpop.sfrf %10130 }
0x36a7   :  { %p10745_p0 = scmp.ne.s32.totalorder %s10131_s25, 0 }
0x36a9   :  { %10135 = shalt.err (%p10745_p0)  }
0x36aa   :  { %10137 = vsyncmov [#allocation4 + $0x3] }
0x36ad   :  { %s10138_s19 = vpop.sfrf %10137 }
0x36ae   :  { %p10746_p13 = scmp.ne.s32.totalorder %s10138_s19, 0 }
0x36b0   :  { %10142 = shalt.err (%p10746_p13)  }

</bundles_post_ra>
